<compile_context>
chip_gen: v7x
topology: tpu7x:2x2x1
jax: 0.10.0
libtpu: 0.0.40
codegen_flags: <defaults>
</compile_context>

<pallas_src>
import functools

import jax
import jax.numpy as jnp
from jax.experimental import pallas as pl
from jax.experimental.pallas import tpu as pltpu


# ---------------------------------------------------------------------------
# Pallas kernels
# ---------------------------------------------------------------------------
def _dense_kernel(x_ref, w1_ref, b1_ref, w2_ref, b2_ref, o_ref):
    """Linear -> ReLU -> Linear -> ReLU, fully fused."""
    h = jnp.dot(x_ref[...], w1_ref[...], preferred_element_type=jnp.float32)
    h = jnp.maximum(h + b1_ref[...], 0.0)
    y = jnp.dot(h, w2_ref[...], preferred_element_type=jnp.float32)
    y = jnp.maximum(y + b2_ref[...], 0.0)
    o_ref[...] = y.astype(o_ref.dtype)


def _conv_kernel(cols_ref, w_ref, b_ref, shift_ref, o_ref, *, relu):
    """im2col matmul + (BN-scale-folded) bias [+ ReLU] + BatchNorm shift."""
    y = jnp.dot(cols_ref[...], w_ref[...], preferred_element_type=jnp.float32)
    y = y + b_ref[...]
    if relu:
        y = jnp.maximum(y, 0.0)
    y = y + shift_ref[...]
    o_ref[...] = y.astype(o_ref.dtype)


# ---------------------------------------------------------------------------
# pallas_call wrappers
# ---------------------------------------------------------------------------
def dense_forward(x, w1, b1, w2, b2):
    B = x.shape[0]
    N = w2.shape[1]
    return pl.pallas_call(
        _dense_kernel,
        out_shape=jax.ShapeDtypeStruct((B, N), jnp.float32),
        grid=(1,),
        in_specs=[
            pl.BlockSpec(x.shape, lambda i: (0, 0)),
            pl.BlockSpec(w1.shape, lambda i: (0, 0)),
            pl.BlockSpec(b1.shape, lambda i: (0, 0)),
            pl.BlockSpec(w2.shape, lambda i: (0, 0)),
            pl.BlockSpec(b2.shape, lambda i: (0, 0)),
        ],
        out_specs=pl.BlockSpec((B, N), lambda i: (0, 0)),
    )(x, w1, b1, w2, b2)


def conv_block(cols, w, b, shift, *, relu, out_dtype):
    M, K = cols.shape
    N = w.shape[1]
    # One big M block (no fine tiling).  For the two largest layers use 2 blocks
    # with a "parallel" grid axis so both v7x TensorCores are used.
    nb = 2 if M >= 2048 else 1
    tm = M // nb
    return pl.pallas_call(
        functools.partial(_conv_kernel, relu=relu),
        out_shape=jax.ShapeDtypeStruct((M, N), out_dtype),
        grid=(nb,),
        in_specs=[
            pl.BlockSpec((tm, K), lambda i: (i, 0)),
            pl.BlockSpec((K, N), lambda i: (0, 0)),
            pl.BlockSpec((1, N), lambda i: (0, 0)),
            pl.BlockSpec((1, N), lambda i: (0, 0)),
        ],
        out_specs=pl.BlockSpec((tm, N), lambda i: (i, 0)),
        compiler_params=pltpu.CompilerParams(dimension_semantics=("parallel",)),
    )(cols, w, b, shift)


# ---------------------------------------------------------------------------
# XLA-side glue: im2col for 3x3 / stride 1 / padding='same'
# ---------------------------------------------------------------------------
def _im2col_same_3x3(x):
    """x: (B,H,W,C) NHWC -> (B*H*W, 9*C); feature order (ky, kx, c) to match
    HWIO weights flattened to (9*C, Cout)."""
    B, H, W, C = x.shape
    xp = jnp.pad(x, ((0, 0), (1, 1), (1, 1), (0, 0)))
    taps = [xp[:, ky:ky + H, kx:kx + W, :] for ky in range(3) for kx in range(3)]
    return jnp.concatenate(taps, axis=-1).reshape(B * H * W, 9 * C)


# ---------------------------------------------------------------------------
# Parameters (deterministic, synthetic) with BN-scale folding & channel padding
# ---------------------------------------------------------------------------
def _fold_bn(w_hwio, b, gamma, beta, mean, var, eps=1e-5):
    """Fold BN scale into conv weight/bias for the Conv -> ReLU -> BN block:
       scale*ReLU(conv+b) + shift == ReLU(conv*scale + b*scale) + shift
    (valid because scale = gamma/sqrt(var+eps) > 0 with the default BN init).
    """
    # TODO(synk): if gamma could be <= 0 (trained BN), keep scale in-kernel instead.
    scale = gamma / jnp.sqrt(var + eps)
    shift = beta - mean * scale
    return w_hwio * scale, b * scale, shift


def init_params(key, latent_dim):
    p = {}
    key, k1, k2, k3, k4 = jax.random.split(key, 5)
    p["fc1_w"] = jax.random.normal(k1, (latent_dim, 2 * latent_dim), jnp.float32) / jnp.sqrt(1.0 * latent_dim)
    p["fc1_b"] = 0.01 * jax.random.normal(k2, (1, 2 * latent_dim), jnp.float32)
    p["fc2_w"] = jax.random.normal(k3, (2 * latent_dim, 128), jnp.float32) / jnp.sqrt(2.0 * latent_dim)
    p["fc2_b"] = 0.01 * jax.random.normal(k4, (1, 128), jnp.float32)

    # (Cin_real, Cout_real, Cin_padded, Cout_padded, has_bn)
    conv_cfg = [
        (8, 16, 8, 16, True),
        (16, 32, 16, 32, True),
        (32, 64, 32, 64, True),
        (64, 5, 64, 8, True),    # Cout padded 5 -> 8 (aligned K for the next conv)
        (5, 5, 8, 8, False),     # conv5: Conv only (no ReLU/BN); 5 -> 8 padding
    ]
    p["conv"] = []
    for cin, cout, cin_p, cout_p, has_bn in conv_cfg:
        key, kw, kb = jax.random.split(key, 3)
        w = jax.random.normal(kw, (3, 3, cin, cout), jnp.float32) / jnp.sqrt(9.0 * cin)
        b = 0.01 * jax.random.normal(kb, (cout,), jnp.float32)
        if has_bn:
            # TODO(synk): BatchNorm2d is applied in eval mode (running stats); a freshly
            # constructed PyTorch module in train() mode would use batch statistics.
            gamma = jnp.ones((cout,), jnp.float32)
            beta = jnp.zeros((cout,), jnp.float32)
            mean = jnp.zeros((cout,), jnp.float32)
            var = jnp.ones((cout,), jnp.float32)
            w, b, shift = _fold_bn(w, b, gamma, beta, mean, var)
        else:
            shift = jnp.zeros((cout,), jnp.float32)
        # Zero-pad channels to aligned sizes (padded channels stay exactly zero).
        w = jnp.pad(w, ((0, 0), (0, 0), (0, cin_p - cin), (0, cout_p - cout)))
        b = jnp.pad(b, (0, cout_p - cout))
        shift = jnp.pad(shift, (0, cout_p - cout))
        p["conv"].append((
            w.reshape(9 * cin_p, cout_p).astype(jnp.bfloat16),  # matches im2col (ky,kx,c)
            b.reshape(1, cout_p),
            shift.reshape(1, cout_p),
        ))
    return p


# ---------------------------------------------------------------------------
# Decoder forward (mirrors the PyTorch module)
# ---------------------------------------------------------------------------
_RELU_FLAGS = (True, True, True, True, False)   # conv5 has no ReLU / no BN


@jax.jit
def decoder_forward(z, params):
    B = z.shape[0]
    h = dense_forward(z, params["fc1_w"], params["fc1_b"], params["fc2_w"], params["fc2_b"])
    # torch.reshape(x, (-1, 8, 4, 4)) is NCHW; convert to NHWC for the conv path.
    x = jnp.transpose(h.reshape(B, 8, 4, 4), (0, 2, 3, 1)).astype(jnp.bfloat16)
    n_conv = len(params["conv"])
    for idx, (w, b, shift) in enumerate(params["conv"]):
        H, W = x.shape[1], x.shape[2]
        cols = _im2col_same_3x3(x)
        last = idx == n_conv - 1
        y = conv_block(cols, w, b, shift,
                       relu=_RELU_FLAGS[idx],
                       out_dtype=jnp.float32 if last else jnp.bfloat16)
        x = y.reshape(B, H, W, w.shape[1])
        if not last:
            # F.interpolate(x, size=2*H), default mode='nearest'
            x = jnp.repeat(jnp.repeat(x, 2, axis=1), 2, axis=2)
    # Drop the zero channel padding (5 real output channels) and return NCHW.
    return jnp.transpose(x[..., :5], (0, 3, 1, 2))


if __name__ == "__main__":
    latent_dim = 16
    batch = 2
    key = jax.random.PRNGKey(0)
    key, kz = jax.random.split(key)
    z = jax.random.normal(kz, (batch, latent_dim), jnp.float32)
    params = init_params(key, latent_dim)

    out = decoder_forward(z, params)
    out = jax.block_until_ready(out)
    assert out.shape == (batch, 5, 64, 64), out.shape
    assert bool(jnp.all(jnp.isfinite(out)))
    print("KERNEL_OK")
</pallas_src>

<mosaic_0001>
module attributes {stable_mosaic.version = 11 : i64} {
  func.func @_dense_kernel(%arg0: i32, %arg1: memref<2x16xf32, #tpu.memory_space<vmem>>, %arg2: memref<16x32xf32, #tpu.memory_space<vmem>>, %arg3: memref<1x32xf32, #tpu.memory_space<vmem>>, %arg4: memref<32x128xf32, #tpu.memory_space<vmem>>, %arg5: memref<1x128xf32, #tpu.memory_space<vmem>>, %arg6: memref<2x128xf32, #tpu.memory_space<vmem>>) attributes {dimension_semantics = [#tpu.dimension_semantics<arbitrary>], iteration_bounds = array<i64: 1>, scalar_prefetch = 0 : i64, scratch_operands = 0 : i64, tpu.core_type = #tpu.core_type<tc>, window_params = [{pipeline_mode = #tpu.pipeline_mode<synchronous>, transform_indices = @transform_0, window_bounds = array<i64: 2, 16>}, {pipeline_mode = #tpu.pipeline_mode<synchronous>, transform_indices = @transform_1, window_bounds = array<i64: 16, 32>}, {pipeline_mode = #tpu.pipeline_mode<synchronous>, transform_indices = @transform_2, window_bounds = array<i64: 1, 32>}, {pipeline_mode = #tpu.pipeline_mode<synchronous>, transform_indices = @transform_3, window_bounds = array<i64: 32, 128>}, {pipeline_mode = #tpu.pipeline_mode<synchronous>, transform_indices = @transform_4, window_bounds = array<i64: 1, 128>}, {pipeline_mode = #tpu.pipeline_mode<synchronous>, transform_indices = @transform_5, window_bounds = array<i64: 2, 128>}]} {
    %c0 = arith.constant 0 : index
    %c0_0 = arith.constant 0 : index
    %0 = vector.load %arg1[%c0, %c0_0] : memref<2x16xf32, #tpu.memory_space<vmem>>, vector<2x16xf32>
    %c0_1 = arith.constant 0 : index
    %c0_2 = arith.constant 0 : index
    %1 = vector.load %arg2[%c0_1, %c0_2] : memref<16x32xf32, #tpu.memory_space<vmem>>, vector<16x32xf32>
    %cst = arith.constant dense<0.000000e+00> : vector<2x32xf32>
    %2 = tpu.matmul %0, %1, %cst {dimension_numbers = #tpu.dot_dimension_numbers<[1], [0], [0], [1], [0, 0, 1, 1], [], []>} : vector<2x16xf32>, vector<16x32xf32>, vector<2x32xf32> -> vector<2x32xf32>
    %c0_3 = arith.constant 0 : index
    %c0_4 = arith.constant 0 : index
    %3 = vector.load %arg3[%c0_3, %c0_4] : memref<1x32xf32, #tpu.memory_space<vmem>>, vector<1x32xf32>
    %4 = vector.broadcast %3 : vector<1x32xf32> to vector<2x32xf32>
    %5 = arith.addf %2, %4 : vector<2x32xf32>
    %cst_5 = arith.constant 0.000000e+00 : f32
    %6 = vector.broadcast %cst_5 : f32 to vector<2x32xf32>
    %7 = arith.maximumf %5, %6 : vector<2x32xf32>
    %c0_6 = arith.constant 0 : index
    %c0_7 = arith.constant 0 : index
    %8 = vector.load %arg4[%c0_6, %c0_7] : memref<32x128xf32, #tpu.memory_space<vmem>>, vector<32x128xf32>
    %cst_8 = arith.constant dense<0.000000e+00> : vector<2x128xf32>
    %9 = tpu.matmul %7, %8, %cst_8 {dimension_numbers = #tpu.dot_dimension_numbers<[1], [0], [0], [1], [0, 0, 1, 1], [], []>} : vector<2x32xf32>, vector<32x128xf32>, vector<2x128xf32> -> vector<2x128xf32>
    %c0_9 = arith.constant 0 : index
    %c0_10 = arith.constant 0 : index
    %10 = vector.load %arg5[%c0_9, %c0_10] : memref<1x128xf32, #tpu.memory_space<vmem>>, vector<1x128xf32>
    %11 = vector.broadcast %10 : vector<1x128xf32> to vector<2x128xf32>
    %12 = arith.addf %9, %11 : vector<2x128xf32>
    %cst_11 = arith.constant 0.000000e+00 : f32
    %13 = vector.broadcast %cst_11 : f32 to vector<2x128xf32>
    %14 = arith.maximumf %12, %13 : vector<2x128xf32>
    %c0_12 = arith.constant 0 : index
    %c0_13 = arith.constant 0 : index
    %15 = vector.load %arg6[%c0_12, %c0_13] : memref<2x128xf32, #tpu.memory_space<vmem>>, vector<2x128xf32>
    tpu.vector_store %arg6[%c0_12, %c0_13], %14 {strides = array<i32>} : memref<2x128xf32, #tpu.memory_space<vmem>>, vector<2x128xf32>,
    return
  }
  func.func @transform_0(%arg0: i32) -> (i32, i32) {
    %c0_i32 = arith.constant 0 : i32
    %c0_i32_0 = arith.constant 0 : i32
    %c0_i32_1 = arith.constant 0 : i32
    return %c0_i32, %c0_i32_0 : i32, i32
  }
  func.func @transform_1(%arg0: i32) -> (i32, i32) {
    %c0_i32 = arith.constant 0 : i32
    %c0_i32_0 = arith.constant 0 : i32
    %c0_i32_1 = arith.constant 0 : i32
    return %c0_i32, %c0_i32_0 : i32, i32
  }
  func.func @transform_2(%arg0: i32) -> (i32, i32) {
    %c0_i32 = arith.constant 0 : i32
    %c0_i32_0 = arith.constant 0 : i32
    %c0_i32_1 = arith.constant 0 : i32
    return %c0_i32, %c0_i32_0 : i32, i32
  }
  func.func @transform_3(%arg0: i32) -> (i32, i32) {
    %c0_i32 = arith.constant 0 : i32
    %c0_i32_0 = arith.constant 0 : i32
    %c0_i32_1 = arith.constant 0 : i32
    return %c0_i32, %c0_i32_0 : i32, i32
  }
  func.func @transform_4(%arg0: i32) -> (i32, i32) {
    %c0_i32 = arith.constant 0 : i32
    %c0_i32_0 = arith.constant 0 : i32
    %c0_i32_1 = arith.constant 0 : i32
    return %c0_i32, %c0_i32_0 : i32, i32
  }
  func.func @transform_5(%arg0: i32) -> (i32, i32) {
    %c0_i32 = arith.constant 0 : i32
    %c0_i32_0 = arith.constant 0 : i32
    %c0_i32_1 = arith.constant 0 : i32
    return %c0_i32, %c0_i32_0 : i32, i32
  }
}

module attributes {stable_mosaic.version = 11 : i64} {
  func.func @_conv_kernel(%arg0: i32, %arg1: memref<32x72xbf16, #tpu.memory_space<vmem>>, %arg2: memref<72x16xbf16, #tpu.memory_space<vmem>>, %arg3: memref<1x16xf32, #tpu.memory_space<vmem>>, %arg4: memref<1x16xf32, #tpu.memory_space<vmem>>, %arg5: memref<32x16xbf16, #tpu.memory_space<vmem>>) attributes {dimension_semantics = [#tpu.dimension_semantics<parallel>], iteration_bounds = array<i64: 1>, scalar_prefetch = 0 : i64, scratch_operands = 0 : i64, tpu.core_type = #tpu.core_type<tc>, window_params = [{transform_indices = @transform_0, window_bounds = array<i64: 32, 72>}, {pipeline_mode = #tpu.pipeline_mode<synchronous>, transform_indices = @transform_1, window_bounds = array<i64: 72, 16>}, {pipeline_mode = #tpu.pipeline_mode<synchronous>, transform_indices = @transform_2, window_bounds = array<i64: 1, 16>}, {pipeline_mode = #tpu.pipeline_mode<synchronous>, transform_indices = @transform_3, window_bounds = array<i64: 1, 16>}, {transform_indices = @transform_4, window_bounds = array<i64: 32, 16>}]} {
    %c0 = arith.constant 0 : index
    %c0_0 = arith.constant 0 : index
    %0 = vector.load %arg1[%c0, %c0_0] : memref<32x72xbf16, #tpu.memory_space<vmem>>, vector<32x72xbf16>
    %c0_1 = arith.constant 0 : index
    %c0_2 = arith.constant 0 : index
    %1 = vector.load %arg2[%c0_1, %c0_2] : memref<72x16xbf16, #tpu.memory_space<vmem>>, vector<72x16xbf16>
    %cst = arith.constant dense<0.000000e+00> : vector<32x16xf32>
    %2 = tpu.matmul %0, %1, %cst {dimension_numbers = #tpu.dot_dimension_numbers<[1], [0], [0], [1], [0, 0, 1, 1], [], []>} : vector<32x72xbf16>, vector<72x16xbf16>, vector<32x16xf32> -> vector<32x16xf32>
    %c0_3 = arith.constant 0 : index
    %c0_4 = arith.constant 0 : index
    %3 = vector.load %arg3[%c0_3, %c0_4] : memref<1x16xf32, #tpu.memory_space<vmem>>, vector<1x16xf32>
    %4 = vector.broadcast %3 : vector<1x16xf32> to vector<32x16xf32>
    %5 = arith.addf %2, %4 : vector<32x16xf32>
    %cst_5 = arith.constant 0.000000e+00 : f32
    %6 = vector.broadcast %cst_5 : f32 to vector<32x16xf32>
    %7 = arith.maximumf %5, %6 : vector<32x16xf32>
    %c0_6 = arith.constant 0 : index
    %c0_7 = arith.constant 0 : index
    %8 = vector.load %arg4[%c0_6, %c0_7] : memref<1x16xf32, #tpu.memory_space<vmem>>, vector<1x16xf32>
    %9 = vector.broadcast %8 : vector<1x16xf32> to vector<32x16xf32>
    %10 = arith.addf %7, %9 : vector<32x16xf32>
    %11 = arith.truncf %10 : vector<32x16xf32> to vector<32x16xbf16>
    %c0_8 = arith.constant 0 : index
    %c0_9 = arith.constant 0 : index
    %12 = vector.load %arg5[%c0_8, %c0_9] : memref<32x16xbf16, #tpu.memory_space<vmem>>, vector<32x16xbf16>
    tpu.vector_store %arg5[%c0_8, %c0_9], %11 {strides = array<i32>} : memref<32x16xbf16, #tpu.memory_space<vmem>>, vector<32x16xbf16>,
    return
  }
  func.func @transform_0(%arg0: i32) -> (i32, i32) {
    %c0_i32 = arith.constant 0 : i32
    %c0_i32_0 = arith.constant 0 : i32
    return %arg0, %c0_i32 : i32, i32
  }
  func.func @transform_1(%arg0: i32) -> (i32, i32) {
    %c0_i32 = arith.constant 0 : i32
    %c0_i32_0 = arith.constant 0 : i32
    %c0_i32_1 = arith.constant 0 : i32
    return %c0_i32, %c0_i32_0 : i32, i32
  }
  func.func @transform_2(%arg0: i32) -> (i32, i32) {
    %c0_i32 = arith.constant 0 : i32
    %c0_i32_0 = arith.constant 0 : i32
    %c0_i32_1 = arith.constant 0 : i32
    return %c0_i32, %c0_i32_0 : i32, i32
  }
  func.func @transform_3(%arg0: i32) -> (i32, i32) {
    %c0_i32 = arith.constant 0 : i32
    %c0_i32_0 = arith.constant 0 : i32
    %c0_i32_1 = arith.constant 0 : i32
    return %c0_i32, %c0_i32_0 : i32, i32
  }
  func.func @transform_4(%arg0: i32) -> (i32, i32) {
    %c0_i32 = arith.constant 0 : i32
    %c0_i32_0 = arith.constant 0 : i32
    return %arg0, %c0_i32 : i32, i32
  }
}

module attributes {stable_mosaic.version = 11 : i64} {
  func.func @_conv_kernel(%arg0: i32, %arg1: memref<128x144xbf16, #tpu.memory_space<vmem>>, %arg2: memref<144x32xbf16, #tpu.memory_space<vmem>>, %arg3: memref<1x32xf32, #tpu.memory_space<vmem>>, %arg4: memref<1x32xf32, #tpu.memory_space<vmem>>, %arg5: memref<128x32xbf16, #tpu.memory_space<vmem>>) attributes {dimension_semantics = [#tpu.dimension_semantics<parallel>], iteration_bounds = array<i64: 1>, scalar_prefetch = 0 : i64, scratch_operands = 0 : i64, tpu.core_type = #tpu.core_type<tc>, window_params = [{transform_indices = @transform_0, window_bounds = array<i64: 128, 144>}, {pipeline_mode = #tpu.pipeline_mode<synchronous>, transform_indices = @transform_1, window_bounds = array<i64: 144, 32>}, {pipeline_mode = #tpu.pipeline_mode<synchronous>, transform_indices = @transform_2, window_bounds = array<i64: 1, 32>}, {pipeline_mode = #tpu.pipeline_mode<synchronous>, transform_indices = @transform_3, window_bounds = array<i64: 1, 32>}, {transform_indices = @transform_4, window_bounds = array<i64: 128, 32>}]} {
    %c0 = arith.constant 0 : index
    %c0_0 = arith.constant 0 : index
    %0 = vector.load %arg1[%c0, %c0_0] : memref<128x144xbf16, #tpu.memory_space<vmem>>, vector<128x144xbf16>
    %c0_1 = arith.constant 0 : index
    %c0_2 = arith.constant 0 : index
    %1 = vector.load %arg2[%c0_1, %c0_2] : memref<144x32xbf16, #tpu.memory_space<vmem>>, vector<144x32xbf16>
    %cst = arith.constant dense<0.000000e+00> : vector<128x32xf32>
    %2 = tpu.matmul %0, %1, %cst {dimension_numbers = #tpu.dot_dimension_numbers<[1], [0], [0], [1], [0, 0, 1, 1], [], []>} : vector<128x144xbf16>, vector<144x32xbf16>, vector<128x32xf32> -> vector<128x32xf32>
    %c0_3 = arith.constant 0 : index
    %c0_4 = arith.constant 0 : index
    %3 = vector.load %arg3[%c0_3, %c0_4] : memref<1x32xf32, #tpu.memory_space<vmem>>, vector<1x32xf32>
    %4 = vector.broadcast %3 : vector<1x32xf32> to vector<128x32xf32>
    %5 = arith.addf %2, %4 : vector<128x32xf32>
    %cst_5 = arith.constant 0.000000e+00 : f32
    %6 = vector.broadcast %cst_5 : f32 to vector<128x32xf32>
    %7 = arith.maximumf %5, %6 : vector<128x32xf32>
    %c0_6 = arith.constant 0 : index
    %c0_7 = arith.constant 0 : index
    %8 = vector.load %arg4[%c0_6, %c0_7] : memref<1x32xf32, #tpu.memory_space<vmem>>, vector<1x32xf32>
    %9 = vector.broadcast %8 : vector<1x32xf32> to vector<128x32xf32>
    %10 = arith.addf %7, %9 : vector<128x32xf32>
    %11 = arith.truncf %10 : vector<128x32xf32> to vector<128x32xbf16>
    %c0_8 = arith.constant 0 : index
    %c0_9 = arith.constant 0 : index
    %12 = vector.load %arg5[%c0_8, %c0_9] : memref<128x32xbf16, #tpu.memory_space<vmem>>, vector<128x32xbf16>
    tpu.vector_store %arg5[%c0_8, %c0_9], %11 {strides = array<i32>} : memref<128x32xbf16, #tpu.memory_space<vmem>>, vector<128x32xbf16>,
    return
  }
  func.func @transform_0(%arg0: i32) -> (i32, i32) {
    %c0_i32 = arith.constant 0 : i32
    %c0_i32_0 = arith.constant 0 : i32
    return %arg0, %c0_i32 : i32, i32
  }
  func.func @transform_1(%arg0: i32) -> (i32, i32) {
    %c0_i32 = arith.constant 0 : i32
    %c0_i32_0 = arith.constant 0 : i32
    %c0_i32_1 = arith.constant 0 : i32
    return %c0_i32, %c0_i32_0 : i32, i32
  }
  func.func @transform_2(%arg0: i32) -> (i32, i32) {
    %c0_i32 = arith.constant 0 : i32
    %c0_i32_0 = arith.constant 0 : i32
    %c0_i32_1 = arith.constant 0 : i32
    return %c0_i32, %c0_i32_0 : i32, i32
  }
  func.func @transform_3(%arg0: i32) -> (i32, i32) {
    %c0_i32 = arith.constant 0 : i32
    %c0_i32_0 = arith.constant 0 : i32
    %c0_i32_1 = arith.constant 0 : i32
    return %c0_i32, %c0_i32_0 : i32, i32
  }
  func.func @transform_4(%arg0: i32) -> (i32, i32) {
    %c0_i32 = arith.constant 0 : i32
    %c0_i32_0 = arith.constant 0 : i32
    return %arg0, %c0_i32 : i32, i32
  }
}

module attributes {stable_mosaic.version = 11 : i64} {
  func.func @_conv_kernel(%arg0: i32, %arg1: memref<512x288xbf16, #tpu.memory_space<vmem>>, %arg2: memref<288x64xbf16, #tpu.memory_space<vmem>>, %arg3: memref<1x64xf32, #tpu.memory_space<vmem>>, %arg4: memref<1x64xf32, #tpu.memory_space<vmem>>, %arg5: memref<512x64xbf16, #tpu.memory_space<vmem>>) attributes {dimension_semantics = [#tpu.dimension_semantics<parallel>], iteration_bounds = array<i64: 1>, scalar_prefetch = 0 : i64, scratch_operands = 0 : i64, tpu.core_type = #tpu.core_type<tc>, window_params = [{transform_indices = @transform_0, window_bounds = array<i64: 512, 288>}, {pipeline_mode = #tpu.pipeline_mode<synchronous>, transform_indices = @transform_1, window_bounds = array<i64: 288, 64>}, {pipeline_mode = #tpu.pipeline_mode<synchronous>, transform_indices = @transform_2, window_bounds = array<i64: 1, 64>}, {pipeline_mode = #tpu.pipeline_mode<synchronous>, transform_indices = @transform_3, window_bounds = array<i64: 1, 64>}, {transform_indices = @transform_4, window_bounds = array<i64: 512, 64>}]} {
    %c0 = arith.constant 0 : index
    %c0_0 = arith.constant 0 : index
    %0 = vector.load %arg1[%c0, %c0_0] : memref<512x288xbf16, #tpu.memory_space<vmem>>, vector<512x288xbf16>
    %c0_1 = arith.constant 0 : index
    %c0_2 = arith.constant 0 : index
    %1 = vector.load %arg2[%c0_1, %c0_2] : memref<288x64xbf16, #tpu.memory_space<vmem>>, vector<288x64xbf16>
    %cst = arith.constant dense<0.000000e+00> : vector<512x64xf32>
    %2 = tpu.matmul %0, %1, %cst {dimension_numbers = #tpu.dot_dimension_numbers<[1], [0], [0], [1], [0, 0, 1, 1], [], []>} : vector<512x288xbf16>, vector<288x64xbf16>, vector<512x64xf32> -> vector<512x64xf32>
    %c0_3 = arith.constant 0 : index
    %c0_4 = arith.constant 0 : index
    %3 = vector.load %arg3[%c0_3, %c0_4] : memref<1x64xf32, #tpu.memory_space<vmem>>, vector<1x64xf32>
    %4 = vector.broadcast %3 : vector<1x64xf32> to vector<512x64xf32>
    %5 = arith.addf %2, %4 : vector<512x64xf32>
    %cst_5 = arith.constant 0.000000e+00 : f32
    %6 = vector.broadcast %cst_5 : f32 to vector<512x64xf32>
    %7 = arith.maximumf %5, %6 : vector<512x64xf32>
    %c0_6 = arith.constant 0 : index
    %c0_7 = arith.constant 0 : index
    %8 = vector.load %arg4[%c0_6, %c0_7] : memref<1x64xf32, #tpu.memory_space<vmem>>, vector<1x64xf32>
    %9 = vector.broadcast %8 : vector<1x64xf32> to vector<512x64xf32>
    %10 = arith.addf %7, %9 : vector<512x64xf32>
    %11 = arith.truncf %10 : vector<512x64xf32> to vector<512x64xbf16>
    %c0_8 = arith.constant 0 : index
    %c0_9 = arith.constant 0 : index
    %12 = vector.load %arg5[%c0_8, %c0_9] : memref<512x64xbf16, #tpu.memory_space<vmem>>, vector<512x64xbf16>
    tpu.vector_store %arg5[%c0_8, %c0_9], %11 {strides = array<i32>} : memref<512x64xbf16, #tpu.memory_space<vmem>>, vector<512x64xbf16>,
    return
  }
  func.func @transform_0(%arg0: i32) -> (i32, i32) {
    %c0_i32 = arith.constant 0 : i32
    %c0_i32_0 = arith.constant 0 : i32
    return %arg0, %c0_i32 : i32, i32
  }
  func.func @transform_1(%arg0: i32) -> (i32, i32) {
    %c0_i32 = arith.constant 0 : i32
    %c0_i32_0 = arith.constant 0 : i32
    %c0_i32_1 = arith.constant 0 : i32
    return %c0_i32, %c0_i32_0 : i32, i32
  }
  func.func @transform_2(%arg0: i32) -> (i32, i32) {
    %c0_i32 = arith.constant 0 : i32
    %c0_i32_0 = arith.constant 0 : i32
    %c0_i32_1 = arith.constant 0 : i32
    return %c0_i32, %c0_i32_0 : i32, i32
  }
  func.func @transform_3(%arg0: i32) -> (i32, i32) {
    %c0_i32 = arith.constant 0 : i32
    %c0_i32_0 = arith.constant 0 : i32
    %c0_i32_1 = arith.constant 0 : i32
    return %c0_i32, %c0_i32_0 : i32, i32
  }
  func.func @transform_4(%arg0: i32) -> (i32, i32) {
    %c0_i32 = arith.constant 0 : i32
    %c0_i32_0 = arith.constant 0 : i32
    return %arg0, %c0_i32 : i32, i32
  }
}

module attributes {stable_mosaic.version = 11 : i64} {
  func.func @_conv_kernel(%arg0: i32, %arg1: memref<1024x576xbf16, #tpu.memory_space<vmem>>, %arg2: memref<576x8xbf16, #tpu.memory_space<vmem>>, %arg3: memref<1x8xf32, #tpu.memory_space<vmem>>, %arg4: memref<1x8xf32, #tpu.memory_space<vmem>>, %arg5: memref<1024x8xbf16, #tpu.memory_space<vmem>>) attributes {dimension_semantics = [#tpu.dimension_semantics<parallel>], iteration_bounds = array<i64: 2>, scalar_prefetch = 0 : i64, scratch_operands = 0 : i64, tpu.core_type = #tpu.core_type<tc>, window_params = [{transform_indices = @transform_0, window_bounds = array<i64: 1024, 576>}, {pipeline_mode = #tpu.pipeline_mode<synchronous>, transform_indices = @transform_1, window_bounds = array<i64: 576, 8>}, {pipeline_mode = #tpu.pipeline_mode<synchronous>, transform_indices = @transform_2, window_bounds = array<i64: 1, 8>}, {pipeline_mode = #tpu.pipeline_mode<synchronous>, transform_indices = @transform_3, window_bounds = array<i64: 1, 8>}, {transform_indices = @transform_4, window_bounds = array<i64: 1024, 8>}]} {
    %c0 = arith.constant 0 : index
    %c0_0 = arith.constant 0 : index
    %0 = vector.load %arg1[%c0, %c0_0] : memref<1024x576xbf16, #tpu.memory_space<vmem>>, vector<1024x576xbf16>
    %c0_1 = arith.constant 0 : index
    %c0_2 = arith.constant 0 : index
    %1 = vector.load %arg2[%c0_1, %c0_2] : memref<576x8xbf16, #tpu.memory_space<vmem>>, vector<576x8xbf16>
    %cst = arith.constant dense<0.000000e+00> : vector<1024x8xf32>
    %2 = tpu.matmul %0, %1, %cst {dimension_numbers = #tpu.dot_dimension_numbers<[1], [0], [0], [1], [0, 0, 1, 1], [], []>} : vector<1024x576xbf16>, vector<576x8xbf16>, vector<1024x8xf32> -> vector<1024x8xf32>
    %c0_3 = arith.constant 0 : index
    %c0_4 = arith.constant 0 : index
    %3 = vector.load %arg3[%c0_3, %c0_4] : memref<1x8xf32, #tpu.memory_space<vmem>>, vector<1x8xf32>
    %4 = vector.broadcast %3 : vector<1x8xf32> to vector<1024x8xf32>
    %5 = arith.addf %2, %4 : vector<1024x8xf32>
    %cst_5 = arith.constant 0.000000e+00 : f32
    %6 = vector.broadcast %cst_5 : f32 to vector<1024x8xf32>
    %7 = arith.maximumf %5, %6 : vector<1024x8xf32>
    %c0_6 = arith.constant 0 : index
    %c0_7 = arith.constant 0 : index
    %8 = vector.load %arg4[%c0_6, %c0_7] : memref<1x8xf32, #tpu.memory_space<vmem>>, vector<1x8xf32>
    %9 = vector.broadcast %8 : vector<1x8xf32> to vector<1024x8xf32>
    %10 = arith.addf %7, %9 : vector<1024x8xf32>
    %11 = arith.truncf %10 : vector<1024x8xf32> to vector<1024x8xbf16>
    %c0_8 = arith.constant 0 : index
    %c0_9 = arith.constant 0 : index
    %12 = vector.load %arg5[%c0_8, %c0_9] : memref<1024x8xbf16, #tpu.memory_space<vmem>>, vector<1024x8xbf16>
    tpu.vector_store %arg5[%c0_8, %c0_9], %11 {strides = array<i32>} : memref<1024x8xbf16, #tpu.memory_space<vmem>>, vector<1024x8xbf16>,
    return
  }
  func.func @transform_0(%arg0: i32) -> (i32, i32) {
    %c0_i32 = arith.constant 0 : i32
    %c0_i32_0 = arith.constant 0 : i32
    return %arg0, %c0_i32 : i32, i32
  }
  func.func @transform_1(%arg0: i32) -> (i32, i32) {
    %c0_i32 = arith.constant 0 : i32
    %c0_i32_0 = arith.constant 0 : i32
    %c0_i32_1 = arith.constant 0 : i32
    return %c0_i32, %c0_i32_0 : i32, i32
  }
  func.func @transform_2(%arg0: i32) -> (i32, i32) {
    %c0_i32 = arith.constant 0 : i32
    %c0_i32_0 = arith.constant 0 : i32
    %c0_i32_1 = arith.constant 0 : i32
    return %c0_i32, %c0_i32_0 : i32, i32
  }
  func.func @transform_3(%arg0: i32) -> (i32, i32) {
    %c0_i32 = arith.constant 0 : i32
    %c0_i32_0 = arith.constant 0 : i32
    %c0_i32_1 = arith.constant 0 : i32
    return %c0_i32, %c0_i32_0 : i32, i32
  }
  func.func @transform_4(%arg0: i32) -> (i32, i32) {
    %c0_i32 = arith.constant 0 : i32
    %c0_i32_0 = arith.constant 0 : i32
    return %arg0, %c0_i32 : i32, i32
  }
}

module attributes {stable_mosaic.version = 11 : i64} {
  func.func @_conv_kernel(%arg0: i32, %arg1: memref<4096x72xbf16, #tpu.memory_space<vmem>>, %arg2: memref<72x8xbf16, #tpu.memory_space<vmem>>, %arg3: memref<1x8xf32, #tpu.memory_space<vmem>>, %arg4: memref<1x8xf32, #tpu.memory_space<vmem>>, %arg5: memref<4096x8xf32, #tpu.memory_space<vmem>>) attributes {dimension_semantics = [#tpu.dimension_semantics<parallel>], iteration_bounds = array<i64: 2>, scalar_prefetch = 0 : i64, scratch_operands = 0 : i64, tpu.core_type = #tpu.core_type<tc>, window_params = [{transform_indices = @transform_0, window_bounds = array<i64: 4096, 72>}, {pipeline_mode = #tpu.pipeline_mode<synchronous>, transform_indices = @transform_1, window_bounds = array<i64: 72, 8>}, {pipeline_mode = #tpu.pipeline_mode<synchronous>, transform_indices = @transform_2, window_bounds = array<i64: 1, 8>}, {pipeline_mode = #tpu.pipeline_mode<synchronous>, transform_indices = @transform_3, window_bounds = array<i64: 1, 8>}, {transform_indices = @transform_4, window_bounds = array<i64: 4096, 8>}]} {
    %c0 = arith.constant 0 : index
    %c0_0 = arith.constant 0 : index
    %0 = vector.load %arg1[%c0, %c0_0] : memref<4096x72xbf16, #tpu.memory_space<vmem>>, vector<4096x72xbf16>
    %c0_1 = arith.constant 0 : index
    %c0_2 = arith.constant 0 : index
    %1 = vector.load %arg2[%c0_1, %c0_2] : memref<72x8xbf16, #tpu.memory_space<vmem>>, vector<72x8xbf16>
    %cst = arith.constant dense<0.000000e+00> : vector<4096x8xf32>
    %2 = tpu.matmul %0, %1, %cst {dimension_numbers = #tpu.dot_dimension_numbers<[1], [0], [0], [1], [0, 0, 1, 1], [], []>} : vector<4096x72xbf16>, vector<72x8xbf16>, vector<4096x8xf32> -> vector<4096x8xf32>
    %c0_3 = arith.constant 0 : index
    %c0_4 = arith.constant 0 : index
    %3 = vector.load %arg3[%c0_3, %c0_4] : memref<1x8xf32, #tpu.memory_space<vmem>>, vector<1x8xf32>
    %4 = vector.broadcast %3 : vector<1x8xf32> to vector<4096x8xf32>
    %5 = arith.addf %2, %4 : vector<4096x8xf32>
    %c0_5 = arith.constant 0 : index
    %c0_6 = arith.constant 0 : index
    %6 = vector.load %arg4[%c0_5, %c0_6] : memref<1x8xf32, #tpu.memory_space<vmem>>, vector<1x8xf32>
    %7 = vector.broadcast %6 : vector<1x8xf32> to vector<4096x8xf32>
    %8 = arith.addf %5, %7 : vector<4096x8xf32>
    %c0_7 = arith.constant 0 : index
    %c0_8 = arith.constant 0 : index
    %9 = vector.load %arg5[%c0_7, %c0_8] : memref<4096x8xf32, #tpu.memory_space<vmem>>, vector<4096x8xf32>
    tpu.vector_store %arg5[%c0_7, %c0_8], %8 {strides = array<i32>} : memref<4096x8xf32, #tpu.memory_space<vmem>>, vector<4096x8xf32>,
    return
  }
  func.func @transform_0(%arg0: i32) -> (i32, i32) {
    %c0_i32 = arith.constant 0 : i32
    %c0_i32_0 = arith.constant 0 : i32
    return %arg0, %c0_i32 : i32, i32
  }
  func.func @transform_1(%arg0: i32) -> (i32, i32) {
    %c0_i32 = arith.constant 0 : i32
    %c0_i32_0 = arith.constant 0 : i32
    %c0_i32_1 = arith.constant 0 : i32
    return %c0_i32, %c0_i32_0 : i32, i32
  }
  func.func @transform_2(%arg0: i32) -> (i32, i32) {
    %c0_i32 = arith.constant 0 : i32
    %c0_i32_0 = arith.constant 0 : i32
    %c0_i32_1 = arith.constant 0 : i32
    return %c0_i32, %c0_i32_0 : i32, i32
  }
  func.func @transform_3(%arg0: i32) -> (i32, i32) {
    %c0_i32 = arith.constant 0 : i32
    %c0_i32_0 = arith.constant 0 : i32
    %c0_i32_1 = arith.constant 0 : i32
    return %c0_i32, %c0_i32_0 : i32, i32
  }
  func.func @transform_4(%arg0: i32) -> (i32, i32) {
    %c0_i32 = arith.constant 0 : i32
    %c0_i32_0 = arith.constant 0 : i32
    return %arg0, %c0_i32 : i32, i32
  }
}

</mosaic_0001>

<bundles_post_ra>
// kernel: decoder_forward.6
= control target key start
LH: loop header
LB: loop body
LE: loop exit
PB: predicated region body
PF: predicated region fallthrough
CT: control target
= control target key end

     0   :  { %10 = vsyncpa [#allocation3], 0  ;;  %s529_s0 = inlined_call_operand.hbm [shape: f32[2,16], index: 0, kind: input, shape index: {}]   ;;  %s530_s1 = inlined_call_operand.hbm [shape: f32[16,32], index: 1, kind: input, shape index: {}]   ;;  %s531_s2 = inlined_call_operand.hbm [shape: f32[1,32], index: 2, kind: input, shape index: {}]   ;;  %s532_s3 = inlined_call_operand.hbm [shape: f32[32,128], index: 3, kind: input, shape index: {}]   ;;  %s533_s4 = inlined_call_operand.hbm [shape: f32[1,128], index: 4, kind: input, shape index: {}]   ;;  %s534_s5 = inlined_call_operand.vmem [shape: f32[2,128], index: 5, kind: output, shape index: {}]  }
   0x1   :  { %11 = vsyncpa [#allocation5], 0 }
   0x2   :  { %12 = vsyncpa [#allocation8], 0  ;;  %s426_s18 = smov [#allocation4]   ;;  %s310_s22 = scalar_lea.hbm %s530_s1, 256 }
   0x3   :  { %s28_s19 = sshll.u32 %s426_s18, 4  ;;  %p311_p0 = scmp.ne.s32.totalorder %s530_s1, %s310_s22  ;;  %s29_s19 = int_to_ptr.vmem [resolvable:$true] %s28_s19 }
   0x4   :  { %p314_p1 = scmp.lt.u32.totalorder %s310_s22, %s530_s1 }
   0x6   :  { %p316_p2 = pnand %p314_p1, %p311_p0 }
   0x8   :  { %319 = shalt.err (!%p316_p2)
}
   0x9   :  { %s320_s27 = scalar_lea.vmem %s29_s19, 256  ;;  %p325_p4 = scmp.lt.s32.totalorder %s29_s19, %s29_s19 }
   0xa   :  { %p321_p3 = scmp.ne.s32.totalorder %s29_s19, %s320_s27  ;;  %p326_p5 = scmp.lt.s32.totalorder %s320_s27, %s320_s27 }
   0xc   :  { %p327_p6 = por %p326_p5, %p325_p4 }
   0xe   :  { %p328_p7 = pnand %p327_p6, %p321_p3 }
  0x10   :  { %331 = shalt.err (!%p328_p7)
}
  0x11   :  { %s427_s28 = smov 128   ;;  %s428_s29 = smov 8  }
  0x12   :  { %34 = dma.hbm_to_vmem [thread:$0]  %s530_s1, 256, %s29_s19, [#allocation5], %s427_s28, %s427_s28, %s428_s29  }
  0x13   :  { %s429_s7 = smov [#allocation7]   ;;  %s430_s9 = smov [#allocation2]  }
  0x14   :  { %s50_s8 = sshll.u32 %s429_s7, 4  ;;  %s19_s10 = sshll.u32 %s430_s9, 4  ;;  %s51_s8 = int_to_ptr.vmem [resolvable:$true] %s50_s8  ;;  %s20_s10 = int_to_ptr.vmem [resolvable:$true] %s19_s10 }
  0x15   :  { %s332_s13 = scalar_lea.hbm %s532_s3, 512 }
  0x16   :  { %p333_p8 = scmp.ne.s32.totalorder %s532_s3, %s332_s13  ;;  %p336_p9 = scmp.lt.u32.totalorder %s332_s13, %s532_s3 }
  0x18   :  { %p338_p10 = pnand %p336_p9, %p333_p8 }
  0x1a   :  { %341 = shalt.err (!%p338_p10)
}
  0x1b   :  { %s342_s1 = scalar_lea.vmem %s51_s8, 512  ;;  %p347_p12 = scmp.lt.s32.totalorder %s51_s8, %s51_s8 }
  0x1c   :  { %p343_p11 = scmp.ne.s32.totalorder %s51_s8, %s342_s1  ;;  %p348_p13 = scmp.lt.s32.totalorder %s342_s1, %s342_s1 }
  0x1e   :  { %p349_p0 = por %p348_p13, %p347_p12 }
  0x20   :  { %p350_p1 = pnand %p349_p0, %p343_p11 }
  0x22   :  { %353 = shalt.err (!%p350_p1)
}
  0x23   :  { %56 = dma.hbm_to_vmem [thread:$0]  %s532_s3, 512, %s51_s8, [#allocation8], %s427_s28, %s427_s28, %s428_s29  }
  0x24   :  { %s354_s22 = scalar_lea.hbm %s529_s0, 32 }
  0x25   :  { %p355_p2 = scmp.ne.s32.totalorder %s529_s0, %s354_s22  ;;  %p358_p3 = scmp.lt.u32.totalorder %s354_s22, %s529_s0 }
  0x27   :  { %p360_p4 = pnand %p358_p3, %p355_p2 }
  0x29   :  { %363 = shalt.err (!%p360_p4)
}
  0x2a   :  { %s364_s27 = scalar_lea.vmem %s20_s10, 32  ;;  %p369_p6 = scmp.lt.s32.totalorder %s20_s10, %s20_s10 }
  0x2b   :  { %p365_p5 = scmp.ne.s32.totalorder %s20_s10, %s364_s27  ;;  %p370_p7 = scmp.lt.s32.totalorder %s364_s27, %s364_s27 }
  0x2d   :  { %p371_p8 = por %p370_p7, %p369_p6 }
  0x2f   :  { %p372_p9 = pnand %p371_p8, %p365_p5 }
  0x31   :  { %375 = shalt.err (!%p372_p9)
}
  0x32   :  { %22 = dma.hbm_to_vmem [thread:$0]  %s529_s0, 32, %s20_s10, [#allocation3]  }
  0x33   :  { %s431_s29 = smov [#allocation6]   ;;  %s432_s6 = smov [#allocation9]  }
  0x34   :  { %s41_s30 = sshll.u32 %s431_s29, 4  ;;  %s63_s7 = sshll.u32 %s432_s6, 4  ;;  %s42_s30 = int_to_ptr.vmem [resolvable:$true] %s41_s30  ;;  %s64_s7 = int_to_ptr.vmem [resolvable:$true] %s63_s7 }
  0x35   :  { %s376_s11 = scalar_lea.hbm %s531_s2, 16 }
  0x36   :  { %p377_p10 = scmp.ne.s32.totalorder %s531_s2, %s376_s11  ;;  %p380_p11 = scmp.lt.u32.totalorder %s376_s11, %s531_s2 }
  0x38   :  { %p382_p12 = pnand %p380_p11, %p377_p10 }
  0x3a   :  { %385 = shalt.err (!%p382_p12)
}
  0x3b   :  { %s386_s0 = scalar_lea.vmem %s42_s30, 16  ;;  %s390_s10 = scalar_lea.vmem %s42_s30, 32 }
  0x3c   :  { %p387_p13 = scmp.ne.s32.totalorder %s42_s30, %s386_s0  ;;  %p391_p0 = scmp.lt.s32.totalorder %s42_s30, %s42_s30 }
  0x3d   :  { %p392_p1 = scmp.lt.s32.totalorder %s390_s10, %s386_s0 }
  0x3f   :  { %p393_p2 = por %p392_p1, %p391_p0 }
  0x41   :  { %p394_p3 = pnand %p393_p2, %p387_p13 }
  0x43   :  { %397 = shalt.err (!%p394_p3)
}
  0x44   :  { %44 = dma.hbm_to_vmem [thread:$0]  %s531_s2, 16, %s42_s30, [#allocation5]  }
  0x45   :  { %s398_s19 = scalar_lea.hbm %s533_s4, 16 }
  0x46   :  { %p399_p4 = scmp.ne.s32.totalorder %s533_s4, %s398_s19  ;;  %p402_p5 = scmp.lt.u32.totalorder %s398_s19, %s533_s4 }
  0x48   :  { %p404_p6 = pnand %p402_p5, %p399_p4 }
  0x4a   :  { %407 = shalt.err (!%p404_p6)
}
  0x4b   :  { %s408_s24 = scalar_lea.vmem %s64_s7, 16  ;;  %s412_s25 = scalar_lea.vmem %s64_s7, 32 }
  0x4c   :  { %p409_p7 = scmp.ne.s32.totalorder %s64_s7, %s408_s24  ;;  %p413_p8 = scmp.lt.s32.totalorder %s64_s7, %s64_s7 }
  0x4d   :  { %p414_p9 = scmp.lt.s32.totalorder %s412_s25, %s408_s24 }
  0x4f   :  { %p415_p10 = por %p414_p9, %p413_p8 }
  0x51   :  { %p416_p11 = pnand %p415_p10, %p409_p7 }
  0x53   :  { %419 = shalt.err (!%p416_p11)
}
  0x54   :  { %66 = dma.hbm_to_vmem [thread:$0]  %s533_s4, 16, %s64_s7, [#allocation8]  }
  0x55   :  { %420 = dma.done.wait [#allocation3], 32  }
  0x56   :  { %421 = vsyncadd [#allocation3], 4294967264 }
  0x57   :  { %422 = dma.done.wait [#allocation5], 272  }
  0x58   :  { %423 = vsyncadd [#allocation5], 4294967024 }
  0x59   :  { %424 = dma.done.wait [#allocation8], 528  }
  0x5a   :  { %425 = vsyncadd [#allocation8], 4294966768  ;;  %v433_v0 = vmov 0.0|0.0   ;;  %vm434_vm0 = vmmov 0   ;;  %v435_v1 = vmov 0.0   ;;  %v83_v2 = vld [vmem:[#allocation4] sm:$0xff] }
  0x5b   :  { %291 = vmatprep.subr.bf16.mxu0 %v433_v0  ;;  %277 = vmatprep.mubr.msk.f32.mxu0 %vm434_vm0, %v435_v1  ;;  %v84_v3 = vld [vmem:[#allocation4 + $0x8] sm:$0xff]  ;;  %v167_v5 = vld [vmem:[#allocation7] sm:$0xff]  ;;  %v168_v6 = vld [vmem:[#allocation7 + $0x8] sm:$0xff]  ;;  %vm92_vm1 = vcmask 130048   ;;  %vm178_vm2 = vcmask 261120  }
  0x5c   :  { %294 = vmatprep.subr.bf16.mxu1 %v433_v0  ;;  %288 = vmatprep.mubr.msk.f32.mxu1 %vm434_vm0, %v435_v1  ;;  %v292_v4 = vpack.c.bf16 %v84_v3, %v83_v2  ;;  %v295_v7 = vpack.c.bf16 %v168_v6, %v167_v5  ;;  %v82_v8 = vld [vmem:[#allocation2] sm:$0x3]  ;;  %v169_v9 = vld [vmem:[#allocation7 + $0x10] sm:$0xff]  ;;  %v170_v10 = vld [vmem:[#allocation7 + $0x18] sm:$0xff] }
  0x5d   :  { %v298_v11 = vpack.c.bf16 %v170_v10, %v169_v9  ;;  %v261_v12 = vld [vmem:[#allocation6] ss:$0 sm:$0xff]  ;;  %v263_v17 = vld [vmem:[#allocation9] ss:$0 sm:$0xff] }
  0x5e   :  { %293 = vmatpush3.bf16.msra.mxu0 %v292_v4  ;;  %296 = vmatpush3.bf16.msra.mxu1 %v295_v7 }
  0x5f   :  { %297 = vmatprep.subr.bf16.mxu1 %v433_v0 }
  0x61   :  { %278 = vmatmul.mubr.msk.f32.vlgmr.msra.gmra.mrb[0].mxu0 %vm92_vm1, %v82_v8 }
  0x62   :  { %299 = vmatpush3.bf16.msra.mxu1 %v298_v11 }
 0x134   :  { %v162_v13 = vpop.f32.mrb[0].mxu0 }
 0x135   :  { %v163_v14 = vadd.f32 %v261_v12, %v162_v13  ;;  %v279_v15 = vpop.f32.mrb[1].mxu0 }
 0x137   :  { %v166_v16 = vmax.f32 %v163_v14, 0.0 }
 0x139   :  { %289 = vmatmul.mubr.msk.f32.vlgmr.msra.gmra.mrb[0].mxu1 %vm178_vm2, %v166_v16 }
 0x20c   :  { %v248_v18 = vpop.f32.mrb[0].mxu1 }
 0x20d   :  { %v249_v19 = vadd.f32 %v263_v17, %v248_v18  ;;  %v290_v20 = vpop.f32.mrb[1].mxu1 }
 0x20f   :  { %v252_v21 = vmax.f32 %v249_v19, 0.0 }
 0x211   :  { %253 = vst [vmem:[%s534_s5] sm:$0x3] %v252_v21 }
 0x212   :  { %258 = vsyncpa [#allocation3], 1 }
 0x213   :  { %259 = vsyncpa [#allocation5], 1 }
 0x214   :  { %260 = vsyncpa [#allocation8], 1 }

// kernel: decoder_forward.7
= control target key start
LH: loop header
LB: loop body
LE: loop exit
PB: predicated region body
PF: predicated region fallthrough
CT: control target
= control target key end

     0   :  { %9 = vsyncpa [#allocation3], 0  ;;  %s383_s0 = inlined_call_operand.vmem [shape: bf16[32,72], index: 0, kind: input, shape index: {}]   ;;  %s384_s1 = inlined_call_operand.vmem [shape: bf16[72,16], index: 1, kind: input, shape index: {}]   ;;  %s385_s2 = inlined_call_operand.hbm [shape: f32[1,16], index: 2, kind: input, shape index: {}]   ;;  %s386_s3 = inlined_call_operand.hbm [shape: f32[1,16], index: 3, kind: input, shape index: {}]   ;;  %s387_s4 = inlined_call_operand.vmem [shape: bf16[32,16], index: 4, kind: output, shape index: {}]  }
   0x1   :  { %10 = vsyncpa [#allocation5], 0  ;;  %s299_s15 = smov [#allocation2]   ;;  %s300_s17 = smov [#allocation4]  }
   0x2   :  { %s21_s16 = sshll.u32 %s299_s15, 4  ;;  %s31_s18 = sshll.u32 %s300_s17, 4  ;;  %s22_s16 = int_to_ptr.vmem [resolvable:$true] %s21_s16  ;;  %s32_s18 = int_to_ptr.vmem [resolvable:$true] %s31_s18 }
   0x3   :  { %s251_s21 = scalar_lea.hbm %s385_s2, 16 }
   0x4   :  { %p252_p0 = scmp.ne.s32.totalorder %s385_s2, %s251_s21  ;;  %p255_p1 = scmp.lt.u32.totalorder %s251_s21, %s385_s2 }
   0x6   :  { %p257_p2 = pnand %p255_p1, %p252_p0 }
   0x8   :  { %260 = shalt.err (!%p257_p2)
}
   0x9   :  { %s261_s26 = scalar_lea.vmem %s22_s16, 16  ;;  %s265_s27 = scalar_lea.vmem %s22_s16, 32 }
   0xa   :  { %p262_p3 = scmp.ne.s32.totalorder %s22_s16, %s261_s26  ;;  %p266_p4 = scmp.lt.s32.totalorder %s22_s16, %s22_s16 }
   0xb   :  { %p267_p5 = scmp.lt.s32.totalorder %s265_s27, %s261_s26 }
   0xd   :  { %p268_p6 = por %p267_p5, %p266_p4 }
   0xf   :  { %p269_p7 = pnand %p268_p6, %p262_p3 }
  0x11   :  { %272 = shalt.err (!%p269_p7)
}
  0x12   :  { %24 = dma.hbm_to_vmem [thread:$0]  %s385_s2, 16, %s22_s16, [#allocation3]  }
  0x13   :  { %s273_s6 = scalar_lea.hbm %s386_s3, 16 }
  0x14   :  { %p274_p8 = scmp.ne.s32.totalorder %s386_s3, %s273_s6  ;;  %p277_p9 = scmp.lt.u32.totalorder %s273_s6, %s386_s3 }
  0x16   :  { %p279_p10 = pnand %p277_p9, %p274_p8 }
  0x18   :  { %282 = shalt.err (!%p279_p10)
}
  0x19   :  { %s283_s11 = scalar_lea.vmem %s32_s18, 16  ;;  %s287_s12 = scalar_lea.vmem %s32_s18, 32 }
  0x1a   :  { %p284_p11 = scmp.ne.s32.totalorder %s32_s18, %s283_s11  ;;  %p288_p12 = scmp.lt.s32.totalorder %s32_s18, %s32_s18 }
  0x1b   :  { %p289_p13 = scmp.lt.s32.totalorder %s287_s12, %s283_s11 }
  0x1d   :  { %p290_p0 = por %p289_p13, %p288_p12 }
  0x1f   :  { %p291_p1 = pnand %p290_p0, %p284_p11 }
  0x21   :  { %294 = shalt.err (!%p291_p1)
}
  0x22   :  { %34 = dma.hbm_to_vmem [thread:$0]  %s386_s3, 16, %s32_s18, [#allocation5]  }
  0x23   :  { %295 = dma.done.wait [#allocation3], 16  }
  0x24   :  { %296 = vsyncadd [#allocation3], 4294967280 }
  0x25   :  { %297 = dma.done.wait [#allocation5], 16  }
  0x26   :  { %298 = vsyncadd [#allocation5], 4294967280  ;;  %v244_v0 = vld [vmem:[%s384_s1] sm:$0xff]   ;;  %v245_v1 = vld [vmem:[%s384_s1 + $0x8] sm:$0xff]   ;;  %vm99_vm0 = vcmask 588800   ;;  %vm106_vm1 = vcmask 1043456  }
  0x27   :  { %227 = vmatprep.subr.bf16.mxu0 %v244_v0  ;;  %v246_v2 = vld [vmem:[%s384_s1 + $0x10] sm:$0xff]   ;;  %v249_v3 = vld [vmem:[%s383_s0] sm:$0xff]   ;;  %v247_v4 = vld [vmem:[%s384_s1 + $0x18] sm:$0xff]   ;;  %vm190_vm2 = vcmask 125952  }
  0x28   :  { %228 = vmatpush3.bf16.msra.mxu0 %v244_v0  ;;  %237 = vmatprep.mubr.msk.bf16.mxu0 %vm99_vm0, %v249_v3  ;;  %v248_v5 = vld [vmem:[%s384_s1 + $0x20] ss:$0 sps:$4 sm:$0xff]   ;;  %v250_v7 = vld [vmem:[%s383_s0 + $0x8] sm:$0xff]   ;;  %v211_v12 = vld [vmem:[#allocation4] ss:$0 sm:$0xff] }
  0x29   :  { %229 = vmatprep.subr.bf16.mxu0 %v245_v1  ;;  %v108_v6 = vsel %vm106_vm1, %v248_v5, 0  ;;  %v201_v8 = vld [vmem:[#allocation2] ss:$0 sm:$0xff] }
  0x2c   :  { %230 = vmatpush3.bf16.msra.mxu0 %v245_v1 }
  0x2d   :  { %231 = vmatprep.subr.bf16.mxu0 %v246_v2 }
  0x30   :  { %232 = vmatpush3.bf16.msra.mxu0 %v246_v2 }
  0x31   :  { %233 = vmatprep.subr.bf16.mxu0 %v247_v4 }
  0x34   :  { %234 = vmatpush3.bf16.msra.mxu0 %v247_v4 }
  0x35   :  { %241 = vmatprep.subr.msk.bf16.mxu0 %vm106_vm1, %v248_v5 }
  0x38   :  { %236 = vmatpush3.bf16.msra.mxu0 %v108_v6 }
  0x3b   :  { %238 = vmatmul.mubr.msk.bf16.vlgmr.msra.gmra.mrb[0].mxu0 %vm99_vm0, %v250_v7 }
 0x10e   :  { %v239_v9 = vpop.f32.mrb[0].mxu0 }
 0x10f   :  { %v153_v10 = vadd.f32 %v239_v9, %v201_v8  ;;  %v144_v11 = vpop.f32.mrb[1].mxu0 }
 0x110   :  { %v145_v13 = vadd.f32 %v201_v8, %v144_v11  ;;  %v240_v14 = vpop.f32.mrb[2].mxu0 }
 0x111   :  { %v161_v15 = vmax.f32 %v153_v10, 0.0  ;;  %v156_v16 = vadd.f32 %v240_v14, %v201_v8  ;;  %v147_v17 = vpop.f32.mrb[3].mxu0 }
 0x112   :  { %v159_v18 = vmax.f32 %v145_v13, 0.0  ;;  %v148_v19 = vadd.f32 %v201_v8, %v147_v17 }
 0x113   :  { %v172_v20 = vadd.f32 %v211_v12, %v161_v15  ;;  %v162_v21 = vmax.f32 %v156_v16, 0.0 }
 0x114   :  { %v170_v22 = vadd.f32 %v211_v12, %v159_v18  ;;  %v160_v23 = vmax.f32 %v148_v19, 0.0 }
 0x115   :  { %v218_v24 = vpack.c.bf16 %v172_v20, %v172_v20  ;;  %v173_v25 = vadd.f32 %v211_v12, %v162_v21 }
 0x116   :  { %v216_v26 = vpack.c.bf16 %v170_v22, %v170_v22  ;;  %v171_v27 = vadd.f32 %v211_v12, %v160_v23 }
 0x117   :  { %193 = vst.msk [vmem:[%s387_s4 + $0x8] sm:$0xf] %vm190_vm2, %v218_v24  ;;  %v219_v28 = vpack.c.bf16 %v173_v25, %v173_v25 }
 0x118   :  { %191 = vst.msk [vmem:[%s387_s4] sm:$0xf] %vm190_vm2, %v216_v26  ;;  %v217_v29 = vpack.c.bf16 %v171_v27, %v171_v27 }
 0x119   :  { %194 = vst.msk [vmem:[%s387_s4 + $0xc] sm:$0xf] %vm190_vm2, %v219_v28 }
 0x11a   :  { %192 = vst.msk [vmem:[%s387_s4 + $0x4] sm:$0xf] %vm190_vm2, %v217_v29 }
 0x11b   :  { %199 = vsyncpa [#allocation3], 1 }
 0x11c   :  { %200 = vsyncpa [#allocation5], 1 }

// kernel: decoder_forward.8
= control target key start
LH: loop header
LB: loop body
LE: loop exit
PB: predicated region body
PF: predicated region fallthrough
CT: control target
= control target key end

     0   :  { %9 = vsyncpa [#allocation3], 0  ;;  %s861_s0 = inlined_call_operand.vmem [shape: bf16[128,144], index: 0, kind: input, shape index: {}]   ;;  %s862_s1 = inlined_call_operand.vmem [shape: bf16[144,32], index: 1, kind: input, shape index: {}]   ;;  %s863_s2 = inlined_call_operand.hbm [shape: f32[1,32], index: 2, kind: input, shape index: {}]   ;;  %s864_s3 = inlined_call_operand.hbm [shape: f32[1,32], index: 3, kind: input, shape index: {}]   ;;  %s865_s4 = inlined_call_operand.vmem [shape: bf16[128,32], index: 4, kind: output, shape index: {}]  }
   0x1   :  { %10 = vsyncpa [#allocation5], 0  ;;  %s626_s15 = smov [#allocation2]   ;;  %s627_s17 = smov [#allocation4]  }
   0x2   :  { %s21_s16 = sshll.u32 %s626_s15, 4  ;;  %s31_s18 = sshll.u32 %s627_s17, 4  ;;  %s22_s16 = int_to_ptr.vmem [resolvable:$true] %s21_s16  ;;  %s32_s18 = int_to_ptr.vmem [resolvable:$true] %s31_s18 }
   0x3   :  { %s578_s21 = scalar_lea.hbm %s863_s2, 16 }
   0x4   :  { %p579_p0 = scmp.ne.s32.totalorder %s863_s2, %s578_s21  ;;  %p582_p1 = scmp.lt.u32.totalorder %s578_s21, %s863_s2 }
   0x6   :  { %p584_p2 = pnand %p582_p1, %p579_p0 }
   0x8   :  { %587 = shalt.err (!%p584_p2)
}
   0x9   :  { %s588_s26 = scalar_lea.vmem %s22_s16, 16  ;;  %s592_s27 = scalar_lea.vmem %s22_s16, 32 }
   0xa   :  { %p589_p3 = scmp.ne.s32.totalorder %s22_s16, %s588_s26  ;;  %p593_p4 = scmp.lt.s32.totalorder %s22_s16, %s22_s16 }
   0xb   :  { %p594_p5 = scmp.lt.s32.totalorder %s592_s27, %s588_s26 }
   0xd   :  { %p595_p6 = por %p594_p5, %p593_p4 }
   0xf   :  { %p596_p7 = pnand %p595_p6, %p589_p3 }
  0x11   :  { %599 = shalt.err (!%p596_p7)
}
  0x12   :  { %24 = dma.hbm_to_vmem [thread:$0]  %s863_s2, 16, %s22_s16, [#allocation3]  }
  0x13   :  { %s600_s6 = scalar_lea.hbm %s864_s3, 16 }
  0x14   :  { %p601_p8 = scmp.ne.s32.totalorder %s864_s3, %s600_s6  ;;  %p604_p9 = scmp.lt.u32.totalorder %s600_s6, %s864_s3 }
  0x16   :  { %p606_p10 = pnand %p604_p9, %p601_p8 }
  0x18   :  { %609 = shalt.err (!%p606_p10)
}
  0x19   :  { %s610_s11 = scalar_lea.vmem %s32_s18, 16  ;;  %s614_s12 = scalar_lea.vmem %s32_s18, 32 }
  0x1a   :  { %p611_p11 = scmp.ne.s32.totalorder %s32_s18, %s610_s11  ;;  %p615_p12 = scmp.lt.s32.totalorder %s32_s18, %s32_s18 }
  0x1b   :  { %p616_p13 = scmp.lt.s32.totalorder %s614_s12, %s610_s11 }
  0x1d   :  { %p617_p0 = por %p616_p13, %p615_p12 }
  0x1f   :  { %p618_p1 = pnand %p617_p0, %p611_p11 }
  0x21   :  { %621 = shalt.err (!%p618_p1)
}
  0x22   :  { %34 = dma.hbm_to_vmem [thread:$0]  %s864_s3, 16, %s32_s18, [#allocation5]  }
  0x23   :  { %622 = dma.done.wait [#allocation3], 16  }
  0x24   :  { %623 = vsyncadd [#allocation3], 4294967280 }
  0x25   :  { %624 = dma.done.wait [#allocation5], 16  }
  0x26   :  { %625 = vsyncadd [#allocation5], 4294967280  ;;  %v628_v0 = vmov 0   ;;  %v545_v1 = vld [vmem:[%s862_s1] sm:$0xff]   ;;  %v546_v2 = vld [vmem:[%s862_s1 + $0x8] sm:$0xff]   ;;  %vm209_vm0 = vcmask 130048  }
  0x27   :  { %234 = vmatprep.subr.bf16.mxu0 %v628_v0  ;;  %524 = vmatprep.subr.bf16.mxu1 %v628_v0  ;;  %v547_v3 = vld [vmem:[%s862_s1 + $0x10] sm:$0xff]   ;;  %v548_v4 = vld [vmem:[%s862_s1 + $0x18] sm:$0xff]   ;;  %v556_v5 = vld [vmem:[%s861_s0 + $0x4] ss:$8 sps:$4 sm:$0xff]   ;;  %vm434_vm1 = vcmask 257024  }
  0x28   :  { %235 = vmatpush1.bf16.msra.mxu0 %v545_v1  ;;  %533 = vmatpush1.bf16.msra.mxu1 %v545_v1  ;;  %v559_v6 = vld [vmem:[%s861_s0 + $0x44] ss:$8 sps:$4 sm:$0xff]   ;;  %v551_v9 = vld [vmem:[%s862_s1 + $0x30] sm:$0xff]   ;;  %v552_v10 = vld [vmem:[%s862_s1 + $0x38] sm:$0xff]  }
  0x29   :  { %236 = vmatprep.subr.bf16.mxu0 %v628_v0  ;;  %525 = vmatprep.subr.bf16.mxu1 %v628_v0  ;;  %v549_v7 = vld [vmem:[%s862_s1 + $0x20] sm:$0xff]   ;;  %v550_v8 = vld [vmem:[%s862_s1 + $0x28] sm:$0xff]   ;;  %v560_v14 = vld [vmem:[%s861_s0 + $0x14] ss:$8 sps:$4 sm:$0xff]  }
  0x2a   :  { %483 = vmatprep.mubr.msk.bf16.mxu0 %vm209_vm0, %v556_v5  ;;  %487 = vmatprep.mubr.msk.bf16.mxu1 %vm209_vm0, %v559_v6  ;;  %v553_v11 = vld [vmem:[%s862_s1 + $0x40] sm:$0xff]   ;;  %v562_v15 = vld [vmem:[%s861_s0 + $0x54] ss:$8 sps:$4 sm:$0xff]   ;;  %v564_v16 = vld [vmem:[%s861_s0 + $0x10] ss:$8 sps:$4 sm:$0xff]  }
  0x2b   :  { %v554_v12 = vld [vmem:[%s861_s0] ss:$8 sps:$4 sm:$0xff]   ;;  %v565_v17 = vld [vmem:[%s861_s0 + $0x50] ss:$8 sps:$4 sm:$0xff]   ;;  %v566_v18 = vld [vmem:[%s861_s0 + $0x24] ss:$8 sps:$4 sm:$0xff]  }
  0x2c   :  { %237 = vmatpush1.bf16.msra.mxu0 %v546_v2  ;;  %534 = vmatpush1.bf16.msra.mxu1 %v546_v2  ;;  %v557_v13 = vld [vmem:[%s861_s0 + $0x40] ss:$8 sps:$4 sm:$0xff]   ;;  %v568_v19 = vld [vmem:[%s861_s0 + $0x64] ss:$8 sps:$4 sm:$0xff]   ;;  %v572_v22 = vld [vmem:[%s861_s0 + $0x34] ss:$8 sps:$4 sm:$0xff]  }
  0x2d   :  { %238 = vmatprep.subr.bf16.mxu0 %v628_v0  ;;  %526 = vmatprep.subr.bf16.mxu1 %v628_v0  ;;  %v570_v20 = vld [vmem:[%s861_s0 + $0x20] ss:$8 sps:$4 sm:$0xff]   ;;  %v574_v23 = vld [vmem:[%s861_s0 + $0x74] ss:$8 sps:$4 sm:$0xff]   ;;  %v576_v24 = vld [vmem:[%s861_s0 + $0x30] ss:$8 sps:$4 sm:$0xff]  }
  0x2e   :  { %v571_v21 = vld [vmem:[%s861_s0 + $0x60] ss:$8 sps:$4 sm:$0xff]   ;;  %v577_v25 = vld [vmem:[%s861_s0 + $0x70] ss:$8 sps:$4 sm:$0xff]  }
  0x2f   :  { %v761_v26 = vld [vmem:[#allocation2] ss:$0 sm:$0xff]  ;;  %v765_v33 = vld [vmem:[#allocation4] ss:$0 sm:$0xff] }
  0x30   :  { %239 = vmatpush1.bf16.msra.mxu0 %v547_v3  ;;  %535 = vmatpush1.bf16.msra.mxu1 %v547_v3 }
  0x31   :  { %240 = vmatprep.subr.bf16.mxu0 %v628_v0  ;;  %527 = vmatprep.subr.bf16.mxu1 %v628_v0 }
  0x34   :  { %241 = vmatpush1.bf16.msra.mxu0 %v548_v4  ;;  %536 = vmatpush1.bf16.msra.mxu1 %v548_v4 }
  0x35   :  { %242 = vmatprep.subr.bf16.mxu0 %v628_v0  ;;  %528 = vmatprep.subr.bf16.mxu1 %v628_v0 }
  0x38   :  { %243 = vmatpush1.bf16.msra.mxu0 %v549_v7  ;;  %537 = vmatpush1.bf16.msra.mxu1 %v549_v7 }
  0x39   :  { %244 = vmatprep.subr.bf16.mxu0 %v628_v0  ;;  %529 = vmatprep.subr.bf16.mxu1 %v628_v0 }
  0x3c   :  { %245 = vmatpush1.bf16.msra.mxu0 %v550_v8  ;;  %538 = vmatpush1.bf16.msra.mxu1 %v550_v8 }
  0x3d   :  { %246 = vmatprep.subr.bf16.mxu0 %v628_v0  ;;  %530 = vmatprep.subr.bf16.mxu1 %v628_v0 }
  0x40   :  { %247 = vmatpush1.bf16.msra.mxu0 %v551_v9  ;;  %539 = vmatpush1.bf16.msra.mxu1 %v551_v9 }
  0x41   :  { %248 = vmatprep.subr.bf16.mxu0 %v628_v0  ;;  %531 = vmatprep.subr.bf16.mxu1 %v628_v0 }
  0x44   :  { %249 = vmatpush1.bf16.msra.mxu0 %v552_v10  ;;  %540 = vmatpush1.bf16.msra.mxu1 %v552_v10 }
  0x45   :  { %250 = vmatprep.subr.bf16.mxu0 %v628_v0  ;;  %532 = vmatprep.subr.bf16.mxu1 %v628_v0 }
  0x48   :  { %251 = vmatpush1.bf16.msra.mxu0 %v553_v11  ;;  %541 = vmatpush1.bf16.msra.mxu1 %v553_v11 }
  0x4b   :  { %267 = vmatmul.mubr.bf16.vlgmr.msra.gmra.mrb[0].mxu0 %v554_v12  ;;  %299 = vmatmul.mubr.bf16.vlgmr.msra.gmra.mrb[0].mxu1 %v557_v13 }
  0x4c   :  { %484 = vmatprep.mubr.msk.bf16.mxu0 %vm209_vm0, %v560_v14  ;;  %488 = vmatprep.mubr.msk.bf16.mxu1 %vm209_vm0, %v562_v15 }
  0x53   :  { %275 = vmatmul.mubr.bf16.gmra.mrb[4].mxu0 %v564_v16  ;;  %307 = vmatmul.mubr.bf16.gmra.mrb[4].mxu1 %v565_v17 }
  0x54   :  { %485 = vmatprep.mubr.msk.bf16.mxu0 %vm209_vm0, %v566_v18  ;;  %489 = vmatprep.mubr.msk.bf16.mxu1 %vm209_vm0, %v568_v19 }
  0x5b   :  { %283 = vmatmul.mubr.bf16.gmra.mrb[8].mxu0 %v570_v20  ;;  %315 = vmatmul.mubr.bf16.gmra.mrb[8].mxu1 %v571_v21 }
  0x5c   :  { %486 = vmatprep.mubr.msk.bf16.mxu0 %vm209_vm0, %v572_v22  ;;  %490 = vmatprep.mubr.msk.bf16.mxu1 %vm209_vm0, %v574_v23 }
  0x63   :  { %291 = vmatmul.mubr.bf16.gmra.mrb[12].mxu0 %v576_v24  ;;  %323 = vmatmul.mubr.bf16.gmra.mrb[12].mxu1 %v577_v25 }
 0x11e   :  { %v268_v27 = vpop.f32.mrb[0].mxu0  ;;  %v300_v28 = vpop.f32.mrb[0].mxu1 }
 0x11f   :  { %v269_v29 = vadd.f32 %v761_v26, %v268_v27  ;;  %v301_v30 = vadd.f32 %v761_v26, %v300_v28  ;;  %v270_v31 = vpop.f32.mrb[1].mxu0  ;;  %v302_v32 = vpop.f32.mrb[1].mxu1 }
 0x120   :  { %v271_v34 = vpop.f32.mrb[2].mxu0  ;;  %v303_v35 = vpop.f32.mrb[2].mxu1 }
 0x121   :  { %v331_v36 = vmax.f32 %v269_v29, 0.0  ;;  %v339_v37 = vmax.f32 %v301_v30, 0.0  ;;  %v272_v38 = vadd.f32 %v761_v26, %v271_v34  ;;  %v304_v39 = vadd.f32 %v761_v26, %v303_v35  ;;  %v273_v40 = vpop.f32.mrb[3].mxu0  ;;  %v305_v41 = vpop.f32.mrb[3].mxu1 }
 0x123   :  { %v354_v42 = vadd.f32 %v765_v33, %v331_v36  ;;  %v362_v43 = vadd.f32 %v765_v33, %v339_v37  ;;  %v332_v44 = vmax.f32 %v272_v38, 0.0  ;;  %v340_v45 = vmax.f32 %v304_v39, 0.0 }
 0x125   :  { %v508_v46 = vpack.c.bf16 %v354_v42, %v354_v42  ;;  %v516_v47 = vpack.c.bf16 %v362_v43, %v362_v43  ;;  %v355_v48 = vadd.f32 %v765_v33, %v332_v44  ;;  %v363_v49 = vadd.f32 %v765_v33, %v340_v45 }
 0x126   :  { %v276_v50 = vpop.f32.mrb[4].mxu0  ;;  %v308_v51 = vpop.f32.mrb[4].mxu1 }
 0x127   :  { %435 = vst.msk [vmem:[%s865_s4] sm:$0xf] %vm434_vm1, %v508_v46  ;;  %443 = vst.msk [vmem:[%s865_s4 + $0x20] sm:$0xf] %vm434_vm1, %v516_v47  ;;  %v509_v52 = vpack.c.bf16 %v355_v48, %v355_v48  ;;  %v517_v53 = vpack.c.bf16 %v363_v49, %v363_v49  ;;  %v277_v54 = vadd.f32 %v761_v26, %v276_v50  ;;  %v278_v56 = vpop.f32.mrb[5].mxu0  ;;  %v310_v57 = vpop.f32.mrb[5].mxu1 }
 0x128   :  { %v309_v55 = vadd.f32 %v761_v26, %v308_v51  ;;  %v279_v58 = vpop.f32.mrb[6].mxu0  ;;  %v311_v59 = vpop.f32.mrb[6].mxu1 }
 0x129   :  { %436 = vst.msk [vmem:[%s865_s4 + $0x4] sm:$0xf] %vm434_vm1, %v509_v52  ;;  %444 = vst.msk [vmem:[%s865_s4 + $0x24] sm:$0xf] %vm434_vm1, %v517_v53  ;;  %v333_v60 = vmax.f32 %v277_v54, 0.0  ;;  %v280_v62 = vadd.f32 %v761_v26, %v279_v58  ;;  %v312_v63 = vadd.f32 %v761_v26, %v311_v59  ;;  %v281_v0 = vpop.f32.mrb[7].mxu0 }
 0x12a   :  { %v341_v61 = vmax.f32 %v309_v55, 0.0  ;;  %v313_v1 = vpop.f32.mrb[7].mxu1 }
 0x12b   :  { %v356_v2 = vadd.f32 %v765_v33, %v333_v60  ;;  %v334_v4 = vmax.f32 %v280_v62, 0.0  ;;  %v342_v5 = vmax.f32 %v312_v63, 0.0 }
 0x12c   :  { %v364_v3 = vadd.f32 %v765_v33, %v341_v61 }
 0x12d   :  { %v510_v6 = vpack.c.bf16 %v356_v2, %v356_v2  ;;  %v357_v8 = vadd.f32 %v765_v33, %v334_v4  ;;  %v365_v9 = vadd.f32 %v765_v33, %v342_v5 }
 0x12e   :  { %v518_v7 = vpack.c.bf16 %v364_v3, %v364_v3  ;;  %v284_v10 = vpop.f32.mrb[8].mxu0  ;;  %v316_v11 = vpop.f32.mrb[8].mxu1 }
 0x12f   :  { %437 = vst.msk [vmem:[%s865_s4 + $0x8] sm:$0xf] %vm434_vm1, %v510_v6  ;;  %v511_v12 = vpack.c.bf16 %v357_v8, %v357_v8  ;;  %v519_v13 = vpack.c.bf16 %v365_v9, %v365_v9  ;;  %v285_v14 = vadd.f32 %v761_v26, %v284_v10  ;;  %v317_v15 = vadd.f32 %v761_v26, %v316_v11  ;;  %v286_v16 = vpop.f32.mrb[9].mxu0  ;;  %v318_v17 = vpop.f32.mrb[9].mxu1 }
 0x130   :  { %445 = vst.msk [vmem:[%s865_s4 + $0x28] sm:$0xf] %vm434_vm1, %v518_v7  ;;  %v287_v18 = vpop.f32.mrb[10].mxu0  ;;  %v319_v19 = vpop.f32.mrb[10].mxu1 }
 0x131   :  { %438 = vst.msk [vmem:[%s865_s4 + $0xc] sm:$0xf] %vm434_vm1, %v511_v12  ;;  %446 = vst.msk [vmem:[%s865_s4 + $0x2c] sm:$0xf] %vm434_vm1, %v519_v13  ;;  %v335_v20 = vmax.f32 %v285_v14, 0.0  ;;  %v343_v21 = vmax.f32 %v317_v15, 0.0  ;;  %v288_v22 = vadd.f32 %v761_v26, %v287_v18  ;;  %v320_v23 = vadd.f32 %v761_v26, %v319_v19 }
 0x132   :  { %v289_v24 = vpop.f32.mrb[11].mxu0  ;;  %v321_v25 = vpop.f32.mrb[11].mxu1 }
 0x133   :  { %v358_v27 = vadd.f32 %v765_v33, %v335_v20  ;;  %v366_v28 = vadd.f32 %v765_v33, %v343_v21  ;;  %v336_v29 = vmax.f32 %v288_v22, 0.0  ;;  %v344_v30 = vmax.f32 %v320_v23, 0.0 }
 0x135   :  { %v512_v31 = vpack.c.bf16 %v358_v27, %v358_v27  ;;  %v520_v32 = vpack.c.bf16 %v366_v28, %v366_v28  ;;  %v359_v34 = vadd.f32 %v765_v33, %v336_v29  ;;  %v367_v35 = vadd.f32 %v765_v33, %v344_v30 }
 0x136   :  { %v292_v36 = vpop.f32.mrb[12].mxu0  ;;  %v324_v37 = vpop.f32.mrb[12].mxu1 }
 0x137   :  { %439 = vst.msk [vmem:[%s865_s4 + $0x10] sm:$0xf] %vm434_vm1, %v512_v31  ;;  %447 = vst.msk [vmem:[%s865_s4 + $0x30] sm:$0xf] %vm434_vm1, %v520_v32  ;;  %v513_v38 = vpack.c.bf16 %v359_v34, %v359_v34  ;;  %v521_v39 = vpack.c.bf16 %v367_v35, %v367_v35  ;;  %v293_v40 = vadd.f32 %v761_v26, %v292_v36  ;;  %v294_v42 = vpop.f32.mrb[13].mxu0  ;;  %v326_v43 = vpop.f32.mrb[13].mxu1 }
 0x138   :  { %v325_v41 = vadd.f32 %v761_v26, %v324_v37  ;;  %v295_v44 = vpop.f32.mrb[14].mxu0  ;;  %v327_v45 = vpop.f32.mrb[14].mxu1 }
 0x139   :  { %440 = vst.msk [vmem:[%s865_s4 + $0x14] sm:$0xf] %vm434_vm1, %v513_v38  ;;  %448 = vst.msk [vmem:[%s865_s4 + $0x34] sm:$0xf] %vm434_vm1, %v521_v39  ;;  %v337_v46 = vmax.f32 %v293_v40, 0.0  ;;  %v296_v48 = vadd.f32 %v761_v26, %v295_v44  ;;  %v328_v49 = vadd.f32 %v761_v26, %v327_v45  ;;  %v297_v50 = vpop.f32.mrb[15].mxu0 }
 0x13a   :  { %v345_v47 = vmax.f32 %v325_v41, 0.0  ;;  %v329_v51 = vpop.f32.mrb[15].mxu1 }
 0x13b   :  { %v360_v52 = vadd.f32 %v765_v33, %v337_v46  ;;  %v338_v54 = vmax.f32 %v296_v48, 0.0  ;;  %v346_v55 = vmax.f32 %v328_v49, 0.0 }
 0x13c   :  { %v368_v53 = vadd.f32 %v765_v33, %v345_v47 }
 0x13d   :  { %v514_v56 = vpack.c.bf16 %v360_v52, %v360_v52  ;;  %v361_v58 = vadd.f32 %v765_v33, %v338_v54  ;;  %v369_v59 = vadd.f32 %v765_v33, %v346_v55 }
 0x13e   :  { %v522_v57 = vpack.c.bf16 %v368_v53, %v368_v53 }
 0x13f   :  { %441 = vst.msk [vmem:[%s865_s4 + $0x18] sm:$0xf] %vm434_vm1, %v514_v56  ;;  %v515_v26 = vpack.c.bf16 %v361_v58, %v361_v58  ;;  %v523_v60 = vpack.c.bf16 %v369_v59, %v369_v59 }
 0x140   :  { %449 = vst.msk [vmem:[%s865_s4 + $0x38] sm:$0xf] %vm434_vm1, %v522_v57 }
 0x141   :  { %442 = vst.msk [vmem:[%s865_s4 + $0x1c] sm:$0xf] %vm434_vm1, %v515_v26  ;;  %450 = vst.msk [vmem:[%s865_s4 + $0x3c] sm:$0xf] %vm434_vm1, %v523_v60 }
 0x142   :  { %455 = vsyncpa [#allocation3], 1 }
 0x143   :  { %456 = vsyncpa [#allocation5], 1 }

// kernel: decoder_forward.9
= control target key start
LH: loop header
LB: loop body
LE: loop exit
PB: predicated region body
PF: predicated region fallthrough
CT: control target
= control target key end

     0   :  { %v2469_v0 = vmov 0   ;;  %vm777_vm0 = vcmask 261120   ;;  %vm1843_vm1 = vcmask 519168   ;;  %s3421_s1 = inlined_call_operand.vmem [shape: bf16[288,64], index: 1, kind: input, shape index: {}]   ;;  %s3422_s0 = inlined_call_operand.vmem [shape: bf16[512,288], index: 0, kind: input, shape index: {}]   ;;  %s3423_s2 = inlined_call_operand.vmem [shape: f32[1,64], index: 2, kind: input, shape index: {}]   ;;  %s3424_s3 = inlined_call_operand.vmem [shape: f32[1,64], index: 3, kind: input, shape index: {}]   ;;  %s3425_s4 = inlined_call_operand.vmem [shape: bf16[512,64], index: 4, kind: output, shape index: {}]  }
   0x1   :  { %874 = vmatprep.subr.bf16.mxu0 %v2469_v0  ;;  %2290 = vmatprep.subr.bf16.mxu1 %v2469_v0  ;;  %v2323_v1 = vld [vmem:[%s3421_s1] sm:$0xff]   ;;  %v2324_v2 = vld [vmem:[%s3421_s1 + $0x8] sm:$0xff]   ;;  %v2325_v3 = vld [vmem:[%s3421_s1 + $0x10] sm:$0xff]  }
   0x2   :  { %875 = vmatpush1.bf16.msra.mxu0 %v2323_v1  ;;  %2306 = vmatpush1.bf16.msra.mxu1 %v2323_v1  ;;  %v2326_v4 = vld [vmem:[%s3421_s1 + $0x18] sm:$0xff]   ;;  %v2327_v5 = vld [vmem:[%s3421_s1 + $0x20] sm:$0xff]   ;;  %v2328_v7 = vld [vmem:[%s3421_s1 + $0x28] sm:$0xff]  }
   0x3   :  { %876 = vmatprep.subr.bf16.mxu0 %v2469_v0  ;;  %2291 = vmatprep.subr.bf16.mxu1 %v2469_v0  ;;  %v2341_v6 = vld [vmem:[%s3422_s0 + $0x4] ss:$12 sps:$4 sm:$0xff]   ;;  %v2330_v10 = vld [vmem:[%s3421_s1 + $0x38] sm:$0xff]   ;;  %v2332_v12 = vld [vmem:[%s3421_s1 + $0x48] sm:$0xff]  }
   0x4   :  { %v2344_v8 = vld [vmem:[%s3422_s0 + $0x244] ss:$12 sps:$4 sm:$0xff]   ;;  %906 = vmatprep.mubr.bf16.mxu0 %v2341_v6  ;;  %v2334_v14 = vld [vmem:[%s3421_s1 + $0x58] sm:$0xff]   ;;  %v2336_v16 = vld [vmem:[%s3421_s1 + $0x68] sm:$0xff]  }
   0x5   :  { %1098 = vmatprep.mubr.bf16.mxu1 %v2344_v8  ;;  %v2329_v9 = vld [vmem:[%s3421_s1 + $0x30] sm:$0xff]   ;;  %v2331_v11 = vld [vmem:[%s3421_s1 + $0x40] sm:$0xff]   ;;  %v2338_v18 = vld [vmem:[%s3421_s1 + $0x78] sm:$0xff]  }
   0x6   :  { %877 = vmatpush1.bf16.msra.mxu0 %v2324_v2  ;;  %2307 = vmatpush1.bf16.msra.mxu1 %v2324_v2  ;;  %v2333_v13 = vld [vmem:[%s3421_s1 + $0x50] sm:$0xff]   ;;  %v2335_v15 = vld [vmem:[%s3421_s1 + $0x60] sm:$0xff]   ;;  %v2346_v22 = vld [vmem:[%s3422_s0 + $0x1c] ss:$12 sps:$4 sm:$0xff]  }
   0x7   :  { %878 = vmatprep.subr.bf16.mxu0 %v2469_v0  ;;  %2292 = vmatprep.subr.bf16.mxu1 %v2469_v0  ;;  %v2337_v17 = vld [vmem:[%s3421_s1 + $0x70] sm:$0xff]   ;;  %v2345_v19 = vld [vmem:[%s3421_s1 + $0x80] sm:$0xff]   ;;  %v2348_v23 = vld [vmem:[%s3422_s0 + $0x25c] ss:$12 sps:$4 sm:$0xff]  }
   0x8   :  { %v2339_v20 = vld [vmem:[%s3422_s0] ss:$12 sps:$4 sm:$0xff]   ;;  %v2350_v25 = vld [vmem:[%s3422_s0 + $0x18] ss:$12 sps:$4 sm:$0xff]   ;;  %v2356_v29 = vld [vmem:[%s3422_s0 + $0x30] ss:$12 sps:$4 sm:$0xff]  }
   0x9   :  { %v2342_v21 = vld [vmem:[%s3422_s0 + $0x240] ss:$12 sps:$4 sm:$0xff]   ;;  %v2351_v26 = vld [vmem:[%s3422_s0 + $0x258] ss:$12 sps:$4 sm:$0xff]   ;;  %v2357_v30 = vld [vmem:[%s3422_s0 + $0x270] ss:$12 sps:$4 sm:$0xff]  }
   0xa   :  { %879 = vmatpush1.bf16.msra.mxu0 %v2325_v3  ;;  %2308 = vmatpush1.bf16.msra.mxu1 %v2325_v3  ;;  %v2370_v24 = vld [vmem:[%s3421_s1 + $0x88] sm:$0xff]   ;;  %v2352_v27 = vld [vmem:[%s3422_s0 + $0x34] ss:$12 sps:$4 sm:$0xff]   ;;  %v2364_v35 = vld [vmem:[%s3422_s0 + $0x64] ss:$12 sps:$4 sm:$0xff]  }
   0xb   :  { %880 = vmatprep.subr.bf16.mxu0 %v2469_v0  ;;  %2293 = vmatprep.subr.bf16.mxu1 %v2469_v0  ;;  %v2354_v28 = vld [vmem:[%s3422_s0 + $0x274] ss:$12 sps:$4 sm:$0xff]   ;;  %v2358_v31 = vld [vmem:[%s3422_s0 + $0x4c] ss:$12 sps:$4 sm:$0xff]   ;;  %v2366_v36 = vld [vmem:[%s3422_s0 + $0x2a4] ss:$12 sps:$4 sm:$0xff]  }
   0xc   :  { %v2360_v32 = vld [vmem:[%s3422_s0 + $0x28c] ss:$12 sps:$4 sm:$0xff]   ;;  %v2362_v33 = vld [vmem:[%s3422_s0 + $0x48] ss:$12 sps:$4 sm:$0xff]   ;;  %v2381_v45 = vld [vmem:[%s3422_s0 + $0x90] ss:$12 sps:$4 sm:$0xff]  }
   0xd   :  { %v2363_v34 = vld [vmem:[%s3422_s0 + $0x288] ss:$12 sps:$4 sm:$0xff]   ;;  %v2368_v37 = vld [vmem:[%s3422_s0 + $0x60] ss:$12 sps:$4 sm:$0xff]   ;;  %v2375_v41 = vld [vmem:[%s3422_s0 + $0x78] ss:$12 sps:$4 sm:$0xff]  }
   0xe   :  { %881 = vmatpush1.bf16.msra.mxu0 %v2326_v4  ;;  %2309 = vmatpush1.bf16.msra.mxu1 %v2326_v4  ;;  %v2369_v38 = vld [vmem:[%s3422_s0 + $0x2a0] ss:$12 sps:$4 sm:$0xff]   ;;  %v2371_v39 = vld [vmem:[%s3422_s0 + $0x7c] ss:$12 sps:$4 sm:$0xff]   ;;  %v2376_v42 = vld [vmem:[%s3422_s0 + $0x2b8] ss:$12 sps:$4 sm:$0xff]  }
   0xf   :  { %882 = vmatprep.subr.bf16.mxu0 %v2469_v0  ;;  %2294 = vmatprep.subr.bf16.mxu1 %v2469_v0  ;;  %v2373_v40 = vld [vmem:[%s3422_s0 + $0x2bc] ss:$12 sps:$4 sm:$0xff]   ;;  %v2377_v43 = vld [vmem:[%s3422_s0 + $0x94] ss:$12 sps:$4 sm:$0xff]   ;;  %v2383_v47 = vld [vmem:[%s3422_s0 + $0xac] ss:$12 sps:$4 sm:$0xff]  }
  0x10   :  { %v2379_v44 = vld [vmem:[%s3422_s0 + $0x2d4] ss:$12 sps:$4 sm:$0xff]   ;;  %v2382_v46 = vld [vmem:[%s3422_s0 + $0x2d0] ss:$12 sps:$4 sm:$0xff]   ;;  %v2385_v48 = vld [vmem:[%s3422_s0 + $0x2ec] ss:$12 sps:$4 sm:$0xff]  }
  0x11   :  { %v2387_v49 = vld [vmem:[%s3422_s0 + $0xa8] ss:$12 sps:$4 sm:$0xff]   ;;  %v2389_v51 = vld [vmem:[%s3422_s0 + $0xc4] ss:$12 sps:$4 sm:$0xff]   ;;  %v2392_v53 = vld [vmem:[%s3422_s0 + $0xc0] ss:$12 sps:$4 sm:$0xff]  }
  0x12   :  { %883 = vmatpush1.bf16.msra.mxu0 %v2327_v5  ;;  %2310 = vmatpush1.bf16.msra.mxu1 %v2327_v5  ;;  %v2388_v50 = vld [vmem:[%s3422_s0 + $0x2e8] ss:$12 sps:$4 sm:$0xff]   ;;  %v2393_v54 = vld [vmem:[%s3422_s0 + $0x20] ss:$12 sps:$4 sm:$0xff]   ;;  %v2396_v56 = vld [vmem:[%s3422_s0 + $0x38] ss:$12 sps:$4 sm:$0xff]  }
  0x13   :  { %884 = vmatprep.subr.bf16.mxu0 %v2469_v0  ;;  %2295 = vmatprep.subr.bf16.mxu1 %v2469_v0  ;;  %v2391_v52 = vld [vmem:[%s3422_s0 + $0x8] ss:$12 sps:$4 sm:$0xff]   ;;  %v2397_v57 = vld [vmem:[%s3422_s0 + $0xd8] ss:$12 sps:$4 sm:$0xff]   ;;  %v2398_v58 = vld [vmem:[%s3422_s0 + $0x50] ss:$12 sps:$4 sm:$0xff]  }
  0x14   :  { %v2394_v55 = vld [vmem:[%s3422_s0 + $0xdc] ss:$12 sps:$4 sm:$0xff]   ;;  %v2399_v59 = vld [vmem:[%s3422_s0 + $0xf4] ss:$12 sps:$4 sm:$0xff]   ;;  %v2404_v63 = vld [vmem:[%s3422_s0 + $0x10c] ss:$12 sps:$4 sm:$0xff]  }
  0x15   :  { %v2401_v60 = vld [vmem:[%s3422_s0 + $0x68] ss:$12 sps:$4 sm:$0xff]   ;;  %v2402_v61 = vld [vmem:[%s3422_s0 + $0xf0] ss:$12 sps:$4 sm:$0xff]   ;;  %v2403_v62 = vld [vmem:[%s3422_s0 + $0x80] ss:$12 sps:$4 sm:$0xff]  }
  0x16   :  { %885 = vmatpush1.bf16.msra.mxu0 %v2328_v7  ;;  %2311 = vmatpush1.bf16.msra.mxu1 %v2328_v7  ;;  %v2407_v1 = vld [vmem:[%s3422_s0 + $0x108] ss:$12 sps:$4 sm:$0xff]   ;;  %v2408_v2 = vld [vmem:[%s3422_s0 + $0xb0] ss:$12 sps:$4 sm:$0xff]   ;;  %v2412_v5 = vld [vmem:[%s3422_s0 + $0x120] ss:$12 sps:$4 sm:$0xff]  }
  0x17   :  { %886 = vmatprep.subr.bf16.mxu0 %v2469_v0  ;;  %2296 = vmatprep.subr.bf16.mxu1 %v2469_v0  ;;  %v2409_v3 = vld [vmem:[%s3422_s0 + $0x124] ss:$12 sps:$4 sm:$0xff]   ;;  %v2411_v4 = vld [vmem:[%s3422_s0 + $0xc8] ss:$12 sps:$4 sm:$0xff]   ;;  %v2413_v6 = vld [vmem:[%s3422_s0 + $0xe0] ss:$12 sps:$4 sm:$0xff]  }
  0x18   :  { %v2414_v7 = vld [vmem:[%s3422_s0 + $0x13c] ss:$12 sps:$4 sm:$0xff]   ;;  %v2416_v8 = vld [vmem:[%s3422_s0 + $0xf8] ss:$12 sps:$4 sm:$0xff]  }
  0x1a   :  { %887 = vmatpush1.bf16.msra.mxu0 %v2329_v9  ;;  %2312 = vmatpush1.bf16.msra.mxu1 %v2329_v9  ;;  %v2417_v9 = vld [vmem:[%s3422_s0 + $0x138] ss:$12 sps:$4 sm:$0xff]  }
  0x1b   :  { %888 = vmatprep.subr.bf16.mxu0 %v2469_v0  ;;  %2297 = vmatprep.subr.bf16.mxu1 %v2469_v0 }
  0x1e   :  { %889 = vmatpush1.bf16.msra.mxu0 %v2330_v10  ;;  %2313 = vmatpush1.bf16.msra.mxu1 %v2330_v10  ;;  %v2418_v10 = vld [vmem:[%s3422_s0 + $0x110] ss:$12 sps:$4 sm:$0xff]  }
  0x1f   :  { %890 = vmatprep.subr.bf16.mxu0 %v2469_v0  ;;  %2298 = vmatprep.subr.bf16.mxu1 %v2469_v0 }
  0x22   :  { %891 = vmatpush1.bf16.msra.mxu0 %v2331_v11  ;;  %2314 = vmatpush1.bf16.msra.mxu1 %v2331_v11  ;;  %v2419_v11 = vld [vmem:[%s3422_s0 + $0x154] ss:$12 sps:$4 sm:$0xff]  }
  0x23   :  { %892 = vmatprep.subr.bf16.mxu0 %v2469_v0  ;;  %2299 = vmatprep.subr.bf16.mxu1 %v2469_v0 }
  0x26   :  { %893 = vmatpush1.bf16.msra.mxu0 %v2332_v12  ;;  %2315 = vmatpush1.bf16.msra.mxu1 %v2332_v12  ;;  %v2421_v12 = vld [vmem:[%s3422_s0 + $0x128] ss:$12 sps:$4 sm:$0xff]  }
  0x27   :  { %894 = vmatprep.subr.bf16.mxu0 %v2469_v0  ;;  %2300 = vmatprep.subr.bf16.mxu1 %v2469_v0 }
  0x2a   :  { %895 = vmatpush1.bf16.msra.mxu0 %v2333_v13  ;;  %2316 = vmatpush1.bf16.msra.mxu1 %v2333_v13  ;;  %v2422_v13 = vld [vmem:[%s3422_s0 + $0x150] ss:$12 sps:$4 sm:$0xff]  }
  0x2b   :  { %896 = vmatprep.subr.bf16.mxu0 %v2469_v0  ;;  %2301 = vmatprep.subr.bf16.mxu1 %v2469_v0 }
  0x2e   :  { %897 = vmatpush1.bf16.msra.mxu0 %v2334_v14  ;;  %2317 = vmatpush1.bf16.msra.mxu1 %v2334_v14  ;;  %v2423_v14 = vld [vmem:[%s3422_s0 + $0x140] ss:$12 sps:$4 sm:$0xff]  }
  0x2f   :  { %898 = vmatprep.subr.bf16.mxu0 %v2469_v0  ;;  %2302 = vmatprep.subr.bf16.mxu1 %v2469_v0 }
  0x32   :  { %899 = vmatpush1.bf16.msra.mxu0 %v2335_v15  ;;  %2318 = vmatpush1.bf16.msra.mxu1 %v2335_v15  ;;  %v2424_v15 = vld [vmem:[%s3422_s0 + $0x16c] ss:$12 sps:$4 sm:$0xff]  }
  0x33   :  { %900 = vmatprep.subr.bf16.mxu0 %v2469_v0  ;;  %2303 = vmatprep.subr.bf16.mxu1 %v2469_v0 }
  0x36   :  { %901 = vmatpush1.bf16.msra.mxu0 %v2336_v16  ;;  %2319 = vmatpush1.bf16.msra.mxu1 %v2336_v16  ;;  %v2426_v16 = vld [vmem:[%s3422_s0 + $0x158] ss:$12 sps:$4 sm:$0xff]  }
  0x37   :  { %902 = vmatprep.subr.bf16.mxu0 %v2469_v0  ;;  %2304 = vmatprep.subr.bf16.mxu1 %v2469_v0 }
  0x3a   :  { %903 = vmatpush1.bf16.msra.mxu0 %v2337_v17  ;;  %2320 = vmatpush1.bf16.msra.mxu1 %v2337_v17  ;;  %v2427_v17 = vld [vmem:[%s3422_s0 + $0x168] ss:$12 sps:$4 sm:$0xff]  }
  0x3b   :  { %904 = vmatprep.subr.bf16.mxu0 %v2469_v0  ;;  %2305 = vmatprep.subr.bf16.mxu1 %v2469_v0  ;;  %v2406_v0 = vld [vmem:[%s3422_s0 + $0x98] ss:$12 sps:$4 sm:$0xff]  }
  0x3e   :  { %905 = vmatpush1.bf16.msra.mxu0 %v2338_v18  ;;  %2321 = vmatpush1.bf16.msra.mxu1 %v2338_v18  ;;  %v2428_v18 = vld [vmem:[%s3422_s0 + $0x170] ss:$12 sps:$4 sm:$0xff]  }
  0x3f   :  { %2222 = vmatprep.subr.bf16.mxu1 %v2345_v19 }
  0x41   :  { %907 = vmatmul.mubr.bf16.vlgmr.msra.gmra.mrb[0].mxu0 %v2339_v20  ;;  %1099 = vmatmul.mubr.bf16.vlgmr.msra.gmra.mrb[0].mxu1 %v2342_v21  ;;  %v2431_v20 = vld [vmem:[%s3422_s0 + $0x188] ss:$12 sps:$4 sm:$0xff]   ;;  %v2432_v21 = vld [vmem:[%s3422_s0 + $0x180] ss:$12 sps:$4 sm:$0xff]  }
  0x42   :  { %2223 = vmatpush3.bf16.msra.mxu1 %v2345_v19  ;;  %914 = vmatprep.mubr.bf16.mxu0 %v2346_v22  ;;  %v2429_v19 = vld [vmem:[%s3422_s0 + $0x184] ss:$12 sps:$4 sm:$0xff]   ;;  %v2433_v22 = vld [vmem:[%s3422_s0 + $0x1a0] ss:$12 sps:$4 sm:$0xff]  }
  0x43   :  { %1106 = vmatprep.mubr.bf16.mxu1 %v2348_v23  ;;  %2224 = vmatprep.subr.bf16.mxu1 %v2370_v24  ;;  %v2434_v23 = vld [vmem:[%s3422_s0 + $0x19c] ss:$12 sps:$4 sm:$0xff]  }
  0x46   :  { %2225 = vmatpush3.bf16.msra.mxu1 %v2370_v24  ;;  %v2436_v24 = vld [vmem:[%s3422_s0 + $0x1b8] ss:$12 sps:$4 sm:$0xff]  }
  0x49   :  { %915 = vmatmul.mubr.bf16.gmra.mrb[4].mxu0 %v2350_v25  ;;  %1107 = vmatmul.mubr.bf16.gmra.mrb[4].mxu1 %v2351_v26  ;;  %v2437_v25 = vld [vmem:[%s3422_s0 + $0x198] ss:$12 sps:$4 sm:$0xff]   ;;  %v2438_v26 = vld [vmem:[%s3422_s0 + $0x1d0] ss:$12 sps:$4 sm:$0xff]  }
  0x4a   :  { %922 = vmatprep.mubr.bf16.mxu0 %v2352_v27  ;;  %1114 = vmatprep.mubr.bf16.mxu1 %v2354_v28  ;;  %v2439_v27 = vld [vmem:[%s3422_s0 + $0x1b4] ss:$12 sps:$4 sm:$0xff]  }
  0x4b   :  { %v2441_v28 = vld [vmem:[%s3422_s0 + $0x1e8] ss:$12 sps:$4 sm:$0xff]  }
  0x51   :  { %923 = vmatmul.mubr.bf16.gmra.mrb[8].mxu0 %v2356_v29  ;;  %1115 = vmatmul.mubr.bf16.gmra.mrb[8].mxu1 %v2357_v30  ;;  %v2442_v29 = vld [vmem:[%s3422_s0 + $0x1b0] ss:$12 sps:$4 sm:$0xff]   ;;  %v2443_v30 = vld [vmem:[%s3422_s0 + $0x200] ss:$12 sps:$4 sm:$0xff]  }
  0x52   :  { %930 = vmatprep.mubr.bf16.mxu0 %v2358_v31  ;;  %1122 = vmatprep.mubr.bf16.mxu1 %v2360_v32  ;;  %v2444_v31 = vld [vmem:[%s3422_s0 + $0x1cc] ss:$12 sps:$4 sm:$0xff]  }
  0x53   :  { %v2446_v32 = vld [vmem:[%s3422_s0 + $0x218] ss:$12 sps:$4 sm:$0xff]  }
  0x59   :  { %931 = vmatmul.mubr.bf16.gmra.mrb[12].mxu0 %v2362_v33  ;;  %1123 = vmatmul.mubr.bf16.gmra.mrb[12].mxu1 %v2363_v34  ;;  %v2447_v33 = vld [vmem:[%s3422_s0 + $0x1c8] ss:$12 sps:$4 sm:$0xff]   ;;  %v2448_v34 = vld [vmem:[%s3422_s0 + $0x230] ss:$12 sps:$4 sm:$0xff]  }
  0x5a   :  { %938 = vmatprep.mubr.bf16.mxu0 %v2364_v35  ;;  %1130 = vmatprep.mubr.bf16.mxu1 %v2366_v36  ;;  %v2449_v35 = vld [vmem:[%s3422_s0 + $0x1e4] ss:$12 sps:$4 sm:$0xff]   ;;  %v2451_v36 = vld [vmem:[%s3422_s0 + $0x248] ss:$12 sps:$4 sm:$0xff]  }
  0x61   :  { %939 = vmatmul.mubr.bf16.gmra.mrb[16].mxu0 %v2368_v37  ;;  %1131 = vmatmul.mubr.bf16.gmra.mrb[16].mxu1 %v2369_v38  ;;  %v2452_v37 = vld [vmem:[%s3422_s0 + $0x1e0] ss:$12 sps:$4 sm:$0xff]  }
  0x62   :  { %946 = vmatprep.mubr.bf16.mxu0 %v2371_v39  ;;  %1138 = vmatprep.mubr.bf16.mxu1 %v2373_v40  ;;  %v2453_v38 = vld [vmem:[%s3422_s0 + $0x260] ss:$12 sps:$4 sm:$0xff]   ;;  %v2454_v39 = vld [vmem:[%s3422_s0 + $0x1fc] ss:$12 sps:$4 sm:$0xff]   ;;  %v2456_v40 = vld [vmem:[%s3422_s0 + $0x278] ss:$12 sps:$4 sm:$0xff]  }
  0x69   :  { %947 = vmatmul.mubr.bf16.gmra.mrb[20].mxu0 %v2375_v41  ;;  %1139 = vmatmul.mubr.bf16.gmra.mrb[20].mxu1 %v2376_v42  ;;  %v2457_v41 = vld [vmem:[%s3422_s0 + $0x1f8] ss:$12 sps:$4 sm:$0xff]   ;;  %v2458_v42 = vld [vmem:[%s3422_s0 + $0x290] ss:$12 sps:$4 sm:$0xff]  }
  0x6a   :  { %954 = vmatprep.mubr.bf16.mxu0 %v2377_v43  ;;  %1146 = vmatprep.mubr.bf16.mxu1 %v2379_v44  ;;  %v2459_v43 = vld [vmem:[%s3422_s0 + $0x214] ss:$12 sps:$4 sm:$0xff]  }
  0x6b   :  { %v2461_v44 = vld [vmem:[%s3422_s0 + $0x2a8] ss:$12 sps:$4 sm:$0xff]  }
  0x71   :  { %955 = vmatmul.mubr.bf16.gmra.mrb[24].mxu0 %v2381_v45  ;;  %1147 = vmatmul.mubr.bf16.gmra.mrb[24].mxu1 %v2382_v46  ;;  %v2462_v45 = vld [vmem:[%s3422_s0 + $0x210] ss:$12 sps:$4 sm:$0xff]   ;;  %v2463_v46 = vld [vmem:[%s3422_s0 + $0x2c0] ss:$12 sps:$4 sm:$0xff]  }
  0x72   :  { %962 = vmatprep.mubr.bf16.mxu0 %v2383_v47  ;;  %1154 = vmatprep.mubr.bf16.mxu1 %v2385_v48  ;;  %v2464_v47 = vld [vmem:[%s3422_s0 + $0x22c] ss:$12 sps:$4 sm:$0xff]  }
  0x73   :  { %v2466_v48 = vld [vmem:[%s3422_s0 + $0x2d8] ss:$12 sps:$4 sm:$0xff]  }
  0x79   :  { %963 = vmatmul.mubr.bf16.gmra.mrb[28].mxu0 %v2387_v49  ;;  %1155 = vmatmul.mubr.bf16.gmra.mrb[28].mxu1 %v2388_v50  ;;  %v2467_v49 = vld [vmem:[%s3422_s0 + $0x228] ss:$12 sps:$4 sm:$0xff]   ;;  %v2468_v50 = vld [vmem:[%s3422_s0 + $0x2f0] ss:$12 sps:$4 sm:$0xff]  }
  0x7a   :  { %970 = vmatprep.mubr.bf16.mxu0 %v2389_v51  ;;  %2226 = vmatprep.mubr.msk.bf16.mxu1 %vm777_vm0, %v2391_v52 }
  0x81   :  { %971 = vmatmul.mubr.bf16.gmra.mrb[32].mxu0 %v2392_v53  ;;  %2227 = vmatmul.mubr.msk.bf16.vlgmr.msra.gmra.mrb[32].mxu1 %vm777_vm0, %v2393_v54 }
  0x82   :  { %978 = vmatprep.mubr.bf16.mxu0 %v2394_v55  ;;  %2230 = vmatprep.mubr.msk.bf16.mxu1 %vm777_vm0, %v2396_v56 }
  0x89   :  { %979 = vmatmul.mubr.bf16.gmra.mrb[36].mxu0 %v2397_v57  ;;  %2231 = vmatmul.mubr.msk.bf16.gmra.mrb[36].mxu1 %vm777_vm0, %v2398_v58 }
  0x8a   :  { %986 = vmatprep.mubr.bf16.mxu0 %v2399_v59  ;;  %2234 = vmatprep.mubr.msk.bf16.mxu1 %vm777_vm0, %v2401_v60 }
  0x91   :  { %987 = vmatmul.mubr.bf16.gmra.mrb[40].mxu0 %v2402_v61  ;;  %2235 = vmatmul.mubr.msk.bf16.gmra.mrb[40].mxu1 %vm777_vm0, %v2403_v62 }
  0x92   :  { %994 = vmatprep.mubr.bf16.mxu0 %v2404_v63  ;;  %2238 = vmatprep.mubr.msk.bf16.mxu1 %vm777_vm0, %v2406_v0 }
  0x99   :  { %995 = vmatmul.mubr.bf16.gmra.mrb[44].mxu0 %v2407_v1  ;;  %2239 = vmatmul.mubr.msk.bf16.gmra.mrb[44].mxu1 %vm777_vm0, %v2408_v2 }
  0x9a   :  { %1002 = vmatprep.mubr.bf16.mxu0 %v2409_v3  ;;  %2242 = vmatprep.mubr.msk.bf16.mxu1 %vm777_vm0, %v2411_v4 }
  0xa1   :  { %1003 = vmatmul.mubr.bf16.gmra.mrb[48].mxu0 %v2412_v5  ;;  %2243 = vmatmul.mubr.msk.bf16.gmra.mrb[48].mxu1 %vm777_vm0, %v2413_v6 }
  0xa2   :  { %1010 = vmatprep.mubr.bf16.mxu0 %v2414_v7  ;;  %2246 = vmatprep.mubr.msk.bf16.mxu1 %vm777_vm0, %v2416_v8 }
  0xa9   :  { %1011 = vmatmul.mubr.bf16.gmra.mrb[52].mxu0 %v2417_v9  ;;  %2247 = vmatmul.mubr.msk.bf16.gmra.mrb[52].mxu1 %vm777_vm0, %v2418_v10 }
  0xaa   :  { %1018 = vmatprep.mubr.bf16.mxu0 %v2419_v11  ;;  %2250 = vmatprep.mubr.msk.bf16.mxu1 %vm777_vm0, %v2421_v12 }
  0xb1   :  { %1019 = vmatmul.mubr.bf16.gmra.mrb[56].mxu0 %v2422_v13  ;;  %2251 = vmatmul.mubr.msk.bf16.gmra.mrb[56].mxu1 %vm777_vm0, %v2423_v14 }
  0xb2   :  { %1026 = vmatprep.mubr.bf16.mxu0 %v2424_v15  ;;  %2254 = vmatprep.mubr.msk.bf16.mxu1 %vm777_vm0, %v2426_v16 }
  0xb9   :  { %1027 = vmatmul.mubr.bf16.gmra.mrb[60].mxu0 %v2427_v17  ;;  %2255 = vmatmul.mubr.msk.bf16.gmra.mrb[60].mxu1 %vm777_vm0, %v2428_v18 }
  0xba   :  { %1034 = vmatprep.mubr.bf16.mxu0 %v2429_v19  ;;  %2258 = vmatprep.mubr.msk.bf16.mxu1 %vm777_vm0, %v2431_v20 }
  0xc1   :  { %1035 = vmatmul.mubr.bf16.gmra.mrb[64].mxu0 %v2432_v21  ;;  %2259 = vmatmul.mubr.msk.bf16.gmra.mrb[64].mxu1 %vm777_vm0, %v2433_v22 }
  0xc2   :  { %1042 = vmatprep.mubr.bf16.mxu0 %v2434_v23  ;;  %2262 = vmatprep.mubr.msk.bf16.mxu1 %vm777_vm0, %v2436_v24 }
  0xc9   :  { %1043 = vmatmul.mubr.bf16.gmra.mrb[68].mxu0 %v2437_v25  ;;  %2263 = vmatmul.mubr.msk.bf16.gmra.mrb[68].mxu1 %vm777_vm0, %v2438_v26 }
  0xca   :  { %1050 = vmatprep.mubr.bf16.mxu0 %v2439_v27  ;;  %2266 = vmatprep.mubr.msk.bf16.mxu1 %vm777_vm0, %v2441_v28 }
  0xd1   :  { %1051 = vmatmul.mubr.bf16.gmra.mrb[72].mxu0 %v2442_v29  ;;  %2267 = vmatmul.mubr.msk.bf16.gmra.mrb[72].mxu1 %vm777_vm0, %v2443_v30 }
  0xd2   :  { %1058 = vmatprep.mubr.bf16.mxu0 %v2444_v31  ;;  %2270 = vmatprep.mubr.msk.bf16.mxu1 %vm777_vm0, %v2446_v32 }
  0xd9   :  { %1059 = vmatmul.mubr.bf16.gmra.mrb[76].mxu0 %v2447_v33  ;;  %2271 = vmatmul.mubr.msk.bf16.gmra.mrb[76].mxu1 %vm777_vm0, %v2448_v34 }
  0xda   :  { %1066 = vmatprep.mubr.bf16.mxu0 %v2449_v35  ;;  %2274 = vmatprep.mubr.msk.bf16.mxu1 %vm777_vm0, %v2451_v36 }
  0xe1   :  { %1067 = vmatmul.mubr.bf16.gmra.mrb[80].mxu0 %v2452_v37  ;;  %2275 = vmatmul.mubr.msk.bf16.gmra.mrb[80].mxu1 %vm777_vm0, %v2453_v38 }
  0xe2   :  { %1074 = vmatprep.mubr.bf16.mxu0 %v2454_v39  ;;  %2278 = vmatprep.mubr.msk.bf16.mxu1 %vm777_vm0, %v2456_v40 }
  0xe9   :  { %1075 = vmatmul.mubr.bf16.gmra.mrb[84].mxu0 %v2457_v41  ;;  %2279 = vmatmul.mubr.msk.bf16.gmra.mrb[84].mxu1 %vm777_vm0, %v2458_v42 }
  0xea   :  { %1082 = vmatprep.mubr.bf16.mxu0 %v2459_v43  ;;  %2282 = vmatprep.mubr.msk.bf16.mxu1 %vm777_vm0, %v2461_v44 }
  0xf1   :  { %1083 = vmatmul.mubr.bf16.gmra.mrb[88].mxu0 %v2462_v45  ;;  %2283 = vmatmul.mubr.msk.bf16.gmra.mrb[88].mxu1 %vm777_vm0, %v2463_v46 }
  0xf2   :  { %1090 = vmatprep.mubr.bf16.mxu0 %v2464_v47  ;;  %2286 = vmatprep.mubr.msk.bf16.mxu1 %vm777_vm0, %v2466_v48 }
  0xf9   :  { %1091 = vmatmul.mubr.bf16.gmra.mrb[92].mxu0 %v2467_v49  ;;  %2287 = vmatmul.mubr.msk.bf16.gmra.mrb[92].mxu1 %vm777_vm0, %v2468_v50 }
 0x114   :  { %v2901_v51 = vpop.f32.mrb[0].mxu0  ;;  %v2903_v52 = vpop.f32.mrb[0].mxu1 }
 0x115   :  { %v910_v53 = vpop.f32.mrb[1].mxu0  ;;  %v1102_v54 = vpop.f32.mrb[1].mxu1 }
 0x116   :  { %v2905_v55 = vpop.f32.mrb[2].mxu0  ;;  %v2907_v56 = vpop.f32.mrb[2].mxu1  ;;  %v2964_v53 = vld [vmem:[%s3423_s2] ss:$0 sm:$0xff] }
 0x117   :  { %v913_v57 = vpop.f32.mrb[3].mxu0  ;;  %v1105_v58 = vpop.f32.mrb[3].mxu1 }
 0x118   :  { %v909_v57 = vadd.f32 %v2964_v53, %v2901_v51 }
 0x11c   :  { %v916_v59 = vpop.f32.mrb[4].mxu0  ;;  %v2909_v60 = vpop.f32.mrb[4].mxu1 }
 0x11d   :  { %v918_v61 = vpop.f32.mrb[5].mxu0  ;;  %v1110_v62 = vpop.f32.mrb[5].mxu1  ;;  %v917_v54 = vadd.f32 %v2964_v53, %v916_v59 }
 0x11e   :  { %v919_v63 = vpop.f32.mrb[6].mxu0  ;;  %v2911_v0 = vpop.f32.mrb[6].mxu1 }
 0x11f   :  { %v921_v1 = vpop.f32.mrb[7].mxu0  ;;  %v1113_v2 = vpop.f32.mrb[7].mxu1  ;;  %v920_v62 = vadd.f32 %v2964_v53, %v919_v63 }
 0x124   :  { %v2913_v3 = vpop.f32.mrb[8].mxu0  ;;  %v2915_v4 = vpop.f32.mrb[8].mxu1 }
 0x125   :  { %v926_v5 = vpop.f32.mrb[9].mxu0  ;;  %v1118_v6 = vpop.f32.mrb[9].mxu1 }
 0x126   :  { %v2917_v7 = vpop.f32.mrb[10].mxu0  ;;  %v2919_v8 = vpop.f32.mrb[10].mxu1  ;;  %v912_v6 = vadd.f32 %v2964_v53, %v2905_v55 }
 0x127   :  { %v929_v9 = vpop.f32.mrb[11].mxu0  ;;  %v1121_v10 = vpop.f32.mrb[11].mxu1 }
 0x128   :  { %v2977_v9 = vld [vmem:[%s3424_s3] ss:$0 sm:$0xff] }
 0x12c   :  { %v2921_v11 = vpop.f32.mrb[12].mxu0  ;;  %v2923_v12 = vpop.f32.mrb[12].mxu1 }
 0x12d   :  { %v934_v13 = vpop.f32.mrb[13].mxu0  ;;  %v1126_v14 = vpop.f32.mrb[13].mxu1 }
 0x12e   :  { %v2925_v15 = vpop.f32.mrb[14].mxu0  ;;  %v2927_v16 = vpop.f32.mrb[14].mxu1 }
 0x12f   :  { %v937_v17 = vpop.f32.mrb[15].mxu0  ;;  %v1129_v18 = vpop.f32.mrb[15].mxu1 }
 0x134   :  { %v2929_v19 = vpop.f32.mrb[16].mxu0  ;;  %v2931_v20 = vpop.f32.mrb[16].mxu1 }
 0x135   :  { %v942_v21 = vpop.f32.mrb[17].mxu0  ;;  %v1134_v22 = vpop.f32.mrb[17].mxu1 }
 0x136   :  { %v2933_v23 = vpop.f32.mrb[18].mxu0  ;;  %v2935_v24 = vpop.f32.mrb[18].mxu1 }
 0x137   :  { %v945_v25 = vpop.f32.mrb[19].mxu0  ;;  %v1137_v26 = vpop.f32.mrb[19].mxu1 }
 0x13c   :  { %v2937_v27 = vpop.f32.mrb[20].mxu0  ;;  %v2939_v28 = vpop.f32.mrb[20].mxu1 }
 0x13d   :  { %v950_v29 = vpop.f32.mrb[21].mxu0  ;;  %v1142_v30 = vpop.f32.mrb[21].mxu1 }
 0x13e   :  { %v2941_v31 = vpop.f32.mrb[22].mxu0  ;;  %v2943_v32 = vpop.f32.mrb[22].mxu1  ;;  %v933_v29 = vadd.f32 %v2964_v53, %v2921_v11 }
 0x13f   :  { %v953_v33 = vpop.f32.mrb[23].mxu0  ;;  %v1145_v34 = vpop.f32.mrb[23].mxu1 }
 0x140   :  { %v925_v34 = vadd.f32 %v2964_v53, %v2913_v3  ;;  %v928_v3 = vadd.f32 %v2964_v53, %v2917_v7 }
 0x144   :  { %v2945_v35 = vpop.f32.mrb[24].mxu0  ;;  %v2947_v36 = vpop.f32.mrb[24].mxu1 }
 0x145   :  { %v958_v37 = vpop.f32.mrb[25].mxu0  ;;  %v1150_v38 = vpop.f32.mrb[25].mxu1 }
 0x146   :  { %v2949_v39 = vpop.f32.mrb[26].mxu0  ;;  %v2951_v40 = vpop.f32.mrb[26].mxu1 }
 0x147   :  { %v961_v41 = vpop.f32.mrb[27].mxu0  ;;  %v1153_v42 = vpop.f32.mrb[27].mxu1 }
 0x14c   :  { %v2953_v43 = vpop.f32.mrb[28].mxu0  ;;  %v2955_v44 = vpop.f32.mrb[28].mxu1 }
 0x14d   :  { %v966_v45 = vpop.f32.mrb[29].mxu0  ;;  %v1158_v46 = vpop.f32.mrb[29].mxu1 }
 0x14e   :  { %v2957_v47 = vpop.f32.mrb[30].mxu0  ;;  %v2959_v48 = vpop.f32.mrb[30].mxu1  ;;  %v936_v45 = vadd.f32 %v2964_v53, %v2925_v15 }
 0x14f   :  { %v969_v49 = vpop.f32.mrb[31].mxu0  ;;  %v1161_v50 = vpop.f32.mrb[31].mxu1 }
 0x154   :  { %v2969_v58 = vpop.f32.mrb[32].mxu0  ;;  %v2228_v61 = vpop.f32.mrb[32].mxu1 }
 0x155   :  { %v1206_v1 = vadd.f32 %v2228_v61, %v917_v54  ;;  %v974_v2 = vpop.f32.mrb[33].mxu0  ;;  %v1197_v5 = vpop.f32.mrb[33].mxu1 }
 0x156   :  { %v1198_v59 = vadd.f32 %v1197_v5, %v909_v57  ;;  %v2979_v10 = vpop.f32.mrb[34].mxu0  ;;  %v2229_v51 = vpop.f32.mrb[34].mxu1 }
 0x157   :  { %v1454_v13 = vmax.f32 %v1206_v1, 0.0  ;;  %v1209_v14 = vadd.f32 %v2229_v51, %v920_v62  ;;  %v977_v17 = vpop.f32.mrb[35].mxu0  ;;  %v1200_v18 = vpop.f32.mrb[35].mxu1 }
 0x158   :  { %v1452_v63 = vmax.f32 %v1198_v59, 0.0  ;;  %v1201_v21 = vadd.f32 %v1200_v18, %v912_v6  ;;  %v949_v17 = vadd.f32 %v2964_v53, %v2937_v27 }
 0x159   :  { %v1525_v22 = vadd.f32 %v2977_v9, %v1454_v13  ;;  %v1455_v25 = vmax.f32 %v1209_v14, 0.0 }
 0x15a   :  { %v1523_v55 = vadd.f32 %v2977_v9, %v1452_v63  ;;  %v1453_v26 = vmax.f32 %v1201_v21, 0.0  ;;  %v941_v21 = vadd.f32 %v2964_v53, %v2929_v19  ;;  %v944_v19 = vadd.f32 %v2964_v53, %v2933_v23 }
 0x15b   :  { %v2126_v30 = vpack.c.bf16 %v1525_v22, %v1525_v22  ;;  %v1526_v33 = vadd.f32 %v2977_v9, %v1455_v25 }
 0x15c   :  { %v2124_v37 = vpack.c.bf16 %v1523_v55, %v1523_v55  ;;  %v1524_v38 = vadd.f32 %v2977_v9, %v1453_v26  ;;  %v2989_v41 = vpop.f32.mrb[36].mxu0  ;;  %v2232_v42 = vpop.f32.mrb[36].mxu1 }
 0x15d   :  { %1846 = vst.msk [vmem:[%s3425_s4 + $0x8] sm:$0xf] %vm1843_vm1, %v2126_v30  ;;  %v2127_v11 = vpack.c.bf16 %v1526_v33, %v1526_v33  ;;  %v1222_v46 = vadd.f32 %v2232_v42, %v933_v29  ;;  %v982_v49 = vpop.f32.mrb[37].mxu0  ;;  %v1213_v50 = vpop.f32.mrb[37].mxu1  ;;  %v952_v29 = vadd.f32 %v2964_v53, %v2941_v31 }
 0x15e   :  { %1844 = vst.msk [vmem:[%s3425_s4] sm:$0xf] %vm1843_vm1, %v2124_v37  ;;  %v2125_v54 = vpack.c.bf16 %v1524_v38, %v1524_v38  ;;  %v1214_v57 = vadd.f32 %v1213_v50, %v925_v34  ;;  %v3003_v15 = vpop.f32.mrb[38].mxu0  ;;  %v2233_v61 = vpop.f32.mrb[38].mxu1 }
 0x15f   :  { %1847 = vst.msk [vmem:[%s3425_s4 + $0xc] sm:$0xf] %vm1843_vm1, %v2127_v11  ;;  %v1458_v62 = vmax.f32 %v1222_v46, 0.0  ;;  %v1225_v1 = vadd.f32 %v2233_v61, %v936_v45  ;;  %v985_v2 = vpop.f32.mrb[39].mxu0  ;;  %v1216_v5 = vpop.f32.mrb[39].mxu1 }
 0x160   :  { %1845 = vst.msk [vmem:[%s3425_s4 + $0x4] sm:$0xf] %vm1843_vm1, %v2125_v54  ;;  %v1456_v7 = vmax.f32 %v1214_v57, 0.0  ;;  %v1217_v6 = vadd.f32 %v1216_v5, %v928_v3  ;;  %v957_v5 = vadd.f32 %v2964_v53, %v2945_v35  ;;  %v960_v35 = vadd.f32 %v2964_v53, %v2949_v39 }
 0x161   :  { %v1529_v59 = vadd.f32 %v2977_v9, %v1458_v62  ;;  %v1459_v51 = vmax.f32 %v1225_v1, 0.0  ;;  %v965_v62 = vadd.f32 %v2964_v53, %v2953_v43 }
 0x162   :  { %v1527_v13 = vadd.f32 %v2977_v9, %v1456_v7  ;;  %v1457_v14 = vmax.f32 %v1217_v6, 0.0 }
 0x163   :  { %v2130_v18 = vpack.c.bf16 %v1529_v59, %v1529_v59  ;;  %v1530_v63 = vadd.f32 %v2977_v9, %v1459_v51 }
 0x164   :  { %v2128_v22 = vpack.c.bf16 %v1527_v13, %v1527_v13  ;;  %v1528_v25 = vadd.f32 %v2977_v9, %v1457_v14  ;;  %v3021_v55 = vpop.f32.mrb[40].mxu0  ;;  %v2236_v26 = vpop.f32.mrb[40].mxu1  ;;  %v968_v13 = vadd.f32 %v2964_v53, %v2957_v47 }
 0x165   :  { %1850 = vst.msk [vmem:[%s3425_s4 + $0x18] sm:$0xf] %vm1843_vm1, %v2130_v18  ;;  %v2131_v27 = vpack.c.bf16 %v1530_v63, %v1530_v63  ;;  %v1238_v30 = vadd.f32 %v2236_v26, %v949_v17  ;;  %v990_v33 = vpop.f32.mrb[41].mxu0  ;;  %v1229_v34 = vpop.f32.mrb[41].mxu1 }
 0x166   :  { %1848 = vst.msk [vmem:[%s3425_s4 + $0x10] sm:$0xf] %vm1843_vm1, %v2128_v22  ;;  %v2129_v37 = vpack.c.bf16 %v1528_v25, %v1528_v25  ;;  %v1230_v38 = vadd.f32 %v1229_v34, %v941_v21  ;;  %v3035_v31 = vpop.f32.mrb[42].mxu0  ;;  %v2237_v42 = vpop.f32.mrb[42].mxu1 }
 0x167   :  { %1851 = vst.msk [vmem:[%s3425_s4 + $0x1c] sm:$0xf] %vm1843_vm1, %v2131_v27  ;;  %v1462_v45 = vmax.f32 %v1238_v30, 0.0  ;;  %v1241_v11 = vadd.f32 %v2237_v42, %v952_v29  ;;  %v993_v46 = vpop.f32.mrb[43].mxu0  ;;  %v1232_v49 = vpop.f32.mrb[43].mxu1 }
 0x168   :  { %1849 = vst.msk [vmem:[%s3425_s4 + $0x14] sm:$0xf] %vm1843_vm1, %v2129_v37  ;;  %v1460_v23 = vmax.f32 %v1230_v38, 0.0  ;;  %v1233_v50 = vadd.f32 %v1232_v49, %v944_v19  ;;  %v981_v38 = vadd.f32 %v2964_v53, %v2989_v41 }
 0x169   :  { %v1533_v3 = vadd.f32 %v2977_v9, %v1462_v45  ;;  %v1463_v54 = vmax.f32 %v1241_v11, 0.0  ;;  %v973_v11 = vadd.f32 %v2964_v53, %v2969_v58  ;;  %v976_v58 = vadd.f32 %v2964_v53, %v2979_v10 }
 0x16a   :  { %v1531_v57 = vadd.f32 %v2977_v9, %v1460_v23  ;;  %v1461_v61 = vmax.f32 %v1233_v50, 0.0 }
 0x16b   :  { %v2134_v1 = vpack.c.bf16 %v1533_v3, %v1533_v3  ;;  %v1534_v2 = vadd.f32 %v2977_v9, %v1463_v54  ;;  %v984_v3 = vadd.f32 %v2964_v53, %v3003_v15 }
 0x16c   :  { %v2132_v7 = vpack.c.bf16 %v1531_v57, %v1531_v57  ;;  %v1532_v6 = vadd.f32 %v2977_v9, %v1461_v61  ;;  %v996_v59 = vpop.f32.mrb[44].mxu0  ;;  %v2240_v51 = vpop.f32.mrb[44].mxu1 }
 0x16d   :  { %1854 = vst.msk [vmem:[%s3425_s4 + $0x28] sm:$0xf] %vm1843_vm1, %v2134_v1  ;;  %v2135_v43 = vpack.c.bf16 %v1534_v2, %v1534_v2  ;;  %v1254_v14 = vadd.f32 %v2240_v51, %v965_v62  ;;  %v998_v17 = vpop.f32.mrb[45].mxu0  ;;  %v1245_v18 = vpop.f32.mrb[45].mxu1 }
 0x16e   :  { %1852 = vst.msk [vmem:[%s3425_s4 + $0x20] sm:$0xf] %vm1843_vm1, %v2132_v7  ;;  %v2133_v63 = vpack.c.bf16 %v1532_v6, %v1532_v6  ;;  %v1246_v21 = vadd.f32 %v1245_v18, %v957_v5  ;;  %v999_v47 = vpop.f32.mrb[46].mxu0  ;;  %v2241_v22 = vpop.f32.mrb[46].mxu1 }
 0x16f   :  { %1855 = vst.msk [vmem:[%s3425_s4 + $0x2c] sm:$0xf] %vm1843_vm1, %v2135_v43  ;;  %v1466_v25 = vmax.f32 %v1254_v14, 0.0  ;;  %v1257_v26 = vadd.f32 %v2241_v22, %v968_v13  ;;  %v1001_v29 = vpop.f32.mrb[47].mxu0  ;;  %v1248_v27 = vpop.f32.mrb[47].mxu1  ;;  %v989_v22 = vadd.f32 %v2964_v53, %v3021_v55 }
 0x170   :  { %1853 = vst.msk [vmem:[%s3425_s4 + $0x24] sm:$0xf] %vm1843_vm1, %v2133_v63  ;;  %v1464_v39 = vmax.f32 %v1246_v21, 0.0  ;;  %v1249_v30 = vadd.f32 %v1248_v27, %v960_v35  ;;  %v997_v35 = vadd.f32 %v2964_v53, %v996_v59 }
 0x171   :  { %v1537_v33 = vadd.f32 %v2977_v9, %v1466_v25  ;;  %v1467_v34 = vmax.f32 %v1257_v26, 0.0 }
 0x172   :  { %v1535_v19 = vadd.f32 %v2977_v9, %v1464_v39  ;;  %v1465_v37 = vmax.f32 %v1249_v30, 0.0  ;;  %v1000_v39 = vadd.f32 %v2964_v53, %v999_v47 }
 0x173   :  { %v2138_v42 = vpack.c.bf16 %v1537_v33, %v1537_v33  ;;  %v1538_v45 = vadd.f32 %v2977_v9, %v1467_v34 }
 0x174   :  { %v2136_v46 = vpack.c.bf16 %v1535_v19, %v1535_v19  ;;  %v1536_v49 = vadd.f32 %v2977_v9, %v1465_v37  ;;  %v1004_v23 = vpop.f32.mrb[48].mxu0  ;;  %v2244_v50 = vpop.f32.mrb[48].mxu1  ;;  %v992_v19 = vadd.f32 %v2964_v53, %v3035_v31 }
 0x175   :  { %1858 = vst.msk [vmem:[%s3425_s4 + $0x38] sm:$0xf] %vm1843_vm1, %v2138_v42  ;;  %v2139_v41 = vpack.c.bf16 %v1538_v45, %v1538_v45  ;;  %v1270_v54 = vadd.f32 %v2244_v50, %v981_v38  ;;  %v1006_v57 = vpop.f32.mrb[49].mxu0  ;;  %v1261_v61 = vpop.f32.mrb[49].mxu1 }
 0x176   :  { %1856 = vst.msk [vmem:[%s3425_s4 + $0x30] sm:$0xf] %vm1843_vm1, %v2136_v46  ;;  %v2137_v62 = vpack.c.bf16 %v1536_v49, %v1536_v49  ;;  %v1262_v1 = vadd.f32 %v1261_v61, %v973_v11  ;;  %v1007_v15 = vpop.f32.mrb[50].mxu0  ;;  %v2245_v2 = vpop.f32.mrb[50].mxu1 }
 0x177   :  { %1859 = vst.msk [vmem:[%s3425_s4 + $0x3c] sm:$0xf] %vm1843_vm1, %v2139_v41  ;;  %v1470_v5 = vmax.f32 %v1270_v54, 0.0  ;;  %v1273_v7 = vadd.f32 %v2245_v2, %v984_v3  ;;  %v1009_v6 = vpop.f32.mrb[51].mxu0  ;;  %v1264_v51 = vpop.f32.mrb[51].mxu1 }
 0x178   :  { %1857 = vst.msk [vmem:[%s3425_s4 + $0x34] sm:$0xf] %vm1843_vm1, %v2137_v62  ;;  %v1468_v10 = vmax.f32 %v1262_v1, 0.0  ;;  %v1265_v13 = vadd.f32 %v1264_v51, %v976_v58  ;;  %v1005_v62 = vadd.f32 %v2964_v53, %v1004_v23 }
 0x179   :  { %v1541_v43 = vadd.f32 %v2977_v9, %v1470_v5  ;;  %v1471_v14 = vmax.f32 %v1273_v7, 0.0 }
 0x17a   :  { %v1539_v17 = vadd.f32 %v2977_v9, %v1468_v10  ;;  %v1469_v18 = vmax.f32 %v1265_v13, 0.0 }
 0x17b   :  { %v2142_v63 = vpack.c.bf16 %v1541_v43, %v1541_v43  ;;  %v1542_v21 = vadd.f32 %v2977_v9, %v1471_v14  ;;  %v1008_v14 = vadd.f32 %v2964_v53, %v1007_v15 }
 0x17c   :  { %v2140_v25 = vpack.c.bf16 %v1539_v17, %v1539_v17  ;;  %v1540_v26 = vadd.f32 %v2977_v9, %v1469_v18  ;;  %v1012_v29 = vpop.f32.mrb[52].mxu0  ;;  %v2248_v27 = vpop.f32.mrb[52].mxu1 }
 0x17d   :  { %1862 = vst.msk [vmem:[%s3425_s4 + $0x48] sm:$0xf] %vm1843_vm1, %v2142_v63  ;;  %v2143_v30 = vpack.c.bf16 %v1542_v21, %v1542_v21  ;;  %v1286_v59 = vadd.f32 %v2248_v27, %v997_v35  ;;  %v1014_v33 = vpop.f32.mrb[53].mxu0  ;;  %v1277_v34 = vpop.f32.mrb[53].mxu1  ;;  %v1013_v57 = vadd.f32 %v2964_v53, %v1012_v29 }
 0x17e   :  { %1860 = vst.msk [vmem:[%s3425_s4 + $0x40] sm:$0xf] %vm1843_vm1, %v2140_v25  ;;  %v2141_v55 = vpack.c.bf16 %v1540_v26, %v1540_v26  ;;  %v1278_v37 = vadd.f32 %v1277_v34, %v989_v22  ;;  %v1015_v47 = vpop.f32.mrb[54].mxu0  ;;  %v2249_v38 = vpop.f32.mrb[54].mxu1 }
 0x17f   :  { %1863 = vst.msk [vmem:[%s3425_s4 + $0x4c] sm:$0xf] %vm1843_vm1, %v2143_v30  ;;  %v1474_v42 = vmax.f32 %v1286_v59, 0.0  ;;  %v1289_v45 = vadd.f32 %v2249_v38, %v1000_v39  ;;  %v1017_v11 = vpop.f32.mrb[55].mxu0  ;;  %v1280_v46 = vpop.f32.mrb[55].mxu1  ;;  %v1016_v6 = vadd.f32 %v2964_v53, %v1015_v47 }
 0x180   :  { %1861 = vst.msk [vmem:[%s3425_s4 + $0x44] sm:$0xf] %vm1843_vm1, %v2141_v55  ;;  %v1472_v31 = vmax.f32 %v1278_v37, 0.0  ;;  %v1281_v49 = vadd.f32 %v1280_v46, %v992_v19 }
 0x181   :  { %v1545_v50 = vadd.f32 %v2977_v9, %v1474_v42  ;;  %v1475_v3 = vmax.f32 %v1289_v45, 0.0 }
 0x182   :  { %v1543_v41 = vadd.f32 %v2977_v9, %v1472_v31  ;;  %v1473_v54 = vmax.f32 %v1281_v49, 0.0 }
 0x183   :  { %v2146_v61 = vpack.c.bf16 %v1545_v50, %v1545_v50  ;;  %v1546_v58 = vadd.f32 %v2977_v9, %v1475_v3 }
 0x184   :  { %v2144_v1 = vpack.c.bf16 %v1543_v41, %v1543_v41  ;;  %v1544_v2 = vadd.f32 %v2977_v9, %v1473_v54  ;;  %v1020_v5 = vpop.f32.mrb[56].mxu0  ;;  %v2252_v7 = vpop.f32.mrb[56].mxu1 }
 0x185   :  { %1866 = vst.msk [vmem:[%s3425_s4 + $0x58] sm:$0xf] %vm1843_vm1, %v2146_v61  ;;  %v2147_v51 = vpack.c.bf16 %v1546_v58, %v1546_v58  ;;  %v1302_v10 = vadd.f32 %v2252_v7, %v1013_v57  ;;  %v1022_v13 = vpop.f32.mrb[57].mxu0  ;;  %v1293_v43 = vpop.f32.mrb[57].mxu1  ;;  %v1021_v34 = vadd.f32 %v2964_v53, %v1020_v5 }
 0x186   :  { %1864 = vst.msk [vmem:[%s3425_s4 + $0x50] sm:$0xf] %vm1843_vm1, %v2144_v1  ;;  %v2145_v23 = vpack.c.bf16 %v1544_v2, %v1544_v2  ;;  %v1294_v17 = vadd.f32 %v1293_v43, %v1005_v62  ;;  %v1023_v18 = vpop.f32.mrb[58].mxu0  ;;  %v2253_v35 = vpop.f32.mrb[58].mxu1 }
 0x187   :  { %1867 = vst.msk [vmem:[%s3425_s4 + $0x5c] sm:$0xf] %vm1843_vm1, %v2147_v51  ;;  %v1478_v63 = vmax.f32 %v1302_v10, 0.0  ;;  %v1305_v21 = vadd.f32 %v2253_v35, %v1016_v6  ;;  %v1025_v22 = vpop.f32.mrb[59].mxu0  ;;  %v1296_v25 = vpop.f32.mrb[59].mxu1  ;;  %v1024_v46 = vadd.f32 %v2964_v53, %v1023_v18 }
 0x188   :  { %1865 = vst.msk [vmem:[%s3425_s4 + $0x54] sm:$0xf] %vm1843_vm1, %v2145_v23  ;;  %v1476_v15 = vmax.f32 %v1294_v17, 0.0  ;;  %v1297_v26 = vadd.f32 %v1296_v25, %v1008_v14 }
 0x189   :  { %v1549_v29 = vadd.f32 %v2977_v9, %v1478_v63  ;;  %v1479_v27 = vmax.f32 %v1305_v21, 0.0 }
 0x18a   :  { %v1547_v39 = vadd.f32 %v2977_v9, %v1476_v15  ;;  %v1477_v30 = vmax.f32 %v1297_v26, 0.0 }
 0x18b   :  { %v2150_v59 = vpack.c.bf16 %v1549_v29, %v1549_v29  ;;  %v1550_v33 = vadd.f32 %v2977_v9, %v1479_v27 }
 0x18c   :  { %v2148_v19 = vpack.c.bf16 %v1547_v39, %v1547_v39  ;;  %v1548_v55 = vadd.f32 %v2977_v9, %v1477_v30  ;;  %v1028_v37 = vpop.f32.mrb[60].mxu0  ;;  %v2256_v47 = vpop.f32.mrb[60].mxu1 }
 0x18d   :  { %1870 = vst.msk [vmem:[%s3425_s4 + $0x68] sm:$0xf] %vm1843_vm1, %v2150_v59  ;;  %v2151_v38 = vpack.c.bf16 %v1550_v33, %v1550_v33  ;;  %v1029_v42 = vadd.f32 %v2964_v53, %v1028_v37  ;;  %v1030_v45 = vpop.f32.mrb[61].mxu0  ;;  %v1309_v11 = vpop.f32.mrb[61].mxu1 }
 0x18e   :  { %1868 = vst.msk [vmem:[%s3425_s4 + $0x60] sm:$0xf] %vm1843_vm1, %v2148_v19  ;;  %v2149_v31 = vpack.c.bf16 %v1548_v55, %v1548_v55  ;;  %v1310_v49 = vadd.f32 %v1309_v11, %v1021_v34  ;;  %v1031_v50 = vpop.f32.mrb[62].mxu0  ;;  %v2257_v3 = vpop.f32.mrb[62].mxu1 }
 0x18f   :  { %1871 = vst.msk [vmem:[%s3425_s4 + $0x6c] sm:$0xf] %vm1843_vm1, %v2151_v38  ;;  %v1318_v41 = vadd.f32 %v2256_v47, %v1029_v42  ;;  %v1032_v54 = vadd.f32 %v2964_v53, %v1031_v50  ;;  %v1033_v57 = vpop.f32.mrb[63].mxu0  ;;  %v1312_v61 = vpop.f32.mrb[63].mxu1 }
 0x190   :  { %1869 = vst.msk [vmem:[%s3425_s4 + $0x64] sm:$0xf] %vm1843_vm1, %v2149_v31  ;;  %v1480_v58 = vmax.f32 %v1310_v49, 0.0  ;;  %v1313_v62 = vadd.f32 %v1312_v61, %v1024_v46 }
 0x191   :  { %v1482_v1 = vmax.f32 %v1318_v41, 0.0  ;;  %v1321_v2 = vadd.f32 %v2257_v3, %v1032_v54 }
 0x192   :  { %v1551_v5 = vadd.f32 %v2977_v9, %v1480_v58  ;;  %v1481_v7 = vmax.f32 %v1313_v62, 0.0 }
 0x193   :  { %v1553_v6 = vadd.f32 %v2977_v9, %v1482_v1  ;;  %v1483_v51 = vmax.f32 %v1321_v2, 0.0 }
 0x194   :  { %v2152_v10 = vpack.c.bf16 %v1551_v5, %v1551_v5  ;;  %v1552_v13 = vadd.f32 %v2977_v9, %v1481_v7  ;;  %v1036_v43 = vpop.f32.mrb[64].mxu0  ;;  %v2260_v14 = vpop.f32.mrb[64].mxu1 }
 0x195   :  { %v2154_v23 = vpack.c.bf16 %v1553_v6, %v1553_v6  ;;  %v1554_v17 = vadd.f32 %v2977_v9, %v1483_v51  ;;  %v1037_v18 = vadd.f32 %v2964_v53, %v1036_v43  ;;  %v1038_v35 = vpop.f32.mrb[65].mxu0  ;;  %v1325_v63 = vpop.f32.mrb[65].mxu1 }
 0x196   :  { %1872 = vst.msk [vmem:[%s3425_s4 + $0x70] sm:$0xf] %vm1843_vm1, %v2152_v10  ;;  %v2153_v21 = vpack.c.bf16 %v1552_v13, %v1552_v13  ;;  %v1039_v22 = vpop.f32.mrb[66].mxu0  ;;  %v2261_v25 = vpop.f32.mrb[66].mxu1 }
 0x197   :  { %1874 = vst.msk [vmem:[%s3425_s4 + $0x78] sm:$0xf] %vm1843_vm1, %v2154_v23  ;;  %v2155_v15 = vpack.c.bf16 %v1554_v17, %v1554_v17  ;;  %v1326_v26 = vadd.f32 %v1325_v63, %v1037_v18  ;;  %v1040_v29 = vadd.f32 %v2964_v53, %v1039_v22  ;;  %v1041_v27 = vpop.f32.mrb[67].mxu0  ;;  %v1328_v39 = vpop.f32.mrb[67].mxu1 }
 0x198   :  { %1873 = vst.msk [vmem:[%s3425_s4 + $0x74] sm:$0xf] %vm1843_vm1, %v2153_v21 }
 0x199   :  { %1875 = vst.msk [vmem:[%s3425_s4 + $0x7c] sm:$0xf] %vm1843_vm1, %v2155_v15  ;;  %v1484_v30 = vmax.f32 %v1326_v26, 0.0  ;;  %v1329_v59 = vadd.f32 %v1328_v39, %v1040_v29 }
 0x19b   :  { %v1555_v33 = vadd.f32 %v2977_v9, %v1484_v30  ;;  %v1485_v34 = vmax.f32 %v1329_v59, 0.0 }
 0x19c   :  { %v1044_v19 = vpop.f32.mrb[68].mxu0  ;;  %v2264_v55 = vpop.f32.mrb[68].mxu1 }
 0x19d   :  { %v2156_v37 = vpack.c.bf16 %v1555_v33, %v1555_v33  ;;  %v1556_v47 = vadd.f32 %v2977_v9, %v1485_v34  ;;  %v1045_v38 = vadd.f32 %v2964_v53, %v1044_v19  ;;  %v1046_v42 = vpop.f32.mrb[69].mxu0  ;;  %v1341_v45 = vpop.f32.mrb[69].mxu1 }
 0x19e   :  { %v1047_v11 = vpop.f32.mrb[70].mxu0  ;;  %v2265_v46 = vpop.f32.mrb[70].mxu1 }
 0x19f   :  { %1876 = vst.msk [vmem:[%s3425_s4 + $0x80] sm:$0xf] %vm1843_vm1, %v2156_v37  ;;  %v2157_v31 = vpack.c.bf16 %v1556_v47, %v1556_v47  ;;  %v1334_v49 = vadd.f32 %v2260_v14, %v1045_v38  ;;  %v1048_v50 = vadd.f32 %v2964_v53, %v1047_v11  ;;  %v1049_v3 = vpop.f32.mrb[71].mxu0  ;;  %v1344_v41 = vpop.f32.mrb[71].mxu1  ;;  %v1109_v11 = vadd.f32 %v2964_v53, %v2909_v60 }
 0x1a0   :  { %v1112_v60 = vadd.f32 %v2964_v53, %v2911_v0 }
 0x1a1   :  { %1877 = vst.msk [vmem:[%s3425_s4 + $0x84] sm:$0xf] %vm1843_vm1, %v2157_v31  ;;  %v1486_v54 = vmax.f32 %v1334_v49, 0.0  ;;  %v1337_v57 = vadd.f32 %v2261_v25, %v1048_v50 }
 0x1a3   :  { %v1557_v61 = vadd.f32 %v2977_v9, %v1486_v54  ;;  %v1487_v58 = vmax.f32 %v1337_v57, 0.0 }
 0x1a4   :  { %v1052_v62 = vpop.f32.mrb[72].mxu0  ;;  %v3210_v1 = vpop.f32.mrb[72].mxu1 }
 0x1a5   :  { %v2158_v2 = vpack.c.bf16 %v1557_v61, %v1557_v61  ;;  %v1558_v5 = vadd.f32 %v2977_v9, %v1487_v58  ;;  %v1053_v7 = vadd.f32 %v2964_v53, %v1052_v62  ;;  %v1054_v6 = vpop.f32.mrb[73].mxu0  ;;  %v1357_v51 = vpop.f32.mrb[73].mxu1 }
 0x1a6   :  { %v1055_v10 = vpop.f32.mrb[74].mxu0  ;;  %v3214_v13 = vpop.f32.mrb[74].mxu1 }
 0x1a7   :  { %1878 = vst.msk [vmem:[%s3425_s4 + $0x88] sm:$0xf] %vm1843_vm1, %v2158_v2  ;;  %v2159_v43 = vpack.c.bf16 %v1558_v5, %v1558_v5  ;;  %v1342_v14 = vadd.f32 %v1341_v45, %v1053_v7  ;;  %v1056_v23 = vadd.f32 %v2964_v53, %v1055_v10  ;;  %v1057_v17 = vpop.f32.mrb[75].mxu0  ;;  %v1360_v18 = vpop.f32.mrb[75].mxu1 }
 0x1a9   :  { %1879 = vst.msk [vmem:[%s3425_s4 + $0x8c] sm:$0xf] %vm1843_vm1, %v2159_v43  ;;  %v1488_v35 = vmax.f32 %v1342_v14, 0.0  ;;  %v1345_v63 = vadd.f32 %v1344_v41, %v1056_v23 }
 0x1ab   :  { %v1559_v21 = vadd.f32 %v2977_v9, %v1488_v35  ;;  %v1489_v22 = vmax.f32 %v1345_v63, 0.0 }
 0x1ac   :  { %v1060_v25 = vpop.f32.mrb[76].mxu0  ;;  %v3226_v15 = vpop.f32.mrb[76].mxu1 }
 0x1ad   :  { %v2160_v26 = vpack.c.bf16 %v1559_v21, %v1559_v21  ;;  %v1560_v29 = vadd.f32 %v2977_v9, %v1489_v22  ;;  %v1061_v27 = vadd.f32 %v2964_v53, %v1060_v25  ;;  %v1062_v39 = vpop.f32.mrb[77].mxu0  ;;  %v3230_v30 = vpop.f32.mrb[77].mxu1 }
 0x1ae   :  { %v1063_v59 = vpop.f32.mrb[78].mxu0  ;;  %v3232_v33 = vpop.f32.mrb[78].mxu1 }
 0x1af   :  { %1880 = vst.msk [vmem:[%s3425_s4 + $0x90] sm:$0xf] %vm1843_vm1, %v2160_v26  ;;  %v2161_v34 = vpack.c.bf16 %v1560_v29, %v1560_v29  ;;  %v1350_v19 = vadd.f32 %v2264_v55, %v1061_v27  ;;  %v1064_v37 = vadd.f32 %v2964_v53, %v1063_v59  ;;  %v1065_v47 = vpop.f32.mrb[79].mxu0  ;;  %v3239_v38 = vpop.f32.mrb[79].mxu1  ;;  %v1101_v55 = vadd.f32 %v2964_v53, %v2903_v52 }
 0x1b0   :  { %v1125_v29 = vadd.f32 %v2964_v53, %v2923_v12 }
 0x1b1   :  { %1881 = vst.msk [vmem:[%s3425_s4 + $0x94] sm:$0xf] %vm1843_vm1, %v2161_v34  ;;  %v1490_v42 = vmax.f32 %v1350_v19, 0.0  ;;  %v1353_v45 = vadd.f32 %v2265_v46, %v1064_v37  ;;  %v1104_v46 = vadd.f32 %v2964_v53, %v2907_v56  ;;  %v1120_v34 = vadd.f32 %v2964_v53, %v2919_v8 }
 0x1b3   :  { %v1561_v31 = vadd.f32 %v2977_v9, %v1490_v42  ;;  %v1491_v49 = vmax.f32 %v1353_v45, 0.0 }
 0x1b4   :  { %v1068_v50 = vpop.f32.mrb[80].mxu0  ;;  %v2276_v3 = vpop.f32.mrb[80].mxu1 }
 0x1b5   :  { %v2162_v41 = vpack.c.bf16 %v1561_v31, %v1561_v31  ;;  %v1562_v54 = vadd.f32 %v2977_v9, %v1491_v49  ;;  %v1069_v57 = vadd.f32 %v2964_v53, %v1068_v50  ;;  %v1398_v61 = vadd.f32 %v2276_v3, %v1109_v11  ;;  %v1070_v58 = vpop.f32.mrb[81].mxu0  ;;  %v1389_v62 = vpop.f32.mrb[81].mxu1 }
 0x1b6   :  { %v1390_v2 = vadd.f32 %v1389_v62, %v1101_v55  ;;  %v1071_v5 = vpop.f32.mrb[82].mxu0  ;;  %v2277_v7 = vpop.f32.mrb[82].mxu1  ;;  %v1128_v49 = vadd.f32 %v2964_v53, %v2927_v16 }
 0x1b7   :  { %1882 = vst.msk [vmem:[%s3425_s4 + $0x98] sm:$0xf] %vm1843_vm1, %v2162_v41  ;;  %v2163_v52 = vpack.c.bf16 %v1562_v54, %v1562_v54  ;;  %v1358_v6 = vadd.f32 %v1357_v51, %v1069_v57  ;;  %v1502_v10 = vmax.f32 %v1398_v61, 0.0  ;;  %v1072_v43 = vadd.f32 %v2964_v53, %v1071_v5  ;;  %v1073_v14 = vpop.f32.mrb[83].mxu0  ;;  %v1392_v23 = vpop.f32.mrb[83].mxu1 }
 0x1b8   :  { %v1500_v17 = vmax.f32 %v1390_v2, 0.0  ;;  %v1401_v56 = vadd.f32 %v2277_v7, %v1112_v60  ;;  %v1393_v35 = vadd.f32 %v1392_v23, %v1104_v46  ;;  %v1117_v51 = vadd.f32 %v2964_v53, %v2915_v4 }
 0x1b9   :  { %1883 = vst.msk [vmem:[%s3425_s4 + $0x9c] sm:$0xf] %vm1843_vm1, %v2163_v52  ;;  %v1492_v0 = vmax.f32 %v1358_v6, 0.0  ;;  %v1573_v63 = vadd.f32 %v2977_v9, %v1502_v10  ;;  %v1361_v21 = vadd.f32 %v1360_v18, %v1072_v43  ;;  %v1133_v6 = vadd.f32 %v2964_v53, %v2931_v20 }
 0x1ba   :  { %v1571_v22 = vadd.f32 %v2977_v9, %v1500_v17  ;;  %v1503_v25 = vmax.f32 %v1401_v56, 0.0  ;;  %v1501_v26 = vmax.f32 %v1393_v35, 0.0  ;;  %v1141_v23 = vadd.f32 %v2964_v53, %v2939_v28 }
 0x1bb   :  { %v1563_v27 = vadd.f32 %v2977_v9, %v1492_v0  ;;  %v2174_v39 = vpack.c.bf16 %v1573_v63, %v1573_v63  ;;  %v1493_v59 = vmax.f32 %v1361_v21, 0.0  ;;  %v1136_v0 = vadd.f32 %v2964_v53, %v2935_v24 }
 0x1bc   :  { %v2172_v19 = vpack.c.bf16 %v1571_v22, %v1571_v22  ;;  %v1574_v18 = vadd.f32 %v2977_v9, %v1503_v25  ;;  %v1572_v37 = vadd.f32 %v2977_v9, %v1501_v26  ;;  %v1076_v4 = vpop.f32.mrb[84].mxu0  ;;  %v2280_v47 = vpop.f32.mrb[84].mxu1 }
 0x1bd   :  { %v2164_v42 = vpack.c.bf16 %v1563_v27, %v1563_v27  ;;  %1894 = vst.msk [vmem:[%s3425_s4 + $0xc8] sm:$0xf] %vm1843_vm1, %v2174_v39  ;;  %v1564_v12 = vadd.f32 %v2977_v9, %v1493_v59  ;;  %v1077_v45 = vadd.f32 %v2964_v53, %v1076_v4  ;;  %v1414_v11 = vadd.f32 %v2280_v47, %v1125_v29  ;;  %v1078_v31 = vpop.f32.mrb[85].mxu0  ;;  %v1405_v8 = vpop.f32.mrb[85].mxu1 }
 0x1be   :  { %1892 = vst.msk [vmem:[%s3425_s4 + $0xc0] sm:$0xf] %vm1843_vm1, %v2172_v19  ;;  %v2175_v55 = vpack.c.bf16 %v1574_v18, %v1574_v18  ;;  %v2173_v50 = vpack.c.bf16 %v1572_v37, %v1572_v37  ;;  %v1406_v3 = vadd.f32 %v1405_v8, %v1117_v51  ;;  %v1079_v41 = vpop.f32.mrb[86].mxu0  ;;  %v2281_v54 = vpop.f32.mrb[86].mxu1  ;;  %v1144_v27 = vadd.f32 %v2964_v53, %v2943_v32 }
 0x1bf   :  { %1884 = vst.msk [vmem:[%s3425_s4 + $0xa0] sm:$0xf] %vm1843_vm1, %v2164_v42  ;;  %v2165_v57 = vpack.c.bf16 %v1564_v12, %v1564_v12  ;;  %v1366_v61 = vadd.f32 %v3210_v1, %v1077_v45  ;;  %v1506_v58 = vmax.f32 %v1414_v11, 0.0  ;;  %v1080_v16 = vadd.f32 %v2964_v53, %v1079_v41  ;;  %v1081_v62 = vpop.f32.mrb[87].mxu0  ;;  %v1408_v46 = vpop.f32.mrb[87].mxu1 }
 0x1c0   :  { %1895 = vst.msk [vmem:[%s3425_s4 + $0xcc] sm:$0xf] %vm1843_vm1, %v2175_v55  ;;  %1893 = vst.msk [vmem:[%s3425_s4 + $0xc4] sm:$0xf] %vm1843_vm1, %v2173_v50  ;;  %v1504_v60 = vmax.f32 %v1406_v3, 0.0  ;;  %v1417_v2 = vadd.f32 %v2281_v54, %v1128_v49  ;;  %v1409_v5 = vadd.f32 %v1408_v46, %v1120_v34  ;;  %v1149_v55 = vadd.f32 %v2964_v53, %v2947_v36 }
 0x1c1   :  { %1885 = vst.msk [vmem:[%s3425_s4 + $0xa4] sm:$0xf] %vm1843_vm1, %v2165_v57  ;;  %v1494_v1 = vmax.f32 %v1366_v61, 0.0  ;;  %v1577_v7 = vadd.f32 %v2977_v9, %v1506_v58  ;;  %v1369_v52 = vadd.f32 %v3214_v13, %v1080_v16  ;;  %v1157_v54 = vadd.f32 %v2964_v53, %v2955_v44 }
 0x1c2   :  { %v1575_v10 = vadd.f32 %v2977_v9, %v1504_v60  ;;  %v1507_v43 = vmax.f32 %v1417_v2, 0.0  ;;  %v1505_v14 = vmax.f32 %v1409_v5, 0.0  ;;  %v1152_v16 = vadd.f32 %v2964_v53, %v2951_v40 }
 0x1c3   :  { %v1565_v17 = vadd.f32 %v2977_v9, %v1494_v1  ;;  %v2178_v56 = vpack.c.bf16 %v1577_v7, %v1577_v7  ;;  %v1495_v35 = vmax.f32 %v1369_v52, 0.0  ;;  %v1160_v52 = vadd.f32 %v2964_v53, %v2959_v48 }
 0x1c4   :  { %v2176_v63 = vpack.c.bf16 %v1575_v10, %v1575_v10  ;;  %v1578_v13 = vadd.f32 %v2977_v9, %v1507_v43  ;;  %v1576_v21 = vadd.f32 %v2977_v9, %v1505_v14  ;;  %v1084_v20 = vpop.f32.mrb[88].mxu0  ;;  %v2284_v51 = vpop.f32.mrb[88].mxu1 }
 0x1c5   :  { %v2166_v22 = vpack.c.bf16 %v1565_v17, %v1565_v17  ;;  %1898 = vst.msk [vmem:[%s3425_s4 + $0xd8] sm:$0xf] %vm1843_vm1, %v2178_v56  ;;  %v1566_v28 = vadd.f32 %v2977_v9, %v1495_v35  ;;  %v1085_v25 = vadd.f32 %v2964_v53, %v1084_v20  ;;  %v1430_v26 = vadd.f32 %v2284_v51, %v1141_v23  ;;  %v1086_v29 = vpop.f32.mrb[89].mxu0  ;;  %v1421_v24 = vpop.f32.mrb[89].mxu1 }
 0x1c6   :  { %1896 = vst.msk [vmem:[%s3425_s4 + $0xd0] sm:$0xf] %vm1843_vm1, %v2176_v63  ;;  %v2179_v39 = vpack.c.bf16 %v1578_v13, %v1578_v13  ;;  %v2177_v59 = vpack.c.bf16 %v1576_v21, %v1576_v21  ;;  %v1422_v34 = vadd.f32 %v1421_v24, %v1133_v6  ;;  %v1087_v19 = vpop.f32.mrb[90].mxu0  ;;  %v2285_v18 = vpop.f32.mrb[90].mxu1 }
 0x1c7   :  { %1886 = vst.msk [vmem:[%s3425_s4 + $0xa8] sm:$0xf] %vm1843_vm1, %v2166_v22  ;;  %v2167_v37 = vpack.c.bf16 %v1566_v28, %v1566_v28  ;;  %v1374_v4 = vadd.f32 %v3230_v30, %v1085_v25  ;;  %v1510_v47 = vmax.f32 %v1430_v26, 0.0  ;;  %v1088_v32 = vadd.f32 %v2964_v53, %v1087_v19  ;;  %v1089_v42 = vpop.f32.mrb[91].mxu0  ;;  %v1424_v12 = vpop.f32.mrb[91].mxu1 }
 0x1c8   :  { %1899 = vst.msk [vmem:[%s3425_s4 + $0xdc] sm:$0xf] %vm1843_vm1, %v2179_v39  ;;  %1897 = vst.msk [vmem:[%s3425_s4 + $0xd4] sm:$0xf] %vm1843_vm1, %v2177_v59  ;;  %v1508_v45 = vmax.f32 %v1422_v34, 0.0  ;;  %v1433_v11 = vadd.f32 %v2285_v18, %v1144_v27  ;;  %v1425_v31 = vadd.f32 %v1424_v12, %v1136_v0 }
 0x1c9   :  { %1887 = vst.msk [vmem:[%s3425_s4 + $0xac] sm:$0xf] %vm1843_vm1, %v2167_v37  ;;  %v1496_v30 = vmax.f32 %v1374_v4, 0.0  ;;  %v1581_v8 = vadd.f32 %v2977_v9, %v1510_v47  ;;  %v1377_v49 = vadd.f32 %v3239_v38, %v1088_v32 }
 0x1ca   :  { %v1579_v50 = vadd.f32 %v2977_v9, %v1508_v45  ;;  %v1511_v3 = vmax.f32 %v1433_v11, 0.0  ;;  %v1509_v41 = vmax.f32 %v1425_v31, 0.0 }
 0x1cb   :  { %v1567_v57 = vadd.f32 %v2977_v9, %v1496_v30  ;;  %v2182_v61 = vpack.c.bf16 %v1581_v8, %v1581_v8  ;;  %v1497_v58 = vmax.f32 %v1377_v49, 0.0 }
 0x1cc   :  { %v2180_v62 = vpack.c.bf16 %v1579_v50, %v1579_v50  ;;  %v1582_v38 = vadd.f32 %v2977_v9, %v1511_v3  ;;  %v1580_v46 = vadd.f32 %v2977_v9, %v1509_v41  ;;  %v1092_v36 = vpop.f32.mrb[92].mxu0  ;;  %v2288_v60 = vpop.f32.mrb[92].mxu1 }
 0x1cd   :  { %v2168_v2 = vpack.c.bf16 %v1567_v57, %v1567_v57  ;;  %1902 = vst.msk [vmem:[%s3425_s4 + $0xe8] sm:$0xf] %vm1843_vm1, %v2182_v61  ;;  %v1568_v44 = vadd.f32 %v2977_v9, %v1497_v58  ;;  %v1093_v5 = vadd.f32 %v2964_v53, %v1092_v36  ;;  %v1446_v1 = vadd.f32 %v2288_v60, %v1157_v54  ;;  %v1094_v7 = vpop.f32.mrb[93].mxu0  ;;  %v1437_v40 = vpop.f32.mrb[93].mxu1 }
 0x1ce   :  { %1900 = vst.msk [vmem:[%s3425_s4 + $0xe0] sm:$0xf] %vm1843_vm1, %v2180_v62  ;;  %v2183_v6 = vpack.c.bf16 %v1582_v38, %v1582_v38  ;;  %v2181_v10 = vpack.c.bf16 %v1580_v46, %v1580_v46  ;;  %v1438_v43 = vadd.f32 %v1437_v40, %v1149_v55  ;;  %v1095_v14 = vpop.f32.mrb[94].mxu0  ;;  %v2289_v23 = vpop.f32.mrb[94].mxu1 }
 0x1cf   :  { %1888 = vst.msk [vmem:[%s3425_s4 + $0xb0] sm:$0xf] %vm1843_vm1, %v2168_v2  ;;  %v2169_v17 = vpack.c.bf16 %v1568_v44, %v1568_v44  ;;  %v1382_v56 = vadd.f32 %v3226_v15, %v1093_v5  ;;  %v1514_v35 = vmax.f32 %v1446_v1, 0.0  ;;  %v1096_v48 = vadd.f32 %v2964_v53, %v1095_v14  ;;  %v1097_v0 = vpop.f32.mrb[95].mxu0  ;;  %v1440_v63 = vpop.f32.mrb[95].mxu1 }
 0x1d0   :  { %1903 = vst.msk [vmem:[%s3425_s4 + $0xec] sm:$0xf] %vm1843_vm1, %v2183_v6  ;;  %1901 = vst.msk [vmem:[%s3425_s4 + $0xe4] sm:$0xf] %vm1843_vm1, %v2181_v10  ;;  %v1512_v13 = vmax.f32 %v1438_v43, 0.0  ;;  %v1449_v21 = vadd.f32 %v2289_v23, %v1160_v52  ;;  %v1441_v20 = vadd.f32 %v1440_v63, %v1152_v16 }
 0x1d1   :  { %1889 = vst.msk [vmem:[%s3425_s4 + $0xb4] sm:$0xf] %vm1843_vm1, %v2169_v17  ;;  %v1498_v53 = vmax.f32 %v1382_v56, 0.0  ;;  %v1585_v15 = vadd.f32 %v2977_v9, %v1514_v35  ;;  %v1385_v51 = vadd.f32 %v3232_v33, %v1096_v48 }
 0x1d2   :  { %v1583_v22 = vadd.f32 %v2977_v9, %v1512_v13  ;;  %v1515_v28 = vmax.f32 %v1449_v21, 0.0  ;;  %v1513_v25 = vmax.f32 %v1441_v20, 0.0 }
 0x1d3   :  { %v1569_v26 = vadd.f32 %v2977_v9, %v1498_v53  ;;  %v2186_v29 = vpack.c.bf16 %v1585_v15, %v1585_v15  ;;  %v1499_v24 = vmax.f32 %v1385_v51, 0.0 }
 0x1d4   :  { %v2184_v27 = vpack.c.bf16 %v1583_v22, %v1583_v22  ;;  %v1586_v39 = vadd.f32 %v2977_v9, %v1515_v28  ;;  %v1584_v59 = vadd.f32 %v2977_v9, %v1513_v25 }
 0x1d5   :  { %v2170_v34 = vpack.c.bf16 %v1569_v26, %v1569_v26  ;;  %1906 = vst.msk [vmem:[%s3425_s4 + $0xf8] sm:$0xf] %vm1843_vm1, %v2186_v29  ;;  %v1570_v33 = vadd.f32 %v2977_v9, %v1499_v24 }
 0x1d6   :  { %1904 = vst.msk [vmem:[%s3425_s4 + $0xf0] sm:$0xf] %vm1843_vm1, %v2184_v27  ;;  %v2187_v19 = vpack.c.bf16 %v1586_v39, %v1586_v39  ;;  %v2185_v18 = vpack.c.bf16 %v1584_v59, %v1584_v59 }
 0x1d7   :  { %1890 = vst.msk [vmem:[%s3425_s4 + $0xb8] sm:$0xf] %vm1843_vm1, %v2170_v34  ;;  %v2171_v37 = vpack.c.bf16 %v1570_v33, %v1570_v33 }
 0x1d8   :  { %1907 = vst.msk [vmem:[%s3425_s4 + $0xfc] sm:$0xf] %vm1843_vm1, %v2187_v19  ;;  %1905 = vst.msk [vmem:[%s3425_s4 + $0xf4] sm:$0xf] %vm1843_vm1, %v2185_v18 }
 0x1d9   :  { %1891 = vst.msk [vmem:[%s3425_s4 + $0xbc] sm:$0xf] %vm1843_vm1, %v2171_v37 }

// kernel: decoder_forward.10
= control target key start
LH: loop header
LB: loop body
LE: loop exit
PB: predicated region body
PF: predicated region fallthrough
CT: control target
= control target key end

     0   :  { %s7017_s15 = smov 0   ;;  %s8768_s0 = inlined_call_operand.vmem [shape: bf16[2048,576], index: 0, kind: input, shape index: {}]   ;;  %s8769_s1 = inlined_call_operand.vmem [shape: bf16[576,8], index: 1, kind: input, shape index: {}]   ;;  %s8770_s2 = inlined_call_operand.vmem [shape: f32[1,8], index: 2, kind: input, shape index: {}]   ;;  %s8771_s3 = inlined_call_operand.vmem [shape: f32[1,8], index: 3, kind: input, shape index: {}]   ;;  %s8772_s4 = inlined_call_operand.vmem [shape: bf16[2048,8], index: 4, kind: output, shape index: {}]  }
   0x1 LB: > { %s5272_s16 = sadd.s32 4294967295, %s6989_s15   ;;  %p5276_p0 = scmp.ge.s32.totalorder %s6989_s15, 1  ;;  %s6989_s15 = sphi %s7017_s15, %s14_s15  }
   0x2   : > { %p164_p1 = scmp.lt.s32.totalorder %s6989_s15, 3 }
   0x4   : > { %p165_p2 = pnand %p5276_p0, %p164_p1 }
   0x6   : > { %168 = sbr.rel (%p165_p2) target bundleno = 935 (0x3a7), region = 36 }
   0xd   : > { %v6495_v0 = vld [vmem:[%s8769_s1] sm:$0xff]   ;;  %v6991_v1 = vmov 0   ;;  %s5277_s19 = sshll.u32 %s5272_s16, 7  ;;  %v6496_v2 = vld [vmem:[%s8769_s1 + $0x8] sm:$0xff]   ;;  %v6497_v3 = vld [vmem:[%s8769_s1 + $0x10] sm:$0xff]   ;;  %vm2484_vm0 = vcmask 523264  }
   0xe   : > { %2677 = vmatprep.subr.bf16.mxu0 %v6991_v1  ;;  %6165 = vmatprep.subr.bf16.mxu1 %v6991_v1  ;;  %p192_p3 = scmp.lt.s32.totalorder %s5277_s19, 255  ;;  %v6498_v4 = vld [vmem:[%s8769_s1 + $0x18] sm:$0xff]   ;;  %v6499_v5 = vld [vmem:[%s8769_s1 + $0x20] sm:$0xff]   ;;  %v6500_v7 = vld [vmem:[%s8769_s1 + $0x28] sm:$0xff]   ;;  %vm5087_vm1 = vcmask 60416  }
   0xf   : > { %2678 = vmatpush1.bf16.msra.mxu0 %v6495_v0  ;;  %6181 = vmatpush1.bf16.msra.mxu1 %v6495_v0  ;;  %v6501_v9 = vld [vmem:[%s8769_s1 + $0x30] sm:$0xff]   ;;  %v6502_v10 = vld [vmem:[%s8769_s1 + $0x38] sm:$0xff]   ;;  %v6503_v11 = vld [vmem:[%s8769_s1 + $0x40] sm:$0xff]  }
  0x10   : > { %2679 = vmatprep.subr.bf16.mxu0 %v6991_v1  ;;  %6166 = vmatprep.subr.bf16.mxu1 %v6991_v1  ;;  %s8946_s19 = smov (!%p192_p3, %s5277_s19), 255  ;;  %v6504_v12 = vld [vmem:[%s8769_s1 + $0x48] sm:$0xff]   ;;  %v6505_v13 = vld [vmem:[%s8769_s1 + $0x50] sm:$0xff]   ;;  %v6506_v14 = vld [vmem:[%s8769_s1 + $0x58] sm:$0xff]  }
  0x11   : > { %s6485_s26 = smul.u32 20, %s8946_s19  ;;  %v6507_v15 = vld [vmem:[%s8769_s1 + $0x60] sm:$0xff]   ;;  %v6508_v16 = vld [vmem:[%s8769_s1 + $0x68] sm:$0xff]   ;;  %v6509_v17 = vld [vmem:[%s8769_s1 + $0x70] sm:$0xff]   ;;  %s5280_s28 = sshll.u32 %s8946_s19, 2 }
  0x12   : > { %v6510_v18 = vld [vmem:[%s8769_s1 + $0x78] sm:$0xff]   ;;  %v6518_v19 = vld [vmem:[%s8769_s1 + $0x100] sm:$0xff]   ;;  %v6603_v25 = vld [vmem:[%s8769_s1 + $0x108] sm:$0xff]   ;;  %s7966_s6 = scalar_lea.vmem %s8772_s4, %s5280_s28 }
  0x13   : > { %2680 = vmatpush1.bf16.msra.mxu0 %v6496_v2  ;;  %6182 = vmatpush1.bf16.msra.mxu1 %v6496_v2  ;;  %s7054_s5 = scalar_lea.vmem %s8768_s0, %s6485_s26  ;;  %v6517_v22 = vld [vmem:[%s8769_s1 + $0x80] sm:$0xff]   ;;  %v6525_v26 = vld [vmem:[%s8769_s1 + $0x88] sm:$0xff]   ;;  %v6532_v31 = vld [vmem:[%s8769_s1 + $0x90] sm:$0xff]  }
  0x14   : > { %2681 = vmatprep.subr.bf16.mxu0 %v6991_v1  ;;  %6167 = vmatprep.subr.bf16.mxu1 %v6991_v1  ;;  %v6513_v6 = vld [vmem:[%s7054_s5 + $0x4] ss:$20 sps:$4 sm:$0xff]   ;;  %v6511_v20 = vld [vmem:[%s7054_s5] ss:$20 sps:$4 sm:$0xff]   ;;  %v6523_v27 = vld [vmem:[%s7054_s5 + $0x28] ss:$20 sps:$4 sm:$0xff]  }
  0x15   : > { %v6516_v8 = vld [vmem:[%s7054_s5 + $0x284] ss:$20 sps:$4 sm:$0xff]   ;;  %2709 = vmatprep.mubr.bf16.mxu0 %v6513_v6  ;;  %v6514_v21 = vld [vmem:[%s7054_s5 + $0x280] ss:$20 sps:$4 sm:$0xff]   ;;  %v6524_v28 = vld [vmem:[%s7054_s5 + $0x2a8] ss:$20 sps:$4 sm:$0xff]  }
  0x16   : > { %2837 = vmatprep.mubr.bf16.mxu1 %v6516_v8  ;;  %v6519_v23 = vld [vmem:[%s7054_s5 + $0x2c] ss:$20 sps:$4 sm:$0xff]   ;;  %v6526_v29 = vld [vmem:[%s7054_s5 + $0x54] ss:$20 sps:$4 sm:$0xff]   ;;  %v6539_v32 = vld [vmem:[%s8769_s1 + $0x98] sm:$0xff]  }
  0x17   : > { %2682 = vmatpush1.bf16.msra.mxu0 %v6497_v3  ;;  %6183 = vmatpush1.bf16.msra.mxu1 %v6497_v3  ;;  %v6521_v24 = vld [vmem:[%s7054_s5 + $0x2ac] ss:$20 sps:$4 sm:$0xff]   ;;  %v6528_v30 = vld [vmem:[%s7054_s5 + $0x2d4] ss:$20 sps:$4 sm:$0xff]   ;;  %v6530_v33 = vld [vmem:[%s7054_s5 + $0x50] ss:$20 sps:$4 sm:$0xff]  }
  0x18   : > { %2683 = vmatprep.subr.bf16.mxu0 %v6991_v1  ;;  %6168 = vmatprep.subr.bf16.mxu1 %v6991_v1  ;;  %v6531_v34 = vld [vmem:[%s7054_s5 + $0x2d0] ss:$20 sps:$4 sm:$0xff]   ;;  %v6553_v38 = vld [vmem:[%s8769_s1 + $0xa8] sm:$0xff]   ;;  %v6567_v44 = vld [vmem:[%s8769_s1 + $0xb8] sm:$0xff]  }
  0x19   : > { %v6533_v35 = vld [vmem:[%s7054_s5 + $0x7c] ss:$20 sps:$4 sm:$0xff]   ;;  %v6546_v37 = vld [vmem:[%s8769_s1 + $0xa0] sm:$0xff]   ;;  %v6537_v39 = vld [vmem:[%s7054_s5 + $0x78] ss:$20 sps:$4 sm:$0xff]  }
  0x1a   : > { %v6535_v36 = vld [vmem:[%s7054_s5 + $0x2fc] ss:$20 sps:$4 sm:$0xff]   ;;  %v6538_v40 = vld [vmem:[%s7054_s5 + $0x2f8] ss:$20 sps:$4 sm:$0xff]   ;;  %v6544_v45 = vld [vmem:[%s7054_s5 + $0xa0] ss:$20 sps:$4 sm:$0xff]  }
  0x1b   : > { %2684 = vmatpush1.bf16.msra.mxu0 %v6498_v4  ;;  %6184 = vmatpush1.bf16.msra.mxu1 %v6498_v4  ;;  %v6540_v41 = vld [vmem:[%s7054_s5 + $0xa4] ss:$20 sps:$4 sm:$0xff]   ;;  %v6560_v43 = vld [vmem:[%s8769_s1 + $0xb0] sm:$0xff]   ;;  %v6547_v47 = vld [vmem:[%s7054_s5 + $0xcc] ss:$20 sps:$4 sm:$0xff]  }
  0x1c   : > { %2685 = vmatprep.subr.bf16.mxu0 %v6991_v1  ;;  %6169 = vmatprep.subr.bf16.mxu1 %v6991_v1  ;;  %v6542_v42 = vld [vmem:[%s7054_s5 + $0x324] ss:$20 sps:$4 sm:$0xff]   ;;  %v6545_v46 = vld [vmem:[%s7054_s5 + $0x320] ss:$20 sps:$4 sm:$0xff]   ;;  %v6581_v50 = vld [vmem:[%s8769_s1 + $0xc8] sm:$0xff]  }
  0x1d   : > { %v6549_v48 = vld [vmem:[%s7054_s5 + $0x34c] ss:$20 sps:$4 sm:$0xff]   ;;  %v6551_v51 = vld [vmem:[%s7054_s5 + $0xc8] ss:$20 sps:$4 sm:$0xff]   ;;  %v6588_v55 = vld [vmem:[%s8769_s1 + $0xd0] sm:$0xff]  }
  0x1e   : > { %v6574_v49 = vld [vmem:[%s8769_s1 + $0xc0] sm:$0xff]   ;;  %v6552_v52 = vld [vmem:[%s7054_s5 + $0x348] ss:$20 sps:$4 sm:$0xff]   ;;  %v6565_v63 = vld [vmem:[%s7054_s5 + $0x118] ss:$20 sps:$4 sm:$0xff]  }
  0x1f   : > { %2686 = vmatpush1.bf16.msra.mxu0 %v6499_v5  ;;  %6185 = vmatpush1.bf16.msra.mxu1 %v6499_v5  ;;  %v6554_v53 = vld [vmem:[%s7054_s5 + $0xf4] ss:$20 sps:$4 sm:$0xff]   ;;  %v6595_v56 = vld [vmem:[%s8769_s1 + $0xd8] sm:$0xff]   ;;  %v6558_v57 = vld [vmem:[%s7054_s5 + $0xf0] ss:$20 sps:$4 sm:$0xff]  }
  0x20   : > { %2687 = vmatprep.subr.bf16.mxu0 %v6991_v1  ;;  %6170 = vmatprep.subr.bf16.mxu1 %v6991_v1  ;;  %v6556_v54 = vld [vmem:[%s7054_s5 + $0x374] ss:$20 sps:$4 sm:$0xff]   ;;  %v6559_v58 = vld [vmem:[%s7054_s5 + $0x370] ss:$20 sps:$4 sm:$0xff]   ;;  %v6566_v0 = vld [vmem:[%s7054_s5 + $0x398] ss:$20 sps:$4 sm:$0xff]  }
  0x21   : > { %v6561_v59 = vld [vmem:[%s7054_s5 + $0x11c] ss:$20 sps:$4 sm:$0xff]   ;;  %v6602_v61 = vld [vmem:[%s8769_s1 + $0xe0] sm:$0xff]   ;;  %v6610_v62 = vld [vmem:[%s8769_s1 + $0xe8] sm:$0xff]  }
  0x22   : > { %v6563_v60 = vld [vmem:[%s7054_s5 + $0x39c] ss:$20 sps:$4 sm:$0xff]   ;;  %v6568_v2 = vld [vmem:[%s7054_s5 + $0x144] ss:$20 sps:$4 sm:$0xff]   ;;  %v6572_v6 = vld [vmem:[%s7054_s5 + $0x140] ss:$20 sps:$4 sm:$0xff]  }
  0x23   : > { %2688 = vmatpush1.bf16.msra.mxu0 %v6500_v7  ;;  %6186 = vmatpush1.bf16.msra.mxu1 %v6500_v7  ;;  %v6570_v3 = vld [vmem:[%s7054_s5 + $0x3c4] ss:$20 sps:$4 sm:$0xff]   ;;  %v6617_v4 = vld [vmem:[%s8769_s1 + $0xf0] sm:$0xff]   ;;  %v6575_v8 = vld [vmem:[%s7054_s5 + $0x16c] ss:$20 sps:$4 sm:$0xff]  }
  0x24   : > { %2689 = vmatprep.subr.bf16.mxu0 %v6991_v1  ;;  %6171 = vmatprep.subr.bf16.mxu1 %v6991_v1  ;;  %v6624_v5 = vld [vmem:[%s8769_s1 + $0xf8] sm:$0xff]   ;;  %v6573_v7 = vld [vmem:[%s7054_s5 + $0x3c0] ss:$20 sps:$4 sm:$0xff]  }
  0x27   : > { %2690 = vmatpush1.bf16.msra.mxu0 %v6501_v9  ;;  %6187 = vmatpush1.bf16.msra.mxu1 %v6501_v9  ;;  %v6577_v9 = vld [vmem:[%s7054_s5 + $0x3ec] ss:$20 sps:$4 sm:$0xff]  }
  0x28   : > { %2691 = vmatprep.subr.bf16.mxu0 %v6991_v1  ;;  %6172 = vmatprep.subr.bf16.mxu1 %v6991_v1 }
  0x2b   : > { %2692 = vmatpush1.bf16.msra.mxu0 %v6502_v10  ;;  %6188 = vmatpush1.bf16.msra.mxu1 %v6502_v10  ;;  %v6679_v10 = vld [vmem:[%s8769_s1 + $0x110] sm:$0xff]  }
  0x2c   : > { %2693 = vmatprep.subr.bf16.mxu0 %v6991_v1  ;;  %6173 = vmatprep.subr.bf16.mxu1 %v6991_v1 }
  0x2f   : > { %2694 = vmatpush1.bf16.msra.mxu0 %v6503_v11  ;;  %6189 = vmatpush1.bf16.msra.mxu1 %v6503_v11  ;;  %v6579_v11 = vld [vmem:[%s7054_s5 + $0x168] ss:$20 sps:$4 sm:$0xff]  }
  0x30   : > { %2695 = vmatprep.subr.bf16.mxu0 %v6991_v1  ;;  %6174 = vmatprep.subr.bf16.mxu1 %v6991_v1 }
  0x33   : > { %2696 = vmatpush1.bf16.msra.mxu0 %v6504_v12  ;;  %6190 = vmatpush1.bf16.msra.mxu1 %v6504_v12  ;;  %v6580_v12 = vld [vmem:[%s7054_s5 + $0x3e8] ss:$20 sps:$4 sm:$0xff]  }
  0x34   : > { %2697 = vmatprep.subr.bf16.mxu0 %v6991_v1  ;;  %6175 = vmatprep.subr.bf16.mxu1 %v6991_v1 }
  0x37   : > { %2698 = vmatpush1.bf16.msra.mxu0 %v6505_v13  ;;  %6191 = vmatpush1.bf16.msra.mxu1 %v6505_v13  ;;  %v6582_v13 = vld [vmem:[%s7054_s5 + $0x194] ss:$20 sps:$4 sm:$0xff]  }
  0x38   : > { %2699 = vmatprep.subr.bf16.mxu0 %v6991_v1  ;;  %6176 = vmatprep.subr.bf16.mxu1 %v6991_v1 }
  0x3b   : > { %2700 = vmatpush1.bf16.msra.mxu0 %v6506_v14  ;;  %6192 = vmatpush1.bf16.msra.mxu1 %v6506_v14  ;;  %v6586_v14 = vld [vmem:[%s7054_s5 + $0x190] ss:$20 sps:$4 sm:$0xff]  }
  0x3c   : > { %2701 = vmatprep.subr.bf16.mxu0 %v6991_v1  ;;  %6177 = vmatprep.subr.bf16.mxu1 %v6991_v1 }
  0x3f   : > { %2702 = vmatpush1.bf16.msra.mxu0 %v6507_v15  ;;  %6193 = vmatpush1.bf16.msra.mxu1 %v6507_v15  ;;  %v6587_v15 = vld [vmem:[%s7054_s5 + $0x410] ss:$20 sps:$4 sm:$0xff]  }
  0x40   : > { %2703 = vmatprep.subr.bf16.mxu0 %v6991_v1  ;;  %6178 = vmatprep.subr.bf16.mxu1 %v6991_v1 }
  0x43   : > { %2704 = vmatpush1.bf16.msra.mxu0 %v6508_v16  ;;  %6194 = vmatpush1.bf16.msra.mxu1 %v6508_v16  ;;  %v6589_v16 = vld [vmem:[%s7054_s5 + $0x1bc] ss:$20 sps:$4 sm:$0xff]  }
  0x44   : > { %2705 = vmatprep.subr.bf16.mxu0 %v6991_v1  ;;  %6179 = vmatprep.subr.bf16.mxu1 %v6991_v1 }
  0x47   : > { %2706 = vmatpush1.bf16.msra.mxu0 %v6509_v17  ;;  %6195 = vmatpush1.bf16.msra.mxu1 %v6509_v17  ;;  %v6591_v17 = vld [vmem:[%s7054_s5 + $0x43c] ss:$20 sps:$4 sm:$0xff]  }
  0x48   : > { %2707 = vmatprep.subr.bf16.mxu0 %v6991_v1  ;;  %6180 = vmatprep.subr.bf16.mxu1 %v6991_v1 }
  0x4b   : > { %2708 = vmatpush1.bf16.msra.mxu0 %v6510_v18  ;;  %6196 = vmatpush1.bf16.msra.mxu1 %v6510_v18  ;;  %v6593_v18 = vld [vmem:[%s7054_s5 + $0x1b8] ss:$20 sps:$4 sm:$0xff]  }
  0x4c   : > { %3222 = vmatprep.subr.bf16.mxu0 %v6991_v1  ;;  %6029 = vmatprep.subr.bf16.mxu1 %v6518_v19 }
  0x4e   : > { %2710 = vmatmul.mubr.bf16.vlgmr.msra.gmra.mrb[0].mxu0 %v6511_v20  ;;  %2838 = vmatmul.mubr.bf16.vlgmr.msra.gmra.mrb[0].mxu1 %v6514_v21  ;;  %v6596_v20 = vld [vmem:[%s7054_s5 + $0x1e4] ss:$20 sps:$4 sm:$0xff]  }
  0x4f   : > { %3223 = vmatpush1.bf16.msra.mxu0 %v6517_v22  ;;  %6030 = vmatpush3.bf16.msra.mxu1 %v6518_v19  ;;  %v6594_v19 = vld [vmem:[%s7054_s5 + $0x438] ss:$20 sps:$4 sm:$0xff]   ;;  %v6600_v22 = vld [vmem:[%s7054_s5 + $0x1e0] ss:$20 sps:$4 sm:$0xff]  }
  0x50   : > { %2717 = vmatprep.mubr.bf16.mxu0 %v6519_v23  ;;  %2845 = vmatprep.mubr.bf16.mxu1 %v6521_v24  ;;  %v6598_v21 = vld [vmem:[%s7054_s5 + $0x464] ss:$20 sps:$4 sm:$0xff]   ;;  %v6601_v23 = vld [vmem:[%s7054_s5 + $0x460] ss:$20 sps:$4 sm:$0xff]  }
  0x51   : > { %3224 = vmatprep.subr.bf16.mxu0 %v6991_v1  ;;  %6031 = vmatprep.subr.bf16.mxu1 %v6603_v25  ;;  %v6604_v24 = vld [vmem:[%s7054_s5 + $0x20c] ss:$20 sps:$4 sm:$0xff]  }
  0x53   : > { %3225 = vmatpush1.bf16.msra.mxu0 %v6525_v26  ;;  %6032 = vmatpush3.bf16.msra.mxu1 %v6603_v25  ;;  %v6606_v25 = vld [vmem:[%s7054_s5 + $0x48c] ss:$20 sps:$4 sm:$0xff]   ;;  %v6608_v26 = vld [vmem:[%s7054_s5 + $0x208] ss:$20 sps:$4 sm:$0xff]  }
  0x54   : > { %3226 = vmatprep.subr.bf16.mxu0 %v6991_v1  ;;  %6033 = vmatprep.subr.bf16.mxu1 %v6679_v10 }
  0x56   : > { %2718 = vmatmul.mubr.bf16.gmra.mrb[4].mxu0 %v6523_v27  ;;  %2846 = vmatmul.mubr.bf16.gmra.mrb[4].mxu1 %v6524_v28  ;;  %v6609_v27 = vld [vmem:[%s7054_s5 + $0x488] ss:$20 sps:$4 sm:$0xff]  }
  0x57   : > { %2725 = vmatprep.mubr.bf16.mxu0 %v6526_v29  ;;  %2853 = vmatprep.mubr.bf16.mxu1 %v6528_v30  ;;  %v6611_v28 = vld [vmem:[%s7054_s5 + $0x234] ss:$20 sps:$4 sm:$0xff]   ;;  %v6615_v30 = vld [vmem:[%s7054_s5 + $0x230] ss:$20 sps:$4 sm:$0xff]  }
  0x58   : > { %3227 = vmatpush1.bf16.msra.mxu0 %v6532_v31  ;;  %6034 = vmatpush3.bf16.msra.mxu1 %v6679_v10  ;;  %v6613_v29 = vld [vmem:[%s7054_s5 + $0x4b4] ss:$20 sps:$4 sm:$0xff]   ;;  %v6616_v31 = vld [vmem:[%s7054_s5 + $0x4b0] ss:$20 sps:$4 sm:$0xff]   ;;  %v6680_v10 = vld [vmem:[%s7054_s5 + $0x66c] ss:$20 sps:$4 sm:$0xff]  }
  0x59   : > { %3228 = vmatprep.subr.bf16.mxu0 %v6991_v1 }
  0x5c   : > { %3229 = vmatpush1.bf16.msra.mxu0 %v6539_v32  ;;  %v6618_v32 = vld [vmem:[%s7054_s5 + $0x25c] ss:$20 sps:$4 sm:$0xff]  }
  0x5d   : > { %3230 = vmatprep.subr.bf16.mxu0 %v6991_v1 }
  0x5e   : > { %2726 = vmatmul.mubr.bf16.gmra.mrb[8].mxu0 %v6530_v33  ;;  %2854 = vmatmul.mubr.bf16.gmra.mrb[8].mxu1 %v6531_v34  ;;  %v6620_v33 = vld [vmem:[%s7054_s5 + $0x4dc] ss:$20 sps:$4 sm:$0xff]   ;;  %v6622_v34 = vld [vmem:[%s7054_s5 + $0x258] ss:$20 sps:$4 sm:$0xff]  }
  0x5f   : > { %2733 = vmatprep.mubr.bf16.mxu0 %v6533_v35  ;;  %2861 = vmatprep.mubr.bf16.mxu1 %v6535_v36  ;;  %v6623_v35 = vld [vmem:[%s7054_s5 + $0x4d8] ss:$20 sps:$4 sm:$0xff]  }
  0x60   : > { %3231 = vmatpush1.bf16.msra.mxu0 %v6546_v37  ;;  %v6625_v36 = vld [vmem:[%s7054_s5 + $0x504] ss:$20 sps:$4 sm:$0xff]   ;;  %v6629_v37 = vld [vmem:[%s7054_s5 + $0xc] ss:$20 sps:$4 sm:$0xff]  }
  0x61   : > { %3232 = vmatprep.subr.bf16.mxu0 %v6991_v1 }
  0x64   : > { %3233 = vmatpush1.bf16.msra.mxu0 %v6553_v38  ;;  %v6627_v38 = vld [vmem:[%s7054_s5 + $0x8] ss:$20 sps:$4 sm:$0xff]  }
  0x65   : > { %3234 = vmatprep.subr.bf16.mxu0 %v6991_v1 }
  0x66   : > { %2734 = vmatmul.mubr.bf16.gmra.mrb[12].mxu0 %v6537_v39  ;;  %2862 = vmatmul.mubr.bf16.gmra.mrb[12].mxu1 %v6538_v40  ;;  %v6630_v39 = vld [vmem:[%s7054_s5 + $0x500] ss:$20 sps:$4 sm:$0xff]  }
  0x67   : > { %2741 = vmatprep.mubr.bf16.mxu0 %v6540_v41  ;;  %2869 = vmatprep.mubr.bf16.mxu1 %v6542_v42  ;;  %v6631_v40 = vld [vmem:[%s7054_s5 + $0x52c] ss:$20 sps:$4 sm:$0xff]   ;;  %v6633_v41 = vld [vmem:[%s7054_s5 + $0x34] ss:$20 sps:$4 sm:$0xff]  }
  0x68   : > { %3235 = vmatpush1.bf16.msra.mxu0 %v6560_v43  ;;  %v6635_v42 = vld [vmem:[%s7054_s5 + $0x528] ss:$20 sps:$4 sm:$0xff]   ;;  %v6636_v43 = vld [vmem:[%s7054_s5 + $0x30] ss:$20 sps:$4 sm:$0xff]  }
  0x69   : > { %3236 = vmatprep.subr.bf16.mxu0 %v6991_v1 }
  0x6c   : > { %3237 = vmatpush1.bf16.msra.mxu0 %v6567_v44  ;;  %v6637_v44 = vld [vmem:[%s7054_s5 + $0x554] ss:$20 sps:$4 sm:$0xff]  }
  0x6d   : > { %3238 = vmatprep.subr.bf16.mxu0 %v6991_v1 }
  0x6e   : > { %2742 = vmatmul.mubr.bf16.gmra.mrb[16].mxu0 %v6544_v45  ;;  %2870 = vmatmul.mubr.bf16.gmra.mrb[16].mxu1 %v6545_v46  ;;  %v6639_v45 = vld [vmem:[%s7054_s5 + $0x5c] ss:$20 sps:$4 sm:$0xff]  }
  0x6f   : > { %2749 = vmatprep.mubr.bf16.mxu0 %v6547_v47  ;;  %2877 = vmatprep.mubr.bf16.mxu1 %v6549_v48  ;;  %v6641_v46 = vld [vmem:[%s7054_s5 + $0x550] ss:$20 sps:$4 sm:$0xff]   ;;  %v6642_v47 = vld [vmem:[%s7054_s5 + $0x58] ss:$20 sps:$4 sm:$0xff]  }
  0x70   : > { %3239 = vmatpush1.bf16.msra.mxu0 %v6574_v49  ;;  %v6643_v48 = vld [vmem:[%s7054_s5 + $0x57c] ss:$20 sps:$4 sm:$0xff]   ;;  %v6645_v49 = vld [vmem:[%s7054_s5 + $0x84] ss:$20 sps:$4 sm:$0xff]  }
  0x71   : > { %3240 = vmatprep.subr.bf16.mxu0 %v6991_v1 }
  0x74   : > { %3241 = vmatpush1.bf16.msra.mxu0 %v6581_v50  ;;  %v6647_v50 = vld [vmem:[%s7054_s5 + $0x578] ss:$20 sps:$4 sm:$0xff]  }
  0x75   : > { %3242 = vmatprep.subr.bf16.mxu0 %v6991_v1 }
  0x76   : > { %2750 = vmatmul.mubr.bf16.gmra.mrb[20].mxu0 %v6551_v51  ;;  %2878 = vmatmul.mubr.bf16.gmra.mrb[20].mxu1 %v6552_v52  ;;  %v6648_v51 = vld [vmem:[%s7054_s5 + $0x80] ss:$20 sps:$4 sm:$0xff]   ;;  %v6649_v52 = vld [vmem:[%s7054_s5 + $0x5a4] ss:$20 sps:$4 sm:$0xff]  }
  0x77   : > { %2757 = vmatprep.mubr.bf16.mxu0 %v6554_v53  ;;  %2885 = vmatprep.mubr.bf16.mxu1 %v6556_v54  ;;  %v6651_v53 = vld [vmem:[%s7054_s5 + $0xac] ss:$20 sps:$4 sm:$0xff]  }
  0x78   : > { %3243 = vmatpush1.bf16.msra.mxu0 %v6588_v55  ;;  %v6653_v54 = vld [vmem:[%s7054_s5 + $0x5a0] ss:$20 sps:$4 sm:$0xff]   ;;  %v6654_v55 = vld [vmem:[%s7054_s5 + $0xa8] ss:$20 sps:$4 sm:$0xff]  }
  0x79   : > { %3244 = vmatprep.subr.bf16.mxu0 %v6991_v1 }
  0x7c   : > { %3245 = vmatpush1.bf16.msra.mxu0 %v6595_v56  ;;  %v6655_v56 = vld [vmem:[%s7054_s5 + $0x5cc] ss:$20 sps:$4 sm:$0xff]  }
  0x7d   : > { %3246 = vmatprep.subr.bf16.mxu0 %v6991_v1 }
  0x7e   : > { %2758 = vmatmul.mubr.bf16.gmra.mrb[24].mxu0 %v6558_v57  ;;  %2886 = vmatmul.mubr.bf16.gmra.mrb[24].mxu1 %v6559_v58  ;;  %v6657_v57 = vld [vmem:[%s7054_s5 + $0xd4] ss:$20 sps:$4 sm:$0xff]   ;;  %v6752_v58 = vld [vmem:[%s8769_s1 + $0x118] sm:$0xff]  }
  0x7f   : > { %2765 = vmatprep.mubr.bf16.mxu0 %v6561_v59  ;;  %2893 = vmatprep.mubr.bf16.mxu1 %v6563_v60  ;;  %v6659_v59 = vld [vmem:[%s7054_s5 + $0x5c8] ss:$20 sps:$4 sm:$0xff]   ;;  %v6660_v60 = vld [vmem:[%s7054_s5 + $0xd0] ss:$20 sps:$4 sm:$0xff]  }
  0x80   : > { %3247 = vmatpush1.bf16.msra.mxu0 %v6602_v61  ;;  %6035 = vmatprep.subr.bf16.mxu1 %v6752_v58  ;;  %v6661_v61 = vld [vmem:[%s7054_s5 + $0x5f4] ss:$20 sps:$4 sm:$0xff]  }
  0x81   : > { %3248 = vmatprep.subr.bf16.mxu0 %v6991_v1  ;;  %6036 = vmatpush3.bf16.msra.mxu1 %v6752_v58 }
  0x84   : > { %3249 = vmatpush1.bf16.msra.mxu0 %v6610_v62  ;;  %v6663_v62 = vld [vmem:[%s7054_s5 + $0xfc] ss:$20 sps:$4 sm:$0xff]  }
  0x85   : > { %3250 = vmatprep.subr.bf16.mxu0 %v6991_v1 }
  0x86   : > { %2766 = vmatmul.mubr.bf16.gmra.mrb[28].mxu0 %v6565_v63  ;;  %2894 = vmatmul.mubr.bf16.gmra.mrb[28].mxu1 %v6566_v0  ;;  %v6665_v63 = vld [vmem:[%s7054_s5 + $0x5f0] ss:$20 sps:$4 sm:$0xff]   ;;  %v6666_v0 = vld [vmem:[%s7054_s5 + $0xf8] ss:$20 sps:$4 sm:$0xff]  }
  0x87   : > { %2773 = vmatprep.mubr.bf16.mxu0 %v6568_v2  ;;  %2901 = vmatprep.mubr.bf16.mxu1 %v6570_v3  ;;  %v6667_v2 = vld [vmem:[%s7054_s5 + $0x61c] ss:$20 sps:$4 sm:$0xff]   ;;  %v6669_v3 = vld [vmem:[%s7054_s5 + $0x124] ss:$20 sps:$4 sm:$0xff]  }
  0x88   : > { %3251 = vmatpush1.bf16.msra.mxu0 %v6617_v4  ;;  %v6671_v4 = vld [vmem:[%s7054_s5 + $0x618] ss:$20 sps:$4 sm:$0xff]  }
  0x89   : > { %3252 = vmatprep.subr.bf16.mxu0 %v6991_v1  ;;  %v6584_v1 = vld [vmem:[%s7054_s5 + $0x414] ss:$20 sps:$4 sm:$0xff]  }
  0x8c   : > { %3253 = vmatpush1.bf16.msra.mxu0 %v6624_v5  ;;  %v6672_v5 = vld [vmem:[%s7054_s5 + $0x120] ss:$20 sps:$4 sm:$0xff]  }
  0x8e   : > { %2774 = vmatmul.mubr.bf16.gmra.mrb[32].mxu0 %v6572_v6  ;;  %2902 = vmatmul.mubr.bf16.gmra.mrb[32].mxu1 %v6573_v7  ;;  %v6673_v6 = vld [vmem:[%s7054_s5 + $0x644] ss:$20 sps:$4 sm:$0xff]   ;;  %v6675_v7 = vld [vmem:[%s7054_s5 + $0x14c] ss:$20 sps:$4 sm:$0xff]  }
  0x8f   : > { %2781 = vmatprep.mubr.bf16.mxu0 %v6575_v8  ;;  %2909 = vmatprep.mubr.bf16.mxu1 %v6577_v9  ;;  %v6677_v8 = vld [vmem:[%s7054_s5 + $0x640] ss:$20 sps:$4 sm:$0xff]   ;;  %v6678_v9 = vld [vmem:[%s7054_s5 + $0x148] ss:$20 sps:$4 sm:$0xff]  }
  0x96   : > { %2782 = vmatmul.mubr.bf16.gmra.mrb[36].mxu0 %v6579_v11  ;;  %2910 = vmatmul.mubr.bf16.gmra.mrb[36].mxu1 %v6580_v12  ;;  %v6682_v11 = vld [vmem:[%s7054_s5 + $0x174] ss:$20 sps:$4 sm:$0xff]  }
  0x97   : > { %2789 = vmatprep.mubr.bf16.mxu0 %v6582_v13  ;;  %2917 = vmatprep.mubr.bf16.mxu1 %v6584_v1  ;;  %v6684_v12 = vld [vmem:[%s7054_s5 + $0x668] ss:$20 sps:$4 sm:$0xff]   ;;  %v6685_v13 = vld [vmem:[%s7054_s5 + $0x170] ss:$20 sps:$4 sm:$0xff]  }
  0x98   : > { %v6686_v1 = vld [vmem:[%s7054_s5 + $0x694] ss:$20 sps:$4 sm:$0xff]  }
  0x9e   : > { %2790 = vmatmul.mubr.bf16.gmra.mrb[40].mxu0 %v6586_v14  ;;  %2918 = vmatmul.mubr.bf16.gmra.mrb[40].mxu1 %v6587_v15  ;;  %v6688_v14 = vld [vmem:[%s7054_s5 + $0x19c] ss:$20 sps:$4 sm:$0xff]  }
  0x9f   : > { %2797 = vmatprep.mubr.bf16.mxu0 %v6589_v16  ;;  %2925 = vmatprep.mubr.bf16.mxu1 %v6591_v17  ;;  %v6690_v15 = vld [vmem:[%s7054_s5 + $0x690] ss:$20 sps:$4 sm:$0xff]   ;;  %v6691_v16 = vld [vmem:[%s7054_s5 + $0x198] ss:$20 sps:$4 sm:$0xff]  }
  0xa0   : > { %v6692_v17 = vld [vmem:[%s7054_s5 + $0x6bc] ss:$20 sps:$4 sm:$0xff]  }
  0xa6   : > { %2798 = vmatmul.mubr.bf16.gmra.mrb[44].mxu0 %v6593_v18  ;;  %2926 = vmatmul.mubr.bf16.gmra.mrb[44].mxu1 %v6594_v19  ;;  %v6694_v18 = vld [vmem:[%s7054_s5 + $0x1c4] ss:$20 sps:$4 sm:$0xff]  }
  0xa7   : > { %2805 = vmatprep.mubr.bf16.mxu0 %v6596_v20  ;;  %2933 = vmatprep.mubr.bf16.mxu1 %v6598_v21  ;;  %v6696_v21 = vld [vmem:[%s7054_s5 + $0x6b8] ss:$20 sps:$4 sm:$0xff]  }
  0xae   : > { %2806 = vmatmul.mubr.bf16.gmra.mrb[48].mxu0 %v6600_v22  ;;  %2934 = vmatmul.mubr.bf16.gmra.mrb[48].mxu1 %v6601_v23  ;;  %v6697_v22 = vld [vmem:[%s7054_s5 + $0x1c0] ss:$20 sps:$4 sm:$0xff]  }
  0xaf   : > { %2813 = vmatprep.mubr.bf16.mxu0 %v6604_v24  ;;  %2941 = vmatprep.mubr.bf16.mxu1 %v6606_v25  ;;  %v6698_v24 = vld [vmem:[%s7054_s5 + $0x6e4] ss:$20 sps:$4 sm:$0xff]   ;;  %v6700_v25 = vld [vmem:[%s7054_s5 + $0x1ec] ss:$20 sps:$4 sm:$0xff]  }
  0xb6   : > { %2814 = vmatmul.mubr.bf16.gmra.mrb[52].mxu0 %v6608_v26  ;;  %2942 = vmatmul.mubr.bf16.gmra.mrb[52].mxu1 %v6609_v27 }
  0xb7   : > { %2821 = vmatprep.mubr.bf16.mxu0 %v6611_v28  ;;  %2949 = vmatprep.mubr.bf16.mxu1 %v6613_v29  ;;  %v6702_v29 = vld [vmem:[%s7054_s5 + $0x6e0] ss:$20 sps:$4 sm:$0xff]  }
  0xbe   : > { %2822 = vmatmul.mubr.bf16.gmra.mrb[56].mxu0 %v6615_v30  ;;  %2950 = vmatmul.mubr.bf16.gmra.mrb[56].mxu1 %v6616_v31  ;;  %v6703_v30 = vld [vmem:[%s7054_s5 + $0x1e8] ss:$20 sps:$4 sm:$0xff]  }
  0xbf   : > { %2829 = vmatprep.mubr.bf16.mxu0 %v6618_v32  ;;  %2957 = vmatprep.mubr.bf16.mxu1 %v6620_v33  ;;  %v6704_v32 = vld [vmem:[%s7054_s5 + $0x70c] ss:$20 sps:$4 sm:$0xff]   ;;  %v6706_v33 = vld [vmem:[%s7054_s5 + $0x214] ss:$20 sps:$4 sm:$0xff]  }
  0xc6   : > { %2830 = vmatmul.mubr.bf16.gmra.mrb[60].mxu0 %v6622_v34  ;;  %2958 = vmatmul.mubr.bf16.gmra.mrb[60].mxu1 %v6623_v35 }
  0xc7   : > { %2965 = vmatprep.mubr.bf16.mxu1 %v6625_v36  ;;  %3254 = vmatprep.mubr.bf16.mxu0 %v6629_v37  ;;  %v6708_v37 = vld [vmem:[%s7054_s5 + $0x708] ss:$20 sps:$4 sm:$0xff]  }
  0xce   : > { %2966 = vmatmul.mubr.bf16.gmra.mrb[64].mxu1 %v6630_v39  ;;  %3255 = vmatmul.mubr.bf16.vlgmr.msra.gmra.mrb[0].mxu0 %v6627_v38  ;;  %v6709_v38 = vld [vmem:[%s7054_s5 + $0x210] ss:$20 sps:$4 sm:$0xff]  }
  0xcf   : > { %2973 = vmatprep.mubr.bf16.mxu1 %v6631_v40  ;;  %3262 = vmatprep.mubr.bf16.mxu0 %v6633_v41  ;;  %v6710_v40 = vld [vmem:[%s7054_s5 + $0x734] ss:$20 sps:$4 sm:$0xff]   ;;  %v6712_v41 = vld [vmem:[%s7054_s5 + $0x23c] ss:$20 sps:$4 sm:$0xff]  }
  0xd6   : > { %2974 = vmatmul.mubr.bf16.gmra.mrb[68].mxu1 %v6635_v42  ;;  %3263 = vmatmul.mubr.bf16.gmra.mrb[4].mxu0 %v6636_v43 }
  0xd7   : > { %2981 = vmatprep.mubr.bf16.mxu1 %v6637_v44  ;;  %3270 = vmatprep.mubr.bf16.mxu0 %v6639_v45  ;;  %v6714_v45 = vld [vmem:[%s7054_s5 + $0x730] ss:$20 sps:$4 sm:$0xff]  }
  0xde   : > { %2982 = vmatmul.mubr.bf16.gmra.mrb[72].mxu1 %v6641_v46  ;;  %3271 = vmatmul.mubr.bf16.gmra.mrb[8].mxu0 %v6642_v47  ;;  %v6715_v46 = vld [vmem:[%s7054_s5 + $0x238] ss:$20 sps:$4 sm:$0xff]  }
  0xdf   : > { %2989 = vmatprep.mubr.bf16.mxu1 %v6643_v48  ;;  %3278 = vmatprep.mubr.bf16.mxu0 %v6645_v49  ;;  %v6716_v48 = vld [vmem:[%s7054_s5 + $0x75c] ss:$20 sps:$4 sm:$0xff]   ;;  %v6718_v49 = vld [vmem:[%s7054_s5 + $0x264] ss:$20 sps:$4 sm:$0xff]  }
  0xe6   : > { %2990 = vmatmul.mubr.bf16.gmra.mrb[76].mxu1 %v6647_v50  ;;  %3279 = vmatmul.mubr.bf16.gmra.mrb[12].mxu0 %v6648_v51 }
  0xe7   : > { %2997 = vmatprep.mubr.bf16.mxu1 %v6649_v52  ;;  %3286 = vmatprep.mubr.bf16.mxu0 %v6651_v53  ;;  %v6720_v53 = vld [vmem:[%s7054_s5 + $0x758] ss:$20 sps:$4 sm:$0xff]  }
  0xee   : > { %2998 = vmatmul.mubr.bf16.gmra.mrb[80].mxu1 %v6653_v54  ;;  %3287 = vmatmul.mubr.bf16.gmra.mrb[16].mxu0 %v6654_v55  ;;  %v6721_v54 = vld [vmem:[%s7054_s5 + $0x260] ss:$20 sps:$4 sm:$0xff]  }
  0xef   : > { %3005 = vmatprep.mubr.bf16.mxu1 %v6655_v56  ;;  %3294 = vmatprep.mubr.bf16.mxu0 %v6657_v57  ;;  %v6722_v56 = vld [vmem:[%s7054_s5 + $0x784] ss:$20 sps:$4 sm:$0xff]   ;;  %v6724_v57 = vld [vmem:[%s7054_s5 + $0x28c] ss:$20 sps:$4 sm:$0xff]  }
  0xf6   : > { %3006 = vmatmul.mubr.bf16.gmra.mrb[84].mxu1 %v6659_v59  ;;  %3295 = vmatmul.mubr.bf16.gmra.mrb[20].mxu0 %v6660_v60 }
  0xf7   : > { %3013 = vmatprep.mubr.bf16.mxu1 %v6661_v61  ;;  %3302 = vmatprep.mubr.bf16.mxu0 %v6663_v62  ;;  %v6726_v61 = vld [vmem:[%s7054_s5 + $0x780] ss:$20 sps:$4 sm:$0xff]   ;;  %v6727_v62 = vld [vmem:[%s7054_s5 + $0x288] ss:$20 sps:$4 sm:$0xff]  }
  0xfe   : > { %3014 = vmatmul.mubr.bf16.gmra.mrb[88].mxu1 %v6665_v63  ;;  %3303 = vmatmul.mubr.bf16.gmra.mrb[24].mxu0 %v6666_v0  ;;  %v6728_v0 = vld [vmem:[%s7054_s5 + $0x7ac] ss:$20 sps:$4 sm:$0xff]  }
  0xff   : > { %3021 = vmatprep.mubr.bf16.mxu1 %v6667_v2  ;;  %3310 = vmatprep.mubr.bf16.mxu0 %v6669_v3  ;;  %v6730_v2 = vld [vmem:[%s7054_s5 + $0x2b4] ss:$20 sps:$4 sm:$0xff]  }
 0x106   : > { %3022 = vmatmul.mubr.bf16.gmra.mrb[92].mxu1 %v6671_v4  ;;  %3311 = vmatmul.mubr.bf16.gmra.mrb[28].mxu0 %v6672_v5 }
 0x107   : > { %3029 = vmatprep.mubr.bf16.mxu1 %v6673_v6  ;;  %3318 = vmatprep.mubr.bf16.mxu0 %v6675_v7  ;;  %v6732_v6 = vld [vmem:[%s7054_s5 + $0x7a8] ss:$20 sps:$4 sm:$0xff]   ;;  %v6733_v7 = vld [vmem:[%s7054_s5 + $0x2b0] ss:$20 sps:$4 sm:$0xff]  }
 0x10e   : > { %3030 = vmatmul.mubr.bf16.gmra.mrb[96].mxu1 %v6677_v8  ;;  %3319 = vmatmul.mubr.bf16.gmra.mrb[32].mxu0 %v6678_v9  ;;  %v6734_v9 = vld [vmem:[%s7054_s5 + $0x7d4] ss:$20 sps:$4 sm:$0xff]  }
 0x10f   : > { %3037 = vmatprep.mubr.bf16.mxu1 %v6680_v10  ;;  %3326 = vmatprep.mubr.bf16.mxu0 %v6682_v11  ;;  %v6736_v10 = vld [vmem:[%s7054_s5 + $0x2dc] ss:$20 sps:$4 sm:$0xff]  }
 0x116   : > { %3038 = vmatmul.mubr.bf16.gmra.mrb[100].mxu1 %v6684_v12  ;;  %3327 = vmatmul.mubr.bf16.gmra.mrb[36].mxu0 %v6685_v13 }
 0x117   : > { %3045 = vmatprep.mubr.bf16.mxu1 %v6686_v1  ;;  %3334 = vmatprep.mubr.bf16.mxu0 %v6688_v14  ;;  %v6738_v1 = vld [vmem:[%s7054_s5 + $0x7d0] ss:$20 sps:$4 sm:$0xff]   ;;  %v6739_v14 = vld [vmem:[%s7054_s5 + $0x2d8] ss:$20 sps:$4 sm:$0xff]  }
 0x11e   : > { %3046 = vmatmul.mubr.bf16.gmra.mrb[104].mxu1 %v6690_v15  ;;  %3335 = vmatmul.mubr.bf16.gmra.mrb[40].mxu0 %v6691_v16  ;;  %v6740_v16 = vld [vmem:[%s7054_s5 + $0x7fc] ss:$20 sps:$4 sm:$0xff]  }
 0x11f   : > { %3053 = vmatprep.mubr.bf16.mxu1 %v6692_v17  ;;  %3342 = vmatprep.mubr.bf16.mxu0 %v6694_v18  ;;  %v6742_v17 = vld [vmem:[%s7054_s5 + $0x304] ss:$20 sps:$4 sm:$0xff]  }
 0x121   : > { %v7299_v19 = vpop.f32.mrb[0].mxu1 }
 0x122   : > { %v2841_v20 = vpop.f32.mrb[1].mxu1 }
 0x123   : > { %v7303_v23 = vpop.f32.mrb[2].mxu1 }
 0x124   : > { %v2844_v26 = vpop.f32.mrb[3].mxu1 }
 0x125   : > { %v6746_v26 = vld [vmem:[%s7054_s5 + $0x824] ss:$20 sps:$4 sm:$0xff]  }
 0x126   : > { %3054 = vmatmul.mubr.bf16.gmra.mrb[108].mxu1 %v6696_v21  ;;  %3343 = vmatmul.mubr.bf16.gmra.mrb[44].mxu0 %v6697_v22  ;;  %v6744_v22 = vld [vmem:[%s7054_s5 + $0x7f8] ss:$20 sps:$4 sm:$0xff]  }
 0x127   : > { %3061 = vmatprep.mubr.bf16.mxu1 %v6698_v24  ;;  %3350 = vmatprep.mubr.bf16.mxu0 %v6700_v25  ;;  %v6745_v24 = vld [vmem:[%s7054_s5 + $0x300] ss:$20 sps:$4 sm:$0xff]  }
 0x129   : > { %v7307_v27 = vpop.f32.mrb[4].mxu1 }
 0x12a   : > { %v2849_v28 = vpop.f32.mrb[5].mxu1 }
 0x12b   : > { %v7311_v31 = vpop.f32.mrb[6].mxu1  ;;  %v6748_v28 = vld [vmem:[%s7054_s5 + $0x32c] ss:$20 sps:$4 sm:$0xff]  }
 0x12c   : > { %v2852_v34 = vpop.f32.mrb[7].mxu1 }
 0x12d   : > { %v6751_v34 = vld [vmem:[%s7054_s5 + $0x328] ss:$20 sps:$4 sm:$0xff]  }
 0x12e   : > { %3062 = vmatmul.mubr.bf16.gmra.mrb[112].mxu1 %v6702_v29  ;;  %3351 = vmatmul.mubr.bf16.gmra.mrb[48].mxu0 %v6703_v30 }
 0x12f   : > { %3069 = vmatprep.mubr.bf16.mxu1 %v6704_v32  ;;  %3358 = vmatprep.mubr.bf16.mxu0 %v6706_v33  ;;  %v6750_v33 = vld [vmem:[%s7054_s5 + $0x820] ss:$20 sps:$4 sm:$0xff]  }
 0x131   : > { %v7315_v35 = vpop.f32.mrb[8].mxu1 }
 0x132   : > { %v2857_v36 = vpop.f32.mrb[9].mxu1 }
 0x133   : > { %v7319_v39 = vpop.f32.mrb[10].mxu1 }
 0x134   : > { %v2860_v42 = vpop.f32.mrb[11].mxu1 }
 0x136   : > { %3070 = vmatmul.mubr.bf16.gmra.mrb[116].mxu1 %v6708_v37  ;;  %3359 = vmatmul.mubr.bf16.gmra.mrb[52].mxu0 %v6709_v38  ;;  %v6753_v37 = vld [vmem:[%s7054_s5 + $0x84c] ss:$20 sps:$4 sm:$0xff]   ;;  %v6755_v38 = vld [vmem:[%s7054_s5 + $0x354] ss:$20 sps:$4 sm:$0xff]  }
 0x137   : > { %3077 = vmatprep.mubr.bf16.mxu1 %v6710_v40  ;;  %3366 = vmatprep.mubr.bf16.mxu0 %v6712_v41 }
 0x139   : > { %v7323_v43 = vpop.f32.mrb[12].mxu1 }
 0x13a   : > { %v2865_v44 = vpop.f32.mrb[13].mxu1 }
 0x13b   : > { %v7327_v47 = vpop.f32.mrb[14].mxu1  ;;  %v6757_v44 = vld [vmem:[%s7054_s5 + $0x848] ss:$20 sps:$4 sm:$0xff]  }
 0x13c   : > { %v2868_v50 = vpop.f32.mrb[15].mxu1 }
 0x13e   : > { %3078 = vmatmul.mubr.bf16.gmra.mrb[120].mxu1 %v6714_v45  ;;  %3367 = vmatmul.mubr.bf16.gmra.mrb[56].mxu0 %v6715_v46  ;;  %v6758_v45 = vld [vmem:[%s7054_s5 + $0x350] ss:$20 sps:$4 sm:$0xff]  }
 0x13f   : > { %3085 = vmatprep.mubr.bf16.mxu1 %v6716_v48  ;;  %3374 = vmatprep.mubr.bf16.mxu0 %v6718_v49  ;;  %v6759_v48 = vld [vmem:[%s7054_s5 + $0x874] ss:$20 sps:$4 sm:$0xff]   ;;  %v6761_v49 = vld [vmem:[%s7054_s5 + $0x37c] ss:$20 sps:$4 sm:$0xff]  }
 0x141   : > { %v7331_v51 = vpop.f32.mrb[16].mxu1 }
 0x142   : > { %v2873_v52 = vpop.f32.mrb[17].mxu1 }
 0x143   : > { %v7335_v55 = vpop.f32.mrb[18].mxu1 }
 0x144   : > { %v2876_v58 = vpop.f32.mrb[19].mxu1 }
 0x145   : > { %v6765_v58 = vld [vmem:[%s7054_s5 + $0x89c] ss:$20 sps:$4 sm:$0xff]  }
 0x146   : > { %3086 = vmatmul.mubr.bf16.gmra.mrb[124].mxu1 %v6720_v53  ;;  %3375 = vmatmul.mubr.bf16.gmra.mrb[60].mxu0 %v6721_v54  ;;  %v6763_v54 = vld [vmem:[%s7054_s5 + $0x870] ss:$20 sps:$4 sm:$0xff]  }
 0x147   : > { %3093 = vmatprep.mubr.bf16.mxu1 %v6722_v56  ;;  %3382 = vmatprep.mubr.bf16.mxu0 %v6724_v57  ;;  %v6764_v56 = vld [vmem:[%s7054_s5 + $0x378] ss:$20 sps:$4 sm:$0xff]  }
 0x149   : > { %v7339_v59 = vpop.f32.mrb[20].mxu1 }
 0x14a   : > { %v2881_v60 = vpop.f32.mrb[21].mxu1 }
 0x14b   : > { %v7343_v63 = vpop.f32.mrb[22].mxu1  ;;  %v6767_v60 = vld [vmem:[%s7054_s5 + $0x3a4] ss:$20 sps:$4 sm:$0xff]  }
 0x14c   : > { %v2884_v3 = vpop.f32.mrb[23].mxu1 }
 0x14d   : > { %v6770_v3 = vld [vmem:[%s7054_s5 + $0x3a0] ss:$20 sps:$4 sm:$0xff]  }
 0x14e   : > { %3094 = vmatmul.mubr.bf16.gmra.mrb[128].mxu1 %v6726_v61  ;;  %3383 = vmatmul.mubr.bf16.gmra.mrb[64].mxu0 %v6727_v62 }
 0x14f   : > { %3101 = vmatprep.mubr.bf16.mxu1 %v6728_v0  ;;  %3390 = vmatprep.mubr.bf16.mxu0 %v6730_v2  ;;  %v6769_v2 = vld [vmem:[%s7054_s5 + $0x898] ss:$20 sps:$4 sm:$0xff]  }
 0x151   : > { %v7347_v4 = vpop.f32.mrb[24].mxu1 }
 0x152   : > { %v2889_v5 = vpop.f32.mrb[25].mxu1 }
 0x153   : > { %v7351_v8 = vpop.f32.mrb[26].mxu1 }
 0x154   : > { %v2892_v11 = vpop.f32.mrb[27].mxu1 }
 0x156   : > { %3102 = vmatmul.mubr.bf16.gmra.mrb[132].mxu1 %v6732_v6  ;;  %3391 = vmatmul.mubr.bf16.gmra.mrb[68].mxu0 %v6733_v7  ;;  %v6771_v6 = vld [vmem:[%s7054_s5 + $0x8c4] ss:$20 sps:$4 sm:$0xff]   ;;  %v6773_v7 = vld [vmem:[%s7054_s5 + $0x3cc] ss:$20 sps:$4 sm:$0xff]  }
 0x157   : > { %3109 = vmatprep.mubr.bf16.mxu1 %v6734_v9  ;;  %3398 = vmatprep.mubr.bf16.mxu0 %v6736_v10 }
 0x159   : > { %v7355_v12 = vpop.f32.mrb[28].mxu1 }
 0x15a   : > { %v2897_v13 = vpop.f32.mrb[29].mxu1 }
 0x15b   : > { %v7359_v15 = vpop.f32.mrb[30].mxu1  ;;  %v6775_v13 = vld [vmem:[%s7054_s5 + $0x8c0] ss:$20 sps:$4 sm:$0xff]  }
 0x15c   : > { %v2900_v18 = vpop.f32.mrb[31].mxu1 }
 0x15e   : > { %3110 = vmatmul.mubr.bf16.gmra.mrb[136].mxu1 %v6738_v1  ;;  %3399 = vmatmul.mubr.bf16.gmra.mrb[72].mxu0 %v6739_v14  ;;  %v6776_v1 = vld [vmem:[%s7054_s5 + $0x3c8] ss:$20 sps:$4 sm:$0xff]  }
 0x15f   : > { %3117 = vmatprep.mubr.bf16.mxu1 %v6740_v16  ;;  %3406 = vmatprep.mubr.bf16.mxu0 %v6742_v17  ;;  %v6777_v16 = vld [vmem:[%s7054_s5 + $0x8ec] ss:$20 sps:$4 sm:$0xff]   ;;  %v6779_v17 = vld [vmem:[%s7054_s5 + $0x3f4] ss:$20 sps:$4 sm:$0xff]  }
 0x161   : > { %v7363_v20 = vpop.f32.mrb[32].mxu1 }
 0x162   : > { %v2905_v21 = vpop.f32.mrb[33].mxu1 }
 0x163   : > { %v7367_v25 = vpop.f32.mrb[34].mxu1 }
 0x164   : > { %v2908_v29 = vpop.f32.mrb[35].mxu1 }
 0x165   : > { %v6783_v29 = vld [vmem:[%s7054_s5 + $0x914] ss:$20 sps:$4 sm:$0xff]  }
 0x166   : > { %3118 = vmatmul.mubr.bf16.gmra.mrb[140].mxu1 %v6744_v22  ;;  %3407 = vmatmul.mubr.bf16.gmra.mrb[76].mxu0 %v6745_v24  ;;  %v6781_v24 = vld [vmem:[%s7054_s5 + $0x8e8] ss:$20 sps:$4 sm:$0xff]  }
 0x167   : > { %3125 = vmatprep.mubr.bf16.mxu1 %v6746_v26  ;;  %3414 = vmatprep.mubr.bf16.mxu0 %v6748_v28  ;;  %v6782_v26 = vld [vmem:[%s7054_s5 + $0x3f0] ss:$20 sps:$4 sm:$0xff]  }
 0x169   : > { %v7371_v30 = vpop.f32.mrb[36].mxu1 }
 0x16a   : > { %v2913_v32 = vpop.f32.mrb[37].mxu1 }
 0x16b   : > { %v7375_v36 = vpop.f32.mrb[38].mxu1  ;;  %v6785_v32 = vld [vmem:[%s7054_s5 + $0x41c] ss:$20 sps:$4 sm:$0xff]  }
 0x16c   : > { %v2916_v40 = vpop.f32.mrb[39].mxu1 }
 0x16d   : > { %v6788_v40 = vld [vmem:[%s7054_s5 + $0x418] ss:$20 sps:$4 sm:$0xff]  }
 0x16e   : > { %3126 = vmatmul.mubr.bf16.gmra.mrb[144].mxu1 %v6750_v33  ;;  %3415 = vmatmul.mubr.bf16.gmra.mrb[80].mxu0 %v6751_v34 }
 0x16f   : > { %3133 = vmatprep.mubr.bf16.mxu1 %v6753_v37  ;;  %3422 = vmatprep.mubr.bf16.mxu0 %v6755_v38  ;;  %v6787_v38 = vld [vmem:[%s7054_s5 + $0x910] ss:$20 sps:$4 sm:$0xff]  }
 0x171   : > { %v7379_v41 = vpop.f32.mrb[40].mxu1 }
 0x172   : > { %v2921_v42 = vpop.f32.mrb[41].mxu1 }
 0x173   : > { %v7383_v46 = vpop.f32.mrb[42].mxu1 }
 0x174   : > { %v2924_v50 = vpop.f32.mrb[43].mxu1 }
 0x176   : > { %3134 = vmatmul.mubr.bf16.gmra.mrb[148].mxu1 %v6757_v44  ;;  %3423 = vmatmul.mubr.bf16.gmra.mrb[84].mxu0 %v6758_v45  ;;  %v6789_v44 = vld [vmem:[%s7054_s5 + $0x93c] ss:$20 sps:$4 sm:$0xff]   ;;  %v6791_v45 = vld [vmem:[%s7054_s5 + $0x444] ss:$20 sps:$4 sm:$0xff]  }
 0x177   : > { %3141 = vmatprep.mubr.bf16.mxu1 %v6759_v48  ;;  %3430 = vmatprep.mubr.bf16.mxu0 %v6761_v49 }
 0x179   : > { %v7387_v52 = vpop.f32.mrb[44].mxu1 }
 0x17a   : > { %v2929_v53 = vpop.f32.mrb[45].mxu1 }
 0x17b   : > { %v7391_v57 = vpop.f32.mrb[46].mxu1 }
 0x17c   : > { %v2932_v61 = vpop.f32.mrb[47].mxu1 }
 0x17e   : > { %3142 = vmatmul.mubr.bf16.gmra.mrb[152].mxu1 %v6763_v54  ;;  %3431 = vmatmul.mubr.bf16.gmra.mrb[88].mxu0 %v6764_v56  ;;  %v6793_v56 = vld [vmem:[%s7054_s5 + $0x938] ss:$20 sps:$4 sm:$0xff]  }
 0x17f   : > { %3149 = vmatprep.mubr.bf16.mxu1 %v6765_v58  ;;  %3438 = vmatprep.mubr.bf16.mxu0 %v6767_v60  ;;  %v6794_v58 = vld [vmem:[%s7054_s5 + $0x440] ss:$20 sps:$4 sm:$0xff]  }
 0x181   : > { %v7395_v62 = vpop.f32.mrb[48].mxu1 }
 0x182   : > { %v2937_v0 = vpop.f32.mrb[49].mxu1 }
 0x183   : > { %v7399_v5 = vpop.f32.mrb[50].mxu1  ;;  %v6795_v0 = vld [vmem:[%s7054_s5 + $0x964] ss:$20 sps:$4 sm:$0xff]  }
 0x184   : > { %v2940_v9 = vpop.f32.mrb[51].mxu1 }
 0x186   : > { %3150 = vmatmul.mubr.bf16.gmra.mrb[156].mxu1 %v6769_v2  ;;  %3439 = vmatmul.mubr.bf16.gmra.mrb[92].mxu0 %v6770_v3  ;;  %v6797_v2 = vld [vmem:[%s7054_s5 + $0x46c] ss:$20 sps:$4 sm:$0xff]  }
 0x187   : > { %3157 = vmatprep.mubr.bf16.mxu1 %v6771_v6  ;;  %3446 = vmatprep.mubr.bf16.mxu0 %v6773_v7 }
 0x189   : > { %v7403_v10 = vpop.f32.mrb[52].mxu1 }
 0x18a   : > { %v2945_v11 = vpop.f32.mrb[53].mxu1 }
 0x18b   : > { %v7407_v14 = vpop.f32.mrb[54].mxu1 }
 0x18c   : > { %v2948_v18 = vpop.f32.mrb[55].mxu1 }
 0x18e   : > { %3158 = vmatmul.mubr.bf16.gmra.mrb[160].mxu1 %v6775_v13  ;;  %3447 = vmatmul.mubr.bf16.gmra.mrb[96].mxu0 %v6776_v1  ;;  %v6799_v1 = vld [vmem:[%s7054_s5 + $0x960] ss:$20 sps:$4 sm:$0xff]  }
 0x18f   : > { %3165 = vmatprep.mubr.bf16.mxu1 %v6777_v16  ;;  %3454 = vmatprep.mubr.bf16.mxu0 %v6779_v17  ;;  %v6800_v16 = vld [vmem:[%s7054_s5 + $0x468] ss:$20 sps:$4 sm:$0xff]  }
 0x191   : > { %v7411_v21 = vpop.f32.mrb[56].mxu1 }
 0x192   : > { %v2953_v22 = vpop.f32.mrb[57].mxu1 }
 0x193   : > { %v7415_v28 = vpop.f32.mrb[58].mxu1  ;;  %v6801_v22 = vld [vmem:[%s7054_s5 + $0x98c] ss:$20 sps:$4 sm:$0xff]  }
 0x194   : > { %v2956_v33 = vpop.f32.mrb[59].mxu1 }
 0x196   : > { %3166 = vmatmul.mubr.bf16.gmra.mrb[164].mxu1 %v6781_v24  ;;  %3455 = vmatmul.mubr.bf16.gmra.mrb[100].mxu0 %v6782_v26  ;;  %v6803_v24 = vld [vmem:[%s7054_s5 + $0x494] ss:$20 sps:$4 sm:$0xff]  }
 0x197   : > { %3173 = vmatprep.mubr.bf16.mxu1 %v6783_v29  ;;  %3462 = vmatprep.mubr.bf16.mxu0 %v6785_v32 }
 0x199   : > { %v7419_v34 = vpop.f32.mrb[60].mxu1 }
 0x19a   : > { %v2961_v37 = vpop.f32.mrb[61].mxu1 }
 0x19b   : > { %v7423_v42 = vpop.f32.mrb[62].mxu1 }
 0x19c   : > { %v2964_v48 = vpop.f32.mrb[63].mxu1 }
 0x19e   : > { %3174 = vmatmul.mubr.bf16.gmra.mrb[168].mxu1 %v6787_v38  ;;  %3463 = vmatmul.mubr.bf16.gmra.mrb[104].mxu0 %v6788_v40  ;;  %v6805_v40 = vld [vmem:[%s7054_s5 + $0x988] ss:$20 sps:$4 sm:$0xff]  }
 0x19f   : > { %3181 = vmatprep.mubr.bf16.mxu1 %v6789_v44  ;;  %3470 = vmatprep.mubr.bf16.mxu0 %v6791_v45  ;;  %v6806_v44 = vld [vmem:[%s7054_s5 + $0x490] ss:$20 sps:$4 sm:$0xff]  }
 0x1a1   : > { %v7427_v49 = vpop.f32.mrb[64].mxu1  ;;  %v7429_v50 = vpop.f32.mrb[0].mxu0 }
 0x1a2   : > { %v2969_v53 = vpop.f32.mrb[65].mxu1  ;;  %v3258_v54 = vpop.f32.mrb[1].mxu0 }
 0x1a3   : > { %v7433_v60 = vpop.f32.mrb[66].mxu1  ;;  %v7435_v61 = vpop.f32.mrb[2].mxu0  ;;  %v6807_v53 = vld [vmem:[%s7054_s5 + $0x9b4] ss:$20 sps:$4 sm:$0xff]   ;;  %v6809_v54 = vld [vmem:[%s7054_s5 + $0x4bc] ss:$20 sps:$4 sm:$0xff]  }
 0x1a4   : > { %v2972_v3 = vpop.f32.mrb[67].mxu1  ;;  %v3261_v6 = vpop.f32.mrb[3].mxu0 }
 0x1a6   : > { %3182 = vmatmul.mubr.bf16.gmra.mrb[172].mxu1 %v6793_v56  ;;  %3471 = vmatmul.mubr.bf16.gmra.mrb[108].mxu0 %v6794_v58 }
 0x1a7   : > { %3189 = vmatprep.mubr.bf16.mxu1 %v6795_v0  ;;  %3478 = vmatprep.mubr.bf16.mxu0 %v6797_v2 }
 0x1a9   : > { %v7439_v7 = vpop.f32.mrb[68].mxu1  ;;  %v7441_v9 = vpop.f32.mrb[4].mxu0 }
 0x1aa   : > { %v2977_v11 = vpop.f32.mrb[69].mxu1  ;;  %v3266_v13 = vpop.f32.mrb[5].mxu0 }
 0x1ab   : > { %v7445_v17 = vpop.f32.mrb[70].mxu1  ;;  %v7447_v18 = vpop.f32.mrb[6].mxu0  ;;  %v6811_v11 = vld [vmem:[%s7054_s5 + $0x9b0] ss:$20 sps:$4 sm:$0xff]   ;;  %v6812_v13 = vld [vmem:[%s7054_s5 + $0x4b8] ss:$20 sps:$4 sm:$0xff]  }
 0x1ac   : > { %v2980_v26 = vpop.f32.mrb[71].mxu1  ;;  %v3269_v29 = vpop.f32.mrb[7].mxu0 }
 0x1ae   : > { %3190 = vmatmul.mubr.bf16.gmra.mrb[176].mxu1 %v6799_v1  ;;  %3479 = vmatmul.mubr.bf16.gmra.mrb[112].mxu0 %v6800_v16 }
 0x1af   : > { %3197 = vmatprep.mubr.bf16.mxu1 %v6801_v22  ;;  %3486 = vmatprep.mubr.bf16.mxu0 %v6803_v24  ;;  %v6813_v22 = vld [vmem:[%s7054_s5 + $0x9dc] ss:$20 sps:$4 sm:$0xff]   ;;  %v6815_v24 = vld [vmem:[%s7054_s5 + $0x4e4] ss:$20 sps:$4 sm:$0xff]  }
 0x1b1   : > { %v7451_v32 = vpop.f32.mrb[72].mxu1  ;;  %v7453_v33 = vpop.f32.mrb[8].mxu0 }
 0x1b2   : > { %v2985_v37 = vpop.f32.mrb[73].mxu1  ;;  %v3274_v38 = vpop.f32.mrb[9].mxu0 }
 0x1b3   : > { %v7457_v45 = vpop.f32.mrb[74].mxu1  ;;  %v7459_v48 = vpop.f32.mrb[10].mxu0 }
 0x1b4   : > { %v2988_v56 = vpop.f32.mrb[75].mxu1  ;;  %v3277_v58 = vpop.f32.mrb[11].mxu0 }
 0x1b6   : > { %3198 = vmatmul.mubr.bf16.gmra.mrb[180].mxu1 %v6805_v40  ;;  %3487 = vmatmul.mubr.bf16.gmra.mrb[116].mxu0 %v6806_v44 }
 0x1b7   : > { %3205 = vmatprep.mubr.bf16.mxu1 %v6807_v53  ;;  %3494 = vmatprep.mubr.bf16.mxu0 %v6809_v54  ;;  %v6817_v53 = vld [vmem:[%s7054_s5 + $0x9d8] ss:$20 sps:$4 sm:$0xff]   ;;  %v6818_v54 = vld [vmem:[%s7054_s5 + $0x4e0] ss:$20 sps:$4 sm:$0xff]  }
 0x1b9   : > { %v7463_v0 = vpop.f32.mrb[76].mxu1  ;;  %v7465_v2 = vpop.f32.mrb[12].mxu0 }
 0x1ba   : > { %8773 = vst [vmem:[#allocation2_spill] sm:$0xff] %v7463_v0  ;;  %v2993_v3 = vpop.f32.mrb[77].mxu1  ;;  %v3282_v6 = vpop.f32.mrb[13].mxu0 }
 0x1bb   : > { %v7469_v1 = vpop.f32.mrb[78].mxu1  ;;  %v7471_v16 = vpop.f32.mrb[14].mxu0  ;;  %v6819_v3 = vld [vmem:[%s7054_s5 + $0x50c] ss:$20 sps:$4 sm:$0xff]   ;;  %v6821_v6 = vld [vmem:[%s7054_s5 + $0x10] ss:$20 sps:$4 sm:$0xff]  }
 0x1bc   : > { %8774 = vst [vmem:[#allocation3_spill] sm:$0xff] %v7469_v1  ;;  %v2996_v26 = vpop.f32.mrb[79].mxu1  ;;  %v3285_v29 = vpop.f32.mrb[15].mxu0 }
 0x1be   : > { %3206 = vmatmul.mubr.bf16.gmra.mrb[184].mxu1 %v6811_v11  ;;  %3495 = vmatmul.mubr.bf16.gmra.mrb[120].mxu0 %v6812_v13 }
 0x1bf   : > { %3213 = vmatprep.mubr.bf16.mxu1 %v6813_v22  ;;  %3502 = vmatprep.mubr.bf16.mxu0 %v6815_v24 }
 0x1c1   : > { %v7475_v37 = vpop.f32.mrb[80].mxu1  ;;  %v7477_v38 = vpop.f32.mrb[16].mxu0 }
 0x1c2   : > { %8775 = vst [vmem:[#allocation4_spill] sm:$0xff] %v7475_v37  ;;  %v3001_v40 = vpop.f32.mrb[81].mxu1  ;;  %v3290_v44 = vpop.f32.mrb[17].mxu0  ;;  %v6828_v37 = vld [vmem:[%s7054_s5 + $0x88] ss:$20 sps:$4 sm:$0xff]  }
 0x1c3   : > { %v7481_v56 = vpop.f32.mrb[82].mxu1  ;;  %v7483_v58 = vpop.f32.mrb[18].mxu0  ;;  %v6822_v40 = vld [vmem:[%s7054_s5 + $0x508] ss:$20 sps:$4 sm:$0xff]   ;;  %v6823_v44 = vld [vmem:[%s7054_s5 + $0x38] ss:$20 sps:$4 sm:$0xff]  }
 0x1c4   : > { %8776 = vst [vmem:[#allocation5_spill] sm:$0xff] %v7481_v56  ;;  %8777 = vst [vmem:[#allocation6_spill] sm:$0xff] %v7483_v58  ;;  %v3004_v11 = vpop.f32.mrb[83].mxu1  ;;  %v3293_v13 = vpop.f32.mrb[19].mxu0 }
 0x1c5   : > { %v6824_v13 = vld [vmem:[%s7054_s5 + $0x534] ss:$20 sps:$4 sm:$0xff]  }
 0x1c6   : > { %3214 = vmatmul.mubr.bf16.gmra.mrb[188].mxu1 %v6817_v53  ;;  %3503 = vmatmul.mubr.bf16.gmra.mrb[124].mxu0 %v6818_v54  ;;  %v6826_v53 = vld [vmem:[%s7054_s5 + $0x60] ss:$20 sps:$4 sm:$0xff]  }
 0x1c7   : > { %3510 = vmatprep.mubr.bf16.mxu0 %v6819_v3  ;;  %6037 = vmatprep.mubr.msk.bf16.mxu1 %vm2484_vm0, %v6821_v6 }
 0x1c9   : > { %v7488_v22 = vpop.f32.mrb[84].mxu1  ;;  %v7490_v24 = vpop.f32.mrb[20].mxu0 }
 0x1ca   : > { %8778 = vst [vmem:[#allocation7_spill] sm:$0xff] %v7488_v22  ;;  %v3009_v26 = vpop.f32.mrb[85].mxu1  ;;  %v3298_v29 = vpop.f32.mrb[21].mxu0  ;;  %v6827_v22 = vld [vmem:[%s7054_s5 + $0x530] ss:$20 sps:$4 sm:$0xff]  }
 0x1cb   : > { %v7494_v56 = vpop.f32.mrb[86].mxu1  ;;  %v7496_v11 = vpop.f32.mrb[22].mxu0 }
 0x1cc   : > { %8779 = vst [vmem:[#allocation8_spill] sm:$0xff] %v7494_v56  ;;  %v3012_v54 = vpop.f32.mrb[87].mxu1  ;;  %v3301_v3 = vpop.f32.mrb[23].mxu0 }
 0x1ce   : > { %3511 = vmatmul.mubr.bf16.gmra.mrb[128].mxu0 %v6822_v40  ;;  %6038 = vmatmul.mubr.msk.bf16.vlgmr.msra.gmra.mrb[192].mxu1 %vm2484_vm0, %v6823_v44  ;;  %v6829_v40 = vld [vmem:[%s7054_s5 + $0x55c] ss:$20 sps:$4 sm:$0xff]  }
 0x1cf   : > { %3518 = vmatprep.mubr.bf16.mxu0 %v6824_v13  ;;  %6041 = vmatprep.mubr.msk.bf16.mxu1 %vm2484_vm0, %v6826_v53  ;;  %v6831_v44 = vld [vmem:[%s7054_s5 + $0xb0] ss:$20 sps:$4 sm:$0xff]  }
 0x1d1   : > { %v7502_v6 = vpop.f32.mrb[88].mxu1  ;;  %v7504_v26 = vpop.f32.mrb[24].mxu0 }
 0x1d2   : > { %8780 = vst [vmem:[#allocation9_spill] sm:$0xff] %v7502_v6  ;;  %8781 = vst [vmem:[#allocation10_spill] sm:$0xff] %v7504_v26  ;;  %v3017_v29 = vpop.f32.mrb[89].mxu1  ;;  %v3306_v56 = vpop.f32.mrb[25].mxu0  ;;  %v6832_v6 = vld [vmem:[%s7054_s5 + $0x558] ss:$20 sps:$4 sm:$0xff]  }
 0x1d3   : > { %v7508_v1 = vpop.f32.mrb[90].mxu1  ;;  %v7510_v54 = vpop.f32.mrb[26].mxu0 }
 0x1d4   : > { %8782 = vst [vmem:[#allocation11_spill] sm:$0xff] %v7508_v1  ;;  %8783 = vst [vmem:[#allocation12_spill] sm:$0xff] %v7510_v54  ;;  %v3020_v13 = vpop.f32.mrb[91].mxu1  ;;  %v3309_v53 = vpop.f32.mrb[27].mxu0  ;;  %v6833_v54 = vld [vmem:[%s7054_s5 + $0xd8] ss:$20 sps:$4 sm:$0xff]  }
 0x1d6   : > { %3519 = vmatmul.mubr.bf16.gmra.mrb[132].mxu0 %v6827_v22  ;;  %6042 = vmatmul.mubr.msk.bf16.gmra.mrb[196].mxu1 %vm2484_vm0, %v6828_v37  ;;  %v6834_v22 = vld [vmem:[%s7054_s5 + $0x584] ss:$20 sps:$4 sm:$0xff]   ;;  %v6836_v37 = vld [vmem:[%s7054_s5 + $0x100] ss:$20 sps:$4 sm:$0xff]  }
 0x1d7   : > { %3526 = vmatprep.mubr.bf16.mxu0 %v6829_v40  ;;  %6045 = vmatprep.mubr.msk.bf16.mxu1 %vm2484_vm0, %v6831_v44 }
 0x1d9   : > { %v7516_v56 = vpop.f32.mrb[92].mxu1  ;;  %v7518_v3 = vpop.f32.mrb[28].mxu0 }
 0x1da   : > { %8784 = vst [vmem:[#allocation13_spill] sm:$0xff] %v7516_v56  ;;  %8785 = vst [vmem:[#allocation14_spill] sm:$0xff] %v7518_v3  ;;  %v3025_v29 = vpop.f32.mrb[93].mxu1  ;;  %v3314_v1 = vpop.f32.mrb[29].mxu0  ;;  %v6837_v56 = vld [vmem:[%s7054_s5 + $0x580] ss:$20 sps:$4 sm:$0xff]  }
 0x1db   : > { %v7522_v26 = vpop.f32.mrb[94].mxu1  ;;  %v7524_v13 = vpop.f32.mrb[30].mxu0 }
 0x1dc   : > { %8786 = vst [vmem:[#allocation15_spill] sm:$0xff] %v7522_v26  ;;  %8787 = vst [vmem:[#allocation16_spill] sm:$0xff] %v7524_v13  ;;  %v3028_v40 = vpop.f32.mrb[95].mxu1  ;;  %v3317_v44 = vpop.f32.mrb[31].mxu0  ;;  %v6838_v13 = vld [vmem:[%s7054_s5 + $0x128] ss:$20 sps:$4 sm:$0xff]  }
 0x1de   : > { %3527 = vmatmul.mubr.bf16.gmra.mrb[136].mxu0 %v6832_v6  ;;  %6046 = vmatmul.mubr.msk.bf16.gmra.mrb[200].mxu1 %vm2484_vm0, %v6833_v54  ;;  %v6839_v6 = vld [vmem:[%s7054_s5 + $0x5ac] ss:$20 sps:$4 sm:$0xff]   ;;  %v6841_v54 = vld [vmem:[%s7054_s5 + $0x150] ss:$20 sps:$4 sm:$0xff]  }
 0x1df   : > { %3534 = vmatprep.mubr.bf16.mxu0 %v6834_v22  ;;  %6049 = vmatprep.mubr.msk.bf16.mxu1 %vm2484_vm0, %v6836_v37 }
 0x1e1   : > { %v7530_v1 = vpop.f32.mrb[96].mxu1  ;;  %v7532_v53 = vpop.f32.mrb[32].mxu0 }
 0x1e2   : > { %8788 = vst [vmem:[#allocation17_spill] sm:$0xff] %v7530_v1  ;;  %8789 = vst [vmem:[#allocation18_spill] sm:$0xff] %v7532_v53  ;;  %v3033_v29 = vpop.f32.mrb[97].mxu1  ;;  %v3322_v26 = vpop.f32.mrb[33].mxu0  ;;  %v6842_v1 = vld [vmem:[%s7054_s5 + $0x5a8] ss:$20 sps:$4 sm:$0xff]  }
 0x1e3   : > { %v7536_v3 = vpop.f32.mrb[98].mxu1  ;;  %v7538_v40 = vpop.f32.mrb[34].mxu0 }
 0x1e4   : > { %8790 = vst [vmem:[#allocation19_spill] sm:$0xff] %v7536_v3  ;;  %8791 = vst [vmem:[#allocation20_spill] sm:$0xff] %v7538_v40  ;;  %v3036_v22 = vpop.f32.mrb[99].mxu1  ;;  %v3325_v37 = vpop.f32.mrb[35].mxu0  ;;  %v6843_v40 = vld [vmem:[%s7054_s5 + $0x178] ss:$20 sps:$4 sm:$0xff]  }
 0x1e6   : > { %3535 = vmatmul.mubr.bf16.gmra.mrb[140].mxu0 %v6837_v56  ;;  %6050 = vmatmul.mubr.msk.bf16.gmra.mrb[204].mxu1 %vm2484_vm0, %v6838_v13  ;;  %v6844_v56 = vld [vmem:[%s7054_s5 + $0x5d4] ss:$20 sps:$4 sm:$0xff]  }
 0x1e7   : > { %3542 = vmatprep.mubr.bf16.mxu0 %v6839_v6  ;;  %6053 = vmatprep.mubr.msk.bf16.mxu1 %vm2484_vm0, %v6841_v54  ;;  %v6846_v13 = vld [vmem:[%s7054_s5 + $0x1a0] ss:$20 sps:$4 sm:$0xff]  }
 0x1e9   : > { %v7544_v26 = vpop.f32.mrb[100].mxu1  ;;  %v7546_v44 = vpop.f32.mrb[36].mxu0 }
 0x1ea   : > { %8792 = vst [vmem:[#allocation21_spill] sm:$0xff] %v7544_v26  ;;  %8793 = vst [vmem:[#allocation22_spill] sm:$0xff] %v7546_v44  ;;  %v3041_v29 = vpop.f32.mrb[101].mxu1  ;;  %v3330_v3 = vpop.f32.mrb[37].mxu0  ;;  %v6847_v26 = vld [vmem:[%s7054_s5 + $0x5d0] ss:$20 sps:$4 sm:$0xff]  }
 0x1eb   : > { %v7550_v53 = vpop.f32.mrb[102].mxu1  ;;  %v7552_v22 = vpop.f32.mrb[38].mxu0 }
 0x1ec   : > { %8794 = vst [vmem:[#allocation23_spill] sm:$0xff] %v7550_v53  ;;  %8795 = vst [vmem:[#allocation24_spill] sm:$0xff] %v7552_v22  ;;  %v3044_v6 = vpop.f32.mrb[103].mxu1  ;;  %v3333_v54 = vpop.f32.mrb[39].mxu0  ;;  %v6848_v22 = vld [vmem:[%s7054_s5 + $0x1c8] ss:$20 sps:$4 sm:$0xff]  }
 0x1ee   : > { %3543 = vmatmul.mubr.bf16.gmra.mrb[144].mxu0 %v6842_v1  ;;  %6054 = vmatmul.mubr.msk.bf16.gmra.mrb[208].mxu1 %vm2484_vm0, %v6843_v40  ;;  %v6849_v1 = vld [vmem:[%s7054_s5 + $0x5fc] ss:$20 sps:$4 sm:$0xff]  }
 0x1ef   : > { %3550 = vmatprep.mubr.bf16.mxu0 %v6844_v56  ;;  %6057 = vmatprep.mubr.msk.bf16.mxu1 %vm2484_vm0, %v6846_v13  ;;  %v6851_v40 = vld [vmem:[%s7054_s5 + $0x1f0] ss:$20 sps:$4 sm:$0xff]  }
 0x1f1   : > { %v7558_v3 = vpop.f32.mrb[104].mxu1  ;;  %v7560_v37 = vpop.f32.mrb[40].mxu0 }
 0x1f2   : > { %8796 = vst [vmem:[#allocation25_spill] sm:$0xff] %v7558_v3  ;;  %8797 = vst [vmem:[#allocation26_spill] sm:$0xff] %v7560_v37  ;;  %v3049_v29 = vpop.f32.mrb[105].mxu1  ;;  %v3338_v53 = vpop.f32.mrb[41].mxu0  ;;  %v6852_v3 = vld [vmem:[%s7054_s5 + $0x5f8] ss:$20 sps:$4 sm:$0xff]  }
 0x1f3   : > { %v7564_v44 = vpop.f32.mrb[106].mxu1  ;;  %v7566_v6 = vpop.f32.mrb[42].mxu0 }
 0x1f4   : > { %8798 = vst [vmem:[#allocation27_spill] sm:$0xff] %v7564_v44  ;;  %8799 = vst [vmem:[#allocation28_spill] sm:$0xff] %v7566_v6  ;;  %v3052_v56 = vpop.f32.mrb[107].mxu1  ;;  %v3341_v13 = vpop.f32.mrb[43].mxu0  ;;  %v6853_v6 = vld [vmem:[%s7054_s5 + $0x218] ss:$20 sps:$4 sm:$0xff]  }
 0x1f6   : > { %3551 = vmatmul.mubr.bf16.gmra.mrb[148].mxu0 %v6847_v26  ;;  %6058 = vmatmul.mubr.msk.bf16.gmra.mrb[212].mxu1 %vm2484_vm0, %v6848_v22  ;;  %v6854_v26 = vld [vmem:[%s7054_s5 + $0x624] ss:$20 sps:$4 sm:$0xff]   ;;  %v6856_v22 = vld [vmem:[%s7054_s5 + $0x240] ss:$20 sps:$4 sm:$0xff]  }
 0x1f7   : > { %3558 = vmatprep.mubr.bf16.mxu0 %v6849_v1  ;;  %6061 = vmatprep.mubr.msk.bf16.mxu1 %vm2484_vm0, %v6851_v40 }
 0x1f9   : > { %v7572_v53 = vpop.f32.mrb[108].mxu1  ;;  %v7574_v54 = vpop.f32.mrb[44].mxu0 }
 0x1fa   : > { %8800 = vst [vmem:[#allocation29_spill] sm:$0xff] %v7572_v53  ;;  %8801 = vst [vmem:[#allocation30_spill] sm:$0xff] %v7574_v54  ;;  %v3057_v29 = vpop.f32.mrb[109].mxu1  ;;  %v3346_v44 = vpop.f32.mrb[45].mxu0  ;;  %v6857_v53 = vld [vmem:[%s7054_s5 + $0x620] ss:$20 sps:$4 sm:$0xff]  }
 0x1fb   : > { %v7578_v37 = vpop.f32.mrb[110].mxu1  ;;  %v7580_v56 = vpop.f32.mrb[46].mxu0 }
 0x1fc   : > { %8802 = vst [vmem:[#allocation31_spill] sm:$0xff] %v7578_v37  ;;  %8803 = vst [vmem:[#allocation32_spill] sm:$0xff] %v7580_v56  ;;  %v3060_v1 = vpop.f32.mrb[111].mxu1  ;;  %v3349_v40 = vpop.f32.mrb[47].mxu0  ;;  %v6858_v56 = vld [vmem:[%s7054_s5 + $0x268] ss:$20 sps:$4 sm:$0xff]  }
 0x1fe   : > { %3559 = vmatmul.mubr.bf16.gmra.mrb[152].mxu0 %v6852_v3  ;;  %6062 = vmatmul.mubr.msk.bf16.gmra.mrb[216].mxu1 %vm2484_vm0, %v6853_v6  ;;  %v6859_v3 = vld [vmem:[%s7054_s5 + $0x64c] ss:$20 sps:$4 sm:$0xff]   ;;  %v6861_v6 = vld [vmem:[%s7054_s5 + $0x290] ss:$20 sps:$4 sm:$0xff]  }
 0x1ff   : > { %3566 = vmatprep.mubr.bf16.mxu0 %v6854_v26  ;;  %6065 = vmatprep.mubr.msk.bf16.mxu1 %vm2484_vm0, %v6856_v22 }
 0x201   : > { %v7586_v44 = vpop.f32.mrb[112].mxu1  ;;  %v7588_v13 = vpop.f32.mrb[48].mxu0 }
 0x202   : > { %8804 = vst [vmem:[#allocation33_spill] sm:$0xff] %v7586_v44  ;;  %8805 = vst [vmem:[#allocation34_spill] sm:$0xff] %v7588_v13  ;;  %v3065_v29 = vpop.f32.mrb[113].mxu1  ;;  %v3354_v37 = vpop.f32.mrb[49].mxu0  ;;  %v6862_v44 = vld [vmem:[%s7054_s5 + $0x648] ss:$20 sps:$4 sm:$0xff]  }
 0x203   : > { %v7592_v54 = vpop.f32.mrb[114].mxu1  ;;  %v7594_v1 = vpop.f32.mrb[50].mxu0 }
 0x204   : > { %8806 = vst [vmem:[#allocation35_spill] sm:$0xff] %v7592_v54  ;;  %8807 = vst [vmem:[#allocation36_spill] sm:$0xff] %v7594_v1  ;;  %v3068_v26 = vpop.f32.mrb[115].mxu1  ;;  %v3357_v22 = vpop.f32.mrb[51].mxu0  ;;  %v6863_v1 = vld [vmem:[%s7054_s5 + $0x2b8] ss:$20 sps:$4 sm:$0xff]  }
 0x206   : > { %3567 = vmatmul.mubr.bf16.gmra.mrb[156].mxu0 %v6857_v53  ;;  %6066 = vmatmul.mubr.msk.bf16.gmra.mrb[220].mxu1 %vm2484_vm0, %v6858_v56  ;;  %v6864_v53 = vld [vmem:[%s7054_s5 + $0x674] ss:$20 sps:$4 sm:$0xff]  }
 0x207   : > { %3574 = vmatprep.mubr.bf16.mxu0 %v6859_v3  ;;  %6069 = vmatprep.mubr.msk.bf16.mxu1 %vm2484_vm0, %v6861_v6  ;;  %v6866_v56 = vld [vmem:[%s7054_s5 + $0x2e0] ss:$20 sps:$4 sm:$0xff]  }
 0x209   : > { %v7600_v37 = vpop.f32.mrb[116].mxu1  ;;  %v7602_v40 = vpop.f32.mrb[52].mxu0 }
 0x20a   : > { %8808 = vst [vmem:[#allocation37_spill] sm:$0xff] %v7600_v37  ;;  %8809 = vst [vmem:[#allocation38_spill] sm:$0xff] %v7602_v40  ;;  %v3073_v29 = vpop.f32.mrb[117].mxu1  ;;  %v3362_v54 = vpop.f32.mrb[53].mxu0  ;;  %v6867_v37 = vld [vmem:[%s7054_s5 + $0x670] ss:$20 sps:$4 sm:$0xff]  }
 0x20b   : > { %v7606_v13 = vpop.f32.mrb[118].mxu1  ;;  %v7608_v26 = vpop.f32.mrb[54].mxu0 }
 0x20c   : > { %8810 = vst [vmem:[#allocation39_spill] sm:$0xff] %v7606_v13  ;;  %8811 = vst [vmem:[#allocation40_spill] sm:$0xff] %v7608_v26  ;;  %v3076_v3 = vpop.f32.mrb[119].mxu1  ;;  %v3365_v6 = vpop.f32.mrb[55].mxu0  ;;  %v6868_v26 = vld [vmem:[%s7054_s5 + $0x308] ss:$20 sps:$4 sm:$0xff]  }
 0x20e   : > { %3575 = vmatmul.mubr.bf16.gmra.mrb[160].mxu0 %v6862_v44  ;;  %6070 = vmatmul.mubr.msk.bf16.gmra.mrb[224].mxu1 %vm2484_vm0, %v6863_v1  ;;  %v6869_v44 = vld [vmem:[%s7054_s5 + $0x69c] ss:$20 sps:$4 sm:$0xff]  }
 0x20f   : > { %3582 = vmatprep.mubr.bf16.mxu0 %v6864_v53  ;;  %6073 = vmatprep.mubr.msk.bf16.mxu1 %vm2484_vm0, %v6866_v56  ;;  %v6871_v1 = vld [vmem:[%s7054_s5 + $0x330] ss:$20 sps:$4 sm:$0xff]  }
 0x211   : > { %v7614_v54 = vpop.f32.mrb[120].mxu1  ;;  %v7616_v22 = vpop.f32.mrb[56].mxu0 }
 0x212   : > { %8812 = vst [vmem:[#allocation41_spill] sm:$0xff] %v7614_v54  ;;  %8813 = vst [vmem:[#allocation42_spill] sm:$0xff] %v7616_v22  ;;  %v3081_v29 = vpop.f32.mrb[121].mxu1  ;;  %v3370_v13 = vpop.f32.mrb[57].mxu0  ;;  %v6872_v54 = vld [vmem:[%s7054_s5 + $0x698] ss:$20 sps:$4 sm:$0xff]  }
 0x213   : > { %v7620_v40 = vpop.f32.mrb[122].mxu1  ;;  %v7622_v3 = vpop.f32.mrb[58].mxu0 }
 0x214   : > { %8814 = vst [vmem:[#allocation43_spill] sm:$0xff] %v7620_v40  ;;  %8815 = vst [vmem:[#allocation44_spill] sm:$0xff] %v7622_v3  ;;  %v3084_v53 = vpop.f32.mrb[123].mxu1  ;;  %v3373_v56 = vpop.f32.mrb[59].mxu0  ;;  %v6873_v3 = vld [vmem:[%s7054_s5 + $0x358] ss:$20 sps:$4 sm:$0xff]  }
 0x215   : > { %v6874_v53 = vld [vmem:[%s7054_s5 + $0x6c4] ss:$20 sps:$4 sm:$0xff]  }
 0x216   : > { %3583 = vmatmul.mubr.bf16.gmra.mrb[164].mxu0 %v6867_v37  ;;  %6074 = vmatmul.mubr.msk.bf16.gmra.mrb[228].mxu1 %vm2484_vm0, %v6868_v26  ;;  %v6876_v37 = vld [vmem:[%s7054_s5 + $0x380] ss:$20 sps:$4 sm:$0xff]  }
 0x217   : > { %3590 = vmatprep.mubr.bf16.mxu0 %v6869_v44  ;;  %6077 = vmatprep.mubr.msk.bf16.mxu1 %vm2484_vm0, %v6871_v1  ;;  %v7643_v1 = vld [vmem:[%s8770_s2] ss:$0 sm:$0xff] }
 0x219   : > { %v7628_v13 = vpop.f32.mrb[124].mxu1  ;;  %v7630_v6 = vpop.f32.mrb[60].mxu0 }
 0x21a   : > { %8816 = vst [vmem:[#allocation45_spill] sm:$0xff] %v7628_v13  ;;  %8817 = vst [vmem:[#allocation46_spill] sm:$0xff] %v7630_v6  ;;  %v3089_v29 = vpop.f32.mrb[125].mxu1  ;;  %v3378_v40 = vpop.f32.mrb[61].mxu0  ;;  %v2843_v13 = vadd.f32 %v7643_v1, %v7303_v23  ;;  %v2848_v23 = vadd.f32 %v7643_v1, %v7307_v27 }
 0x21b   : > { %v7634_v22 = vpop.f32.mrb[126].mxu1  ;;  %v7636_v0 = vpop.f32.mrb[62].mxu0  ;;  %v2840_v40 = vadd.f32 %v7643_v1, %v7299_v19 }
 0x21c   : > { %8818 = vst [vmem:[#allocation47_spill] sm:$0xff] %v7634_v22  ;;  %8819 = vst [vmem:[#allocation48_spill] sm:$0xff] %v7636_v0  ;;  %v3092_v26 = vpop.f32.mrb[127].mxu1  ;;  %v3381_v44 = vpop.f32.mrb[63].mxu0  ;;  %v6878_v0 = vld [vmem:[%s7054_s5 + $0x3a8] ss:$20 sps:$4 sm:$0xff]  }
 0x21e   : > { %3591 = vmatmul.mubr.bf16.gmra.mrb[168].mxu0 %v6872_v54  ;;  %6078 = vmatmul.mubr.msk.bf16.gmra.mrb[232].mxu1 %vm2484_vm0, %v6873_v3  ;;  %v6877_v54 = vld [vmem:[%s7054_s5 + $0x6c0] ss:$20 sps:$4 sm:$0xff]  }
 0x21f   : > { %3598 = vmatprep.mubr.bf16.mxu0 %v6874_v53  ;;  %6081 = vmatprep.mubr.msk.bf16.mxu1 %vm2484_vm0, %v6876_v37  ;;  %v6879_v53 = vld [vmem:[%s7054_s5 + $0x6ec] ss:$20 sps:$4 sm:$0xff]   ;;  %v6881_v37 = vld [vmem:[%s7054_s5 + $0x3d0] ss:$20 sps:$4 sm:$0xff]  }
 0x221   : > { %v7649_v56 = vpop.f32.mrb[128].mxu1  ;;  %v3384_v29 = vpop.f32.mrb[64].mxu0 }
 0x222   : > { %8820 = vst [vmem:[#allocation49_spill] sm:$0xff] %v7649_v56  ;;  %v7651_v26 = vadd.f32 %v3384_v29, %v2840_v40  ;;  %v3097_v44 = vpop.f32.mrb[129].mxu1  ;;  %v3386_v22 = vpop.f32.mrb[65].mxu0 }
 0x223   : > { %v7657_v6 = vpop.f32.mrb[130].mxu1  ;;  %v3387_v3 = vpop.f32.mrb[66].mxu0 }
 0x224   : > { %8821 = vst [vmem:[#allocation50_spill] sm:$0xff] %v7657_v6  ;;  %v7661_v19 = vadd.f32 %v3387_v3, %v2843_v13  ;;  %v3100_v56 = vpop.f32.mrb[131].mxu1  ;;  %v3389_v58 = vpop.f32.mrb[67].mxu0 }
 0x225   : > { %v2851_v58 = vadd.f32 %v7643_v1, %v7311_v31  ;;  %v6882_v56 = vld [vmem:[%s7054_s5 + $0x6e8] ss:$20 sps:$4 sm:$0xff]   ;;  %v2856_v31 = vadd.f32 %v7643_v1, %v7315_v35 }
 0x226   : > { %3599 = vmatmul.mubr.bf16.gmra.mrb[172].mxu0 %v6877_v54  ;;  %6082 = vmatmul.mubr.msk.bf16.gmra.mrb[236].mxu1 %vm2484_vm0, %v6878_v0  ;;  %v6883_v54 = vld [vmem:[%s7054_s5 + $0x3f8] ss:$20 sps:$4 sm:$0xff]  }
 0x227   : > { %3606 = vmatprep.mubr.bf16.mxu0 %v6879_v53  ;;  %6085 = vmatprep.mubr.msk.bf16.mxu1 %vm2484_vm0, %v6881_v37  ;;  %v6884_v53 = vld [vmem:[%s7054_s5 + $0x714] ss:$20 sps:$4 sm:$0xff]  }
 0x228   : > { %v6886_v37 = vld [vmem:[%s7054_s5 + $0x420] ss:$20 sps:$4 sm:$0xff]  }
 0x229   : > { %v7667_v22 = vpop.f32.mrb[132].mxu1  ;;  %v3392_v40 = vpop.f32.mrb[68].mxu0 }
 0x22a   : > { %8822 = vst [vmem:[#allocation51_spill] sm:$0xff] %v7667_v22  ;;  %v7669_v29 = vadd.f32 %v3392_v40, %v2848_v23  ;;  %v3105_v13 = vpop.f32.mrb[133].mxu1  ;;  %v3394_v44 = vpop.f32.mrb[69].mxu0 }
 0x22b   : > { %v7675_v3 = vpop.f32.mrb[134].mxu1  ;;  %v3395_v0 = vpop.f32.mrb[70].mxu0 }
 0x22c   : > { %8823 = vst [vmem:[#allocation52_spill] sm:$0xff] %v7675_v3  ;;  %v7679_v27 = vadd.f32 %v3395_v0, %v2851_v58  ;;  %v3108_v22 = vpop.f32.mrb[135].mxu1  ;;  %v3397_v6 = vpop.f32.mrb[71].mxu0 }
 0x22d   : > { %v2859_v6 = vadd.f32 %v7643_v1, %v7319_v39  ;;  %v6887_v22 = vld [vmem:[%s7054_s5 + $0x710] ss:$20 sps:$4 sm:$0xff]   ;;  %v2864_v39 = vadd.f32 %v7643_v1, %v7323_v43 }
 0x22e   : > { %3607 = vmatmul.mubr.bf16.gmra.mrb[176].mxu0 %v6882_v56  ;;  %6086 = vmatmul.mubr.msk.bf16.gmra.mrb[240].mxu1 %vm2484_vm0, %v6883_v54  ;;  %v6888_v56 = vld [vmem:[%s7054_s5 + $0x448] ss:$20 sps:$4 sm:$0xff]  }
 0x22f   : > { %3614 = vmatprep.mubr.bf16.mxu0 %v6884_v53  ;;  %6089 = vmatprep.mubr.msk.bf16.mxu1 %vm2484_vm0, %v6886_v37  ;;  %v6889_v53 = vld [vmem:[%s7054_s5 + $0x73c] ss:$20 sps:$4 sm:$0xff]  }
 0x230   : > { %v6891_v37 = vld [vmem:[%s7054_s5 + $0x470] ss:$20 sps:$4 sm:$0xff]  }
 0x231   : > { %v7685_v23 = vpop.f32.mrb[136].mxu1  ;;  %v3400_v40 = vpop.f32.mrb[72].mxu0 }
 0x232   : > { %8824 = vst [vmem:[#allocation53_spill] sm:$0xff] %v7685_v23  ;;  %v7687_v13 = vadd.f32 %v3400_v40, %v2856_v31  ;;  %v3113_v44 = vpop.f32.mrb[137].mxu1  ;;  %v3402_v58 = vpop.f32.mrb[73].mxu0 }
 0x233   : > { %v7693_v0 = vpop.f32.mrb[138].mxu1  ;;  %v3403_v54 = vpop.f32.mrb[74].mxu0 }
 0x234   : > { %8825 = vst [vmem:[#allocation54_spill] sm:$0xff] %v7693_v0  ;;  %v7697_v35 = vadd.f32 %v3403_v54, %v2859_v6  ;;  %v3116_v23 = vpop.f32.mrb[139].mxu1  ;;  %v3405_v3 = vpop.f32.mrb[75].mxu0 }
 0x235   : > { %v2867_v3 = vadd.f32 %v7643_v1, %v7327_v47  ;;  %v6892_v23 = vld [vmem:[%s7054_s5 + $0x738] ss:$20 sps:$4 sm:$0xff]   ;;  %v2872_v47 = vadd.f32 %v7643_v1, %v7331_v51 }
 0x236   : > { %3615 = vmatmul.mubr.bf16.gmra.mrb[180].mxu0 %v6887_v22  ;;  %6090 = vmatmul.mubr.msk.bf16.gmra.mrb[244].mxu1 %vm2484_vm0, %v6888_v56  ;;  %v6893_v22 = vld [vmem:[%s7054_s5 + $0x498] ss:$20 sps:$4 sm:$0xff]  }
 0x237   : > { %3622 = vmatprep.mubr.bf16.mxu0 %v6889_v53  ;;  %6093 = vmatprep.mubr.msk.bf16.mxu1 %vm2484_vm0, %v6891_v37  ;;  %v6894_v53 = vld [vmem:[%s7054_s5 + $0x764] ss:$20 sps:$4 sm:$0xff]   ;;  %v6896_v37 = vld [vmem:[%s7054_s5 + $0x4c0] ss:$20 sps:$4 sm:$0xff]  }
 0x239   : > { %v7703_v31 = vpop.f32.mrb[140].mxu1  ;;  %v3408_v40 = vpop.f32.mrb[76].mxu0 }
 0x23a   : > { %8826 = vst [vmem:[#allocation55_spill] sm:$0xff] %v7703_v31  ;;  %v7705_v44 = vadd.f32 %v3408_v40, %v2864_v39  ;;  %v3121_v58 = vpop.f32.mrb[141].mxu1  ;;  %v3410_v6 = vpop.f32.mrb[77].mxu0 }
 0x23b   : > { %v7711_v54 = vpop.f32.mrb[142].mxu1  ;;  %v3411_v56 = vpop.f32.mrb[78].mxu0 }
 0x23c   : > { %8827 = vst [vmem:[#allocation56_spill] sm:$0xff] %v7711_v54  ;;  %v7715_v43 = vadd.f32 %v3411_v56, %v2867_v3  ;;  %v3124_v31 = vpop.f32.mrb[143].mxu1  ;;  %v3413_v0 = vpop.f32.mrb[79].mxu0 }
 0x23d   : > { %v2875_v0 = vadd.f32 %v7643_v1, %v7335_v55  ;;  %v6897_v31 = vld [vmem:[%s7054_s5 + $0x760] ss:$20 sps:$4 sm:$0xff]   ;;  %v2880_v55 = vadd.f32 %v7643_v1, %v7339_v59 }
 0x23e   : > { %3623 = vmatmul.mubr.bf16.gmra.mrb[184].mxu0 %v6892_v23  ;;  %6094 = vmatmul.mubr.msk.bf16.gmra.mrb[248].mxu1 %vm2484_vm0, %v6893_v22  ;;  %v6898_v23 = vld [vmem:[%s7054_s5 + $0x4e8] ss:$20 sps:$4 sm:$0xff]  }
 0x23f   : > { %3630 = vmatprep.mubr.bf16.mxu0 %v6894_v53  ;;  %6097 = vmatprep.mubr.msk.bf16.mxu1 %vm2484_vm0, %v6896_v37  ;;  %v6899_v53 = vld [vmem:[%s7054_s5 + $0x78c] ss:$20 sps:$4 sm:$0xff]   ;;  %v6901_v37 = vld [vmem:[%s7054_s5 + $0x510] ss:$20 sps:$4 sm:$0xff]  }
 0x241   : > { %v7721_v39 = vpop.f32.mrb[144].mxu1  ;;  %v3416_v40 = vpop.f32.mrb[80].mxu0 }
 0x242   : > { %8828 = vst [vmem:[#allocation57_spill] sm:$0xff] %v7721_v39  ;;  %v7723_v58 = vadd.f32 %v3416_v40, %v2872_v47  ;;  %v3129_v6 = vpop.f32.mrb[145].mxu1  ;;  %v3418_v3 = vpop.f32.mrb[81].mxu0 }
 0x243   : > { %v7729_v56 = vpop.f32.mrb[146].mxu1  ;;  %v3419_v22 = vpop.f32.mrb[82].mxu0 }
 0x244   : > { %8829 = vst [vmem:[#allocation58_spill] sm:$0xff] %v7729_v56  ;;  %v7733_v51 = vadd.f32 %v3419_v22, %v2875_v0  ;;  %v3132_v39 = vpop.f32.mrb[147].mxu1  ;;  %v3421_v54 = vpop.f32.mrb[83].mxu0 }
 0x245   : > { %v2883_v54 = vadd.f32 %v7643_v1, %v7343_v63  ;;  %v6902_v39 = vld [vmem:[%s7054_s5 + $0x788] ss:$20 sps:$4 sm:$0xff]   ;;  %v2888_v63 = vadd.f32 %v7643_v1, %v7347_v4 }
 0x246   : > { %3631 = vmatmul.mubr.bf16.gmra.mrb[188].mxu0 %v6897_v31  ;;  %6098 = vmatmul.mubr.msk.bf16.gmra.mrb[252].mxu1 %vm2484_vm0, %v6898_v23  ;;  %v6903_v31 = vld [vmem:[%s7054_s5 + $0x538] ss:$20 sps:$4 sm:$0xff]  }
 0x247   : > { %3638 = vmatprep.mubr.bf16.mxu0 %v6899_v53  ;;  %6101 = vmatprep.mubr.msk.bf16.mxu1 %vm2484_vm0, %v6901_v37  ;;  %v6904_v53 = vld [vmem:[%s7054_s5 + $0x7b4] ss:$20 sps:$4 sm:$0xff]  }
 0x248   : > { %v6906_v37 = vld [vmem:[%s7054_s5 + $0x560] ss:$20 sps:$4 sm:$0xff]  }
 0x249   : > { %v7739_v47 = vpop.f32.mrb[148].mxu1  ;;  %v3424_v40 = vpop.f32.mrb[84].mxu0 }
 0x24a   : > { %8830 = vst [vmem:[#allocation59_spill] sm:$0xff] %v7739_v47  ;;  %v7741_v6 = vadd.f32 %v3424_v40, %v2880_v55  ;;  %v3137_v3 = vpop.f32.mrb[149].mxu1  ;;  %v3426_v0 = vpop.f32.mrb[85].mxu0 }
 0x24b   : > { %v7747_v22 = vpop.f32.mrb[150].mxu1  ;;  %v3427_v23 = vpop.f32.mrb[86].mxu0 }
 0x24c   : > { %8831 = vst [vmem:[#allocation60_spill] sm:$0xff] %v7747_v22  ;;  %v7751_v59 = vadd.f32 %v3427_v23, %v2883_v54  ;;  %v3140_v47 = vpop.f32.mrb[151].mxu1  ;;  %v3429_v56 = vpop.f32.mrb[87].mxu0 }
 0x24d   : > { %v2891_v56 = vadd.f32 %v7643_v1, %v7351_v8  ;;  %v6907_v47 = vld [vmem:[%s7054_s5 + $0x7b0] ss:$20 sps:$4 sm:$0xff]   ;;  %v2896_v8 = vadd.f32 %v7643_v1, %v7355_v12 }
 0x24e   : > { %3639 = vmatmul.mubr.bf16.gmra.mrb[192].mxu0 %v6902_v39  ;;  %6102 = vmatmul.mubr.msk.bf16.gmra.mrb[0].mxu1 %vm2484_vm0, %v6903_v31  ;;  %v6908_v39 = vld [vmem:[%s7054_s5 + $0x588] ss:$20 sps:$4 sm:$0xff]  }
 0x24f   : > { %3646 = vmatprep.mubr.bf16.mxu0 %v6904_v53  ;;  %6105 = vmatprep.mubr.msk.bf16.mxu1 %vm2484_vm0, %v6906_v37  ;;  %v6909_v53 = vld [vmem:[%s7054_s5 + $0x7dc] ss:$20 sps:$4 sm:$0xff]  }
 0x250   : > { %v6911_v37 = vld [vmem:[%s7054_s5 + $0x5b0] ss:$20 sps:$4 sm:$0xff]  }
 0x251   : > { %v7757_v55 = vpop.f32.mrb[152].mxu1  ;;  %v3432_v40 = vpop.f32.mrb[88].mxu0 }
 0x252   : > { %8832 = vst [vmem:[#allocation61_spill] sm:$0xff] %v7757_v55  ;;  %v7759_v3 = vadd.f32 %v3432_v40, %v2888_v63  ;;  %v3145_v0 = vpop.f32.mrb[153].mxu1  ;;  %v3434_v54 = vpop.f32.mrb[89].mxu0 }
 0x253   : > { %v7765_v23 = vpop.f32.mrb[154].mxu1  ;;  %v3435_v31 = vpop.f32.mrb[90].mxu0 }
 0x254   : > { %8833 = vst [vmem:[#allocation62_spill] sm:$0xff] %v7765_v23  ;;  %v7769_v4 = vadd.f32 %v3435_v31, %v2891_v56  ;;  %v3148_v55 = vpop.f32.mrb[155].mxu1  ;;  %v3437_v22 = vpop.f32.mrb[91].mxu0 }
 0x255   : > { %v2899_v22 = vadd.f32 %v7643_v1, %v7359_v15  ;;  %v6912_v55 = vld [vmem:[%s7054_s5 + $0x7d8] ss:$20 sps:$4 sm:$0xff]   ;;  %v2904_v15 = vadd.f32 %v7643_v1, %v7363_v20 }
 0x256   : > { %3647 = vmatmul.mubr.bf16.gmra.mrb[196].mxu0 %v6907_v47  ;;  %6106 = vmatmul.mubr.msk.bf16.gmra.mrb[4].mxu1 %vm2484_vm0, %v6908_v39  ;;  %v6913_v47 = vld [vmem:[%s7054_s5 + $0x5d8] ss:$20 sps:$4 sm:$0xff]  }
 0x257   : > { %3654 = vmatprep.mubr.bf16.mxu0 %v6909_v53  ;;  %6109 = vmatprep.mubr.msk.bf16.mxu1 %vm2484_vm0, %v6911_v37  ;;  %v6914_v53 = vld [vmem:[%s7054_s5 + $0x804] ss:$20 sps:$4 sm:$0xff]   ;;  %v6916_v37 = vld [vmem:[%s7054_s5 + $0x600] ss:$20 sps:$4 sm:$0xff]  }
 0x259   : > { %v7775_v63 = vpop.f32.mrb[156].mxu1  ;;  %v3440_v40 = vpop.f32.mrb[92].mxu0 }
 0x25a   : > { %8834 = vst [vmem:[#allocation63_spill] sm:$0xff] %v7775_v63  ;;  %v7777_v0 = vadd.f32 %v3440_v40, %v2896_v8  ;;  %v3153_v54 = vpop.f32.mrb[157].mxu1  ;;  %v3442_v56 = vpop.f32.mrb[93].mxu0 }
 0x25b   : > { %v7783_v31 = vpop.f32.mrb[158].mxu1  ;;  %v3443_v39 = vpop.f32.mrb[94].mxu0 }
 0x25c   : > { %8835 = vst [vmem:[#allocation64_spill] sm:$0xff] %v7783_v31  ;;  %v7787_v12 = vadd.f32 %v3443_v39, %v2899_v22  ;;  %v3156_v63 = vpop.f32.mrb[159].mxu1  ;;  %v3445_v23 = vpop.f32.mrb[95].mxu0 }
 0x25d   : > { %v2907_v23 = vadd.f32 %v7643_v1, %v7367_v25  ;;  %v6917_v63 = vld [vmem:[%s7054_s5 + $0x800] ss:$20 sps:$4 sm:$0xff]   ;;  %v2912_v25 = vadd.f32 %v7643_v1, %v7371_v30 }
 0x25e   : > { %3655 = vmatmul.mubr.bf16.gmra.mrb[200].mxu0 %v6912_v55  ;;  %6110 = vmatmul.mubr.msk.bf16.gmra.mrb[8].mxu1 %vm2484_vm0, %v6913_v47  ;;  %v6918_v55 = vld [vmem:[%s7054_s5 + $0x628] ss:$20 sps:$4 sm:$0xff]  }
 0x25f   : > { %3662 = vmatprep.mubr.bf16.mxu0 %v6914_v53  ;;  %6113 = vmatprep.mubr.msk.bf16.mxu1 %vm2484_vm0, %v6916_v37  ;;  %v6919_v53 = vld [vmem:[%s7054_s5 + $0x82c] ss:$20 sps:$4 sm:$0xff]   ;;  %v6921_v37 = vld [vmem:[%s7054_s5 + $0x650] ss:$20 sps:$4 sm:$0xff]  }
 0x261   : > { %v7793_v8 = vpop.f32.mrb[160].mxu1  ;;  %v3448_v40 = vpop.f32.mrb[96].mxu0 }
 0x262   : > { %8836 = vst [vmem:[#allocation65_spill] sm:$0xff] %v7793_v8  ;;  %v7795_v54 = vadd.f32 %v3448_v40, %v2904_v15  ;;  %v3161_v56 = vpop.f32.mrb[161].mxu1  ;;  %v3450_v22 = vpop.f32.mrb[97].mxu0 }
 0x263   : > { %v7801_v39 = vpop.f32.mrb[162].mxu1  ;;  %v3451_v47 = vpop.f32.mrb[98].mxu0 }
 0x264   : > { %8837 = vst [vmem:[#allocation66_spill] sm:$0xff] %v7801_v39  ;;  %v7805_v20 = vadd.f32 %v3451_v47, %v2907_v23  ;;  %v3164_v8 = vpop.f32.mrb[163].mxu1  ;;  %v3453_v31 = vpop.f32.mrb[99].mxu0 }
 0x265   : > { %v2915_v31 = vadd.f32 %v7643_v1, %v7375_v36  ;;  %v6922_v8 = vld [vmem:[%s7054_s5 + $0x828] ss:$20 sps:$4 sm:$0xff]   ;;  %v2920_v36 = vadd.f32 %v7643_v1, %v7379_v41 }
 0x266   : > { %3663 = vmatmul.mubr.bf16.gmra.mrb[204].mxu0 %v6917_v63  ;;  %6114 = vmatmul.mubr.msk.bf16.gmra.mrb[12].mxu1 %vm2484_vm0, %v6918_v55  ;;  %v6923_v63 = vld [vmem:[%s7054_s5 + $0x678] ss:$20 sps:$4 sm:$0xff]  }
 0x267   : > { %3670 = vmatprep.mubr.bf16.mxu0 %v6919_v53  ;;  %6117 = vmatprep.mubr.msk.bf16.mxu1 %vm2484_vm0, %v6921_v37  ;;  %v6924_v53 = vld [vmem:[%s7054_s5 + $0x854] ss:$20 sps:$4 sm:$0xff]  }
 0x268   : > { %v6926_v37 = vld [vmem:[%s7054_s5 + $0x6a0] ss:$20 sps:$4 sm:$0xff]  }
 0x269   : > { %v7811_v15 = vpop.f32.mrb[164].mxu1  ;;  %v3456_v40 = vpop.f32.mrb[100].mxu0 }
 0x26a   : > { %8838 = vst [vmem:[#allocation67_spill] sm:$0xff] %v7811_v15  ;;  %v7813_v56 = vadd.f32 %v3456_v40, %v2912_v25  ;;  %v3169_v22 = vpop.f32.mrb[165].mxu1  ;;  %v3458_v23 = vpop.f32.mrb[101].mxu0 }
 0x26b   : > { %v7819_v47 = vpop.f32.mrb[166].mxu1  ;;  %v3459_v55 = vpop.f32.mrb[102].mxu0 }
 0x26c   : > { %8839 = vst [vmem:[#allocation68_spill] sm:$0xff] %v7819_v47  ;;  %v7823_v30 = vadd.f32 %v3459_v55, %v2915_v31  ;;  %v3172_v15 = vpop.f32.mrb[167].mxu1  ;;  %v3461_v39 = vpop.f32.mrb[103].mxu0 }
 0x26d   : > { %v2923_v39 = vadd.f32 %v7643_v1, %v7383_v46  ;;  %v6927_v15 = vld [vmem:[%s7054_s5 + $0x850] ss:$20 sps:$4 sm:$0xff]   ;;  %v2928_v46 = vadd.f32 %v7643_v1, %v7387_v52 }
 0x26e   : > { %3671 = vmatmul.mubr.bf16.gmra.mrb[208].mxu0 %v6922_v8  ;;  %6118 = vmatmul.mubr.msk.bf16.gmra.mrb[16].mxu1 %vm2484_vm0, %v6923_v63  ;;  %v6928_v8 = vld [vmem:[%s7054_s5 + $0x6c8] ss:$20 sps:$4 sm:$0xff]  }
 0x26f   : > { %3678 = vmatprep.mubr.bf16.mxu0 %v6924_v53  ;;  %6121 = vmatprep.mubr.msk.bf16.mxu1 %vm2484_vm0, %v6926_v37  ;;  %v6929_v53 = vld [vmem:[%s7054_s5 + $0x87c] ss:$20 sps:$4 sm:$0xff]  }
 0x270   : > { %v6931_v37 = vld [vmem:[%s7054_s5 + $0x6f0] ss:$20 sps:$4 sm:$0xff]  }
 0x271   : > { %v7829_v25 = vpop.f32.mrb[168].mxu1  ;;  %v3464_v40 = vpop.f32.mrb[104].mxu0 }
 0x272   : > { %8840 = vst [vmem:[#allocation69_spill] sm:$0xff] %v7829_v25  ;;  %v7831_v22 = vadd.f32 %v3464_v40, %v2920_v36  ;;  %v3177_v23 = vpop.f32.mrb[169].mxu1  ;;  %v3466_v31 = vpop.f32.mrb[105].mxu0 }
 0x273   : > { %v7837_v55 = vpop.f32.mrb[170].mxu1  ;;  %v3467_v63 = vpop.f32.mrb[106].mxu0 }
 0x274   : > { %8841 = vst [vmem:[#allocation70_spill] sm:$0xff] %v7837_v55  ;;  %v7841_v41 = vadd.f32 %v3467_v63, %v2923_v39  ;;  %v3180_v25 = vpop.f32.mrb[171].mxu1  ;;  %v3469_v47 = vpop.f32.mrb[107].mxu0 }
 0x275   : > { %v2931_v47 = vadd.f32 %v7643_v1, %v7391_v57  ;;  %v6932_v25 = vld [vmem:[%s7054_s5 + $0x878] ss:$20 sps:$4 sm:$0xff]   ;;  %v2936_v57 = vadd.f32 %v7643_v1, %v7395_v62 }
 0x276   : > { %3679 = vmatmul.mubr.bf16.gmra.mrb[212].mxu0 %v6927_v15  ;;  %6122 = vmatmul.mubr.msk.bf16.gmra.mrb[20].mxu1 %vm2484_vm0, %v6928_v8  ;;  %v6933_v15 = vld [vmem:[%s7054_s5 + $0x718] ss:$20 sps:$4 sm:$0xff]  }
 0x277   : > { %3686 = vmatprep.mubr.bf16.mxu0 %v6929_v53  ;;  %6125 = vmatprep.mubr.msk.bf16.mxu1 %vm2484_vm0, %v6931_v37  ;;  %v6934_v53 = vld [vmem:[%s7054_s5 + $0x8a4] ss:$20 sps:$4 sm:$0xff]   ;;  %v6936_v37 = vld [vmem:[%s7054_s5 + $0x740] ss:$20 sps:$4 sm:$0xff]  }
 0x279   : > { %v7847_v36 = vpop.f32.mrb[172].mxu1  ;;  %v3472_v40 = vpop.f32.mrb[108].mxu0 }
 0x27a   : > { %8842 = vst [vmem:[#allocation71_spill] sm:$0xff] %v7847_v36  ;;  %v7849_v23 = vadd.f32 %v3472_v40, %v2928_v46  ;;  %v3185_v31 = vpop.f32.mrb[173].mxu1  ;;  %v3474_v39 = vpop.f32.mrb[109].mxu0 }
 0x27b   : > { %v7855_v63 = vpop.f32.mrb[174].mxu1  ;;  %v3475_v8 = vpop.f32.mrb[110].mxu0 }
 0x27c   : > { %8843 = vst [vmem:[#allocation72_spill] sm:$0xff] %v7855_v63  ;;  %v7859_v52 = vadd.f32 %v3475_v8, %v2931_v47  ;;  %v3188_v36 = vpop.f32.mrb[175].mxu1  ;;  %v3477_v55 = vpop.f32.mrb[111].mxu0 }
 0x27d   : > { %v2939_v55 = vadd.f32 %v7643_v1, %v7399_v5  ;;  %v6937_v36 = vld [vmem:[%s7054_s5 + $0x8a0] ss:$20 sps:$4 sm:$0xff]   ;;  %v2944_v5 = vadd.f32 %v7643_v1, %v7403_v10 }
 0x27e   : > { %3687 = vmatmul.mubr.bf16.gmra.mrb[216].mxu0 %v6932_v25  ;;  %6126 = vmatmul.mubr.msk.bf16.gmra.mrb[24].mxu1 %vm2484_vm0, %v6933_v15  ;;  %v6938_v25 = vld [vmem:[%s7054_s5 + $0x768] ss:$20 sps:$4 sm:$0xff]  }
 0x27f   : > { %3694 = vmatprep.mubr.bf16.mxu0 %v6934_v53  ;;  %6129 = vmatprep.mubr.msk.bf16.mxu1 %vm2484_vm0, %v6936_v37  ;;  %v6939_v53 = vld [vmem:[%s7054_s5 + $0x8cc] ss:$20 sps:$4 sm:$0xff]   ;;  %v6941_v37 = vld [vmem:[%s7054_s5 + $0x790] ss:$20 sps:$4 sm:$0xff]  }
 0x281   : > { %v7865_v46 = vpop.f32.mrb[176].mxu1  ;;  %v3480_v40 = vpop.f32.mrb[112].mxu0 }
 0x282   : > { %8844 = vst [vmem:[#allocation73_spill] sm:$0xff] %v7865_v46  ;;  %v7867_v31 = vadd.f32 %v3480_v40, %v2936_v57  ;;  %v3193_v39 = vpop.f32.mrb[177].mxu1  ;;  %v3482_v47 = vpop.f32.mrb[113].mxu0 }
 0x283   : > { %v7873_v8 = vpop.f32.mrb[178].mxu1  ;;  %v3483_v15 = vpop.f32.mrb[114].mxu0 }
 0x284   : > { %8845 = vst [vmem:[#allocation74_spill] sm:$0xff] %v7873_v8  ;;  %v7877_v62 = vadd.f32 %v3483_v15, %v2939_v55  ;;  %v3196_v46 = vpop.f32.mrb[179].mxu1  ;;  %v3485_v63 = vpop.f32.mrb[115].mxu0 }
 0x285   : > { %v2947_v63 = vadd.f32 %v7643_v1, %v7407_v14  ;;  %v6942_v46 = vld [vmem:[%s7054_s5 + $0x8c8] ss:$20 sps:$4 sm:$0xff]   ;;  %v2952_v14 = vadd.f32 %v7643_v1, %v7411_v21 }
 0x286   : > { %3695 = vmatmul.mubr.bf16.gmra.mrb[220].mxu0 %v6937_v36  ;;  %6130 = vmatmul.mubr.msk.bf16.gmra.mrb[28].mxu1 %vm2484_vm0, %v6938_v25  ;;  %v6943_v36 = vld [vmem:[%s7054_s5 + $0x7b8] ss:$20 sps:$4 sm:$0xff]  }
 0x287   : > { %3702 = vmatprep.mubr.bf16.mxu0 %v6939_v53  ;;  %6133 = vmatprep.mubr.msk.bf16.mxu1 %vm2484_vm0, %v6941_v37  ;;  %v6944_v53 = vld [vmem:[%s7054_s5 + $0x8f4] ss:$20 sps:$4 sm:$0xff]  }
 0x288   : > { %v6946_v37 = vld [vmem:[%s7054_s5 + $0x7e0] ss:$20 sps:$4 sm:$0xff]  }
 0x289   : > { %v7883_v57 = vpop.f32.mrb[180].mxu1  ;;  %v3488_v40 = vpop.f32.mrb[116].mxu0 }
 0x28a   : > { %8846 = vst [vmem:[#allocation75_spill] sm:$0xff] %v7883_v57  ;;  %v7885_v39 = vadd.f32 %v3488_v40, %v2944_v5  ;;  %v3201_v47 = vpop.f32.mrb[181].mxu1  ;;  %v3490_v55 = vpop.f32.mrb[117].mxu0 }
 0x28b   : > { %v7891_v15 = vpop.f32.mrb[182].mxu1  ;;  %v3491_v25 = vpop.f32.mrb[118].mxu0 }
 0x28c   : > { %8847 = vst [vmem:[#allocation76_spill] sm:$0xff] %v7891_v15  ;;  %v7895_v10 = vadd.f32 %v3491_v25, %v2947_v63  ;;  %v3204_v57 = vpop.f32.mrb[183].mxu1  ;;  %v3493_v8 = vpop.f32.mrb[119].mxu0 }
 0x28d   : > { %v2955_v8 = vadd.f32 %v7643_v1, %v7415_v28  ;;  %v6947_v57 = vld [vmem:[%s7054_s5 + $0x8f0] ss:$20 sps:$4 sm:$0xff]   ;;  %v2960_v28 = vadd.f32 %v7643_v1, %v7419_v34 }
 0x28e   : > { %3703 = vmatmul.mubr.bf16.gmra.mrb[224].mxu0 %v6942_v46  ;;  %6134 = vmatmul.mubr.msk.bf16.gmra.mrb[32].mxu1 %vm2484_vm0, %v6943_v36  ;;  %v6948_v46 = vld [vmem:[%s7054_s5 + $0x808] ss:$20 sps:$4 sm:$0xff]  }
 0x28f   : > { %3710 = vmatprep.mubr.bf16.mxu0 %v6944_v53  ;;  %6137 = vmatprep.mubr.msk.bf16.mxu1 %vm2484_vm0, %v6946_v37  ;;  %v6949_v53 = vld [vmem:[%s7054_s5 + $0x91c] ss:$20 sps:$4 sm:$0xff]  }
 0x290   : > { %v6951_v37 = vld [vmem:[%s7054_s5 + $0x830] ss:$20 sps:$4 sm:$0xff]  }
 0x291   : > { %v7901_v5 = vpop.f32.mrb[184].mxu1  ;;  %v3496_v40 = vpop.f32.mrb[120].mxu0 }
 0x292   : > { %8848 = vst [vmem:[#allocation77_spill] sm:$0xff] %v7901_v5  ;;  %v7903_v47 = vadd.f32 %v3496_v40, %v2952_v14  ;;  %v3209_v55 = vpop.f32.mrb[185].mxu1  ;;  %v3498_v63 = vpop.f32.mrb[121].mxu0 }
 0x293   : > { %v7909_v25 = vpop.f32.mrb[186].mxu1  ;;  %v3499_v36 = vpop.f32.mrb[122].mxu0 }
 0x294   : > { %8849 = vst [vmem:[#allocation78_spill] sm:$0xff] %v7903_v47  ;;  %8850 = vst [vmem:[#allocation79_spill] sm:$0xff] %v7909_v25  ;;  %v7913_v21 = vadd.f32 %v3499_v36, %v2955_v8  ;;  %v3212_v5 = vpop.f32.mrb[187].mxu1  ;;  %v3501_v15 = vpop.f32.mrb[123].mxu0  ;;  %v6961_v47 = vld [vmem:[%s7054_s5 + $0x8d0] ss:$20 sps:$4 sm:$0xff]  }
 0x295   : > { %v2963_v15 = vadd.f32 %v7643_v1, %v7423_v42  ;;  %v6952_v5 = vld [vmem:[%s7054_s5 + $0x918] ss:$20 sps:$4 sm:$0xff]   ;;  %v2968_v42 = vadd.f32 %v7643_v1, %v7427_v49  ;;  %v6200_v49 = vadd.f32 %v7643_v1, %v7447_v18 }
 0x296   : > { %8851 = vst [vmem:[#allocation80_spill] sm:$0xff] %v7913_v21  ;;  %3711 = vmatmul.mubr.bf16.gmra.mrb[228].mxu0 %v6947_v57  ;;  %6138 = vmatmul.mubr.msk.bf16.gmra.mrb[36].mxu1 %vm2484_vm0, %v6948_v46  ;;  %v6953_v57 = vld [vmem:[%s7054_s5 + $0x858] ss:$20 sps:$4 sm:$0xff]  }
 0x297   : > { %3718 = vmatprep.mubr.bf16.mxu0 %v6949_v53  ;;  %6141 = vmatprep.mubr.msk.bf16.mxu1 %vm2484_vm0, %v6951_v37  ;;  %v6954_v53 = vld [vmem:[%s7054_s5 + $0x944] ss:$20 sps:$4 sm:$0xff]   ;;  %v6956_v37 = vld [vmem:[%s7054_s5 + $0x880] ss:$20 sps:$4 sm:$0xff]  }
 0x299   : > { %v7919_v14 = vpop.f32.mrb[188].mxu1  ;;  %v3504_v40 = vpop.f32.mrb[124].mxu0 }
 0x29a   : > { %8852 = vst [vmem:[#allocation81_spill] sm:$0xff] %v7919_v14  ;;  %v7921_v55 = vadd.f32 %v3504_v40, %v2960_v28  ;;  %v3217_v63 = vpop.f32.mrb[189].mxu1  ;;  %v3506_v8 = vpop.f32.mrb[125].mxu0  ;;  %v6199_v28 = vadd.f32 %v7643_v1, %v7441_v9  ;;  %v6197_v40 = vadd.f32 %v7643_v1, %v7429_v50 }
 0x29b   : > { %v7927_v36 = vpop.f32.mrb[190].mxu1  ;;  %v3507_v46 = vpop.f32.mrb[126].mxu0  ;;  %v7944_v8 = vld [vmem:[%s8771_s3] ss:$0 sm:$0xff] }
 0x29c   : > { %8853 = vst [vmem:[#allocation82_spill] sm:$0xff] %v7921_v55  ;;  %8854 = vst [vmem:[#allocation83_spill] sm:$0xff] %v7927_v36  ;;  %v7931_v25 = vadd.f32 %v3507_v46, %v2963_v15  ;;  %v3220_v34 = vpop.f32.mrb[191].mxu1  ;;  %v3509_v21 = vpop.f32.mrb[127].mxu0  ;;  %v2971_v15 = vadd.f32 %v7643_v1, %v7433_v60  ;;  %v6957_v46 = vld [vmem:[%s7054_s5 + $0x940] ss:$20 sps:$4 sm:$0xff]  }
 0x29e   : > { %8855 = vst [vmem:[#allocation84_spill] sm:$0xff] %v7931_v25  ;;  %3719 = vmatmul.mubr.bf16.gmra.mrb[232].mxu0 %v6952_v5  ;;  %6142 = vmatmul.mubr.msk.bf16.gmra.mrb[40].mxu1 %vm2484_vm0, %v6953_v57  ;;  %v6959_v25 = vld [vmem:[%s7054_s5 + $0x96c] ss:$20 sps:$4 sm:$0xff]  }
 0x29f   : > { %3726 = vmatprep.mubr.bf16.mxu0 %v6954_v53  ;;  %6145 = vmatprep.mubr.msk.bf16.mxu1 %vm2484_vm0, %v6956_v37  ;;  %v6958_v53 = vld [vmem:[%s7054_s5 + $0x8a8] ss:$20 sps:$4 sm:$0xff]   ;;  %v6198_v37 = vadd.f32 %v7643_v1, %v7435_v61 }
 0x2a1   : > { %v3512_v63 = vpop.f32.mrb[128].mxu0  ;;  %v6039_v21 = vpop.f32.mrb[192].mxu1 }
 0x2a2   : > { %v7950_v9 = vadd.f32 %v3512_v63, %v2968_v42  ;;  %v3810_v5 = vadd.f32 %v6199_v28, %v6039_v21  ;;  %v3514_v50 = vpop.f32.mrb[129].mxu0  ;;  %v3801_v57 = vpop.f32.mrb[193].mxu1 }
 0x2a3   : > { %v3802_v34 = vadd.f32 %v6197_v40, %v3801_v57  ;;  %v3515_v36 = vpop.f32.mrb[130].mxu0  ;;  %v6040_v14 = vpop.f32.mrb[194].mxu1  ;;  %v6203_v40 = vadd.f32 %v7643_v1, %v7465_v2  ;;  %v6204_v2 = vadd.f32 %v7643_v1, %v7471_v16 }
 0x2a4   : > { %8856 = vst [vmem:[#allocation85_spill] sm:$0xff] %v7950_v9  ;;  %v4314_v60 = vmax.f32 %v3810_v5, 0.0  ;;  %v7959_v55 = vadd.f32 %v3515_v36, %v2971_v15  ;;  %v3813_v18 = vadd.f32 %v6200_v49, %v6040_v14  ;;  %v3517_v42 = vpop.f32.mrb[131].mxu0  ;;  %v3804_v63 = vpop.f32.mrb[195].mxu1  ;;  %v2976_v36 = vadd.f32 %v7643_v1, %v7439_v7 }
 0x2a5   : > { %v4312_v28 = vmax.f32 %v3802_v34, 0.0  ;;  %v3805_v21 = vadd.f32 %v6198_v37, %v3804_v63  ;;  %v2979_v5 = vadd.f32 %v7643_v1, %v7445_v17 }
 0x2a6   : > { %v4449_v50 = vadd.f32 %v7944_v8, %v4314_v60  ;;  %v4315_v9 = vmax.f32 %v3813_v18, 0.0  ;;  %3727 = vmatmul.mubr.bf16.gmra.mrb[236].mxu0 %v6957_v46  ;;  %6146 = vmatmul.mubr.msk.bf16.gmra.mrb[44].mxu1 %vm2484_vm0, %v6958_v53  ;;  %v6963_v60 = vld [vmem:[%s7054_s5 + $0x8f8] ss:$20 sps:$4 sm:$0xff]   ;;  %v6202_v18 = vadd.f32 %v7643_v1, %v7459_v48 }
 0x2a7   : > { %v4447_v61 = vadd.f32 %v7944_v8, %v4312_v28  ;;  %v4313_v14 = vmax.f32 %v3805_v21, 0.0  ;;  %3734 = vmatprep.mubr.bf16.mxu0 %v6959_v25  ;;  %6149 = vmatprep.mubr.msk.bf16.mxu1 %vm2484_vm0, %v6961_v47  ;;  %v6201_v25 = vadd.f32 %v7643_v1, %v7453_v33  ;;  %v6962_v33 = vld [vmem:[%s7054_s5 + $0x968] ss:$20 sps:$4 sm:$0xff]  }
 0x2a8   : > { %v5835_v15 = vpack.c.bf16 %v4449_v50, %v4449_v50  ;;  %v4450_v49 = vadd.f32 %v7944_v8, %v4315_v9  ;;  %v6964_v21 = vld [vmem:[%s7054_s5 + $0x994] ss:$20 sps:$4 sm:$0xff]  }
 0x2a9   : > { %v5833_v57 = vpack.c.bf16 %v4447_v61, %v4447_v61  ;;  %v4448_v47 = vadd.f32 %v7944_v8, %v4313_v14  ;;  %v3520_v46 = vpop.f32.mrb[132].mxu0  ;;  %v6043_v7 = vpop.f32.mrb[196].mxu1  ;;  %v6966_v50 = vld [vmem:[%s7054_s5 + $0x920] ss:$20 sps:$4 sm:$0xff]  }
 0x2aa   : > { %5090 = vst.msk [vmem:[%s7966_s6 + $0x8] sm:$0xf] %vm5087_vm1, %v5835_v15  ;;  %v5836_v9 = vpack.c.bf16 %v4450_v49, %v4450_v49  ;;  %v7984_v53 = vadd.f32 %v3520_v46, %v2976_v36  ;;  %v3826_v17 = vadd.f32 %v6203_v40, %v6043_v7  ;;  %v3522_v37 = vpop.f32.mrb[133].mxu0  ;;  %v3817_v34 = vpop.f32.mrb[197].mxu1  ;;  %v6207_v7 = vadd.f32 %v7643_v1, %v7490_v24 }
 0x2ab   : > { %5088 = vst.msk [vmem:[%s7966_s6] sm:$0xf] %vm5087_vm1, %v5833_v57  ;;  %v5834_v42 = vpack.c.bf16 %v4448_v47, %v4448_v47  ;;  %v3818_v16 = vadd.f32 %v6201_v25, %v3817_v34  ;;  %v3523_v63 = vpop.f32.mrb[134].mxu0  ;;  %v6044_v28 = vpop.f32.mrb[198].mxu1  ;;  %v6205_v37 = vadd.f32 %v7643_v1, %v7477_v38  ;;  %v6208_v24 = vadd.f32 %v7643_v1, %v7496_v11  ;;  %v6967_v38 = vld [vmem:[%s7054_s5 + $0x990] ss:$20 sps:$4 sm:$0xff]  }
 0x2ac   : > { %5091 = vst.msk [vmem:[%s7966_s6 + $0xc] sm:$0xf] %vm5087_vm1, %v5836_v9  ;;  %v4318_v61 = vmax.f32 %v3826_v17, 0.0  ;;  %v7996_v14 = vadd.f32 %v3523_v63, %v2979_v5  ;;  %v3829_v36 = vadd.f32 %v6204_v2, %v6044_v28  ;;  %v3525_v40 = vpop.f32.mrb[135].mxu0  ;;  %v3820_v15 = vpop.f32.mrb[199].mxu1  ;;  %v2984_v5 = vadd.f32 %v7643_v1, %v7451_v32 }
 0x2ad   : > { %5089 = vst.msk [vmem:[%s7966_s6 + $0x4] sm:$0xf] %vm5087_vm1, %v5834_v42  ;;  %v4316_v49 = vmax.f32 %v3818_v16, 0.0  ;;  %v3821_v48 = vadd.f32 %v6202_v18, %v3820_v15  ;;  %v2987_v17 = vadd.f32 %v7643_v1, %v7457_v45  ;;  %v6968_v28 = vld [vmem:[%s7054_s5 + $0x948] ss:$20 sps:$4 sm:$0xff]  }
 0x2ae   : > { %v4453_v57 = vadd.f32 %v7944_v8, %v4318_v61  ;;  %v4319_v47 = vmax.f32 %v3829_v36, 0.0  ;;  %3735 = vmatmul.mubr.bf16.gmra.mrb[240].mxu0 %v6962_v33  ;;  %6150 = vmatmul.mubr.msk.bf16.gmra.mrb[48].mxu1 %vm2484_vm0, %v6963_v60  ;;  %v6969_v15 = vld [vmem:[%s7054_s5 + $0x9bc] ss:$20 sps:$4 sm:$0xff]  }
 0x2af   : > { %v4451_v25 = vadd.f32 %v7944_v8, %v4316_v49  ;;  %v4317_v46 = vmax.f32 %v3821_v48, 0.0  ;;  %3742 = vmatprep.mubr.bf16.mxu0 %v6964_v21  ;;  %6153 = vmatprep.mubr.msk.bf16.mxu1 %vm2484_vm0, %v6966_v50  ;;  %v8857_v21 = vld [vmem:[#allocation6_spill] sm:$0xff] }
 0x2b0   : > { %v5839_v2 = vpack.c.bf16 %v4453_v57, %v4453_v57  ;;  %v4454_v9 = vadd.f32 %v7944_v8, %v4319_v47  ;;  %v6206_v50 = vadd.f32 %v7643_v1, %v8857_v21  ;;  %v6971_v49 = vld [vmem:[%s7054_s5 + $0x970] ss:$20 sps:$4 sm:$0xff]  }
 0x2b1   : > { %v5837_v34 = vpack.c.bf16 %v4451_v25, %v4451_v25  ;;  %v4452_v33 = vadd.f32 %v7944_v8, %v4317_v46  ;;  %v3528_v60 = vpop.f32.mrb[136].mxu0  ;;  %v6047_v32 = vpop.f32.mrb[200].mxu1 }
 0x2b2   : > { %5094 = vst.msk [vmem:[%s7966_s6 + $0x18] sm:$0xf] %vm5087_vm1, %v5839_v2  ;;  %v5840_v18 = vpack.c.bf16 %v4454_v9, %v4454_v9  ;;  %v8018_v42 = vadd.f32 %v3528_v60, %v2984_v5  ;;  %v3842_v45 = vadd.f32 %v6207_v7, %v6047_v32  ;;  %v3530_v16 = vpop.f32.mrb[137].mxu0  ;;  %v3833_v63 = vpop.f32.mrb[201].mxu1  ;;  %v8859_v60 = vld [vmem:[#allocation14_spill] sm:$0xff] }
 0x2b3   : > { %5092 = vst.msk [vmem:[%s7966_s6 + $0x10] sm:$0xf] %vm5087_vm1, %v5837_v34  ;;  %v5838_v61 = vpack.c.bf16 %v4452_v33, %v4452_v33  ;;  %v3834_v11 = vadd.f32 %v6205_v37, %v3833_v63  ;;  %v3531_v36 = vpop.f32.mrb[138].mxu0  ;;  %v6048_v40 = vpop.f32.mrb[202].mxu1  ;;  %v6211_v32 = vadd.f32 %v7643_v1, %v8859_v60  ;;  %v8861_v63 = vld [vmem:[#allocation10_spill] sm:$0xff] }
 0x2b4   : > { %5095 = vst.msk [vmem:[%s7966_s6 + $0x1c] sm:$0xf] %vm5087_vm1, %v5840_v18  ;;  %v4322_v48 = vmax.f32 %v3842_v45, 0.0  ;;  %v8030_v57 = vadd.f32 %v3531_v36, %v2987_v17  ;;  %v3845_v47 = vadd.f32 %v6208_v24, %v6048_v40  ;;  %v3533_v25 = vpop.f32.mrb[139].mxu0  ;;  %v3836_v46 = vpop.f32.mrb[203].mxu1  ;;  %v8858_v17 = vld [vmem:[#allocation2_spill] sm:$0xff] }
 0x2b5   : > { %5093 = vst.msk [vmem:[%s7966_s6 + $0x14] sm:$0xf] %vm5087_vm1, %v5838_v61  ;;  %v4320_v5 = vmax.f32 %v3834_v11, 0.0  ;;  %v3837_v7 = vadd.f32 %v6206_v50, %v3836_v46  ;;  %v2992_v33 = vadd.f32 %v7643_v1, %v8858_v17  ;;  %v8860_v45 = vld [vmem:[#allocation3_spill] sm:$0xff]  ;;  %v8862_v11 = vld [vmem:[#allocation16_spill] sm:$0xff] }
 0x2b6   : > { %v4457_v2 = vadd.f32 %v7944_v8, %v4322_v48  ;;  %v4323_v9 = vmax.f32 %v3845_v47, 0.0  ;;  %3743 = vmatmul.mubr.bf16.gmra.mrb[244].mxu0 %v6967_v38  ;;  %6154 = vmatmul.mubr.msk.bf16.gmra.mrb[52].mxu1 %vm2484_vm0, %v6968_v28  ;;  %v2995_v16 = vadd.f32 %v7643_v1, %v8860_v45  ;;  %v6209_v38 = vadd.f32 %v7643_v1, %v8861_v63  ;;  %v6972_v25 = vld [vmem:[%s7054_s5 + $0x9b8] ss:$20 sps:$4 sm:$0xff]   ;;  %v6976_v60 = vld [vmem:[%s7054_s5 + $0x9c0] ss:$20 sps:$4 sm:$0xff]  }
 0x2b7   : > { %v4455_v37 = vadd.f32 %v7944_v8, %v4320_v5  ;;  %v4321_v34 = vmax.f32 %v3837_v7, 0.0  ;;  %3750 = vmatprep.mubr.bf16.mxu0 %v6969_v15  ;;  %6157 = vmatprep.mubr.msk.bf16.mxu1 %vm2484_vm0, %v6971_v49  ;;  %v6212_v36 = vadd.f32 %v7643_v1, %v8862_v11  ;;  %v6973_v46 = vld [vmem:[%s7054_s5 + $0x998] ss:$20 sps:$4 sm:$0xff]   ;;  %v8863_v5 = vld [vmem:[#allocation12_spill] sm:$0xff] }
 0x2b8   : > { %v5843_v24 = vpack.c.bf16 %v4457_v2, %v4457_v2  ;;  %v4458_v18 = vadd.f32 %v7944_v8, %v4323_v9  ;;  %v6210_v7 = vadd.f32 %v7643_v1, %v8863_v5  ;;  %v6974_v17 = vld [vmem:[%s7054_s5 + $0x9e4] ss:$20 sps:$4 sm:$0xff]  }
 0x2b9   : > { %v5841_v28 = vpack.c.bf16 %v4455_v37, %v4455_v37  ;;  %v4456_v21 = vadd.f32 %v7944_v8, %v4321_v34  ;;  %v3536_v50 = vpop.f32.mrb[140].mxu0  ;;  %v6051_v61 = vpop.f32.mrb[204].mxu1 }
 0x2ba   : > { %5098 = vst.msk [vmem:[%s7966_s6 + $0x28] sm:$0xf] %vm5087_vm1, %v5843_v24  ;;  %v5844_v40 = vpack.c.bf16 %v4458_v18, %v4458_v18  ;;  %v8052_v15 = vadd.f32 %v3536_v50, %v2992_v33  ;;  %v3858_v49 = vadd.f32 %v6211_v32, %v6051_v61  ;;  %v3538_v48 = vpop.f32.mrb[141].mxu0  ;;  %v3849_v47 = vpop.f32.mrb[205].mxu1 }
 0x2bb   : > { %5096 = vst.msk [vmem:[%s7966_s6 + $0x20] sm:$0xf] %vm5087_vm1, %v5841_v28  ;;  %v5842_v2 = vpack.c.bf16 %v4456_v21, %v4456_v21  ;;  %v3850_v9 = vadd.f32 %v6209_v38, %v3849_v47  ;;  %v3539_v37 = vpop.f32.mrb[142].mxu0  ;;  %v6052_v34 = vpop.f32.mrb[206].mxu1  ;;  %v8866_v47 = vld [vmem:[#allocation5_spill] sm:$0xff] }
 0x2bc   : > { %5099 = vst.msk [vmem:[%s7966_s6 + $0x2c] sm:$0xf] %vm5087_vm1, %v5844_v40  ;;  %v4326_v33 = vmax.f32 %v3858_v49, 0.0  ;;  %v8064_v32 = vadd.f32 %v3539_v37, %v2995_v16  ;;  %v3861_v24 = vadd.f32 %v6212_v36, %v6052_v34  ;;  %v3541_v18 = vpop.f32.mrb[143].mxu0  ;;  %v3852_v45 = vpop.f32.mrb[207].mxu1  ;;  %v8864_v16 = vld [vmem:[#allocation4_spill] sm:$0xff] }
 0x2bd   : > { %5097 = vst.msk [vmem:[%s7966_s6 + $0x24] sm:$0xf] %vm5087_vm1, %v5842_v2  ;;  %v4324_v63 = vmax.f32 %v3850_v9, 0.0  ;;  %v3853_v50 = vadd.f32 %v6210_v7, %v3852_v45  ;;  %v3000_v11 = vadd.f32 %v7643_v1, %v8864_v16  ;;  %v8865_v36 = vld [vmem:[#allocation22_spill] sm:$0xff]  ;;  %v8868_v34 = vld [vmem:[#allocation24_spill] sm:$0xff] }
 0x2be   : > { %v4461_v28 = vadd.f32 %v7944_v8, %v4326_v33  ;;  %v4327_v21 = vmax.f32 %v3861_v24, 0.0  ;;  %3751 = vmatmul.mubr.bf16.gmra.mrb[248].mxu0 %v6972_v25  ;;  %6158 = vmatmul.mubr.msk.bf16.gmra.mrb[56].mxu1 %vm2484_vm0, %v6973_v46  ;;  %v6215_v40 = vadd.f32 %v7643_v1, %v8865_v36  ;;  %v3003_v25 = vadd.f32 %v7643_v1, %v8866_v47  ;;  %v8867_v46 = vld [vmem:[#allocation18_spill] sm:$0xff] }
 0x2bf   : > { %v4459_v38 = vadd.f32 %v7944_v8, %v4324_v63  ;;  %v4325_v61 = vmax.f32 %v3853_v50, 0.0  ;;  %3758 = vmatprep.mubr.bf16.mxu0 %v6974_v17  ;;  %6161 = vmatprep.mubr.msk.bf16.mxu1 %vm2484_vm0, %v6976_v60  ;;  %v6213_v5 = vadd.f32 %v7643_v1, %v8867_v46  ;;  %v6216_v17 = vadd.f32 %v7643_v1, %v8868_v34  ;;  %v6977_v63 = vld [vmem:[%s7054_s5 + $0x9e0] ss:$20 sps:$4 sm:$0xff]   ;;  %v6978_v50 = vld [vmem:[%s7054_s5 + $0x9e8] ss:$20 sps:$4 sm:$0xff]  }
 0x2c0   : > { %v5847_v49 = vpack.c.bf16 %v4461_v28, %v4461_v28  ;;  %v4462_v48 = vadd.f32 %v7944_v8, %v4327_v21  ;;  %v8093_v28 = vld [vmem:[%s8770_s2] ss:$0 sm:$0xff]  ;;  %v8869_v21 = vld [vmem:[#allocation20_spill] sm:$0xff] }
 0x2c1   : > { %v5845_v7 = vpack.c.bf16 %v4459_v38, %v4459_v38  ;;  %v4460_v2 = vadd.f32 %v7944_v8, %v4325_v61  ;;  %v3544_v9 = vpop.f32.mrb[144].mxu0  ;;  %v6055_v37 = vpop.f32.mrb[208].mxu1  ;;  %v6214_v1 = vadd.f32 %v8093_v28, %v8869_v21 }
 0x2c2   : > { %5102 = vst.msk [vmem:[%s7966_s6 + $0x38] sm:$0xf] %vm5087_vm1, %v5847_v49  ;;  %v5848_v60 = vpack.c.bf16 %v4462_v48, %v4462_v48  ;;  %v8086_v33 = vadd.f32 %v3544_v9, %v3000_v11  ;;  %v3874_v24 = vadd.f32 %v6215_v40, %v6055_v37  ;;  %v3546_v18 = vpop.f32.mrb[145].mxu0  ;;  %v3865_v45 = vpop.f32.mrb[209].mxu1 }
 0x2c3   : > { %5100 = vst.msk [vmem:[%s7966_s6 + $0x30] sm:$0xf] %vm5087_vm1, %v5845_v7  ;;  %v5846_v38 = vpack.c.bf16 %v4460_v2, %v4460_v2  ;;  %v3866_v61 = vadd.f32 %v6213_v5, %v3865_v45  ;;  %v3547_v16 = vpop.f32.mrb[146].mxu0  ;;  %v6056_v11 = vpop.f32.mrb[210].mxu1  ;;  %v8870_v2 = vld [vmem:[#allocation7_spill] sm:$0xff]  ;;  %v8872_v45 = vld [vmem:[#allocation8_spill] sm:$0xff] }
 0x2c4   : > { %5103 = vst.msk [vmem:[%s7966_s6 + $0x3c] sm:$0xf] %vm5087_vm1, %v5848_v60  ;;  %v4330_v36 = vmax.f32 %v3874_v24, 0.0  ;;  %v8101_v40 = vadd.f32 %v3547_v16, %v3003_v25  ;;  %v3877_v49 = vadd.f32 %v6216_v17, %v6056_v11  ;;  %v3549_v48 = vpop.f32.mrb[147].mxu0  ;;  %v3868_v47 = vpop.f32.mrb[211].mxu1  ;;  %v3008_v25 = vadd.f32 %v8093_v28, %v8870_v2  ;;  %v8871_v17 = vld [vmem:[#allocation30_spill] sm:$0xff] }
 0x2c5   : > { %5101 = vst.msk [vmem:[%s7966_s6 + $0x34] sm:$0xf] %vm5087_vm1, %v5846_v38  ;;  %v4328_v46 = vmax.f32 %v3866_v61, 0.0  ;;  %v3869_v9 = vadd.f32 %v6214_v1, %v3868_v47  ;;  %v6219_v60 = vadd.f32 %v8093_v28, %v8871_v17  ;;  %v3011_v21 = vadd.f32 %v8093_v28, %v8872_v45  ;;  %v8873_v1 = vld [vmem:[#allocation26_spill] sm:$0xff]  ;;  %v8874_v11 = vld [vmem:[#allocation32_spill] sm:$0xff] }
 0x2c6   : > { %v4465_v37 = vadd.f32 %v7944_v8, %v4330_v36  ;;  %v4331_v34 = vmax.f32 %v3877_v49, 0.0  ;;  %3759 = vmatmul.mubr.bf16.gmra.mrb[252].mxu0 %v6977_v63  ;;  %6162 = vmatmul.mubr.msk.bf16.gmra.mrb[60].mxu1 %vm2484_vm0, %v6978_v50  ;;  %v6217_v63 = vadd.f32 %v8093_v28, %v8873_v1  ;;  %v6220_v36 = vadd.f32 %v8093_v28, %v8874_v11  ;;  %v8876_v11 = vld [vmem:[#allocation9_spill] sm:$0xff] }
 0x2c7   : > { %v4463_v5 = vadd.f32 %v7944_v8, %v4328_v46  ;;  %v4329_v7 = vmax.f32 %v3869_v9, 0.0 }
 0x2c8   : > { %v5851_v24 = vpack.c.bf16 %v4465_v37, %v4465_v37  ;;  %v4466_v18 = vadd.f32 %v7944_v8, %v4331_v34  ;;  %v8875_v37 = vld [vmem:[#allocation28_spill] sm:$0xff] }
 0x2c9   : > { %v5849_v50 = vpack.c.bf16 %v4463_v5, %v4463_v5  ;;  %v4464_v38 = vadd.f32 %v7944_v8, %v4329_v7  ;;  %v3552_v61 = vpop.f32.mrb[148].mxu0  ;;  %v6059_v16 = vpop.f32.mrb[212].mxu1  ;;  %v6218_v34 = vadd.f32 %v8093_v28, %v8875_v37 }
 0x2ca   : > { %5106 = vst.msk [vmem:[%s7966_s6 + $0x48] sm:$0xf] %vm5087_vm1, %v5851_v24  ;;  %v5852_v49 = vpack.c.bf16 %v4466_v18, %v4466_v18  ;;  %v8122_v48 = vadd.f32 %v3552_v61, %v3008_v25  ;;  %v3890_v47 = vadd.f32 %v6219_v60, %v6059_v16  ;;  %v3554_v46 = vpop.f32.mrb[149].mxu0  ;;  %v3881_v9 = vpop.f32.mrb[213].mxu1 }
 0x2cb   : > { %5104 = vst.msk [vmem:[%s7966_s6 + $0x40] sm:$0xf] %vm5087_vm1, %v5849_v50  ;;  %v5850_v5 = vpack.c.bf16 %v4464_v38, %v4464_v38  ;;  %v3882_v7 = vadd.f32 %v6217_v63, %v3881_v9  ;;  %v3555_v2 = vpop.f32.mrb[150].mxu0  ;;  %v6060_v17 = vpop.f32.mrb[214].mxu1  ;;  %v8878_v9 = vld [vmem:[#allocation11_spill] sm:$0xff] }
 0x2cc   : > { %5107 = vst.msk [vmem:[%s7966_s6 + $0x4c] sm:$0xf] %vm5087_vm1, %v5852_v49  ;;  %v4334_v45 = vmax.f32 %v3890_v47, 0.0  ;;  %v8130_v24 = vadd.f32 %v3555_v2, %v3011_v21  ;;  %v3893_v25 = vadd.f32 %v6220_v36, %v6060_v17  ;;  %v3557_v18 = vpop.f32.mrb[151].mxu0  ;;  %v3884_v1 = vpop.f32.mrb[215].mxu1  ;;  %v3016_v49 = vadd.f32 %v8093_v28, %v8876_v11  ;;  %v8877_v47 = vld [vmem:[#allocation38_spill] sm:$0xff] }
 0x2cd   : > { %5105 = vst.msk [vmem:[%s7966_s6 + $0x44] sm:$0xf] %vm5087_vm1, %v5850_v5  ;;  %v4332_v60 = vmax.f32 %v3882_v7, 0.0  ;;  %v3885_v61 = vadd.f32 %v6218_v34, %v3884_v1  ;;  %v6223_v21 = vadd.f32 %v8093_v28, %v8877_v47  ;;  %v3019_v37 = vadd.f32 %v8093_v28, %v8878_v9  ;;  %v8879_v34 = vld [vmem:[#allocation34_spill] sm:$0xff]  ;;  %v8882_v11 = vld [vmem:[#allocation36_spill] sm:$0xff] }
 0x2ce   : > { %v4469_v16 = vadd.f32 %v7944_v8, %v4334_v45  ;;  %v4335_v50 = vmax.f32 %v3893_v25, 0.0  ;;  %v6221_v5 = vadd.f32 %v8093_v28, %v8879_v34  ;;  %v8880_v25 = vld [vmem:[#allocation40_spill] sm:$0xff] }
 0x2cf   : > { %v4467_v63 = vadd.f32 %v7944_v8, %v4332_v60  ;;  %v4333_v38 = vmax.f32 %v3885_v61, 0.0  ;;  %v6224_v18 = vadd.f32 %v8093_v28, %v8880_v25 }
 0x2d0   : > { %v5855_v36 = vpack.c.bf16 %v4469_v16, %v4469_v16  ;;  %v4470_v46 = vadd.f32 %v7944_v8, %v4335_v50 }
 0x2d1   : > { %v5853_v7 = vpack.c.bf16 %v4467_v63, %v4467_v63  ;;  %v4468_v2 = vadd.f32 %v7944_v8, %v4333_v38  ;;  %v3560_v17 = vpop.f32.mrb[152].mxu0  ;;  %v6063_v45 = vpop.f32.mrb[216].mxu1  ;;  %v6222_v63 = vadd.f32 %v8093_v28, %v8882_v11 }
 0x2d2   : > { %5110 = vst.msk [vmem:[%s7966_s6 + $0x58] sm:$0xf] %vm5087_vm1, %v5855_v36  ;;  %v5856_v1 = vpack.c.bf16 %v4470_v46, %v4470_v46  ;;  %v8150_v60 = vadd.f32 %v3560_v17, %v3016_v49  ;;  %v3906_v61 = vadd.f32 %v6223_v21, %v6063_v45  ;;  %v3562_v16 = vpop.f32.mrb[153].mxu0  ;;  %v3897_v50 = vpop.f32.mrb[217].mxu1 }
 0x2d3   : > { %5108 = vst.msk [vmem:[%s7966_s6 + $0x50] sm:$0xf] %vm5087_vm1, %v5853_v7  ;;  %v5854_v38 = vpack.c.bf16 %v4468_v2, %v4468_v2  ;;  %v3898_v47 = vadd.f32 %v6221_v5, %v3897_v50  ;;  %v3563_v9 = vpop.f32.mrb[154].mxu0  ;;  %v6064_v34 = vpop.f32.mrb[218].mxu1  ;;  %v8884_v50 = vld [vmem:[#allocation13_spill] sm:$0xff] }
 0x2d4   : > { %8881 = vst [vmem:[#allocation6_spill] sm:$0xff] %v8150_v60  ;;  %5111 = vst.msk [vmem:[%s7966_s6 + $0x5c] sm:$0xf] %vm5087_vm1, %v5856_v1  ;;  %v4338_v25 = vmax.f32 %v3906_v61, 0.0  ;;  %v8158_v36 = vadd.f32 %v3563_v9, %v3019_v37  ;;  %v3909_v49 = vadd.f32 %v6224_v18, %v6064_v34  ;;  %v3565_v46 = vpop.f32.mrb[155].mxu0  ;;  %v3900_v17 = vpop.f32.mrb[219].mxu1  ;;  %v3024_v1 = vadd.f32 %v8093_v28, %v8884_v50 }
 0x2d5   : > { %5109 = vst.msk [vmem:[%s7966_s6 + $0x54] sm:$0xf] %vm5087_vm1, %v5854_v38  ;;  %v4336_v21 = vmax.f32 %v3898_v47, 0.0  ;;  %v3901_v45 = vadd.f32 %v6222_v63, %v3900_v17  ;;  %v8885_v61 = vld [vmem:[#allocation46_spill] sm:$0xff]  ;;  %v8886_v38 = vld [vmem:[#allocation15_spill] sm:$0xff]  ;;  %v8888_v17 = vld [vmem:[#allocation48_spill] sm:$0xff] }
 0x2d6   : > { %8883 = vst [vmem:[#allocation2_spill] sm:$0xff] %v8158_v36  ;;  %v4473_v16 = vadd.f32 %v7944_v8, %v4338_v25  ;;  %v4339_v7 = vmax.f32 %v3909_v49, 0.0  ;;  %v6227_v37 = vadd.f32 %v8093_v28, %v8885_v61  ;;  %v3027_v63 = vadd.f32 %v8093_v28, %v8886_v38  ;;  %v8887_v47 = vld [vmem:[#allocation42_spill] sm:$0xff]  ;;  %v8889_v38 = vld [vmem:[#allocation44_spill] sm:$0xff] }
 0x2d7   : > { %v4471_v5 = vadd.f32 %v7944_v8, %v4336_v21  ;;  %v4337_v2 = vmax.f32 %v3901_v45, 0.0  ;;  %v6225_v9 = vadd.f32 %v8093_v28, %v8887_v47  ;;  %v6228_v21 = vadd.f32 %v8093_v28, %v8888_v17 }
 0x2d8   : > { %v5859_v18 = vpack.c.bf16 %v4473_v16, %v4473_v16  ;;  %v4474_v11 = vadd.f32 %v7944_v8, %v4339_v7 }
 0x2d9   : > { %v5857_v34 = vpack.c.bf16 %v4471_v5, %v4471_v5  ;;  %v4472_v25 = vadd.f32 %v7944_v8, %v4337_v2  ;;  %v3568_v49 = vpop.f32.mrb[156].mxu0  ;;  %v6067_v46 = vpop.f32.mrb[220].mxu1  ;;  %v6226_v5 = vadd.f32 %v8093_v28, %v8889_v38 }
 0x2da   : > { %5114 = vst.msk [vmem:[%s7966_s6 + $0x68] sm:$0xf] %vm5087_vm1, %v5859_v18  ;;  %v5860_v45 = vpack.c.bf16 %v4474_v11, %v4474_v11  ;;  %v8178_v16 = vadd.f32 %v3568_v49, %v3024_v1  ;;  %v3922_v7 = vadd.f32 %v6227_v37, %v6067_v46  ;;  %v3570_v50 = vpop.f32.mrb[157].mxu0  ;;  %v3913_v61 = vpop.f32.mrb[221].mxu1 }
 0x2db   : > { %5112 = vst.msk [vmem:[%s7966_s6 + $0x60] sm:$0xf] %vm5087_vm1, %v5857_v34  ;;  %v5858_v2 = vpack.c.bf16 %v4472_v25, %v4472_v25  ;;  %v3914_v47 = vadd.f32 %v6225_v9, %v3913_v61  ;;  %v3571_v36 = vpop.f32.mrb[158].mxu0  ;;  %v6068_v60 = vpop.f32.mrb[222].mxu1  ;;  %v8890_v61 = vld [vmem:[#allocation17_spill] sm:$0xff] }
 0x2dc   : > { %5115 = vst.msk [vmem:[%s7966_s6 + $0x6c] sm:$0xf] %vm5087_vm1, %v5860_v45  ;;  %v4342_v17 = vmax.f32 %v3922_v7, 0.0  ;;  %v8186_v18 = vadd.f32 %v3571_v36, %v3027_v63  ;;  %v3925_v1 = vadd.f32 %v6228_v21, %v6068_v60  ;;  %v3573_v11 = vpop.f32.mrb[159].mxu0  ;;  %v3916_v49 = vpop.f32.mrb[223].mxu1  ;;  %v3032_v45 = vadd.f32 %v8093_v28, %v8890_v61 }
 0x2dd   : > { %5113 = vst.msk [vmem:[%s7966_s6 + $0x64] sm:$0xf] %vm5087_vm1, %v5858_v2  ;;  %v4340_v37 = vmax.f32 %v3914_v47, 0.0  ;;  %v3917_v46 = vadd.f32 %v6226_v5, %v3916_v49  ;;  %v8891_v5 = vld [vmem:[#allocation19_spill] sm:$0xff] }
 0x2de   : > { %v4477_v50 = vadd.f32 %v7944_v8, %v4342_v17  ;;  %v4343_v34 = vmax.f32 %v3925_v1, 0.0  ;;  %v3035_v2 = vadd.f32 %v8093_v28, %v8891_v5 }
 0x2df   : > { %v4475_v9 = vadd.f32 %v7944_v8, %v4340_v37  ;;  %v4341_v25 = vmax.f32 %v3917_v46, 0.0 }
 0x2e0   : > { %v5863_v36 = vpack.c.bf16 %v4477_v50, %v4477_v50  ;;  %v4478_v60 = vadd.f32 %v7944_v8, %v4343_v34 }
 0x2e1   : > { %v5861_v63 = vpack.c.bf16 %v4475_v9, %v4475_v9  ;;  %v4476_v21 = vadd.f32 %v7944_v8, %v4341_v25  ;;  %v3576_v7 = vpop.f32.mrb[160].mxu0  ;;  %v6071_v38 = vpop.f32.mrb[224].mxu1 }
 0x2e2   : > { %5118 = vst.msk [vmem:[%s7966_s6 + $0x78] sm:$0xf] %vm5087_vm1, %v5863_v36  ;;  %v5864_v47 = vpack.c.bf16 %v4478_v60, %v4478_v60  ;;  %v8200_v17 = vadd.f32 %v3576_v7, %v3032_v45  ;;  %v3938_v1 = vadd.f32 %v6071_v38, %v7669_v29  ;;  %v3578_v11 = vpop.f32.mrb[161].mxu0  ;;  %v3929_v49 = vpop.f32.mrb[225].mxu1  ;;  %v8892_v38 = vld [vmem:[#allocation21_spill] sm:$0xff] }
 0x2e3   : > { %5116 = vst.msk [vmem:[%s7966_s6 + $0x70] sm:$0xf] %vm5087_vm1, %v5861_v63  ;;  %v5862_v37 = vpack.c.bf16 %v4476_v21, %v4476_v21  ;;  %v3930_v46 = vadd.f32 %v3929_v49, %v7651_v26  ;;  %v3579_v50 = vpop.f32.mrb[162].mxu0  ;;  %v6072_v34 = vpop.f32.mrb[226].mxu1  ;;  %v3040_v5 = vadd.f32 %v8093_v28, %v8892_v38 }
 0x2e4   : > { %5119 = vst.msk [vmem:[%s7966_s6 + $0x7c] sm:$0xf] %vm5087_vm1, %v5864_v47  ;;  %v4346_v9 = vmax.f32 %v3938_v1, 0.0  ;;  %v8208_v25 = vadd.f32 %v3579_v50, %v3035_v2  ;;  %v3941_v61 = vadd.f32 %v6072_v34, %v7679_v27  ;;  %v3581_v45 = vpop.f32.mrb[163].mxu0  ;;  %v3932_v36 = vpop.f32.mrb[227].mxu1 }
 0x2e5   : > { %5117 = vst.msk [vmem:[%s7966_s6 + $0x74] sm:$0xf] %vm5087_vm1, %v5862_v37  ;;  %v4344_v29 = vmax.f32 %v3930_v46, 0.0  ;;  %v3933_v60 = vadd.f32 %v3932_v36, %v7661_v19  ;;  %v8893_v19 = vld [vmem:[#allocation23_spill] sm:$0xff] }
 0x2e6   : > { %v4481_v63 = vadd.f32 %v7944_v8, %v4346_v9  ;;  %v4347_v26 = vmax.f32 %v3941_v61, 0.0  ;;  %v3043_v37 = vadd.f32 %v8093_v28, %v8893_v19 }
 0x2e7   : > { %v4479_v21 = vadd.f32 %v7944_v8, %v4344_v29  ;;  %v4345_v7 = vmax.f32 %v3933_v60, 0.0 }
 0x2e8   : > { %v5867_v2 = vpack.c.bf16 %v4481_v63, %v4481_v63  ;;  %v4482_v27 = vadd.f32 %v7944_v8, %v4347_v26 }
 0x2e9   : > { %v5865_v47 = vpack.c.bf16 %v4479_v21, %v4479_v21  ;;  %v4480_v1 = vadd.f32 %v7944_v8, %v4345_v7  ;;  %v3584_v11 = vpop.f32.mrb[164].mxu0  ;;  %v6075_v49 = vpop.f32.mrb[228].mxu1 }
 0x2ea   : > { %5122 = vst.msk [vmem:[%s7966_s6 + $0x88] sm:$0xf] %vm5087_vm1, %v5867_v2  ;;  %v5868_v46 = vpack.c.bf16 %v4482_v27, %v4482_v27  ;;  %v8224_v50 = vadd.f32 %v3584_v11, %v3040_v5  ;;  %v3954_v34 = vadd.f32 %v6075_v49, %v7705_v44  ;;  %v3586_v9 = vpop.f32.mrb[165].mxu0  ;;  %v3945_v61 = vpop.f32.mrb[229].mxu1 }
 0x2eb   : > { %5120 = vst.msk [vmem:[%s7966_s6 + $0x80] sm:$0xf] %vm5087_vm1, %v5865_v47  ;;  %v5866_v45 = vpack.c.bf16 %v4480_v1, %v4480_v1  ;;  %v3946_v36 = vadd.f32 %v3945_v61, %v7687_v13  ;;  %v3587_v29 = vpop.f32.mrb[166].mxu0  ;;  %v6076_v60 = vpop.f32.mrb[230].mxu1  ;;  %v8894_v1 = vld [vmem:[#allocation25_spill] sm:$0xff] }
 0x2ec   : > { %5123 = vst.msk [vmem:[%s7966_s6 + $0x8c] sm:$0xf] %vm5087_vm1, %v5868_v46  ;;  %v4350_v63 = vmax.f32 %v3954_v34, 0.0  ;;  %v8232_v26 = vadd.f32 %v3587_v29, %v3043_v37  ;;  %v3957_v21 = vadd.f32 %v6076_v60, %v7715_v43  ;;  %v3589_v7 = vpop.f32.mrb[167].mxu0  ;;  %v3948_v38 = vpop.f32.mrb[231].mxu1  ;;  %v3048_v11 = vadd.f32 %v8093_v28, %v8894_v1 }
 0x2ed   : > { %5121 = vst.msk [vmem:[%s7966_s6 + $0x84] sm:$0xf] %vm5087_vm1, %v5866_v45  ;;  %v4348_v44 = vmax.f32 %v3946_v36, 0.0  ;;  %v3949_v5 = vadd.f32 %v3948_v38, %v7697_v35  ;;  %v8895_v35 = vld [vmem:[#allocation27_spill] sm:$0xff] }
 0x2ee   : > { %v4485_v2 = vadd.f32 %v7944_v8, %v4350_v63  ;;  %v4351_v13 = vmax.f32 %v3957_v21, 0.0  ;;  %v3051_v9 = vadd.f32 %v8093_v28, %v8895_v35 }
 0x2ef   : > { %v4483_v27 = vadd.f32 %v7944_v8, %v4348_v44  ;;  %v4349_v47 = vmax.f32 %v3949_v5, 0.0 }
 0x2f0   : > { %v5871_v49 = vpack.c.bf16 %v4485_v2, %v4485_v2  ;;  %v4486_v43 = vadd.f32 %v7944_v8, %v4351_v13 }
 0x2f1   : > { %v5869_v19 = vpack.c.bf16 %v4483_v27, %v4483_v27  ;;  %v4484_v37 = vadd.f32 %v7944_v8, %v4349_v47  ;;  %v3592_v46 = vpop.f32.mrb[168].mxu0  ;;  %v6079_v34 = vpop.f32.mrb[232].mxu1 }
 0x2f2   : > { %5126 = vst.msk [vmem:[%s7966_s6 + $0x98] sm:$0xf] %vm5087_vm1, %v5871_v49  ;;  %v5872_v61 = vpack.c.bf16 %v4486_v43, %v4486_v43  ;;  %v8248_v45 = vadd.f32 %v3592_v46, %v3048_v11  ;;  %v3970_v36 = vadd.f32 %v6079_v34, %v7741_v6  ;;  %v3594_v29 = vpop.f32.mrb[169].mxu0  ;;  %v3961_v60 = vpop.f32.mrb[233].mxu1  ;;  %v8896_v43 = vld [vmem:[#allocation29_spill] sm:$0xff] }
 0x2f3   : > { %5124 = vst.msk [vmem:[%s7966_s6 + $0x90] sm:$0xf] %vm5087_vm1, %v5869_v19  ;;  %v5870_v63 = vpack.c.bf16 %v4484_v37, %v4484_v37  ;;  %v3962_v21 = vadd.f32 %v3961_v60, %v7723_v58  ;;  %v3595_v7 = vpop.f32.mrb[170].mxu0  ;;  %v6080_v38 = vpop.f32.mrb[234].mxu1  ;;  %v3056_v19 = vadd.f32 %v8093_v28, %v8896_v43 }
 0x2f4   : > { %5127 = vst.msk [vmem:[%s7966_s6 + $0x9c] sm:$0xf] %vm5087_vm1, %v5872_v61  ;;  %v4354_v44 = vmax.f32 %v3970_v36, 0.0  ;;  %v8256_v5 = vadd.f32 %v3595_v7, %v3051_v9  ;;  %v3973_v2 = vadd.f32 %v6080_v38, %v7751_v59  ;;  %v3597_v13 = vpop.f32.mrb[171].mxu0  ;;  %v3964_v27 = vpop.f32.mrb[235].mxu1 }
 0x2f5   : > { %5125 = vst.msk [vmem:[%s7966_s6 + $0x94] sm:$0xf] %vm5087_vm1, %v5870_v63  ;;  %v4352_v6 = vmax.f32 %v3962_v21, 0.0  ;;  %v3965_v47 = vadd.f32 %v3964_v27, %v7733_v51  ;;  %v8897_v51 = vld [vmem:[#allocation31_spill] sm:$0xff] }
 0x2f6   : > { %v4489_v1 = vadd.f32 %v7944_v8, %v4354_v44  ;;  %v4355_v58 = vmax.f32 %v3973_v2, 0.0  ;;  %v3059_v61 = vadd.f32 %v8093_v28, %v8897_v51 }
 0x2f7   : > { %v4487_v11 = vadd.f32 %v7944_v8, %v4352_v6  ;;  %v4353_v49 = vmax.f32 %v3965_v47, 0.0 }
 0x2f8   : > { %v5875_v37 = vpack.c.bf16 %v4489_v1, %v4489_v1  ;;  %v4490_v59 = vadd.f32 %v7944_v8, %v4355_v58 }
 0x2f9   : > { %v5873_v46 = vpack.c.bf16 %v4487_v11, %v4487_v11  ;;  %v4488_v34 = vadd.f32 %v7944_v8, %v4353_v49  ;;  %v3600_v35 = vpop.f32.mrb[172].mxu0  ;;  %v6083_v9 = vpop.f32.mrb[236].mxu1 }
 0x2fa   : > { %5130 = vst.msk [vmem:[%s7966_s6 + $0xa8] sm:$0xf] %vm5087_vm1, %v5875_v37  ;;  %v5876_v36 = vpack.c.bf16 %v4490_v59, %v4490_v59  ;;  %v8272_v29 = vadd.f32 %v3600_v35, %v3056_v19  ;;  %v3986_v60 = vadd.f32 %v6083_v9, %v7777_v0  ;;  %v3602_v63 = vpop.f32.mrb[173].mxu0  ;;  %v3977_v21 = vpop.f32.mrb[237].mxu1  ;;  %v8898_v19 = vld [vmem:[#allocation33_spill] sm:$0xff] }
 0x2fb   : > { %5128 = vst.msk [vmem:[%s7966_s6 + $0xa0] sm:$0xf] %vm5087_vm1, %v5873_v46  ;;  %v5874_v7 = vpack.c.bf16 %v4488_v34, %v4488_v34  ;;  %v3978_v38 = vadd.f32 %v3977_v21, %v7759_v3  ;;  %v3603_v44 = vpop.f32.mrb[174].mxu0  ;;  %v6084_v2 = vpop.f32.mrb[238].mxu1  ;;  %v3064_v37 = vadd.f32 %v8093_v28, %v8898_v19 }
 0x2fc   : > { %5131 = vst.msk [vmem:[%s7966_s6 + $0xac] sm:$0xf] %vm5087_vm1, %v5876_v36  ;;  %v4358_v13 = vmax.f32 %v3986_v60, 0.0  ;;  %v8280_v27 = vadd.f32 %v3603_v44, %v3059_v61  ;;  %v3989_v6 = vadd.f32 %v6084_v2, %v7787_v12  ;;  %v3605_v47 = vpop.f32.mrb[175].mxu0  ;;  %v3980_v1 = vpop.f32.mrb[239].mxu1 }
 0x2fd   : > { %5129 = vst.msk [vmem:[%s7966_s6 + $0xa4] sm:$0xf] %vm5087_vm1, %v5874_v7  ;;  %v4356_v0 = vmax.f32 %v3978_v38, 0.0  ;;  %v3981_v58 = vadd.f32 %v3980_v1, %v7769_v4  ;;  %v8899_v4 = vld [vmem:[#allocation35_spill] sm:$0xff] }
 0x2fe   : > { %v4493_v11 = vadd.f32 %v7944_v8, %v4358_v13  ;;  %v4359_v3 = vmax.f32 %v3989_v6, 0.0  ;;  %v3067_v51 = vadd.f32 %v8093_v28, %v8899_v4 }
 0x2ff   : > { %v4491_v49 = vadd.f32 %v7944_v8, %v4356_v0  ;;  %v4357_v43 = vmax.f32 %v3981_v58, 0.0 }
 0x300   : > { %v5879_v59 = vpack.c.bf16 %v4493_v11, %v4493_v11  ;;  %v4494_v12 = vadd.f32 %v7944_v8, %v4359_v3 }
 0x301   : > { %v5877_v46 = vpack.c.bf16 %v4491_v49, %v4491_v49  ;;  %v4492_v34 = vadd.f32 %v7944_v8, %v4357_v43  ;;  %v3608_v35 = vpop.f32.mrb[176].mxu0  ;;  %v6087_v9 = vpop.f32.mrb[240].mxu1  ;;  %v8900_v43 = vld [vmem:[#allocation37_spill] sm:$0xff] }
 0x302   : > { %5134 = vst.msk [vmem:[%s7966_s6 + $0xb8] sm:$0xf] %vm5087_vm1, %v5879_v59  ;;  %v5880_v61 = vpack.c.bf16 %v4494_v12, %v4494_v12  ;;  %v8296_v36 = vadd.f32 %v3608_v35, %v3064_v37  ;;  %v4002_v60 = vadd.f32 %v6087_v9, %v7813_v56  ;;  %v3610_v63 = vpop.f32.mrb[177].mxu0  ;;  %v3993_v21 = vpop.f32.mrb[241].mxu1  ;;  %v3072_v19 = vadd.f32 %v8093_v28, %v8900_v43 }
 0x303   : > { %5132 = vst.msk [vmem:[%s7966_s6 + $0xb0] sm:$0xf] %vm5087_vm1, %v5877_v46  ;;  %v5878_v7 = vpack.c.bf16 %v4492_v34, %v4492_v34  ;;  %v3994_v38 = vadd.f32 %v3993_v21, %v7795_v54  ;;  %v3611_v44 = vpop.f32.mrb[178].mxu0  ;;  %v6088_v2 = vpop.f32.mrb[242].mxu1 }
 0x304   : > { %5135 = vst.msk [vmem:[%s7966_s6 + $0xbc] sm:$0xf] %vm5087_vm1, %v5880_v61  ;;  %v4362_v13 = vmax.f32 %v4002_v60, 0.0  ;;  %v8304_v6 = vadd.f32 %v3611_v44, %v3067_v51  ;;  %v4005_v47 = vadd.f32 %v6088_v2, %v7823_v30  ;;  %v3613_v1 = vpop.f32.mrb[179].mxu0  ;;  %v3996_v0 = vpop.f32.mrb[243].mxu1 }
 0x305   : > { %5133 = vst.msk [vmem:[%s7966_s6 + $0xb4] sm:$0xf] %vm5087_vm1, %v5878_v7  ;;  %v4360_v56 = vmax.f32 %v3994_v38, 0.0  ;;  %v3997_v58 = vadd.f32 %v3996_v0, %v7805_v20  ;;  %v8901_v20 = vld [vmem:[#allocation39_spill] sm:$0xff] }
 0x306   : > { %v4497_v11 = vadd.f32 %v7944_v8, %v4362_v13  ;;  %v4363_v54 = vmax.f32 %v4005_v47, 0.0  ;;  %v3075_v35 = vadd.f32 %v8093_v28, %v8901_v20 }
 0x307   : > { %v4495_v3 = vadd.f32 %v7944_v8, %v4360_v56  ;;  %v4361_v49 = vmax.f32 %v3997_v58, 0.0 }
 0x308   : > { %v5883_v37 = vpack.c.bf16 %v4497_v11, %v4497_v11  ;;  %v4498_v30 = vadd.f32 %v7944_v8, %v4363_v54  ;;  %v8902_v54 = vld [vmem:[#allocation41_spill] sm:$0xff] }
 0x309   : > { %v5881_v59 = vpack.c.bf16 %v4495_v3, %v4495_v3  ;;  %v4496_v12 = vadd.f32 %v7944_v8, %v4361_v49  ;;  %v3616_v46 = vpop.f32.mrb[180].mxu0  ;;  %v6091_v34 = vpop.f32.mrb[244].mxu1  ;;  %v3080_v3 = vadd.f32 %v8093_v28, %v8902_v54 }
 0x30a   : > { %5138 = vst.msk [vmem:[%s7966_s6 + $0xc8] sm:$0xf] %vm5087_vm1, %v5883_v37  ;;  %v5884_v9 = vpack.c.bf16 %v4498_v30, %v4498_v30  ;;  %v8320_v4 = vadd.f32 %v3616_v46, %v3072_v19  ;;  %v4018_v51 = vadd.f32 %v6091_v34, %v7849_v23  ;;  %v3618_v61 = vpop.f32.mrb[181].mxu0  ;;  %v4009_v60 = vpop.f32.mrb[245].mxu1 }
 0x30b   : > { %5136 = vst.msk [vmem:[%s7966_s6 + $0xc0] sm:$0xf] %vm5087_vm1, %v5881_v59  ;;  %v5882_v63 = vpack.c.bf16 %v4496_v12, %v4496_v12  ;;  %v4010_v21 = vadd.f32 %v4009_v60, %v7831_v22  ;;  %v3619_v7 = vpop.f32.mrb[182].mxu0  ;;  %v6092_v38 = vpop.f32.mrb[246].mxu1 }
 0x30c   : > { %5139 = vst.msk [vmem:[%s7966_s6 + $0xcc] sm:$0xf] %vm5087_vm1, %v5884_v9  ;;  %v4366_v44 = vmax.f32 %v4018_v51, 0.0  ;;  %v8328_v2 = vadd.f32 %v3619_v7, %v3075_v35  ;;  %v4021_v13 = vadd.f32 %v6092_v38, %v7859_v52  ;;  %v3621_v47 = vpop.f32.mrb[183].mxu0  ;;  %v4012_v1 = vpop.f32.mrb[247].mxu1 }
 0x30d   : > { %5137 = vst.msk [vmem:[%s7966_s6 + $0xc4] sm:$0xf] %vm5087_vm1, %v5882_v63  ;;  %v4364_v23 = vmax.f32 %v4010_v21, 0.0  ;;  %v4013_v0 = vadd.f32 %v4012_v1, %v7841_v41  ;;  %v8903_v41 = vld [vmem:[#allocation43_spill] sm:$0xff] }
 0x30e   : > { %v4501_v56 = vadd.f32 %v7944_v8, %v4366_v44  ;;  %v4367_v22 = vmax.f32 %v4021_v13, 0.0  ;;  %v3083_v59 = vadd.f32 %v8093_v28, %v8903_v41 }
 0x30f   : > { %v4499_v58 = vadd.f32 %v7944_v8, %v4364_v23  ;;  %v4365_v11 = vmax.f32 %v4013_v0, 0.0  ;;  %v8904_v23 = vld [vmem:[#allocation45_spill] sm:$0xff] }
 0x310   : > { %v5887_v49 = vpack.c.bf16 %v4501_v56, %v4501_v56  ;;  %v4502_v52 = vadd.f32 %v7944_v8, %v4367_v22  ;;  %v3088_v0 = vadd.f32 %v8093_v28, %v8904_v23 }
 0x311   : > { %v5885_v43 = vpack.c.bf16 %v4499_v58, %v4499_v58  ;;  %v4500_v19 = vadd.f32 %v7944_v8, %v4365_v11  ;;  %v3624_v37 = vpop.f32.mrb[184].mxu0  ;;  %v6095_v30 = vpop.f32.mrb[248].mxu1 }
 0x312   : > { %5142 = vst.msk [vmem:[%s7966_s6 + $0xd8] sm:$0xf] %vm5087_vm1, %v5887_v49  ;;  %v5888_v12 = vpack.c.bf16 %v4502_v52, %v4502_v52  ;;  %v8344_v46 = vadd.f32 %v3624_v37, %v3080_v3  ;;  %v4034_v34 = vadd.f32 %v6095_v30, %v7885_v39  ;;  %v3626_v20 = vpop.f32.mrb[185].mxu0  ;;  %v4025_v35 = vpop.f32.mrb[249].mxu1  ;;  %v8905_v3 = vld [vmem:[#allocation47_spill] sm:$0xff] }
 0x313   : > { %5140 = vst.msk [vmem:[%s7966_s6 + $0xd0] sm:$0xf] %vm5087_vm1, %v5885_v43  ;;  %v5886_v9 = vpack.c.bf16 %v4500_v19, %v4500_v19  ;;  %v4026_v8 = vadd.f32 %v4025_v35, %v7867_v31  ;;  %v3627_v51 = vpop.f32.mrb[186].mxu0  ;;  %v6096_v61 = vpop.f32.mrb[250].mxu1  ;;  %v8361_v31 = vld [vmem:[%s8771_s3] ss:$0 sm:$0xff]  ;;  %v3091_v49 = vadd.f32 %v8093_v28, %v8905_v3 }
 0x314   : > { %5143 = vst.msk [vmem:[%s7966_s6 + $0xdc] sm:$0xf] %vm5087_vm1, %v5888_v12  ;;  %v4370_v60 = vmax.f32 %v4034_v34, 0.0  ;;  %v8352_v63 = vadd.f32 %v3627_v51, %v3083_v59  ;;  %v4037_v21 = vadd.f32 %v6096_v61, %v7895_v10  ;;  %v3629_v7 = vpop.f32.mrb[187].mxu0  ;;  %v4028_v38 = vpop.f32.mrb[251].mxu1  ;;  %v8906_v19 = vld [vmem:[#allocation82_spill] sm:$0xff] }
 0x315   : > { %5141 = vst.msk [vmem:[%s7966_s6 + $0xd4] sm:$0xf] %vm5087_vm1, %v5886_v9  ;;  %v4368_v39 = vmax.f32 %v4026_v8, 0.0  ;;  %v4029_v44 = vadd.f32 %v4028_v38, %v7877_v62  ;;  %v8907_v12 = vld [vmem:[#allocation78_spill] sm:$0xff]  ;;  %v8908_v51 = vld [vmem:[#allocation84_spill] sm:$0xff] }
 0x316   : > { %v4505_v13 = vadd.f32 %v8361_v31, %v4370_v60  ;;  %v4371_v47 = vmax.f32 %v4037_v21, 0.0  ;;  %v8909_v38 = vld [vmem:[#allocation80_spill] sm:$0xff] }
 0x317   : > { %v4503_v1 = vadd.f32 %v8361_v31, %v4368_v39  ;;  %v4369_v10 = vmax.f32 %v4029_v44, 0.0 }
 0x318   : > { %v5891_v56 = vpack.c.bf16 %v4505_v13, %v4505_v13  ;;  %v4506_v22 = vadd.f32 %v8361_v31, %v4371_v47 }
 0x319   : > { %v5889_v58 = vpack.c.bf16 %v4503_v1, %v4503_v1  ;;  %v4504_v62 = vadd.f32 %v8361_v31, %v4369_v10  ;;  %v3632_v11 = vpop.f32.mrb[188].mxu0  ;;  %v6099_v54 = vpop.f32.mrb[252].mxu1  ;;  %v8910_v10 = vld [vmem:[#allocation49_spill] sm:$0xff] }
 0x31a   : > { %5146 = vst.msk [vmem:[%s7966_s6 + $0xe8] sm:$0xf] %vm5087_vm1, %v5891_v56  ;;  %v5892_v52 = vpack.c.bf16 %v4506_v22, %v4506_v22  ;;  %v8373_v43 = vadd.f32 %v3632_v11, %v3088_v0  ;;  %v4050_v37 = vadd.f32 %v6099_v54, %v8906_v19  ;;  %v3634_v30 = vpop.f32.mrb[189].mxu0  ;;  %v4041_v41 = vpop.f32.mrb[253].mxu1  ;;  %v3096_v23 = vadd.f32 %v8093_v28, %v8910_v10  ;;  %v8911_v54 = vld [vmem:[#allocation50_spill] sm:$0xff] }
 0x31b   : > { %5144 = vst.msk [vmem:[%s7966_s6 + $0xe0] sm:$0xf] %vm5087_vm1, %v5889_v58  ;;  %v5890_v59 = vpack.c.bf16 %v4504_v62, %v4504_v62  ;;  %v4042_v34 = vadd.f32 %v4041_v41, %v8907_v12  ;;  %v3635_v20 = vpop.f32.mrb[190].mxu0  ;;  %v6100_v35 = vpop.f32.mrb[254].mxu1  ;;  %v3099_v3 = vadd.f32 %v8093_v28, %v8911_v54 }
 0x31c   : > { %5147 = vst.msk [vmem:[%s7966_s6 + $0xec] sm:$0xf] %vm5087_vm1, %v5892_v52  ;;  %v4374_v9 = vmax.f32 %v4050_v37, 0.0  ;;  %v8381_v8 = vadd.f32 %v3635_v20, %v3091_v49  ;;  %v4053_v61 = vadd.f32 %v6100_v35, %v8908_v51  ;;  %v3637_v60 = vpop.f32.mrb[191].mxu0  ;;  %v4044_v21 = vpop.f32.mrb[255].mxu1 }
 0x31d   : > { %5145 = vst.msk [vmem:[%s7966_s6 + $0xe4] sm:$0xf] %vm5087_vm1, %v5890_v59  ;;  %v4372_v7 = vmax.f32 %v4042_v34, 0.0  ;;  %v4045_v39 = vadd.f32 %v4044_v21, %v8909_v38  ;;  %v8912_v59 = vld [vmem:[#allocation85_spill] sm:$0xff] }
 0x31e   : > { %v4509_v44 = vadd.f32 %v8361_v31, %v4374_v9  ;;  %v4375_v13 = vmax.f32 %v4053_v61, 0.0 }
 0x31f   : > { %v4507_v47 = vadd.f32 %v8361_v31, %v4372_v7  ;;  %v4373_v1 = vmax.f32 %v4045_v39, 0.0 }
 0x320   : > { %v5895_v0 = vpack.c.bf16 %v4509_v44, %v4509_v44  ;;  %v4510_v56 = vadd.f32 %v8361_v31, %v4375_v13  ;;  %v8913_v13 = vld [vmem:[#allocation51_spill] sm:$0xff] }
 0x321   : > { %v5893_v22 = vpack.c.bf16 %v4507_v47, %v4507_v47  ;;  %v4508_v58 = vadd.f32 %v8361_v31, %v4373_v1  ;;  %v3640_v62 = vpop.f32.mrb[192].mxu0  ;;  %v6103_v11 = vpop.f32.mrb[0].mxu1  ;;  %v3104_v47 = vadd.f32 %v8093_v28, %v8913_v13 }
 0x322   : > { %5150 = vst.msk [vmem:[%s7966_s6 + $0xf8] sm:$0xf] %vm5087_vm1, %v5895_v0  ;;  %v5896_v49 = vpack.c.bf16 %v4510_v56, %v4510_v56  ;;  %v8397_v52 = vadd.f32 %v3640_v62, %v3096_v23  ;;  %v4066_v19 = vadd.f32 %v6103_v11, %v7984_v53  ;;  %v3642_v37 = vpop.f32.mrb[193].mxu0  ;;  %v4057_v30 = vpop.f32.mrb[1].mxu1 }
 0x323   : > { %5148 = vst.msk [vmem:[%s7966_s6 + $0xf0] sm:$0xf] %vm5087_vm1, %v5893_v22  ;;  %v5894_v41 = vpack.c.bf16 %v4508_v58, %v4508_v58  ;;  %v4058_v12 = vadd.f32 %v4057_v30, %v8912_v59  ;;  %v3643_v34 = vpop.f32.mrb[194].mxu0  ;;  %v6104_v20 = vpop.f32.mrb[2].mxu1 }
 0x324   : > { %5151 = vst.msk [vmem:[%s7966_s6 + $0xfc] sm:$0xf] %vm5087_vm1, %v5896_v49  ;;  %v4378_v35 = vmax.f32 %v4066_v19, 0.0  ;;  %v8405_v9 = vadd.f32 %v3643_v34, %v3099_v3  ;;  %v4069_v51 = vadd.f32 %v6104_v20, %v7996_v14  ;;  %v3645_v61 = vpop.f32.mrb[195].mxu0  ;;  %v4060_v60 = vpop.f32.mrb[3].mxu1 }
 0x325   : > { %5149 = vst.msk [vmem:[%s7966_s6 + $0xf4] sm:$0xf] %vm5087_vm1, %v5894_v41  ;;  %v4376_v53 = vmax.f32 %v4058_v12, 0.0  ;;  %v4061_v21 = vadd.f32 %v4060_v60, %v7959_v55  ;;  %v8914_v55 = vld [vmem:[#allocation52_spill] sm:$0xff] }
 0x326   : > { %v4513_v7 = vadd.f32 %v8361_v31, %v4378_v35  ;;  %v4379_v38 = vmax.f32 %v4069_v51, 0.0  ;;  %v3107_v22 = vadd.f32 %v8093_v28, %v8914_v55 }
 0x327   : > { %v4511_v39 = vadd.f32 %v8361_v31, %v4376_v53  ;;  %v4377_v44 = vmax.f32 %v4061_v21, 0.0  ;;  %v8915_v53 = vld [vmem:[#allocation53_spill] sm:$0xff] }
 0x328   : > { %v5899_v1 = vpack.c.bf16 %v4513_v7, %v4513_v7  ;;  %v4514_v14 = vadd.f32 %v8361_v31, %v4379_v38  ;;  %v3112_v21 = vadd.f32 %v8093_v28, %v8915_v53 }
 0x329   : > { %v5897_v10 = vpack.c.bf16 %v4511_v39, %v4511_v39  ;;  %v4512_v23 = vadd.f32 %v8361_v31, %v4377_v44  ;;  %v3648_v0 = vpop.f32.mrb[196].mxu0  ;;  %v6107_v56 = vpop.f32.mrb[4].mxu1 }
 0x32a   : > { %5154 = vst.msk [vmem:[%s7966_s6 + $0x108] sm:$0xf] %vm5087_vm1, %v5899_v1  ;;  %v5900_v58 = vpack.c.bf16 %v4514_v14, %v4514_v14  ;;  %v8421_v62 = vadd.f32 %v3648_v0, %v3104_v47  ;;  %v4082_v11 = vadd.f32 %v6107_v56, %v8052_v15  ;;  %v3650_v54 = vpop.f32.mrb[197].mxu0  ;;  %v4073_v3 = vpop.f32.mrb[5].mxu1 }
 0x32b   : > { %5152 = vst.msk [vmem:[%s7966_s6 + $0x100] sm:$0xf] %vm5087_vm1, %v5897_v10  ;;  %v5898_v49 = vpack.c.bf16 %v4512_v23, %v4512_v23  ;;  %v4074_v19 = vadd.f32 %v4073_v3, %v8018_v42  ;;  %v3651_v37 = vpop.f32.mrb[198].mxu0  ;;  %v6108_v30 = vpop.f32.mrb[6].mxu1 }
 0x32c   : > { %5155 = vst.msk [vmem:[%s7966_s6 + $0x10c] sm:$0xf] %vm5087_vm1, %v5900_v58  ;;  %v4382_v41 = vmax.f32 %v4082_v11, 0.0  ;;  %v8429_v59 = vadd.f32 %v3651_v37, %v3107_v22  ;;  %v4085_v12 = vadd.f32 %v6108_v30, %v8064_v32  ;;  %v3653_v34 = vpop.f32.mrb[199].mxu0  ;;  %v4076_v20 = vpop.f32.mrb[7].mxu1 }
 0x32d   : > { %5153 = vst.msk [vmem:[%s7966_s6 + $0x104] sm:$0xf] %vm5087_vm1, %v5898_v49  ;;  %v4380_v15 = vmax.f32 %v4074_v19, 0.0  ;;  %v4077_v35 = vadd.f32 %v4076_v20, %v8030_v57  ;;  %v8916_v57 = vld [vmem:[#allocation54_spill] sm:$0xff]  ;;  %v8917_v34 = vld [vmem:[#allocation55_spill] sm:$0xff] }
 0x32e   : > { %v4517_v51 = vadd.f32 %v8361_v31, %v4382_v41  ;;  %v4383_v42 = vmax.f32 %v4085_v12, 0.0  ;;  %v3115_v47 = vadd.f32 %v8093_v28, %v8916_v57  ;;  %v3120_v20 = vadd.f32 %v8093_v28, %v8917_v34  ;;  %v8922_v34 = vld [vmem:[#allocation58_spill] sm:$0xff] }
 0x32f   : > { %v4515_v61 = vadd.f32 %v8361_v31, %v4380_v15  ;;  %v4381_v60 = vmax.f32 %v4077_v35, 0.0 }
 0x330   : > { %v5903_v7 = vpack.c.bf16 %v4517_v51, %v4517_v51  ;;  %v4518_v32 = vadd.f32 %v8361_v31, %v4383_v42 }
 0x331   : > { %v5901_v38 = vpack.c.bf16 %v4515_v61, %v4515_v61  ;;  %v4516_v39 = vadd.f32 %v8361_v31, %v4381_v60  ;;  %v3656_v44 = vpop.f32.mrb[200].mxu0  ;;  %v6111_v13 = vpop.f32.mrb[8].mxu1 }
 0x332   : > { %5158 = vst.msk [vmem:[%s7966_s6 + $0x118] sm:$0xf] %vm5087_vm1, %v5903_v7  ;;  %v5904_v1 = vpack.c.bf16 %v4518_v32, %v4518_v32  ;;  %v8445_v14 = vadd.f32 %v3656_v44, %v3112_v21  ;;  %v4098_v10 = vadd.f32 %v6111_v13, %v8122_v48  ;;  %v3658_v23 = vpop.f32.mrb[201].mxu0  ;;  %v4089_v0 = vpop.f32.mrb[9].mxu1  ;;  %v8919_v44 = vld [vmem:[#allocation6_spill] sm:$0xff] }
 0x333   : > { %5156 = vst.msk [vmem:[%s7966_s6 + $0x110] sm:$0xf] %vm5087_vm1, %v5901_v38  ;;  %v5902_v56 = vpack.c.bf16 %v4516_v39, %v4516_v39  ;;  %v4090_v55 = vadd.f32 %v4089_v0, %v8086_v33  ;;  %v3659_v22 = vpop.f32.mrb[202].mxu0  ;;  %v6112_v58 = vpop.f32.mrb[10].mxu1 }
 0x334   : > { %5159 = vst.msk [vmem:[%s7966_s6 + $0x11c] sm:$0xf] %vm5087_vm1, %v5904_v1  ;;  %v4386_v11 = vmax.f32 %v4098_v10, 0.0  ;;  %v8453_v54 = vadd.f32 %v3659_v22, %v3115_v47  ;;  %v4101_v3 = vadd.f32 %v6112_v58, %v8130_v24  ;;  %v3661_v49 = vpop.f32.mrb[203].mxu0  ;;  %v4092_v19 = vpop.f32.mrb[11].mxu1 }
 0x335   : > { %5157 = vst.msk [vmem:[%s7966_s6 + $0x114] sm:$0xf] %vm5087_vm1, %v5902_v56  ;;  %v4384_v48 = vmax.f32 %v4090_v55, 0.0  ;;  %v4093_v37 = vadd.f32 %v4092_v19, %v8101_v40  ;;  %v8918_v40 = vld [vmem:[#allocation56_spill] sm:$0xff]  ;;  %v8920_v56 = vld [vmem:[#allocation2_spill] sm:$0xff] }
 0x336   : > { %v4521_v30 = vadd.f32 %v8361_v31, %v4386_v11  ;;  %v4387_v33 = vmax.f32 %v4101_v3, 0.0  ;;  %v3123_v60 = vadd.f32 %v8093_v28, %v8918_v40  ;;  %v8488_v49 = vld [vmem:[%s8770_s2] ss:$0 sm:$0xff] }
 0x337   : > { %v4519_v41 = vadd.f32 %v8361_v31, %v4384_v48  ;;  %v4385_v12 = vmax.f32 %v4093_v37, 0.0 }
 0x338   : > { %v5907_v15 = vpack.c.bf16 %v4521_v30, %v4521_v30  ;;  %v4522_v24 = vadd.f32 %v8361_v31, %v4387_v33 }
 0x339   : > { %v5905_v35 = vpack.c.bf16 %v4519_v41, %v4519_v41  ;;  %v4520_v51 = vadd.f32 %v8361_v31, %v4385_v12  ;;  %v3664_v42 = vpop.f32.mrb[204].mxu0  ;;  %v6115_v61 = vpop.f32.mrb[12].mxu1 }
 0x33a   : > { %5162 = vst.msk [vmem:[%s7966_s6 + $0x128] sm:$0xf] %vm5087_vm1, %v5907_v15  ;;  %v5908_v53 = vpack.c.bf16 %v4522_v24, %v4522_v24  ;;  %v8469_v21 = vadd.f32 %v3664_v42, %v3120_v20  ;;  %v4114_v7 = vadd.f32 %v6115_v61, %v8178_v16  ;;  %v3666_v32 = vpop.f32.mrb[205].mxu0  ;;  %v4105_v38 = vpop.f32.mrb[13].mxu1  ;;  %v3131_v20 = vadd.f32 %v8488_v49, %v8922_v34 }
 0x33b   : > { %5160 = vst.msk [vmem:[%s7966_s6 + $0x120] sm:$0xf] %vm5087_vm1, %v5905_v35  ;;  %v5906_v39 = vpack.c.bf16 %v4520_v51, %v4520_v51  ;;  %v4106_v13 = vadd.f32 %v4105_v38, %v8919_v44  ;;  %v3667_v57 = vpop.f32.mrb[206].mxu0  ;;  %v6116_v47 = vpop.f32.mrb[14].mxu1 }
 0x33c   : > { %5163 = vst.msk [vmem:[%s7966_s6 + $0x12c] sm:$0xf] %vm5087_vm1, %v5908_v53  ;;  %v4390_v28 = vmax.f32 %v4114_v7, 0.0  ;;  %v8477_v1 = vadd.f32 %v3667_v57, %v3123_v60  ;;  %v4117_v10 = vadd.f32 %v6116_v47, %v8186_v18  ;;  %v3669_v23 = vpop.f32.mrb[207].mxu0  ;;  %v4108_v0 = vpop.f32.mrb[15].mxu1  ;;  %v8921_v18 = vld [vmem:[#allocation57_spill] sm:$0xff] }
 0x33d   : > { %5161 = vst.msk [vmem:[%s7966_s6 + $0x124] sm:$0xf] %vm5087_vm1, %v5906_v39  ;;  %v4388_v16 = vmax.f32 %v4106_v13, 0.0  ;;  %v4109_v55 = vadd.f32 %v4108_v0, %v8920_v56  ;;  %v3128_v19 = vadd.f32 %v8488_v49, %v8921_v18 }
 0x33e   : > { %v4525_v22 = vadd.f32 %v8361_v31, %v4390_v28  ;;  %v4391_v58 = vmax.f32 %v4117_v10, 0.0  ;;  %v8923_v10 = vld [vmem:[#allocation59_spill] sm:$0xff] }
 0x33f   : > { %v4523_v11 = vadd.f32 %v8361_v31, %v4388_v16  ;;  %v4389_v3 = vmax.f32 %v4109_v55, 0.0  ;;  %v3136_v23 = vadd.f32 %v8488_v49, %v8923_v10 }
 0x340   : > { %v5911_v48 = vpack.c.bf16 %v4525_v22, %v4525_v22  ;;  %v4526_v37 = vadd.f32 %v8361_v31, %v4391_v58 }
 0x341   : > { %v5909_v30 = vpack.c.bf16 %v4523_v11, %v4523_v11  ;;  %v4524_v33 = vadd.f32 %v8361_v31, %v4389_v3  ;;  %v3672_v41 = vpop.f32.mrb[208].mxu0  ;;  %v6119_v12 = vpop.f32.mrb[16].mxu1 }
 0x342   : > { %5166 = vst.msk [vmem:[%s7966_s6 + $0x138] sm:$0xf] %vm5087_vm1, %v5911_v48  ;;  %v5912_v15 = vpack.c.bf16 %v4526_v37, %v4526_v37  ;;  %v8498_v24 = vadd.f32 %v3672_v41, %v3128_v19  ;;  %v4130_v35 = vadd.f32 %v6119_v12, %v8224_v50  ;;  %v3674_v51 = vpop.f32.mrb[209].mxu0  ;;  %v4121_v42 = vpop.f32.mrb[17].mxu1 }
 0x343   : > { %5164 = vst.msk [vmem:[%s7966_s6 + $0x130] sm:$0xf] %vm5087_vm1, %v5909_v30  ;;  %v5910_v61 = vpack.c.bf16 %v4524_v33, %v4524_v33  ;;  %v4122_v40 = vadd.f32 %v4121_v42, %v8200_v17  ;;  %v3675_v60 = vpop.f32.mrb[210].mxu0  ;;  %v6120_v53 = vpop.f32.mrb[18].mxu1 }
 0x344   : > { %5167 = vst.msk [vmem:[%s7966_s6 + $0x13c] sm:$0xf] %vm5087_vm1, %v5912_v15  ;;  %v4394_v7 = vmax.f32 %v4130_v35, 0.0  ;;  %v8506_v32 = vadd.f32 %v3675_v60, %v3131_v20  ;;  %v4133_v38 = vadd.f32 %v6120_v53, %v8232_v26  ;;  %v3677_v39 = vpop.f32.mrb[211].mxu0  ;;  %v4124_v44 = vpop.f32.mrb[19].mxu1  ;;  %v8925_v60 = vld [vmem:[#allocation61_spill] sm:$0xff] }
 0x345   : > { %5165 = vst.msk [vmem:[%s7966_s6 + $0x134] sm:$0xf] %vm5087_vm1, %v5910_v61  ;;  %v4392_v50 = vmax.f32 %v4122_v40, 0.0  ;;  %v4125_v13 = vadd.f32 %v4124_v44, %v8208_v25  ;;  %v8924_v25 = vld [vmem:[#allocation60_spill] sm:$0xff]  ;;  %v3144_v53 = vadd.f32 %v8488_v49, %v8925_v60 }
 0x346   : > { %v4529_v57 = vadd.f32 %v8361_v31, %v4394_v7  ;;  %v4395_v17 = vmax.f32 %v4133_v38, 0.0  ;;  %v3139_v58 = vadd.f32 %v8488_v49, %v8924_v25 }
 0x347   : > { %v4527_v47 = vadd.f32 %v8361_v31, %v4392_v50  ;;  %v4393_v28 = vmax.f32 %v4125_v13, 0.0 }
 0x348   : > { %v5915_v0 = vpack.c.bf16 %v4529_v57, %v4529_v57  ;;  %v4530_v26 = vadd.f32 %v8361_v31, %v4395_v17 }
 0x349   : > { %v5913_v16 = vpack.c.bf16 %v4527_v47, %v4527_v47  ;;  %v4528_v56 = vadd.f32 %v8361_v31, %v4393_v28  ;;  %v3680_v55 = vpop.f32.mrb[212].mxu0  ;;  %v6123_v22 = vpop.f32.mrb[20].mxu1 }
 0x34a   : > { %5170 = vst.msk [vmem:[%s7966_s6 + $0x148] sm:$0xf] %vm5087_vm1, %v5915_v0  ;;  %v5916_v11 = vpack.c.bf16 %v4530_v26, %v4530_v26  ;;  %v8522_v3 = vadd.f32 %v3680_v55, %v3136_v23  ;;  %v4146_v18 = vadd.f32 %v6123_v22, %v8272_v29  ;;  %v3682_v19 = vpop.f32.mrb[213].mxu0  ;;  %v4137_v48 = vpop.f32.mrb[21].mxu1 }
 0x34b   : > { %5168 = vst.msk [vmem:[%s7966_s6 + $0x140] sm:$0xf] %vm5087_vm1, %v5913_v16  ;;  %v5914_v37 = vpack.c.bf16 %v4528_v56, %v4528_v56  ;;  %v4138_v30 = vadd.f32 %v4137_v48, %v8248_v45  ;;  %v3683_v33 = vpop.f32.mrb[214].mxu0  ;;  %v6124_v41 = vpop.f32.mrb[22].mxu1 }
 0x34c   : > { %5171 = vst.msk [vmem:[%s7966_s6 + $0x14c] sm:$0xf] %vm5087_vm1, %v5916_v11  ;;  %v4398_v12 = vmax.f32 %v4146_v18, 0.0  ;;  %v8530_v34 = vadd.f32 %v3683_v33, %v3139_v58  ;;  %v4149_v20 = vadd.f32 %v6124_v41, %v8280_v27  ;;  %v3685_v15 = vpop.f32.mrb[215].mxu0  ;;  %v4140_v35 = vpop.f32.mrb[23].mxu1 }
 0x34d   : > { %5169 = vst.msk [vmem:[%s7966_s6 + $0x144] sm:$0xf] %vm5087_vm1, %v5914_v37  ;;  %v4396_v29 = vmax.f32 %v4138_v30, 0.0  ;;  %v4141_v51 = vadd.f32 %v4140_v35, %v8256_v5  ;;  %v8926_v5 = vld [vmem:[#allocation62_spill] sm:$0xff]  ;;  %v8927_v37 = vld [vmem:[#allocation63_spill] sm:$0xff] }
 0x34e   : > { %v4533_v42 = vadd.f32 %v8361_v31, %v4398_v12  ;;  %v4399_v45 = vmax.f32 %v4149_v20, 0.0  ;;  %v3147_v13 = vadd.f32 %v8488_v49, %v8926_v5  ;;  %v3152_v30 = vadd.f32 %v8488_v49, %v8927_v37 }
 0x34f   : > { %v4531_v61 = vadd.f32 %v8361_v31, %v4396_v29  ;;  %v4397_v40 = vmax.f32 %v4141_v51, 0.0 }
 0x350   : > { %v5919_v7 = vpack.c.bf16 %v4533_v42, %v4533_v42  ;;  %v4534_v27 = vadd.f32 %v8361_v31, %v4399_v45 }
 0x351   : > { %v5917_v38 = vpack.c.bf16 %v4531_v61, %v4531_v61  ;;  %v4532_v39 = vadd.f32 %v8361_v31, %v4397_v40  ;;  %v3688_v44 = vpop.f32.mrb[216].mxu0  ;;  %v6127_v50 = vpop.f32.mrb[24].mxu1 }
 0x352   : > { %5174 = vst.msk [vmem:[%s7966_s6 + $0x158] sm:$0xf] %vm5087_vm1, %v5919_v7  ;;  %v5920_v57 = vpack.c.bf16 %v4534_v27, %v4534_v27  ;;  %v8546_v17 = vadd.f32 %v3688_v44, %v3144_v53  ;;  %v4162_v47 = vadd.f32 %v6127_v50, %v8320_v4  ;;  %v3690_v28 = vpop.f32.mrb[217].mxu0  ;;  %v4153_v10 = vpop.f32.mrb[25].mxu1 }
 0x353   : > { %5172 = vst.msk [vmem:[%s7966_s6 + $0x150] sm:$0xf] %vm5087_vm1, %v5917_v38  ;;  %v5918_v23 = vpack.c.bf16 %v4532_v39, %v4532_v39  ;;  %v4154_v0 = vadd.f32 %v4153_v10, %v8296_v36  ;;  %v3691_v26 = vpop.f32.mrb[218].mxu0  ;;  %v6128_v16 = vpop.f32.mrb[26].mxu1  ;;  %v8929_v28 = vld [vmem:[#allocation65_spill] sm:$0xff] }
 0x354   : > { %5175 = vst.msk [vmem:[%s7966_s6 + $0x15c] sm:$0xf] %vm5087_vm1, %v5920_v57  ;;  %v4402_v56 = vmax.f32 %v4162_v47, 0.0  ;;  %v8554_v55 = vadd.f32 %v3691_v26, %v3147_v13  ;;  %v4165_v22 = vadd.f32 %v6128_v16, %v8328_v2  ;;  %v3693_v25 = vpop.f32.mrb[219].mxu0  ;;  %v4156_v58 = vpop.f32.mrb[27].mxu1  ;;  %v3160_v10 = vadd.f32 %v8488_v49, %v8929_v28 }
 0x355   : > { %5173 = vst.msk [vmem:[%s7966_s6 + $0x154] sm:$0xf] %vm5087_vm1, %v5918_v23  ;;  %v4400_v4 = vmax.f32 %v4154_v0, 0.0  ;;  %v4157_v11 = vadd.f32 %v4156_v58, %v8304_v6  ;;  %v8928_v6 = vld [vmem:[#allocation64_spill] sm:$0xff] }
 0x356   : > { %v4537_v18 = vadd.f32 %v8361_v31, %v4402_v56  ;;  %v4403_v36 = vmax.f32 %v4165_v22, 0.0  ;;  %v3155_v35 = vadd.f32 %v8488_v49, %v8928_v6 }
 0x357   : > { %v4535_v19 = vadd.f32 %v8361_v31, %v4400_v4  ;;  %v4401_v48 = vmax.f32 %v4157_v11, 0.0 }
 0x358   : > { %v5923_v33 = vpack.c.bf16 %v4537_v18, %v4537_v18  ;;  %v4538_v2 = vadd.f32 %v8361_v31, %v4403_v36 }
 0x359   : > { %v5921_v41 = vpack.c.bf16 %v4535_v19, %v4535_v19  ;;  %v4536_v12 = vadd.f32 %v8361_v31, %v4401_v48  ;;  %v3696_v20 = vpop.f32.mrb[220].mxu0  ;;  %v6131_v15 = vpop.f32.mrb[28].mxu1 }
 0x35a   : > { %5178 = vst.msk [vmem:[%s7966_s6 + $0x168] sm:$0xf] %vm5087_vm1, %v5923_v33  ;;  %v5924_v29 = vpack.c.bf16 %v4538_v2, %v4538_v2  ;;  %v8570_v51 = vadd.f32 %v3696_v20, %v3152_v30  ;;  %v4178_v42 = vadd.f32 %v6131_v15, %v8373_v43  ;;  %v3698_v45 = vpop.f32.mrb[221].mxu0  ;;  %v4169_v61 = vpop.f32.mrb[29].mxu1 }
 0x35b   : > { %5176 = vst.msk [vmem:[%s7966_s6 + $0x160] sm:$0xf] %vm5087_vm1, %v5921_v41  ;;  %v5922_v40 = vpack.c.bf16 %v4536_v12, %v4536_v12  ;;  %v4170_v60 = vadd.f32 %v4169_v61, %v8344_v46  ;;  %v3699_v53 = vpop.f32.mrb[222].mxu0  ;;  %v6132_v7 = vpop.f32.mrb[30].mxu1 }
 0x35c   : > { %5179 = vst.msk [vmem:[%s7966_s6 + $0x16c] sm:$0xf] %vm5087_vm1, %v5924_v29  ;;  %v4406_v27 = vmax.f32 %v4178_v42, 0.0  ;;  %v8578_v38 = vadd.f32 %v3699_v53, %v3155_v35  ;;  %v4181_v39 = vadd.f32 %v6132_v7, %v8381_v8  ;;  %v3701_v44 = vpop.f32.mrb[223].mxu0  ;;  %v4172_v50 = vpop.f32.mrb[31].mxu1  ;;  %v8931_v29 = vld [vmem:[#allocation67_spill] sm:$0xff] }
 0x35d   : > { %5177 = vst.msk [vmem:[%s7966_s6 + $0x164] sm:$0xf] %vm5087_vm1, %v5922_v40  ;;  %v4404_v43 = vmax.f32 %v4170_v60, 0.0  ;;  %v4173_v5 = vadd.f32 %v4172_v50, %v8352_v63  ;;  %v8930_v63 = vld [vmem:[#allocation66_spill] sm:$0xff]  ;;  %v3168_v42 = vadd.f32 %v8488_v49, %v8931_v29 }
 0x35e   : > { %v4541_v13 = vadd.f32 %v8361_v31, %v4406_v27  ;;  %v4407_v46 = vmax.f32 %v4181_v39, 0.0  ;;  %v3163_v22 = vadd.f32 %v8488_v49, %v8930_v63  ;;  %v8933_v63 = vld [vmem:[#allocation69_spill] sm:$0xff] }
 0x35f   : > { %v4539_v57 = vadd.f32 %v8361_v31, %v4404_v43  ;;  %v4405_v47 = vmax.f32 %v4173_v5, 0.0 }
 0x360   : > { %v5927_v23 = vpack.c.bf16 %v4541_v13, %v4541_v13  ;;  %v4542_v8 = vadd.f32 %v8361_v31, %v4407_v46 }
 0x361   : > { %v5925_v0 = vpack.c.bf16 %v4539_v57, %v4539_v57  ;;  %v4540_v26 = vadd.f32 %v8361_v31, %v4405_v47  ;;  %v3704_v16 = vpop.f32.mrb[224].mxu0  ;;  %v6135_v56 = vpop.f32.mrb[32].mxu1 }
 0x362   : > { %5182 = vst.msk [vmem:[%s7966_s6 + $0x178] sm:$0xf] %vm5087_vm1, %v5927_v23  ;;  %v5928_v25 = vpack.c.bf16 %v4542_v8, %v4542_v8  ;;  %v8594_v58 = vadd.f32 %v3704_v16, %v3160_v10  ;;  %v4194_v4 = vadd.f32 %v6135_v56, %v8421_v62  ;;  %v3706_v11 = vpop.f32.mrb[225].mxu0  ;;  %v4185_v18 = vpop.f32.mrb[33].mxu1 }
 0x363   : > { %5180 = vst.msk [vmem:[%s7966_s6 + $0x170] sm:$0xf] %vm5087_vm1, %v5925_v0  ;;  %v5926_v36 = vpack.c.bf16 %v4540_v26, %v4540_v26  ;;  %v4186_v19 = vadd.f32 %v4185_v18, %v8397_v52  ;;  %v3707_v48 = vpop.f32.mrb[226].mxu0  ;;  %v6136_v37 = vpop.f32.mrb[34].mxu1 }
 0x364   : > { %5183 = vst.msk [vmem:[%s7966_s6 + $0x17c] sm:$0xf] %vm5087_vm1, %v5928_v25  ;;  %v4410_v30 = vmax.f32 %v4194_v4, 0.0  ;;  %v8602_v33 = vadd.f32 %v3707_v48, %v3163_v22  ;;  %v4197_v2 = vadd.f32 %v6136_v37, %v8429_v59  ;;  %v3709_v41 = vpop.f32.mrb[227].mxu0  ;;  %v4188_v12 = vpop.f32.mrb[35].mxu1  ;;  %v3176_v22 = vadd.f32 %v8488_v49, %v8933_v63 }
 0x365   : > { %5181 = vst.msk [vmem:[%s7966_s6 + $0x174] sm:$0xf] %vm5087_vm1, %v5926_v36  ;;  %v4408_v62 = vmax.f32 %v4186_v19, 0.0  ;;  %v4189_v20 = vadd.f32 %v4188_v12, %v8405_v9  ;;  %v8932_v9 = vld [vmem:[#allocation68_spill] sm:$0xff] }
 0x366   : > { %v4545_v15 = vadd.f32 %v8361_v31, %v4410_v30  ;;  %v4411_v52 = vmax.f32 %v4197_v2, 0.0  ;;  %v3171_v7 = vadd.f32 %v8488_v49, %v8932_v9 }
 0x367   : > { %v4543_v6 = vadd.f32 %v8361_v31, %v4408_v62  ;;  %v4409_v35 = vmax.f32 %v4189_v20, 0.0 }
 0x368   : > { %v5931_v45 = vpack.c.bf16 %v4545_v15, %v4545_v15  ;;  %v4546_v59 = vadd.f32 %v8361_v31, %v4411_v52 }
 0x369   : > { %v5929_v61 = vpack.c.bf16 %v4543_v6, %v4543_v6  ;;  %v4544_v40 = vadd.f32 %v8361_v31, %v4409_v35  ;;  %v3712_v60 = vpop.f32.mrb[228].mxu0  ;;  %v6139_v53 = vpop.f32.mrb[36].mxu1 }
 0x36a   : > { %5186 = vst.msk [vmem:[%s7966_s6 + $0x188] sm:$0xf] %vm5087_vm1, %v5931_v45  ;;  %v5932_v27 = vpack.c.bf16 %v4546_v59, %v4546_v59  ;;  %v8618_v39 = vadd.f32 %v3712_v60, %v3168_v42  ;;  %v4210_v44 = vadd.f32 %v6139_v53, %v8469_v21  ;;  %v3714_v50 = vpop.f32.mrb[229].mxu0  ;;  %v4201_v43 = vpop.f32.mrb[37].mxu1  ;;  %v8935_v60 = vld [vmem:[#allocation71_spill] sm:$0xff] }
 0x36b   : > { %5184 = vst.msk [vmem:[%s7966_s6 + $0x180] sm:$0xf] %vm5087_vm1, %v5929_v61  ;;  %v5930_v5 = vpack.c.bf16 %v4544_v40, %v4544_v40  ;;  %v4202_v13 = vadd.f32 %v4201_v43, %v8445_v14  ;;  %v3715_v46 = vpop.f32.mrb[230].mxu0  ;;  %v6140_v57 = vpop.f32.mrb[38].mxu1  ;;  %v3184_v53 = vadd.f32 %v8488_v49, %v8935_v60 }
 0x36c   : > { %5187 = vst.msk [vmem:[%s7966_s6 + $0x18c] sm:$0xf] %vm5087_vm1, %v5932_v27  ;;  %v4414_v47 = vmax.f32 %v4210_v44, 0.0  ;;  %v8626_v28 = vadd.f32 %v3715_v46, %v3171_v7  ;;  %v4213_v10 = vadd.f32 %v6140_v57, %v8477_v1  ;;  %v3717_v23 = vpop.f32.mrb[231].mxu0  ;;  %v4204_v8 = vpop.f32.mrb[39].mxu1 }
 0x36d   : > { %5185 = vst.msk [vmem:[%s7966_s6 + $0x184] sm:$0xf] %vm5087_vm1, %v5930_v5  ;;  %v4412_v21 = vmax.f32 %v4202_v13, 0.0  ;;  %v4205_v0 = vadd.f32 %v4204_v8, %v8453_v54  ;;  %v8934_v54 = vld [vmem:[#allocation70_spill] sm:$0xff] }
 0x36e   : > { %v4549_v26 = vadd.f32 %v8361_v31, %v4414_v47  ;;  %v4415_v14 = vmax.f32 %v4213_v10, 0.0  ;;  %v3179_v19 = vadd.f32 %v8488_v49, %v8934_v54 }
 0x36f   : > { %v4547_v16 = vadd.f32 %v8361_v31, %v4412_v21  ;;  %v4413_v56 = vmax.f32 %v4205_v0, 0.0 }
 0x370   : > { %v5935_v25 = vpack.c.bf16 %v4549_v26, %v4549_v26  ;;  %v4550_v1 = vadd.f32 %v8361_v31, %v4415_v14 }
 0x371   : > { %v5933_v4 = vpack.c.bf16 %v4547_v16, %v4547_v16  ;;  %v4548_v11 = vadd.f32 %v8361_v31, %v4413_v56  ;;  %v3720_v18 = vpop.f32.mrb[232].mxu0  ;;  %v6143_v36 = vpop.f32.mrb[40].mxu1 }
 0x372   : > { %5190 = vst.msk [vmem:[%s7966_s6 + $0x198] sm:$0xf] %vm5087_vm1, %v5935_v25  ;;  %v5936_v48 = vpack.c.bf16 %v4550_v1, %v4550_v1  ;;  %v8642_v37 = vadd.f32 %v3720_v18, %v3176_v22  ;;  %v4226_v30 = vadd.f32 %v6143_v36, %v8522_v3  ;;  %v3722_v2 = vpop.f32.mrb[233].mxu0  ;;  %v4217_v41 = vpop.f32.mrb[41].mxu1 }
 0x373   : > { %5188 = vst.msk [vmem:[%s7966_s6 + $0x190] sm:$0xf] %vm5087_vm1, %v5933_v4  ;;  %v5934_v12 = vpack.c.bf16 %v4548_v11, %v4548_v11  ;;  %v4218_v62 = vadd.f32 %v4217_v41, %v8498_v24  ;;  %v3723_v20 = vpop.f32.mrb[234].mxu0  ;;  %v6144_v15 = vpop.f32.mrb[42].mxu1  ;;  %v8937_v4 = vld [vmem:[#allocation73_spill] sm:$0xff] }
 0x374   : > { %5191 = vst.msk [vmem:[%s7966_s6 + $0x19c] sm:$0xf] %vm5087_vm1, %v5936_v48  ;;  %v4418_v52 = vmax.f32 %v4226_v30, 0.0  ;;  %v8650_v6 = vadd.f32 %v3723_v20, %v3179_v19  ;;  %v4229_v35 = vadd.f32 %v6144_v15, %v8530_v34  ;;  %v3725_v29 = vpop.f32.mrb[235].mxu0  ;;  %v4220_v42 = vpop.f32.mrb[43].mxu1  ;;  %v3192_v11 = vadd.f32 %v8488_v49, %v8937_v4  ;;  %v8941_v4 = vld [vmem:[#allocation77_spill] sm:$0xff] }
 0x375   : > { %5189 = vst.msk [vmem:[%s7966_s6 + $0x194] sm:$0xf] %vm5087_vm1, %v5934_v12  ;;  %v4416_v3 = vmax.f32 %v4218_v62, 0.0  ;;  %v4221_v45 = vadd.f32 %v4220_v42, %v8506_v32  ;;  %v8936_v32 = vld [vmem:[#allocation72_spill] sm:$0xff] }
 0x376   : > { %v4553_v59 = vadd.f32 %v8361_v31, %v4418_v52  ;;  %v4419_v24 = vmax.f32 %v4229_v35, 0.0  ;;  %v3187_v43 = vadd.f32 %v8488_v49, %v8936_v32 }
 0x377   : > { %v4551_v61 = vadd.f32 %v8361_v31, %v4416_v3  ;;  %v4417_v40 = vmax.f32 %v4221_v45, 0.0 }
 0x378   : > { %v5939_v9 = vpack.c.bf16 %v4553_v59, %v4553_v59  ;;  %v4554_v34 = vadd.f32 %v8361_v31, %v4419_v24 }
 0x379   : > { %v5937_v7 = vpack.c.bf16 %v4551_v61, %v4551_v61  ;;  %v4552_v27 = vadd.f32 %v8361_v31, %v4417_v40  ;;  %v3728_v44 = vpop.f32.mrb[236].mxu0  ;;  %v6147_v50 = vpop.f32.mrb[44].mxu1 }
 0x37a   : > { %5194 = vst.msk [vmem:[%s7966_s6 + $0x1a8] sm:$0xf] %vm5087_vm1, %v5939_v9  ;;  %v5940_v5 = vpack.c.bf16 %v4554_v34, %v4554_v34  ;;  %v8666_v13 = vadd.f32 %v3728_v44, %v3184_v53  ;;  %v4242_v46 = vadd.f32 %v6147_v50, %v8570_v51  ;;  %v3730_v57 = vpop.f32.mrb[237].mxu0  ;;  %v4233_v47 = vpop.f32.mrb[45].mxu1  ;;  %v8939_v9 = vld [vmem:[#allocation75_spill] sm:$0xff] }
 0x37b   : > { %5192 = vst.msk [vmem:[%s7966_s6 + $0x1a0] sm:$0xf] %vm5087_vm1, %v5937_v7  ;;  %v5938_v10 = vpack.c.bf16 %v4552_v27, %v4552_v27  ;;  %v4234_v23 = vadd.f32 %v4233_v47, %v8546_v17  ;;  %v3731_v8 = vpop.f32.mrb[238].mxu0  ;;  %v6148_v21 = vpop.f32.mrb[46].mxu1  ;;  %v3200_v34 = vadd.f32 %v8488_v49, %v8939_v9 }
 0x37c   : > { %5195 = vst.msk [vmem:[%s7966_s6 + $0x1ac] sm:$0xf] %vm5087_vm1, %v5940_v5  ;;  %v4422_v0 = vmax.f32 %v4242_v46, 0.0  ;;  %v8674_v26 = vadd.f32 %v3731_v8, %v3187_v43  ;;  %v4245_v14 = vadd.f32 %v6148_v21, %v8578_v38  ;;  %v3733_v16 = vpop.f32.mrb[239].mxu0  ;;  %v4236_v56 = vpop.f32.mrb[47].mxu1 }
 0x37d   : > { %5193 = vst.msk [vmem:[%s7966_s6 + $0x1a4] sm:$0xf] %vm5087_vm1, %v5938_v10  ;;  %v4420_v51 = vmax.f32 %v4234_v23, 0.0  ;;  %v4237_v63 = vadd.f32 %v4236_v56, %v8554_v55  ;;  %v8938_v55 = vld [vmem:[#allocation74_spill] sm:$0xff] }
 0x37e   : > { %v4557_v22 = vadd.f32 %v8361_v31, %v4422_v0  ;;  %v4423_v17 = vmax.f32 %v4245_v14, 0.0  ;;  %v3195_v30 = vadd.f32 %v8488_v49, %v8938_v55 }
 0x37f   : > { %v4555_v25 = vadd.f32 %v8361_v31, %v4420_v51  ;;  %v4421_v1 = vmax.f32 %v4237_v63, 0.0 }
 0x380   : > { %v5943_v18 = vpack.c.bf16 %v4557_v22, %v4557_v22  ;;  %v4558_v38 = vadd.f32 %v8361_v31, %v4423_v17 }
 0x381   : > { %v5941_v36 = vpack.c.bf16 %v4555_v25, %v4555_v25  ;;  %v4556_v54 = vadd.f32 %v8361_v31, %v4421_v1  ;;  %v3736_v19 = vpop.f32.mrb[240].mxu0  ;;  %v6151_v48 = vpop.f32.mrb[48].mxu1 }
 0x382   : > { %5198 = vst.msk [vmem:[%s7966_s6 + $0x1b8] sm:$0xf] %vm5087_vm1, %v5943_v18  ;;  %v5944_v2 = vpack.c.bf16 %v4558_v38, %v4558_v38  ;;  %v8690_v41 = vadd.f32 %v3736_v19, %v3192_v11  ;;  %v4258_v12 = vadd.f32 %v6151_v48, %v8618_v39  ;;  %v3738_v62 = vpop.f32.mrb[241].mxu0  ;;  %v4249_v20 = vpop.f32.mrb[49].mxu1  ;;  %v3208_v11 = vadd.f32 %v8488_v49, %v8941_v4 }
 0x383   : > { %5196 = vst.msk [vmem:[%s7966_s6 + $0x1b0] sm:$0xf] %vm5087_vm1, %v5941_v36  ;;  %v5942_v15 = vpack.c.bf16 %v4556_v54, %v4556_v54  ;;  %v4250_v52 = vadd.f32 %v4249_v20, %v8594_v58  ;;  %v3739_v35 = vpop.f32.mrb[242].mxu0  ;;  %v6152_v29 = vpop.f32.mrb[50].mxu1 }
 0x384   : > { %5199 = vst.msk [vmem:[%s7966_s6 + $0x1bc] sm:$0xf] %vm5087_vm1, %v5944_v2  ;;  %v4426_v42 = vmax.f32 %v4258_v12, 0.0  ;;  %v8698_v3 = vadd.f32 %v3739_v35, %v3195_v30  ;;  %v4261_v45 = vadd.f32 %v6152_v29, %v8626_v28  ;;  %v3741_v59 = vpop.f32.mrb[243].mxu0  ;;  %v4252_v24 = vpop.f32.mrb[51].mxu1 }
 0x385   : > { %5197 = vst.msk [vmem:[%s7966_s6 + $0x1b4] sm:$0xf] %vm5087_vm1, %v5942_v15  ;;  %v4424_v39 = vmax.f32 %v4250_v52, 0.0  ;;  %v4253_v61 = vadd.f32 %v4252_v24, %v8602_v33  ;;  %v8940_v33 = vld [vmem:[#allocation76_spill] sm:$0xff] }
 0x386   : > { %v4561_v40 = vadd.f32 %v8361_v31, %v4426_v42  ;;  %v4427_v58 = vmax.f32 %v4261_v45, 0.0  ;;  %v3203_v43 = vadd.f32 %v8488_v49, %v8940_v33 }
 0x387   : > { %v4559_v60 = vadd.f32 %v8361_v31, %v4424_v39  ;;  %v4425_v53 = vmax.f32 %v4253_v61, 0.0  ;;  %v6982_v61 = vld [vmem:[%s8771_s3] ss:$0 sm:$0xff] }
 0x388   : > { %v5947_v7 = vpack.c.bf16 %v4561_v40, %v4561_v40  ;;  %v4562_v28 = vadd.f32 %v8361_v31, %v4427_v58 }
 0x389   : > { %v5945_v27 = vpack.c.bf16 %v4559_v60, %v4559_v60  ;;  %v4560_v44 = vadd.f32 %v8361_v31, %v4425_v53  ;;  %v3744_v50 = vpop.f32.mrb[244].mxu0  ;;  %v6155_v32 = vpop.f32.mrb[52].mxu1  ;;  %v8943_v53 = vld [vmem:[#allocation81_spill] sm:$0xff] }
 0x38a   : > { %5202 = vst.msk [vmem:[%s7966_s6 + $0x1c8] sm:$0xf] %vm5087_vm1, %v5947_v7  ;;  %v5948_v5 = vpack.c.bf16 %v4562_v28, %v4562_v28  ;;  %v3745_v46 = vadd.f32 %v3744_v50, %v3200_v34  ;;  %v4274_v57 = vadd.f32 %v6155_v32, %v8666_v13  ;;  %v3746_v47 = vpop.f32.mrb[245].mxu0  ;;  %v4265_v10 = vpop.f32.mrb[53].mxu1  ;;  %v3216_v9 = vadd.f32 %v8488_v49, %v8943_v53 }
 0x38b   : > { %5200 = vst.msk [vmem:[%s7966_s6 + $0x1c0] sm:$0xf] %vm5087_vm1, %v5945_v27  ;;  %v5946_v23 = vpack.c.bf16 %v4560_v44, %v4560_v44  ;;  %v4266_v8 = vadd.f32 %v4265_v10, %v8642_v37  ;;  %v3747_v21 = vpop.f32.mrb[246].mxu0  ;;  %v6156_v0 = vpop.f32.mrb[54].mxu1 }
 0x38c   : > { %5203 = vst.msk [vmem:[%s7966_s6 + $0x1cc] sm:$0xf] %vm5087_vm1, %v5948_v5  ;;  %v4430_v14 = vmax.f32 %v4274_v57, 0.0  ;;  %v3748_v16 = vadd.f32 %v3747_v21, %v3203_v43  ;;  %v4277_v56 = vadd.f32 %v6156_v0, %v8674_v26  ;;  %v3749_v51 = vpop.f32.mrb[247].mxu0  ;;  %v4268_v63 = vpop.f32.mrb[55].mxu1 }
 0x38d   : > { %5201 = vst.msk [vmem:[%s7966_s6 + $0x1c4] sm:$0xf] %vm5087_vm1, %v5946_v23  ;;  %v4428_v13 = vmax.f32 %v4266_v8, 0.0  ;;  %v4269_v22 = vadd.f32 %v4268_v63, %v8650_v6  ;;  %v8942_v6 = vld [vmem:[#allocation79_spill] sm:$0xff] }
 0x38e   : > { %v4565_v17 = vadd.f32 %v8361_v31, %v4430_v14  ;;  %v4431_v25 = vmax.f32 %v4277_v56, 0.0  ;;  %v3211_v48 = vadd.f32 %v8488_v49, %v8942_v6 }
 0x38f   : > { %v4563_v37 = vadd.f32 %v8361_v31, %v4428_v13  ;;  %v4429_v1 = vmax.f32 %v4269_v22, 0.0 }
 0x390   : > { %v5951_v18 = vpack.c.bf16 %v4565_v17, %v4565_v17  ;;  %v4566_v26 = vadd.f32 %v8361_v31, %v4431_v25 }
 0x391   : > { %v5949_v38 = vpack.c.bf16 %v4563_v37, %v4563_v37  ;;  %v4564_v36 = vadd.f32 %v8361_v31, %v4429_v1  ;;  %v3752_v54 = vpop.f32.mrb[248].mxu0  ;;  %v6159_v19 = vpop.f32.mrb[56].mxu1 }
 0x392   : > { %5206 = vst.msk [vmem:[%s7966_s6 + $0x1d8] sm:$0xf] %vm5087_vm1, %v5951_v18  ;;  %v5952_v55 = vpack.c.bf16 %v4566_v26, %v4566_v26  ;;  %v3753_v30 = vadd.f32 %v3752_v54, %v3208_v11  ;;  %v4290_v2 = vadd.f32 %v6159_v19, %v3745_v46  ;;  %v3754_v12 = vpop.f32.mrb[249].mxu0  ;;  %v4281_v62 = vpop.f32.mrb[57].mxu1 }
 0x393   : > { %5204 = vst.msk [vmem:[%s7966_s6 + $0x1d0] sm:$0xf] %vm5087_vm1, %v5949_v38  ;;  %v5950_v20 = vpack.c.bf16 %v4564_v36, %v4564_v36  ;;  %v4282_v15 = vadd.f32 %v4281_v62, %v8690_v41  ;;  %v3755_v52 = vpop.f32.mrb[250].mxu0  ;;  %v6160_v31 = vpop.f32.mrb[58].mxu1 }
 0x394   : > { %5207 = vst.msk [vmem:[%s7966_s6 + $0x1dc] sm:$0xf] %vm5087_vm1, %v5952_v55  ;;  %v4434_v35 = vmax.f32 %v4290_v2, 0.0  ;;  %v3756_v29 = vadd.f32 %v3755_v52, %v3211_v48  ;;  %v4293_v42 = vadd.f32 %v6160_v31, %v3748_v16  ;;  %v3757_v45 = vpop.f32.mrb[251].mxu0  ;;  %v4284_v59 = vpop.f32.mrb[59].mxu1 }
 0x395   : > { %5205 = vst.msk [vmem:[%s7966_s6 + $0x1d4] sm:$0xf] %vm5087_vm1, %v5950_v20  ;;  %v4432_v24 = vmax.f32 %v4282_v15, 0.0  ;;  %v4285_v39 = vadd.f32 %v4284_v59, %v8698_v3  ;;  %v8944_v3 = vld [vmem:[#allocation83_spill] sm:$0xff] }
 0x396   : > { %v4569_v41 = vadd.f32 %v6982_v61, %v4434_v35  ;;  %v4435_v40 = vmax.f32 %v4293_v42, 0.0  ;;  %v3219_v32 = vadd.f32 %v8488_v49, %v8944_v3 }
 0x397   : > { %v4567_v58 = vadd.f32 %v6982_v61, %v4432_v24  ;;  %v4433_v60 = vmax.f32 %v4285_v39, 0.0 }
 0x398   : > { %v5955_v34 = vpack.c.bf16 %v4569_v41, %v4569_v41  ;;  %v4570_v7 = vadd.f32 %v6982_v61, %v4435_v40 }
 0x399   : > { %v5953_v28 = vpack.c.bf16 %v4567_v58, %v4567_v58  ;;  %v4568_v27 = vadd.f32 %v6982_v61, %v4433_v60  ;;  %v3760_v44 = vpop.f32.mrb[252].mxu0  ;;  %v6163_v50 = vpop.f32.mrb[60].mxu1 }
 0x39a   : > { %5210 = vst.msk [vmem:[%s7966_s6 + $0x1e8] sm:$0xf] %vm5087_vm1, %v5955_v34  ;;  %v5956_v33 = vpack.c.bf16 %v4570_v7, %v4570_v7  ;;  %v3761_v43 = vadd.f32 %v3760_v44, %v3216_v9  ;;  %v3762_v5 = vpop.f32.mrb[253].mxu0  ;;  %v4297_v46 = vpop.f32.mrb[61].mxu1 }
 0x39b   : > { %5208 = vst.msk [vmem:[%s7966_s6 + $0x1e0] sm:$0xf] %vm5087_vm1, %v5953_v28  ;;  %v5954_v57 = vpack.c.bf16 %v4568_v27, %v4568_v27  ;;  %v4298_v47 = vadd.f32 %v4297_v46, %v3753_v30  ;;  %v3763_v10 = vpop.f32.mrb[254].mxu0  ;;  %v6164_v23 = vpop.f32.mrb[62].mxu1 }
 0x39c   : > { %5211 = vst.msk [vmem:[%s7966_s6 + $0x1ec] sm:$0xf] %vm5087_vm1, %v5956_v33  ;;  %v4306_v8 = vadd.f32 %v6163_v50, %v3761_v43  ;;  %v3764_v21 = vadd.f32 %v3763_v10, %v3219_v32  ;;  %v3765_v0 = vpop.f32.mrb[255].mxu0  ;;  %v4300_v49 = vpop.f32.mrb[63].mxu1 }
 0x39d   : > { %5209 = vst.msk [vmem:[%s7966_s6 + $0x1e4] sm:$0xf] %vm5087_vm1, %v5954_v57  ;;  %v4436_v14 = vmax.f32 %v4298_v47, 0.0  ;;  %v4301_v16 = vadd.f32 %v4300_v49, %v3756_v29 }
 0x39e   : > { %v4438_v56 = vmax.f32 %v4306_v8, 0.0  ;;  %v4309_v51 = vadd.f32 %v6164_v23, %v3764_v21 }
 0x39f   : > { %v4571_v63 = vadd.f32 %v6982_v61, %v4436_v14  ;;  %v4437_v13 = vmax.f32 %v4301_v16, 0.0 }
 0x3a0   : > { %v4573_v22 = vadd.f32 %v6982_v61, %v4438_v56  ;;  %v4439_v17 = vmax.f32 %v4309_v51, 0.0 }
 0x3a1   : > { %v5957_v25 = vpack.c.bf16 %v4571_v63, %v4571_v63  ;;  %v4572_v37 = vadd.f32 %v6982_v61, %v4437_v13 }
 0x3a2   : > { %v5959_v1 = vpack.c.bf16 %v4573_v22, %v4573_v22  ;;  %v4574_v4 = vadd.f32 %v6982_v61, %v4439_v17 }
 0x3a3   : > { %5212 = vst.msk [vmem:[%s7966_s6 + $0x1f0] sm:$0xf] %vm5087_vm1, %v5957_v25  ;;  %v5958_v11 = vpack.c.bf16 %v4572_v37, %v4572_v37 }
 0x3a4   : > { %5214 = vst.msk [vmem:[%s7966_s6 + $0x1f8] sm:$0xf] %vm5087_vm1, %v5959_v1  ;;  %v5960_v18 = vpack.c.bf16 %v4574_v4, %v4574_v4 }
 0x3a5   : > { %5213 = vst.msk [vmem:[%s7966_s6 + $0x1f4] sm:$0xf] %vm5087_vm1, %v5958_v11 }
 0x3a6   : > { %5215 = vst.msk [vmem:[%s7966_s6 + $0x1fc] sm:$0xf] %vm5087_vm1, %v5960_v18 }
 0x3a7 PF: > { %s14_s15 = sadd.s32 1, %s6989_s15  }
 0x3a8   : > { %p11_p4 = scmp.ge.s32.totalorder %s14_s15, 4  }
 0x3aa   :  { %13 = sbr.rel (!%p11_p4) target bundleno = 1 (0x1), region = 66 }

// kernel: decoder_forward.11
= control target key start
LH: loop header
LB: loop body
LE: loop exit
PB: predicated region body
PF: predicated region fallthrough
CT: control target
= control target key end

     0   :  { %s7614_s15 = smov 0   ;;  %s10264_s0 = inlined_call_operand.vmem [shape: bf16[8192,72], index: 0, kind: input, shape index: {}]   ;;  %s10265_s1 = inlined_call_operand.vmem [shape: bf16[72,8], index: 1, kind: input, shape index: {}]   ;;  %s10266_s2 = inlined_call_operand.vmem [shape: f32[1,8], index: 2, kind: input, shape index: {}]   ;;  %s10267_s3 = inlined_call_operand.vmem [shape: f32[1,8], index: 3, kind: input, shape index: {}]   ;;  %s10268_s4 = inlined_call_operand.vmem [shape: f32[8192,8], index: 4, kind: output, shape index: {}]  }
   0x1 LB: > { %s5979_s16 = sadd.s32 4294967295, %s7587_s15   ;;  %p5983_p0 = scmp.ge.s32.totalorder %s7587_s15, 1  ;;  %s7587_s15 = sphi %s7614_s15, %s14_s15  }
   0x2   : > { %p163_p1 = scmp.lt.s32.totalorder %s7587_s15, 3 }
   0x4   : > { %p164_p2 = pnand %p5983_p0, %p163_p1 }
   0x5   : > { %v7312_v0 = vld [vmem:[%s10265_s1] sm:$0xff] (!%p164_p2)   ;;  %v7313_v1 = vld [vmem:[%s10265_s1 + $0x8] sm:$0xff] (!%p164_p2)   ;;  %s5984_s21 = sshll.u32 (!%p164_p2), %s5979_s16, 9  ;;  %v7314_v2 = vld [vmem:[%s10265_s1 + $0x10] sm:$0xff] (!%p164_p2)   ;;  %vm2037_vm0 = vcmask (!%p164_p2), 588800   ;;  %vm2806_vm1 = vcmask (!%p164_p2), 1043456  }
   0x6   : > { %167 = sbr.rel (%p164_p2) target bundleno = 750 (0x2ee), region = 36  ;;  %6770 = vmatprep.subr.bf16.mxu0 (!%p164_p2), %v7312_v0  ;;  %7292 = vmatprep.subr.bf16.mxu1 (!%p164_p2), %v7312_v0  ;;  %p190_p3 = scmp.lt.s32.totalorder (!%p164_p2), %s5984_s21, 1023  ;;  %v7315_v3 = vld [vmem:[%s10265_s1 + $0x18] sm:$0xff] (!%p164_p2)   ;;  %v7316_v6 = vld [vmem:[%s10265_s1 + $0x20] ss:$0 sps:$4 sm:$0xff] (!%p164_p2)   ;;  %vm5410_vm2 = vcmask (!%p164_p2), 64512  }
   0x7   : > { %6771 = vmatpush3.bf16.msra.mxu0 (!%p164_p2), %v7312_v0  ;;  %7297 = vmatpush3.bf16.msra.mxu1 (!%p164_p2), %v7312_v0  ;;  %v2808_v7 = vsel (!%p164_p2), %vm2806_vm1, %v7316_v6, 0 }
   0x8   : > { %6772 = vmatprep.subr.bf16.mxu0 (!%p164_p2), %v7313_v1  ;;  %7293 = vmatprep.subr.bf16.mxu1 (!%p164_p2), %v7313_v1 }
   0xb   : > { %6773 = vmatpush3.bf16.msra.mxu0 (!%p164_p2), %v7313_v1  ;;  %7298 = vmatpush3.bf16.msra.mxu1 (!%p164_p2), %v7313_v1 }
   0xc   : > { %6774 = vmatprep.subr.bf16.mxu0 (!%p164_p2), %v7314_v2  ;;  %7294 = vmatprep.subr.bf16.mxu1 (!%p164_p2), %v7314_v2 }
   0xd   : > { %s10270_s21 = smov (!%p190_p3, %s5984_s21), 1023 }
   0xe   : > { %s5985_s24 = sshll.u32 %s10270_s21, 2  ;;  %s5987_s6 = sshll.u32 %s10270_s21, 3 }
   0xf   : > { %s7640_s29 = scalar_lea.vmem %s10264_s0, %s5985_s24  ;;  %6775 = vmatpush3.bf16.msra.mxu0 %v7314_v2  ;;  %7299 = vmatpush3.bf16.msra.mxu1 %v7314_v2  ;;  %s7883_s13 = scalar_lea.vmem %s10268_s4, %s5987_s6 }
  0x10   : > { %v7317_v4 = vld [vmem:[%s7640_s29] sm:$0xff]   ;;  %6776 = vmatprep.subr.bf16.mxu0 %v7315_v3  ;;  %7295 = vmatprep.subr.bf16.mxu1 %v7315_v3  ;;  %v7319_v8 = vld [vmem:[%s7640_s29 + $0x8] sm:$0xff]   ;;  %v7321_v10 = vld [vmem:[%s7640_s29 + $0x10] sm:$0xff]  }
  0x11   : > { %v7318_v5 = vld [vmem:[%s7640_s29 + $0x400] sm:$0xff]   ;;  %6780 = vmatprep.mubr.msk.bf16.mxu0 %vm2037_vm0, %v7317_v4  ;;  %v7320_v9 = vld [vmem:[%s7640_s29 + $0x408] sm:$0xff]   ;;  %v7322_v11 = vld [vmem:[%s7640_s29 + $0x410] sm:$0xff]  }
  0x12   : > { %7036 = vmatprep.mubr.msk.bf16.mxu1 %vm2037_vm0, %v7318_v5  ;;  %v7323_v12 = vld [vmem:[%s7640_s29 + $0x18] sm:$0xff]   ;;  %v7325_v14 = vld [vmem:[%s7640_s29 + $0x20] sm:$0xff]   ;;  %v7327_v16 = vld [vmem:[%s7640_s29 + $0x28] sm:$0xff]  }
  0x13   : > { %6777 = vmatpush3.bf16.msra.mxu0 %v7315_v3  ;;  %7300 = vmatpush3.bf16.msra.mxu1 %v7315_v3  ;;  %v7324_v13 = vld [vmem:[%s7640_s29 + $0x418] sm:$0xff]   ;;  %v7326_v15 = vld [vmem:[%s7640_s29 + $0x420] sm:$0xff]   ;;  %v7328_v17 = vld [vmem:[%s7640_s29 + $0x428] sm:$0xff]  }
  0x14   : > { %7302 = vmatprep.subr.msk.bf16.mxu0 %vm2806_vm1, %v7316_v6  ;;  %7303 = vmatprep.subr.msk.bf16.mxu1 %vm2806_vm1, %v7316_v6  ;;  %v7329_v18 = vld [vmem:[%s7640_s29 + $0x30] sm:$0xff]   ;;  %v7331_v20 = vld [vmem:[%s7640_s29 + $0x38] sm:$0xff]   ;;  %v7333_v22 = vld [vmem:[%s7640_s29 + $0x40] sm:$0xff]  }
  0x15   : > { %v7330_v19 = vld [vmem:[%s7640_s29 + $0x430] sm:$0xff]   ;;  %v7332_v21 = vld [vmem:[%s7640_s29 + $0x438] sm:$0xff]   ;;  %v7334_v23 = vld [vmem:[%s7640_s29 + $0x440] sm:$0xff]  }
  0x16   : > { %v7335_v24 = vld [vmem:[%s7640_s29 + $0x48] sm:$0xff]   ;;  %v7337_v26 = vld [vmem:[%s7640_s29 + $0x50] sm:$0xff]   ;;  %v7339_v28 = vld [vmem:[%s7640_s29 + $0x58] sm:$0xff]  }
  0x17   : > { %6779 = vmatpush3.bf16.msra.mxu0 %v2808_v7  ;;  %7301 = vmatpush3.bf16.msra.mxu1 %v2808_v7  ;;  %v7336_v25 = vld [vmem:[%s7640_s29 + $0x448] sm:$0xff]   ;;  %v7338_v27 = vld [vmem:[%s7640_s29 + $0x450] sm:$0xff]   ;;  %v7340_v29 = vld [vmem:[%s7640_s29 + $0x458] sm:$0xff]  }
  0x18   : > { %v7341_v30 = vld [vmem:[%s7640_s29 + $0x60] sm:$0xff]   ;;  %v7343_v32 = vld [vmem:[%s7640_s29 + $0x68] sm:$0xff]   ;;  %v7345_v34 = vld [vmem:[%s7640_s29 + $0x70] sm:$0xff]  }
  0x19   : > { %v7342_v31 = vld [vmem:[%s7640_s29 + $0x460] sm:$0xff]   ;;  %v7344_v33 = vld [vmem:[%s7640_s29 + $0x468] sm:$0xff]   ;;  %v7346_v35 = vld [vmem:[%s7640_s29 + $0x470] sm:$0xff]  }
  0x1a   : > { %6781 = vmatmul.mubr.msk.bf16.vlgmr.msra.gmra.mrb[0].mxu0 %vm2037_vm0, %v7319_v8  ;;  %7037 = vmatmul.mubr.msk.bf16.vlgmr.msra.gmra.mrb[0].mxu1 %vm2037_vm0, %v7320_v9  ;;  %v7347_v36 = vld [vmem:[%s7640_s29 + $0x78] sm:$0xff]   ;;  %v7349_v38 = vld [vmem:[%s7640_s29 + $0x80] sm:$0xff]   ;;  %v7351_v40 = vld [vmem:[%s7640_s29 + $0x88] sm:$0xff]  }
  0x1b   : > { %6784 = vmatprep.mubr.msk.bf16.mxu0 %vm2037_vm0, %v7321_v10  ;;  %7040 = vmatprep.mubr.msk.bf16.mxu1 %vm2037_vm0, %v7322_v11  ;;  %v7348_v37 = vld [vmem:[%s7640_s29 + $0x478] sm:$0xff]   ;;  %v7350_v39 = vld [vmem:[%s7640_s29 + $0x480] sm:$0xff]   ;;  %v7352_v41 = vld [vmem:[%s7640_s29 + $0x488] sm:$0xff]  }
  0x1c   : > { %v7353_v42 = vld [vmem:[%s7640_s29 + $0x90] sm:$0xff]   ;;  %v7355_v44 = vld [vmem:[%s7640_s29 + $0x98] sm:$0xff]   ;;  %v7357_v46 = vld [vmem:[%s7640_s29 + $0xa0] sm:$0xff]  }
  0x1d   : > { %v7354_v43 = vld [vmem:[%s7640_s29 + $0x490] sm:$0xff]   ;;  %v7356_v45 = vld [vmem:[%s7640_s29 + $0x498] sm:$0xff]   ;;  %v7358_v47 = vld [vmem:[%s7640_s29 + $0x4a0] sm:$0xff]  }
  0x1e   : > { %v7359_v48 = vld [vmem:[%s7640_s29 + $0xa8] sm:$0xff]   ;;  %v7361_v50 = vld [vmem:[%s7640_s29 + $0xb0] sm:$0xff]   ;;  %v7363_v52 = vld [vmem:[%s7640_s29 + $0xb8] sm:$0xff]  }
  0x1f   : > { %v7360_v49 = vld [vmem:[%s7640_s29 + $0x4a8] sm:$0xff]   ;;  %v7362_v51 = vld [vmem:[%s7640_s29 + $0x4b0] sm:$0xff]   ;;  %v7364_v53 = vld [vmem:[%s7640_s29 + $0x4b8] sm:$0xff]  }
  0x20   : > { %v7365_v54 = vld [vmem:[%s7640_s29 + $0xc0] sm:$0xff]   ;;  %v7367_v56 = vld [vmem:[%s7640_s29 + $0xc8] sm:$0xff]   ;;  %v7369_v58 = vld [vmem:[%s7640_s29 + $0xd0] sm:$0xff]  }
  0x21   : > { %v7366_v55 = vld [vmem:[%s7640_s29 + $0x4c0] sm:$0xff]   ;;  %v7368_v57 = vld [vmem:[%s7640_s29 + $0x4c8] sm:$0xff]   ;;  %v7370_v59 = vld [vmem:[%s7640_s29 + $0x4d0] sm:$0xff]  }
  0x22   : > { %6785 = vmatmul.mubr.msk.bf16.gmra.mrb[4].mxu0 %vm2037_vm0, %v7323_v12  ;;  %7041 = vmatmul.mubr.msk.bf16.gmra.mrb[4].mxu1 %vm2037_vm0, %v7324_v13  ;;  %v7371_v60 = vld [vmem:[%s7640_s29 + $0xd8] sm:$0xff]   ;;  %v7373_v62 = vld [vmem:[%s7640_s29 + $0xe0] sm:$0xff]   ;;  %v7375_v0 = vld [vmem:[%s7640_s29 + $0xe8] sm:$0xff]  }
  0x23   : > { %6788 = vmatprep.mubr.msk.bf16.mxu0 %vm2037_vm0, %v7325_v14  ;;  %7044 = vmatprep.mubr.msk.bf16.mxu1 %vm2037_vm0, %v7326_v15  ;;  %v7372_v61 = vld [vmem:[%s7640_s29 + $0x4d8] sm:$0xff]   ;;  %v7374_v63 = vld [vmem:[%s7640_s29 + $0x4e0] sm:$0xff]   ;;  %v7376_v1 = vld [vmem:[%s7640_s29 + $0x4e8] sm:$0xff]  }
  0x24   : > { %v7377_v2 = vld [vmem:[%s7640_s29 + $0xf0] sm:$0xff]   ;;  %v7379_v4 = vld [vmem:[%s7640_s29 + $0xf8] sm:$0xff]   ;;  %v7381_v6 = vld [vmem:[%s7640_s29 + $0x100] sm:$0xff]  }
  0x25   : > { %v7378_v3 = vld [vmem:[%s7640_s29 + $0x4f0] sm:$0xff]   ;;  %v7380_v5 = vld [vmem:[%s7640_s29 + $0x4f8] sm:$0xff]   ;;  %v7382_v7 = vld [vmem:[%s7640_s29 + $0x500] sm:$0xff]  }
  0x26   : > { %v7383_v8 = vld [vmem:[%s7640_s29 + $0x108] sm:$0xff]   ;;  %v7385_v10 = vld [vmem:[%s7640_s29 + $0x110] sm:$0xff]   ;;  %v7387_v12 = vld [vmem:[%s7640_s29 + $0x118] sm:$0xff]  }
  0x27   : > { %v7384_v9 = vld [vmem:[%s7640_s29 + $0x508] sm:$0xff]   ;;  %v7386_v11 = vld [vmem:[%s7640_s29 + $0x510] sm:$0xff]   ;;  %v7388_v13 = vld [vmem:[%s7640_s29 + $0x518] sm:$0xff]  }
  0x28   : > { %v7389_v14 = vld [vmem:[%s7640_s29 + $0x120] sm:$0xff]  }
  0x29   : > { %v7390_v15 = vld [vmem:[%s7640_s29 + $0x520] sm:$0xff]  }
  0x2a   : > { %6789 = vmatmul.mubr.msk.bf16.gmra.mrb[8].mxu0 %vm2037_vm0, %v7327_v16  ;;  %7045 = vmatmul.mubr.msk.bf16.gmra.mrb[8].mxu1 %vm2037_vm0, %v7328_v17  ;;  %v7391_v16 = vld [vmem:[%s7640_s29 + $0x128] sm:$0xff]  }
  0x2b   : > { %6792 = vmatprep.mubr.msk.bf16.mxu0 %vm2037_vm0, %v7329_v18  ;;  %7048 = vmatprep.mubr.msk.bf16.mxu1 %vm2037_vm0, %v7330_v19  ;;  %v7392_v17 = vld [vmem:[%s7640_s29 + $0x528] sm:$0xff]   ;;  %v7393_v18 = vld [vmem:[%s7640_s29 + $0x130] sm:$0xff]  }
  0x2c   : > { %v7394_v19 = vld [vmem:[%s7640_s29 + $0x530] sm:$0xff]  }
  0x32   : > { %6793 = vmatmul.mubr.msk.bf16.gmra.mrb[12].mxu0 %vm2037_vm0, %v7331_v20  ;;  %7049 = vmatmul.mubr.msk.bf16.gmra.mrb[12].mxu1 %vm2037_vm0, %v7332_v21  ;;  %v7395_v20 = vld [vmem:[%s7640_s29 + $0x138] sm:$0xff]  }
  0x33   : > { %6796 = vmatprep.mubr.msk.bf16.mxu0 %vm2037_vm0, %v7333_v22  ;;  %7052 = vmatprep.mubr.msk.bf16.mxu1 %vm2037_vm0, %v7334_v23  ;;  %v7396_v21 = vld [vmem:[%s7640_s29 + $0x538] sm:$0xff]   ;;  %v7397_v22 = vld [vmem:[%s7640_s29 + $0x140] sm:$0xff]  }
  0x34   : > { %v7398_v23 = vld [vmem:[%s7640_s29 + $0x540] sm:$0xff]  }
  0x3a   : > { %6797 = vmatmul.mubr.msk.bf16.gmra.mrb[16].mxu0 %vm2037_vm0, %v7335_v24  ;;  %7053 = vmatmul.mubr.msk.bf16.gmra.mrb[16].mxu1 %vm2037_vm0, %v7336_v25  ;;  %v7399_v24 = vld [vmem:[%s7640_s29 + $0x148] sm:$0xff]  }
  0x3b   : > { %6800 = vmatprep.mubr.msk.bf16.mxu0 %vm2037_vm0, %v7337_v26  ;;  %7056 = vmatprep.mubr.msk.bf16.mxu1 %vm2037_vm0, %v7338_v27  ;;  %v7400_v25 = vld [vmem:[%s7640_s29 + $0x548] sm:$0xff]   ;;  %v7401_v26 = vld [vmem:[%s7640_s29 + $0x150] sm:$0xff]  }
  0x3c   : > { %v7402_v27 = vld [vmem:[%s7640_s29 + $0x550] sm:$0xff]  }
  0x42   : > { %6801 = vmatmul.mubr.msk.bf16.gmra.mrb[20].mxu0 %vm2037_vm0, %v7339_v28  ;;  %7057 = vmatmul.mubr.msk.bf16.gmra.mrb[20].mxu1 %vm2037_vm0, %v7340_v29  ;;  %v7403_v28 = vld [vmem:[%s7640_s29 + $0x158] sm:$0xff]  }
  0x43   : > { %6804 = vmatprep.mubr.msk.bf16.mxu0 %vm2037_vm0, %v7341_v30  ;;  %7060 = vmatprep.mubr.msk.bf16.mxu1 %vm2037_vm0, %v7342_v31  ;;  %v7404_v29 = vld [vmem:[%s7640_s29 + $0x558] sm:$0xff]   ;;  %v7405_v30 = vld [vmem:[%s7640_s29 + $0x160] sm:$0xff]  }
  0x44   : > { %v7406_v31 = vld [vmem:[%s7640_s29 + $0x560] sm:$0xff]  }
  0x4a   : > { %6805 = vmatmul.mubr.msk.bf16.gmra.mrb[24].mxu0 %vm2037_vm0, %v7343_v32  ;;  %7061 = vmatmul.mubr.msk.bf16.gmra.mrb[24].mxu1 %vm2037_vm0, %v7344_v33  ;;  %v7407_v32 = vld [vmem:[%s7640_s29 + $0x168] sm:$0xff]  }
  0x4b   : > { %6808 = vmatprep.mubr.msk.bf16.mxu0 %vm2037_vm0, %v7345_v34  ;;  %7064 = vmatprep.mubr.msk.bf16.mxu1 %vm2037_vm0, %v7346_v35  ;;  %v7408_v33 = vld [vmem:[%s7640_s29 + $0x568] sm:$0xff]   ;;  %v7409_v34 = vld [vmem:[%s7640_s29 + $0x170] sm:$0xff]  }
  0x4c   : > { %v7410_v35 = vld [vmem:[%s7640_s29 + $0x570] sm:$0xff]  }
  0x52   : > { %6809 = vmatmul.mubr.msk.bf16.gmra.mrb[28].mxu0 %vm2037_vm0, %v7347_v36  ;;  %7065 = vmatmul.mubr.msk.bf16.gmra.mrb[28].mxu1 %vm2037_vm0, %v7348_v37  ;;  %v7411_v36 = vld [vmem:[%s7640_s29 + $0x178] sm:$0xff]  }
  0x53   : > { %6812 = vmatprep.mubr.msk.bf16.mxu0 %vm2037_vm0, %v7349_v38  ;;  %7068 = vmatprep.mubr.msk.bf16.mxu1 %vm2037_vm0, %v7350_v39  ;;  %v7412_v37 = vld [vmem:[%s7640_s29 + $0x578] sm:$0xff]   ;;  %v7413_v38 = vld [vmem:[%s7640_s29 + $0x180] sm:$0xff]  }
  0x54   : > { %v7414_v39 = vld [vmem:[%s7640_s29 + $0x580] sm:$0xff]  }
  0x5a   : > { %6813 = vmatmul.mubr.msk.bf16.gmra.mrb[32].mxu0 %vm2037_vm0, %v7351_v40  ;;  %7069 = vmatmul.mubr.msk.bf16.gmra.mrb[32].mxu1 %vm2037_vm0, %v7352_v41  ;;  %v7415_v40 = vld [vmem:[%s7640_s29 + $0x188] sm:$0xff]  }
  0x5b   : > { %6816 = vmatprep.mubr.msk.bf16.mxu0 %vm2037_vm0, %v7353_v42  ;;  %7072 = vmatprep.mubr.msk.bf16.mxu1 %vm2037_vm0, %v7354_v43  ;;  %v7416_v41 = vld [vmem:[%s7640_s29 + $0x588] sm:$0xff]   ;;  %v7417_v42 = vld [vmem:[%s7640_s29 + $0x190] sm:$0xff]  }
  0x5c   : > { %v7418_v43 = vld [vmem:[%s7640_s29 + $0x590] sm:$0xff]  }
  0x62   : > { %6817 = vmatmul.mubr.msk.bf16.gmra.mrb[36].mxu0 %vm2037_vm0, %v7355_v44  ;;  %7073 = vmatmul.mubr.msk.bf16.gmra.mrb[36].mxu1 %vm2037_vm0, %v7356_v45  ;;  %v7419_v44 = vld [vmem:[%s7640_s29 + $0x198] sm:$0xff]  }
  0x63   : > { %6820 = vmatprep.mubr.msk.bf16.mxu0 %vm2037_vm0, %v7357_v46  ;;  %7076 = vmatprep.mubr.msk.bf16.mxu1 %vm2037_vm0, %v7358_v47  ;;  %v7420_v45 = vld [vmem:[%s7640_s29 + $0x598] sm:$0xff]   ;;  %v7421_v46 = vld [vmem:[%s7640_s29 + $0x1a0] sm:$0xff]  }
  0x64   : > { %v7422_v47 = vld [vmem:[%s7640_s29 + $0x5a0] sm:$0xff]  }
  0x6a   : > { %6821 = vmatmul.mubr.msk.bf16.gmra.mrb[40].mxu0 %vm2037_vm0, %v7359_v48  ;;  %7077 = vmatmul.mubr.msk.bf16.gmra.mrb[40].mxu1 %vm2037_vm0, %v7360_v49  ;;  %v7423_v48 = vld [vmem:[%s7640_s29 + $0x1a8] sm:$0xff]  }
  0x6b   : > { %6824 = vmatprep.mubr.msk.bf16.mxu0 %vm2037_vm0, %v7361_v50  ;;  %7080 = vmatprep.mubr.msk.bf16.mxu1 %vm2037_vm0, %v7362_v51  ;;  %v7424_v49 = vld [vmem:[%s7640_s29 + $0x5a8] sm:$0xff]   ;;  %v7425_v50 = vld [vmem:[%s7640_s29 + $0x1b0] sm:$0xff]  }
  0x6c   : > { %v7426_v51 = vld [vmem:[%s7640_s29 + $0x5b0] sm:$0xff]  }
  0x72   : > { %6825 = vmatmul.mubr.msk.bf16.gmra.mrb[44].mxu0 %vm2037_vm0, %v7363_v52  ;;  %7081 = vmatmul.mubr.msk.bf16.gmra.mrb[44].mxu1 %vm2037_vm0, %v7364_v53  ;;  %v7865_v52 = vld [vmem:[%s10266_s2] ss:$0 sm:$0xff] }
  0x73   : > { %6828 = vmatprep.mubr.msk.bf16.mxu0 %vm2037_vm0, %v7365_v54  ;;  %7084 = vmatprep.mubr.msk.bf16.mxu1 %vm2037_vm0, %v7366_v55  ;;  %v7872_v53 = vld [vmem:[%s10267_s3] ss:$0 sm:$0xff]  ;;  %v7427_v54 = vld [vmem:[%s7640_s29 + $0x1b8] sm:$0xff]  }
  0x74   : > { %v7428_v55 = vld [vmem:[%s7640_s29 + $0x5b8] sm:$0xff]  }
  0x7a   : > { %6829 = vmatmul.mubr.msk.bf16.gmra.mrb[48].mxu0 %vm2037_vm0, %v7367_v56  ;;  %7085 = vmatmul.mubr.msk.bf16.gmra.mrb[48].mxu1 %vm2037_vm0, %v7368_v57 }
  0x7b   : > { %6832 = vmatprep.mubr.msk.bf16.mxu0 %vm2037_vm0, %v7369_v58  ;;  %7088 = vmatprep.mubr.msk.bf16.mxu1 %vm2037_vm0, %v7370_v59 }
  0x82   : > { %6833 = vmatmul.mubr.msk.bf16.gmra.mrb[52].mxu0 %vm2037_vm0, %v7371_v60  ;;  %7089 = vmatmul.mubr.msk.bf16.gmra.mrb[52].mxu1 %vm2037_vm0, %v7372_v61 }
  0x83   : > { %6836 = vmatprep.mubr.msk.bf16.mxu0 %vm2037_vm0, %v7373_v62  ;;  %7092 = vmatprep.mubr.msk.bf16.mxu1 %vm2037_vm0, %v7374_v63 }
  0x8a   : > { %6837 = vmatmul.mubr.msk.bf16.gmra.mrb[56].mxu0 %vm2037_vm0, %v7375_v0  ;;  %7093 = vmatmul.mubr.msk.bf16.gmra.mrb[56].mxu1 %vm2037_vm0, %v7376_v1 }
  0x8b   : > { %6840 = vmatprep.mubr.msk.bf16.mxu0 %vm2037_vm0, %v7377_v2  ;;  %7096 = vmatprep.mubr.msk.bf16.mxu1 %vm2037_vm0, %v7378_v3  ;;  %v7429_v2 = vld [vmem:[%s7640_s29 + $0x1c0] sm:$0xff]  }
  0x8c   : > { %v7430_v3 = vld [vmem:[%s7640_s29 + $0x5c0] sm:$0xff]  }
  0x92   : > { %6841 = vmatmul.mubr.msk.bf16.gmra.mrb[60].mxu0 %vm2037_vm0, %v7379_v4  ;;  %7097 = vmatmul.mubr.msk.bf16.gmra.mrb[60].mxu1 %vm2037_vm0, %v7380_v5 }
  0x93   : > { %6844 = vmatprep.mubr.msk.bf16.mxu0 %vm2037_vm0, %v7381_v6  ;;  %7100 = vmatprep.mubr.msk.bf16.mxu1 %vm2037_vm0, %v7382_v7 }
  0x9a   : > { %6845 = vmatmul.mubr.msk.bf16.gmra.mrb[64].mxu0 %vm2037_vm0, %v7383_v8  ;;  %7101 = vmatmul.mubr.msk.bf16.gmra.mrb[64].mxu1 %vm2037_vm0, %v7384_v9 }
  0x9b   : > { %6848 = vmatprep.mubr.msk.bf16.mxu0 %vm2037_vm0, %v7385_v10  ;;  %7104 = vmatprep.mubr.msk.bf16.mxu1 %vm2037_vm0, %v7386_v11 }
  0xa2   : > { %6849 = vmatmul.mubr.msk.bf16.gmra.mrb[68].mxu0 %vm2037_vm0, %v7387_v12  ;;  %7105 = vmatmul.mubr.msk.bf16.gmra.mrb[68].mxu1 %vm2037_vm0, %v7388_v13 }
  0xa3   : > { %6852 = vmatprep.mubr.msk.bf16.mxu0 %vm2037_vm0, %v7389_v14  ;;  %7108 = vmatprep.mubr.msk.bf16.mxu1 %vm2037_vm0, %v7390_v15 }
  0xaa   : > { %6853 = vmatmul.mubr.msk.bf16.gmra.mrb[72].mxu0 %vm2037_vm0, %v7391_v16  ;;  %7109 = vmatmul.mubr.msk.bf16.gmra.mrb[72].mxu1 %vm2037_vm0, %v7392_v17 }
  0xab   : > { %6856 = vmatprep.mubr.msk.bf16.mxu0 %vm2037_vm0, %v7393_v18  ;;  %7112 = vmatprep.mubr.msk.bf16.mxu1 %vm2037_vm0, %v7394_v19 }
  0xb2   : > { %6857 = vmatmul.mubr.msk.bf16.gmra.mrb[76].mxu0 %vm2037_vm0, %v7395_v20  ;;  %7113 = vmatmul.mubr.msk.bf16.gmra.mrb[76].mxu1 %vm2037_vm0, %v7396_v21 }
  0xb3   : > { %6860 = vmatprep.mubr.msk.bf16.mxu0 %vm2037_vm0, %v7397_v22  ;;  %7116 = vmatprep.mubr.msk.bf16.mxu1 %vm2037_vm0, %v7398_v23 }
  0xba   : > { %6861 = vmatmul.mubr.msk.bf16.gmra.mrb[80].mxu0 %vm2037_vm0, %v7399_v24  ;;  %7117 = vmatmul.mubr.msk.bf16.gmra.mrb[80].mxu1 %vm2037_vm0, %v7400_v25  ;;  %v7431_v24 = vld [vmem:[%s7640_s29 + $0x1c8] sm:$0xff]  }
  0xbb   : > { %6864 = vmatprep.mubr.msk.bf16.mxu0 %vm2037_vm0, %v7401_v26  ;;  %7120 = vmatprep.mubr.msk.bf16.mxu1 %vm2037_vm0, %v7402_v27  ;;  %v7432_v25 = vld [vmem:[%s7640_s29 + $0x5c8] sm:$0xff]  }
  0xc2   : > { %6865 = vmatmul.mubr.msk.bf16.gmra.mrb[84].mxu0 %vm2037_vm0, %v7403_v28  ;;  %7121 = vmatmul.mubr.msk.bf16.gmra.mrb[84].mxu1 %vm2037_vm0, %v7404_v29 }
  0xc3   : > { %6868 = vmatprep.mubr.msk.bf16.mxu0 %vm2037_vm0, %v7405_v30  ;;  %7124 = vmatprep.mubr.msk.bf16.mxu1 %vm2037_vm0, %v7406_v31  ;;  %v7433_v30 = vld [vmem:[%s7640_s29 + $0x1d0] sm:$0xff]  }
  0xc4   : > { %v7434_v31 = vld [vmem:[%s7640_s29 + $0x5d0] sm:$0xff]  }
  0xca   : > { %6869 = vmatmul.mubr.msk.bf16.gmra.mrb[88].mxu0 %vm2037_vm0, %v7407_v32  ;;  %7125 = vmatmul.mubr.msk.bf16.gmra.mrb[88].mxu1 %vm2037_vm0, %v7408_v33 }
  0xcb   : > { %6872 = vmatprep.mubr.msk.bf16.mxu0 %vm2037_vm0, %v7409_v34  ;;  %7128 = vmatprep.mubr.msk.bf16.mxu1 %vm2037_vm0, %v7410_v35 }
  0xd2   : > { %6873 = vmatmul.mubr.msk.bf16.gmra.mrb[92].mxu0 %vm2037_vm0, %v7411_v36  ;;  %7129 = vmatmul.mubr.msk.bf16.gmra.mrb[92].mxu1 %vm2037_vm0, %v7412_v37 }
  0xd3   : > { %6876 = vmatprep.mubr.msk.bf16.mxu0 %vm2037_vm0, %v7413_v38  ;;  %7132 = vmatprep.mubr.msk.bf16.mxu1 %vm2037_vm0, %v7414_v39 }
  0xda   : > { %6877 = vmatmul.mubr.msk.bf16.gmra.mrb[96].mxu0 %vm2037_vm0, %v7415_v40  ;;  %7133 = vmatmul.mubr.msk.bf16.gmra.mrb[96].mxu1 %vm2037_vm0, %v7416_v41 }
  0xdb   : > { %6880 = vmatprep.mubr.msk.bf16.mxu0 %vm2037_vm0, %v7417_v42  ;;  %7136 = vmatprep.mubr.msk.bf16.mxu1 %vm2037_vm0, %v7418_v43 }
  0xe2   : > { %6881 = vmatmul.mubr.msk.bf16.gmra.mrb[100].mxu0 %vm2037_vm0, %v7419_v44  ;;  %7137 = vmatmul.mubr.msk.bf16.gmra.mrb[100].mxu1 %vm2037_vm0, %v7420_v45 }
  0xe3   : > { %6884 = vmatprep.mubr.msk.bf16.mxu0 %vm2037_vm0, %v7421_v46  ;;  %7140 = vmatprep.mubr.msk.bf16.mxu1 %vm2037_vm0, %v7422_v47 }
  0xea   : > { %6885 = vmatmul.mubr.msk.bf16.gmra.mrb[104].mxu0 %vm2037_vm0, %v7423_v48  ;;  %7141 = vmatmul.mubr.msk.bf16.gmra.mrb[104].mxu1 %vm2037_vm0, %v7424_v49 }
  0xeb   : > { %6888 = vmatprep.mubr.msk.bf16.mxu0 %vm2037_vm0, %v7425_v50  ;;  %7144 = vmatprep.mubr.msk.bf16.mxu1 %vm2037_vm0, %v7426_v51 }
  0xed   : > { %v6782_v56 = vpop.f32.mrb[0].mxu0  ;;  %v7038_v57 = vpop.f32.mrb[0].mxu1 }
  0xee   : > { %v2853_v58 = vadd.f32 %v6782_v56, %v7865_v52  ;;  %v3877_v59 = vadd.f32 %v7038_v57, %v7865_v52  ;;  %v2844_v60 = vpop.f32.mrb[1].mxu0  ;;  %v3868_v61 = vpop.f32.mrb[1].mxu1 }
  0xef   : > { %v2845_v62 = vadd.f32 %v7865_v52, %v2844_v60  ;;  %v3869_v63 = vadd.f32 %v7865_v52, %v3868_v61  ;;  %v6783_v0 = vpop.f32.mrb[2].mxu0  ;;  %v7039_v1 = vpop.f32.mrb[2].mxu1  ;;  %v7437_v60 = vld [vmem:[%s7640_s29 + $0x1e0] sm:$0xff]  }
  0xf0   : > { %v4900_v4 = vadd.f32 %v7872_v53, %v2853_v58  ;;  %v5156_v5 = vadd.f32 %v7872_v53, %v3877_v59  ;;  %v2856_v6 = vadd.f32 %v6783_v0, %v7865_v52  ;;  %v3880_v7 = vadd.f32 %v7039_v1, %v7865_v52  ;;  %v2847_v8 = vpop.f32.mrb[3].mxu0  ;;  %v3871_v9 = vpop.f32.mrb[3].mxu1  ;;  %v7438_v61 = vld [vmem:[%s7640_s29 + $0x5e0] sm:$0xff]  }
  0xf1   : > { %v4898_v10 = vadd.f32 %v7872_v53, %v2845_v62  ;;  %v5154_v11 = vadd.f32 %v7872_v53, %v3869_v63  ;;  %v2848_v12 = vadd.f32 %v7865_v52, %v2847_v8  ;;  %v3872_v13 = vadd.f32 %v7865_v52, %v3871_v9 }
  0xf2   : > { %5413 = vst.msk [vmem:[%s7883_s13 + $0x10] sm:$0xff] %vm5410_vm2, %v4900_v4  ;;  %5669 = vst.msk [vmem:[%s7883_s13 + $0x810] sm:$0xff] %vm5410_vm2, %v5156_v5  ;;  %v4901_v14 = vadd.f32 %v7872_v53, %v2856_v6  ;;  %v5157_v15 = vadd.f32 %v7872_v53, %v3880_v7  ;;  %6889 = vmatmul.mubr.msk.bf16.gmra.mrb[108].mxu0 %vm2037_vm0, %v7427_v54  ;;  %7145 = vmatmul.mubr.msk.bf16.gmra.mrb[108].mxu1 %vm2037_vm0, %v7428_v55  ;;  %v7435_v54 = vld [vmem:[%s7640_s29 + $0x1d8] sm:$0xff]  }
  0xf3   : > { %5411 = vst.msk [vmem:[%s7883_s13] sm:$0xff] %vm5410_vm2, %v4898_v10  ;;  %5667 = vst.msk [vmem:[%s7883_s13 + $0x800] sm:$0xff] %vm5410_vm2, %v5154_v11  ;;  %v4899_v16 = vadd.f32 %v7872_v53, %v2848_v12  ;;  %v5155_v17 = vadd.f32 %v7872_v53, %v3872_v13  ;;  %6892 = vmatprep.mubr.msk.bf16.mxu0 %vm2037_vm0, %v7429_v2  ;;  %7148 = vmatprep.mubr.msk.bf16.mxu1 %vm2037_vm0, %v7430_v3  ;;  %v7436_v55 = vld [vmem:[%s7640_s29 + $0x5d8] sm:$0xff]  }
  0xf4   : > { %5414 = vst.msk [vmem:[%s7883_s13 + $0x18] sm:$0xff] %vm5410_vm2, %v4901_v14  ;;  %5670 = vst.msk [vmem:[%s7883_s13 + $0x818] sm:$0xff] %vm5410_vm2, %v5157_v15 }
  0xf5   : > { %5412 = vst.msk [vmem:[%s7883_s13 + $0x8] sm:$0xff] %vm5410_vm2, %v4899_v16  ;;  %5668 = vst.msk [vmem:[%s7883_s13 + $0x808] sm:$0xff] %vm5410_vm2, %v5155_v17  ;;  %v6786_v18 = vpop.f32.mrb[4].mxu0  ;;  %v7042_v19 = vpop.f32.mrb[4].mxu1 }
  0xf6   : > { %v2869_v20 = vadd.f32 %v6786_v18, %v7865_v52  ;;  %v3893_v21 = vadd.f32 %v7042_v19, %v7865_v52  ;;  %v2860_v22 = vpop.f32.mrb[5].mxu0  ;;  %v3884_v23 = vpop.f32.mrb[5].mxu1  ;;  %v7439_v18 = vld [vmem:[%s7640_s29 + $0x1e8] sm:$0xff]  }
  0xf7   : > { %v2861_v26 = vadd.f32 %v7865_v52, %v2860_v22  ;;  %v3885_v27 = vadd.f32 %v7865_v52, %v3884_v23  ;;  %v6787_v28 = vpop.f32.mrb[6].mxu0  ;;  %v7043_v29 = vpop.f32.mrb[6].mxu1  ;;  %v7440_v19 = vld [vmem:[%s7640_s29 + $0x5e8] sm:$0xff]  }
  0xf8   : > { %v4904_v32 = vadd.f32 %v7872_v53, %v2869_v20  ;;  %v5160_v33 = vadd.f32 %v7872_v53, %v3893_v21  ;;  %v2872_v34 = vadd.f32 %v6787_v28, %v7865_v52  ;;  %v3896_v35 = vadd.f32 %v7043_v29, %v7865_v52  ;;  %v2863_v36 = vpop.f32.mrb[7].mxu0  ;;  %v3887_v37 = vpop.f32.mrb[7].mxu1 }
  0xf9   : > { %v4902_v38 = vadd.f32 %v7872_v53, %v2861_v26  ;;  %v5158_v39 = vadd.f32 %v7872_v53, %v3885_v27  ;;  %v2864_v40 = vadd.f32 %v7865_v52, %v2863_v36  ;;  %v3888_v41 = vadd.f32 %v7865_v52, %v3887_v37 }
  0xfa   : > { %5417 = vst.msk [vmem:[%s7883_s13 + $0x30] sm:$0xff] %vm5410_vm2, %v4904_v32  ;;  %5673 = vst.msk [vmem:[%s7883_s13 + $0x830] sm:$0xff] %vm5410_vm2, %v5160_v33  ;;  %v4905_v42 = vadd.f32 %v7872_v53, %v2872_v34  ;;  %v5161_v43 = vadd.f32 %v7872_v53, %v3896_v35  ;;  %6893 = vmatmul.mubr.msk.bf16.gmra.mrb[112].mxu0 %vm2037_vm0, %v7431_v24  ;;  %7149 = vmatmul.mubr.msk.bf16.gmra.mrb[112].mxu1 %vm2037_vm0, %v7432_v25  ;;  %v7441_v24 = vld [vmem:[%s7640_s29 + $0x1f0] sm:$0xff]  }
  0xfb   : > { %5415 = vst.msk [vmem:[%s7883_s13 + $0x20] sm:$0xff] %vm5410_vm2, %v4902_v38  ;;  %5671 = vst.msk [vmem:[%s7883_s13 + $0x820] sm:$0xff] %vm5410_vm2, %v5158_v39  ;;  %v4903_v44 = vadd.f32 %v7872_v53, %v2864_v40  ;;  %v5159_v45 = vadd.f32 %v7872_v53, %v3888_v41  ;;  %6896 = vmatprep.mubr.msk.bf16.mxu0 %vm2037_vm0, %v7433_v30  ;;  %7152 = vmatprep.mubr.msk.bf16.mxu1 %vm2037_vm0, %v7434_v31  ;;  %v7442_v25 = vld [vmem:[%s7640_s29 + $0x5f0] sm:$0xff]  }
  0xfc   : > { %5418 = vst.msk [vmem:[%s7883_s13 + $0x38] sm:$0xff] %vm5410_vm2, %v4905_v42  ;;  %5674 = vst.msk [vmem:[%s7883_s13 + $0x838] sm:$0xff] %vm5410_vm2, %v5161_v43 }
  0xfd   : > { %5416 = vst.msk [vmem:[%s7883_s13 + $0x28] sm:$0xff] %vm5410_vm2, %v4903_v44  ;;  %5672 = vst.msk [vmem:[%s7883_s13 + $0x828] sm:$0xff] %vm5410_vm2, %v5159_v45  ;;  %v6790_v46 = vpop.f32.mrb[8].mxu0  ;;  %v7046_v47 = vpop.f32.mrb[8].mxu1 }
  0xfe   : > { %v2885_v48 = vadd.f32 %v6790_v46, %v7865_v52  ;;  %v3909_v49 = vadd.f32 %v7046_v47, %v7865_v52  ;;  %v2876_v50 = vpop.f32.mrb[9].mxu0  ;;  %v3900_v51 = vpop.f32.mrb[9].mxu1  ;;  %v7443_v46 = vld [vmem:[%s7640_s29 + $0x1f8] sm:$0xff]  }
  0xff   : > { %v2877_v56 = vadd.f32 %v7865_v52, %v2876_v50  ;;  %v3901_v57 = vadd.f32 %v7865_v52, %v3900_v51  ;;  %v6791_v58 = vpop.f32.mrb[10].mxu0  ;;  %v7047_v59 = vpop.f32.mrb[10].mxu1  ;;  %v7444_v47 = vld [vmem:[%s7640_s29 + $0x5f8] sm:$0xff]  }
 0x100   : > { %v4908_v62 = vadd.f32 %v7872_v53, %v2885_v48  ;;  %v5164_v63 = vadd.f32 %v7872_v53, %v3909_v49  ;;  %v2888_v0 = vadd.f32 %v6791_v58, %v7865_v52  ;;  %v3912_v1 = vadd.f32 %v7047_v59, %v7865_v52  ;;  %v2879_v2 = vpop.f32.mrb[11].mxu0  ;;  %v3903_v3 = vpop.f32.mrb[11].mxu1 }
 0x101   : > { %v4906_v4 = vadd.f32 %v7872_v53, %v2877_v56  ;;  %v5162_v5 = vadd.f32 %v7872_v53, %v3901_v57  ;;  %v2880_v6 = vadd.f32 %v7865_v52, %v2879_v2  ;;  %v3904_v7 = vadd.f32 %v7865_v52, %v3903_v3 }
 0x102   : > { %5421 = vst.msk [vmem:[%s7883_s13 + $0x50] sm:$0xff] %vm5410_vm2, %v4908_v62  ;;  %5677 = vst.msk [vmem:[%s7883_s13 + $0x850] sm:$0xff] %vm5410_vm2, %v5164_v63  ;;  %v4909_v8 = vadd.f32 %v7872_v53, %v2888_v0  ;;  %v5165_v9 = vadd.f32 %v7872_v53, %v3912_v1  ;;  %6897 = vmatmul.mubr.msk.bf16.gmra.mrb[116].mxu0 %vm2037_vm0, %v7435_v54  ;;  %7153 = vmatmul.mubr.msk.bf16.gmra.mrb[116].mxu1 %vm2037_vm0, %v7436_v55  ;;  %v7445_v54 = vld [vmem:[%s7640_s29 + $0x200] sm:$0xff]  }
 0x103   : > { %5419 = vst.msk [vmem:[%s7883_s13 + $0x40] sm:$0xff] %vm5410_vm2, %v4906_v4  ;;  %5675 = vst.msk [vmem:[%s7883_s13 + $0x840] sm:$0xff] %vm5410_vm2, %v5162_v5  ;;  %v4907_v10 = vadd.f32 %v7872_v53, %v2880_v6  ;;  %v5163_v11 = vadd.f32 %v7872_v53, %v3904_v7  ;;  %6900 = vmatprep.mubr.msk.bf16.mxu0 %vm2037_vm0, %v7437_v60  ;;  %7156 = vmatprep.mubr.msk.bf16.mxu1 %vm2037_vm0, %v7438_v61  ;;  %v7446_v55 = vld [vmem:[%s7640_s29 + $0x600] sm:$0xff]  }
 0x104   : > { %5422 = vst.msk [vmem:[%s7883_s13 + $0x58] sm:$0xff] %vm5410_vm2, %v4909_v8  ;;  %5678 = vst.msk [vmem:[%s7883_s13 + $0x858] sm:$0xff] %vm5410_vm2, %v5165_v9 }
 0x105   : > { %5420 = vst.msk [vmem:[%s7883_s13 + $0x48] sm:$0xff] %vm5410_vm2, %v4907_v10  ;;  %5676 = vst.msk [vmem:[%s7883_s13 + $0x848] sm:$0xff] %vm5410_vm2, %v5163_v11  ;;  %v6794_v12 = vpop.f32.mrb[12].mxu0  ;;  %v7050_v13 = vpop.f32.mrb[12].mxu1 }
 0x106   : > { %v2901_v14 = vadd.f32 %v6794_v12, %v7865_v52  ;;  %v3925_v15 = vadd.f32 %v7050_v13, %v7865_v52  ;;  %v2892_v16 = vpop.f32.mrb[13].mxu0  ;;  %v3916_v17 = vpop.f32.mrb[13].mxu1  ;;  %v7447_v12 = vld [vmem:[%s7640_s29 + $0x208] sm:$0xff]  }
 0x107   : > { %v2893_v20 = vadd.f32 %v7865_v52, %v2892_v16  ;;  %v3917_v21 = vadd.f32 %v7865_v52, %v3916_v17  ;;  %v6795_v22 = vpop.f32.mrb[14].mxu0  ;;  %v7051_v23 = vpop.f32.mrb[14].mxu1  ;;  %v7448_v13 = vld [vmem:[%s7640_s29 + $0x608] sm:$0xff]  }
 0x108   : > { %v4912_v26 = vadd.f32 %v7872_v53, %v2901_v14  ;;  %v5168_v27 = vadd.f32 %v7872_v53, %v3925_v15  ;;  %v2904_v28 = vadd.f32 %v6795_v22, %v7865_v52  ;;  %v3928_v29 = vadd.f32 %v7051_v23, %v7865_v52  ;;  %v2895_v30 = vpop.f32.mrb[15].mxu0  ;;  %v3919_v31 = vpop.f32.mrb[15].mxu1 }
 0x109   : > { %v4910_v32 = vadd.f32 %v7872_v53, %v2893_v20  ;;  %v5166_v33 = vadd.f32 %v7872_v53, %v3917_v21  ;;  %v2896_v34 = vadd.f32 %v7865_v52, %v2895_v30  ;;  %v3920_v35 = vadd.f32 %v7865_v52, %v3919_v31 }
 0x10a   : > { %5425 = vst.msk [vmem:[%s7883_s13 + $0x70] sm:$0xff] %vm5410_vm2, %v4912_v26  ;;  %5681 = vst.msk [vmem:[%s7883_s13 + $0x870] sm:$0xff] %vm5410_vm2, %v5168_v27  ;;  %v4913_v36 = vadd.f32 %v7872_v53, %v2904_v28  ;;  %v5169_v37 = vadd.f32 %v7872_v53, %v3928_v29  ;;  %6901 = vmatmul.mubr.msk.bf16.gmra.mrb[120].mxu0 %vm2037_vm0, %v7439_v18  ;;  %7157 = vmatmul.mubr.msk.bf16.gmra.mrb[120].mxu1 %vm2037_vm0, %v7440_v19  ;;  %v7449_v18 = vld [vmem:[%s7640_s29 + $0x210] sm:$0xff]  }
 0x10b   : > { %5423 = vst.msk [vmem:[%s7883_s13 + $0x60] sm:$0xff] %vm5410_vm2, %v4910_v32  ;;  %5679 = vst.msk [vmem:[%s7883_s13 + $0x860] sm:$0xff] %vm5410_vm2, %v5166_v33  ;;  %v4911_v38 = vadd.f32 %v7872_v53, %v2896_v34  ;;  %v5167_v39 = vadd.f32 %v7872_v53, %v3920_v35  ;;  %6904 = vmatprep.mubr.msk.bf16.mxu0 %vm2037_vm0, %v7441_v24  ;;  %7160 = vmatprep.mubr.msk.bf16.mxu1 %vm2037_vm0, %v7442_v25  ;;  %v7450_v19 = vld [vmem:[%s7640_s29 + $0x610] sm:$0xff]  }
 0x10c   : > { %5426 = vst.msk [vmem:[%s7883_s13 + $0x78] sm:$0xff] %vm5410_vm2, %v4913_v36  ;;  %5682 = vst.msk [vmem:[%s7883_s13 + $0x878] sm:$0xff] %vm5410_vm2, %v5169_v37 }
 0x10d   : > { %5424 = vst.msk [vmem:[%s7883_s13 + $0x68] sm:$0xff] %vm5410_vm2, %v4911_v38  ;;  %5680 = vst.msk [vmem:[%s7883_s13 + $0x868] sm:$0xff] %vm5410_vm2, %v5167_v39  ;;  %v6798_v40 = vpop.f32.mrb[16].mxu0  ;;  %v7054_v41 = vpop.f32.mrb[16].mxu1 }
 0x10e   : > { %v2917_v42 = vadd.f32 %v6798_v40, %v7865_v52  ;;  %v3941_v43 = vadd.f32 %v7054_v41, %v7865_v52  ;;  %v2908_v44 = vpop.f32.mrb[17].mxu0  ;;  %v3932_v45 = vpop.f32.mrb[17].mxu1  ;;  %v7451_v40 = vld [vmem:[%s7640_s29 + $0x218] sm:$0xff]  }
 0x10f   : > { %v2909_v48 = vadd.f32 %v7865_v52, %v2908_v44  ;;  %v3933_v49 = vadd.f32 %v7865_v52, %v3932_v45  ;;  %v6799_v50 = vpop.f32.mrb[18].mxu0  ;;  %v7055_v51 = vpop.f32.mrb[18].mxu1  ;;  %v7452_v41 = vld [vmem:[%s7640_s29 + $0x618] sm:$0xff]  }
 0x110   : > { %v4916_v56 = vadd.f32 %v7872_v53, %v2917_v42  ;;  %v5172_v57 = vadd.f32 %v7872_v53, %v3941_v43  ;;  %v2920_v58 = vadd.f32 %v6799_v50, %v7865_v52  ;;  %v3944_v59 = vadd.f32 %v7055_v51, %v7865_v52  ;;  %v2911_v60 = vpop.f32.mrb[19].mxu0  ;;  %v3935_v61 = vpop.f32.mrb[19].mxu1 }
 0x111   : > { %v4914_v62 = vadd.f32 %v7872_v53, %v2909_v48  ;;  %v5170_v63 = vadd.f32 %v7872_v53, %v3933_v49  ;;  %v2912_v0 = vadd.f32 %v7865_v52, %v2911_v60  ;;  %v3936_v1 = vadd.f32 %v7865_v52, %v3935_v61 }
 0x112   : > { %5429 = vst.msk [vmem:[%s7883_s13 + $0x90] sm:$0xff] %vm5410_vm2, %v4916_v56  ;;  %5685 = vst.msk [vmem:[%s7883_s13 + $0x890] sm:$0xff] %vm5410_vm2, %v5172_v57  ;;  %v4917_v2 = vadd.f32 %v7872_v53, %v2920_v58  ;;  %v5173_v3 = vadd.f32 %v7872_v53, %v3944_v59  ;;  %6905 = vmatmul.mubr.msk.bf16.gmra.mrb[124].mxu0 %vm2037_vm0, %v7443_v46  ;;  %7161 = vmatmul.mubr.msk.bf16.gmra.mrb[124].mxu1 %vm2037_vm0, %v7444_v47  ;;  %v7453_v46 = vld [vmem:[%s7640_s29 + $0x220] sm:$0xff]  }
 0x113   : > { %5427 = vst.msk [vmem:[%s7883_s13 + $0x80] sm:$0xff] %vm5410_vm2, %v4914_v62  ;;  %5683 = vst.msk [vmem:[%s7883_s13 + $0x880] sm:$0xff] %vm5410_vm2, %v5170_v63  ;;  %v4915_v4 = vadd.f32 %v7872_v53, %v2912_v0  ;;  %v5171_v5 = vadd.f32 %v7872_v53, %v3936_v1  ;;  %6908 = vmatprep.mubr.msk.bf16.mxu0 %vm2037_vm0, %v7445_v54  ;;  %7164 = vmatprep.mubr.msk.bf16.mxu1 %vm2037_vm0, %v7446_v55  ;;  %v7454_v47 = vld [vmem:[%s7640_s29 + $0x620] sm:$0xff]  }
 0x114   : > { %5430 = vst.msk [vmem:[%s7883_s13 + $0x98] sm:$0xff] %vm5410_vm2, %v4917_v2  ;;  %5686 = vst.msk [vmem:[%s7883_s13 + $0x898] sm:$0xff] %vm5410_vm2, %v5173_v3 }
 0x115   : > { %5428 = vst.msk [vmem:[%s7883_s13 + $0x88] sm:$0xff] %vm5410_vm2, %v4915_v4  ;;  %5684 = vst.msk [vmem:[%s7883_s13 + $0x888] sm:$0xff] %vm5410_vm2, %v5171_v5  ;;  %v6802_v6 = vpop.f32.mrb[20].mxu0  ;;  %v7058_v7 = vpop.f32.mrb[20].mxu1 }
 0x116   : > { %v2933_v8 = vadd.f32 %v6802_v6, %v7865_v52  ;;  %v3957_v9 = vadd.f32 %v7058_v7, %v7865_v52  ;;  %v2924_v10 = vpop.f32.mrb[21].mxu0  ;;  %v3948_v11 = vpop.f32.mrb[21].mxu1  ;;  %v7455_v6 = vld [vmem:[%s7640_s29 + $0x228] sm:$0xff]  }
 0x117   : > { %v2925_v14 = vadd.f32 %v7865_v52, %v2924_v10  ;;  %v3949_v15 = vadd.f32 %v7865_v52, %v3948_v11  ;;  %v6803_v16 = vpop.f32.mrb[22].mxu0  ;;  %v7059_v17 = vpop.f32.mrb[22].mxu1  ;;  %v7456_v7 = vld [vmem:[%s7640_s29 + $0x628] sm:$0xff]  }
 0x118   : > { %v4920_v20 = vadd.f32 %v7872_v53, %v2933_v8  ;;  %v5176_v21 = vadd.f32 %v7872_v53, %v3957_v9  ;;  %v2936_v22 = vadd.f32 %v6803_v16, %v7865_v52  ;;  %v3960_v23 = vadd.f32 %v7059_v17, %v7865_v52  ;;  %v2927_v24 = vpop.f32.mrb[23].mxu0  ;;  %v3951_v25 = vpop.f32.mrb[23].mxu1 }
 0x119   : > { %v4918_v26 = vadd.f32 %v7872_v53, %v2925_v14  ;;  %v5174_v27 = vadd.f32 %v7872_v53, %v3949_v15  ;;  %v2928_v28 = vadd.f32 %v7865_v52, %v2927_v24  ;;  %v3952_v29 = vadd.f32 %v7865_v52, %v3951_v25 }
 0x11a   : > { %5433 = vst.msk [vmem:[%s7883_s13 + $0xb0] sm:$0xff] %vm5410_vm2, %v4920_v20  ;;  %5689 = vst.msk [vmem:[%s7883_s13 + $0x8b0] sm:$0xff] %vm5410_vm2, %v5176_v21  ;;  %v4921_v30 = vadd.f32 %v7872_v53, %v2936_v22  ;;  %v5177_v31 = vadd.f32 %v7872_v53, %v3960_v23  ;;  %6909 = vmatmul.mubr.msk.bf16.gmra.mrb[128].mxu0 %vm2037_vm0, %v7447_v12  ;;  %7165 = vmatmul.mubr.msk.bf16.gmra.mrb[128].mxu1 %vm2037_vm0, %v7448_v13  ;;  %v7457_v12 = vld [vmem:[%s7640_s29 + $0x230] sm:$0xff]  }
 0x11b   : > { %5431 = vst.msk [vmem:[%s7883_s13 + $0xa0] sm:$0xff] %vm5410_vm2, %v4918_v26  ;;  %5687 = vst.msk [vmem:[%s7883_s13 + $0x8a0] sm:$0xff] %vm5410_vm2, %v5174_v27  ;;  %v4919_v32 = vadd.f32 %v7872_v53, %v2928_v28  ;;  %v5175_v33 = vadd.f32 %v7872_v53, %v3952_v29  ;;  %6912 = vmatprep.mubr.msk.bf16.mxu0 %vm2037_vm0, %v7449_v18  ;;  %7168 = vmatprep.mubr.msk.bf16.mxu1 %vm2037_vm0, %v7450_v19  ;;  %v7458_v13 = vld [vmem:[%s7640_s29 + $0x630] sm:$0xff]  }
 0x11c   : > { %5434 = vst.msk [vmem:[%s7883_s13 + $0xb8] sm:$0xff] %vm5410_vm2, %v4921_v30  ;;  %5690 = vst.msk [vmem:[%s7883_s13 + $0x8b8] sm:$0xff] %vm5410_vm2, %v5177_v31 }
 0x11d   : > { %5432 = vst.msk [vmem:[%s7883_s13 + $0xa8] sm:$0xff] %vm5410_vm2, %v4919_v32  ;;  %5688 = vst.msk [vmem:[%s7883_s13 + $0x8a8] sm:$0xff] %vm5410_vm2, %v5175_v33  ;;  %v6806_v34 = vpop.f32.mrb[24].mxu0  ;;  %v7062_v35 = vpop.f32.mrb[24].mxu1 }
 0x11e   : > { %v2949_v36 = vadd.f32 %v6806_v34, %v7865_v52  ;;  %v3973_v37 = vadd.f32 %v7062_v35, %v7865_v52  ;;  %v2940_v38 = vpop.f32.mrb[25].mxu0  ;;  %v3964_v39 = vpop.f32.mrb[25].mxu1  ;;  %v7459_v34 = vld [vmem:[%s7640_s29 + $0x238] sm:$0xff]  }
 0x11f   : > { %v2941_v42 = vadd.f32 %v7865_v52, %v2940_v38  ;;  %v3965_v43 = vadd.f32 %v7865_v52, %v3964_v39  ;;  %v6807_v44 = vpop.f32.mrb[26].mxu0  ;;  %v7063_v45 = vpop.f32.mrb[26].mxu1  ;;  %v7460_v35 = vld [vmem:[%s7640_s29 + $0x638] sm:$0xff]  }
 0x120   : > { %v4924_v48 = vadd.f32 %v7872_v53, %v2949_v36  ;;  %v5180_v49 = vadd.f32 %v7872_v53, %v3973_v37  ;;  %v2952_v50 = vadd.f32 %v6807_v44, %v7865_v52  ;;  %v3976_v51 = vadd.f32 %v7063_v45, %v7865_v52  ;;  %v2943_v54 = vpop.f32.mrb[27].mxu0  ;;  %v3967_v55 = vpop.f32.mrb[27].mxu1 }
 0x121   : > { %v4922_v56 = vadd.f32 %v7872_v53, %v2941_v42  ;;  %v5178_v57 = vadd.f32 %v7872_v53, %v3965_v43  ;;  %v2944_v58 = vadd.f32 %v7865_v52, %v2943_v54  ;;  %v3968_v59 = vadd.f32 %v7865_v52, %v3967_v55 }
 0x122   : > { %5437 = vst.msk [vmem:[%s7883_s13 + $0xd0] sm:$0xff] %vm5410_vm2, %v4924_v48  ;;  %5693 = vst.msk [vmem:[%s7883_s13 + $0x8d0] sm:$0xff] %vm5410_vm2, %v5180_v49  ;;  %v4925_v60 = vadd.f32 %v7872_v53, %v2952_v50  ;;  %v5181_v61 = vadd.f32 %v7872_v53, %v3976_v51  ;;  %6913 = vmatmul.mubr.msk.bf16.gmra.mrb[132].mxu0 %vm2037_vm0, %v7451_v40  ;;  %7169 = vmatmul.mubr.msk.bf16.gmra.mrb[132].mxu1 %vm2037_vm0, %v7452_v41  ;;  %v7461_v40 = vld [vmem:[%s7640_s29 + $0x240] sm:$0xff]  }
 0x123   : > { %5435 = vst.msk [vmem:[%s7883_s13 + $0xc0] sm:$0xff] %vm5410_vm2, %v4922_v56  ;;  %5691 = vst.msk [vmem:[%s7883_s13 + $0x8c0] sm:$0xff] %vm5410_vm2, %v5178_v57  ;;  %v4923_v62 = vadd.f32 %v7872_v53, %v2944_v58  ;;  %v5179_v63 = vadd.f32 %v7872_v53, %v3968_v59  ;;  %6916 = vmatprep.mubr.msk.bf16.mxu0 %vm2037_vm0, %v7453_v46  ;;  %7172 = vmatprep.mubr.msk.bf16.mxu1 %vm2037_vm0, %v7454_v47  ;;  %v7462_v41 = vld [vmem:[%s7640_s29 + $0x640] sm:$0xff]  }
 0x124   : > { %5438 = vst.msk [vmem:[%s7883_s13 + $0xd8] sm:$0xff] %vm5410_vm2, %v4925_v60  ;;  %5694 = vst.msk [vmem:[%s7883_s13 + $0x8d8] sm:$0xff] %vm5410_vm2, %v5181_v61 }
 0x125   : > { %5436 = vst.msk [vmem:[%s7883_s13 + $0xc8] sm:$0xff] %vm5410_vm2, %v4923_v62  ;;  %5692 = vst.msk [vmem:[%s7883_s13 + $0x8c8] sm:$0xff] %vm5410_vm2, %v5179_v63  ;;  %v6810_v0 = vpop.f32.mrb[28].mxu0  ;;  %v7066_v1 = vpop.f32.mrb[28].mxu1 }
 0x126   : > { %v2965_v2 = vadd.f32 %v6810_v0, %v7865_v52  ;;  %v3989_v3 = vadd.f32 %v7066_v1, %v7865_v52  ;;  %v2956_v4 = vpop.f32.mrb[29].mxu0  ;;  %v3980_v5 = vpop.f32.mrb[29].mxu1  ;;  %v7463_v0 = vld [vmem:[%s7640_s29 + $0x248] sm:$0xff]  }
 0x127   : > { %v2957_v8 = vadd.f32 %v7865_v52, %v2956_v4  ;;  %v3981_v9 = vadd.f32 %v7865_v52, %v3980_v5  ;;  %v6811_v10 = vpop.f32.mrb[30].mxu0  ;;  %v7067_v11 = vpop.f32.mrb[30].mxu1  ;;  %v7464_v1 = vld [vmem:[%s7640_s29 + $0x648] sm:$0xff]  }
 0x128   : > { %v4928_v14 = vadd.f32 %v7872_v53, %v2965_v2  ;;  %v5184_v15 = vadd.f32 %v7872_v53, %v3989_v3  ;;  %v2968_v16 = vadd.f32 %v6811_v10, %v7865_v52  ;;  %v3992_v17 = vadd.f32 %v7067_v11, %v7865_v52  ;;  %v2959_v18 = vpop.f32.mrb[31].mxu0  ;;  %v3983_v19 = vpop.f32.mrb[31].mxu1 }
 0x129   : > { %v4926_v20 = vadd.f32 %v7872_v53, %v2957_v8  ;;  %v5182_v21 = vadd.f32 %v7872_v53, %v3981_v9  ;;  %v2960_v22 = vadd.f32 %v7865_v52, %v2959_v18  ;;  %v3984_v23 = vadd.f32 %v7865_v52, %v3983_v19 }
 0x12a   : > { %5441 = vst.msk [vmem:[%s7883_s13 + $0xf0] sm:$0xff] %vm5410_vm2, %v4928_v14  ;;  %5697 = vst.msk [vmem:[%s7883_s13 + $0x8f0] sm:$0xff] %vm5410_vm2, %v5184_v15  ;;  %v4929_v24 = vadd.f32 %v7872_v53, %v2968_v16  ;;  %v5185_v25 = vadd.f32 %v7872_v53, %v3992_v17  ;;  %6917 = vmatmul.mubr.msk.bf16.gmra.mrb[136].mxu0 %vm2037_vm0, %v7455_v6  ;;  %7173 = vmatmul.mubr.msk.bf16.gmra.mrb[136].mxu1 %vm2037_vm0, %v7456_v7  ;;  %v7465_v6 = vld [vmem:[%s7640_s29 + $0x250] sm:$0xff]  }
 0x12b   : > { %5439 = vst.msk [vmem:[%s7883_s13 + $0xe0] sm:$0xff] %vm5410_vm2, %v4926_v20  ;;  %5695 = vst.msk [vmem:[%s7883_s13 + $0x8e0] sm:$0xff] %vm5410_vm2, %v5182_v21  ;;  %v4927_v26 = vadd.f32 %v7872_v53, %v2960_v22  ;;  %v5183_v27 = vadd.f32 %v7872_v53, %v3984_v23  ;;  %6920 = vmatprep.mubr.msk.bf16.mxu0 %vm2037_vm0, %v7457_v12  ;;  %7176 = vmatprep.mubr.msk.bf16.mxu1 %vm2037_vm0, %v7458_v13  ;;  %v7466_v7 = vld [vmem:[%s7640_s29 + $0x650] sm:$0xff]  }
 0x12c   : > { %5442 = vst.msk [vmem:[%s7883_s13 + $0xf8] sm:$0xff] %vm5410_vm2, %v4929_v24  ;;  %5698 = vst.msk [vmem:[%s7883_s13 + $0x8f8] sm:$0xff] %vm5410_vm2, %v5185_v25 }
 0x12d   : > { %5440 = vst.msk [vmem:[%s7883_s13 + $0xe8] sm:$0xff] %vm5410_vm2, %v4927_v26  ;;  %5696 = vst.msk [vmem:[%s7883_s13 + $0x8e8] sm:$0xff] %vm5410_vm2, %v5183_v27  ;;  %v6814_v28 = vpop.f32.mrb[32].mxu0  ;;  %v7070_v29 = vpop.f32.mrb[32].mxu1 }
 0x12e   : > { %v2981_v30 = vadd.f32 %v6814_v28, %v7865_v52  ;;  %v4005_v31 = vadd.f32 %v7070_v29, %v7865_v52  ;;  %v2972_v32 = vpop.f32.mrb[33].mxu0  ;;  %v3996_v33 = vpop.f32.mrb[33].mxu1  ;;  %v7467_v28 = vld [vmem:[%s7640_s29 + $0x258] sm:$0xff]  }
 0x12f   : > { %v2973_v36 = vadd.f32 %v7865_v52, %v2972_v32  ;;  %v3997_v37 = vadd.f32 %v7865_v52, %v3996_v33  ;;  %v6815_v38 = vpop.f32.mrb[34].mxu0  ;;  %v7071_v39 = vpop.f32.mrb[34].mxu1  ;;  %v7468_v29 = vld [vmem:[%s7640_s29 + $0x658] sm:$0xff]  }
 0x130   : > { %v4932_v42 = vadd.f32 %v7872_v53, %v2981_v30  ;;  %v5188_v43 = vadd.f32 %v7872_v53, %v4005_v31  ;;  %v2984_v44 = vadd.f32 %v6815_v38, %v7865_v52  ;;  %v4008_v45 = vadd.f32 %v7071_v39, %v7865_v52  ;;  %v2975_v46 = vpop.f32.mrb[35].mxu0  ;;  %v3999_v47 = vpop.f32.mrb[35].mxu1 }
 0x131   : > { %v4930_v48 = vadd.f32 %v7872_v53, %v2973_v36  ;;  %v5186_v49 = vadd.f32 %v7872_v53, %v3997_v37  ;;  %v2976_v50 = vadd.f32 %v7865_v52, %v2975_v46  ;;  %v4000_v51 = vadd.f32 %v7865_v52, %v3999_v47 }
 0x132   : > { %5445 = vst.msk [vmem:[%s7883_s13 + $0x110] sm:$0xff] %vm5410_vm2, %v4932_v42  ;;  %5701 = vst.msk [vmem:[%s7883_s13 + $0x910] sm:$0xff] %vm5410_vm2, %v5188_v43  ;;  %v4933_v54 = vadd.f32 %v7872_v53, %v2984_v44  ;;  %v5189_v55 = vadd.f32 %v7872_v53, %v4008_v45  ;;  %6921 = vmatmul.mubr.msk.bf16.gmra.mrb[140].mxu0 %vm2037_vm0, %v7459_v34  ;;  %7177 = vmatmul.mubr.msk.bf16.gmra.mrb[140].mxu1 %vm2037_vm0, %v7460_v35  ;;  %v7469_v34 = vld [vmem:[%s7640_s29 + $0x260] sm:$0xff]  }
 0x133   : > { %5443 = vst.msk [vmem:[%s7883_s13 + $0x100] sm:$0xff] %vm5410_vm2, %v4930_v48  ;;  %5699 = vst.msk [vmem:[%s7883_s13 + $0x900] sm:$0xff] %vm5410_vm2, %v5186_v49  ;;  %v4931_v56 = vadd.f32 %v7872_v53, %v2976_v50  ;;  %v5187_v57 = vadd.f32 %v7872_v53, %v4000_v51  ;;  %6924 = vmatprep.mubr.msk.bf16.mxu0 %vm2037_vm0, %v7461_v40  ;;  %7180 = vmatprep.mubr.msk.bf16.mxu1 %vm2037_vm0, %v7462_v41  ;;  %v7470_v35 = vld [vmem:[%s7640_s29 + $0x660] sm:$0xff]  }
 0x134   : > { %5446 = vst.msk [vmem:[%s7883_s13 + $0x118] sm:$0xff] %vm5410_vm2, %v4933_v54  ;;  %5702 = vst.msk [vmem:[%s7883_s13 + $0x918] sm:$0xff] %vm5410_vm2, %v5189_v55 }
 0x135   : > { %5444 = vst.msk [vmem:[%s7883_s13 + $0x108] sm:$0xff] %vm5410_vm2, %v4931_v56  ;;  %5700 = vst.msk [vmem:[%s7883_s13 + $0x908] sm:$0xff] %vm5410_vm2, %v5187_v57  ;;  %v6818_v58 = vpop.f32.mrb[36].mxu0  ;;  %v7074_v59 = vpop.f32.mrb[36].mxu1 }
 0x136   : > { %v2997_v60 = vadd.f32 %v6818_v58, %v7865_v52  ;;  %v4021_v61 = vadd.f32 %v7074_v59, %v7865_v52  ;;  %v2988_v62 = vpop.f32.mrb[37].mxu0  ;;  %v4012_v63 = vpop.f32.mrb[37].mxu1  ;;  %v7471_v58 = vld [vmem:[%s7640_s29 + $0x268] sm:$0xff]  }
 0x137   : > { %v2989_v2 = vadd.f32 %v7865_v52, %v2988_v62  ;;  %v4013_v3 = vadd.f32 %v7865_v52, %v4012_v63  ;;  %v6819_v4 = vpop.f32.mrb[38].mxu0  ;;  %v7075_v5 = vpop.f32.mrb[38].mxu1  ;;  %v7472_v59 = vld [vmem:[%s7640_s29 + $0x668] sm:$0xff]  }
 0x138   : > { %v4936_v8 = vadd.f32 %v7872_v53, %v2997_v60  ;;  %v5192_v9 = vadd.f32 %v7872_v53, %v4021_v61  ;;  %v3000_v10 = vadd.f32 %v6819_v4, %v7865_v52  ;;  %v4024_v11 = vadd.f32 %v7075_v5, %v7865_v52  ;;  %v2991_v12 = vpop.f32.mrb[39].mxu0  ;;  %v4015_v13 = vpop.f32.mrb[39].mxu1 }
 0x139   : > { %v4934_v14 = vadd.f32 %v7872_v53, %v2989_v2  ;;  %v5190_v15 = vadd.f32 %v7872_v53, %v4013_v3  ;;  %v2992_v16 = vadd.f32 %v7865_v52, %v2991_v12  ;;  %v4016_v17 = vadd.f32 %v7865_v52, %v4015_v13 }
 0x13a   : > { %5449 = vst.msk [vmem:[%s7883_s13 + $0x130] sm:$0xff] %vm5410_vm2, %v4936_v8  ;;  %5705 = vst.msk [vmem:[%s7883_s13 + $0x930] sm:$0xff] %vm5410_vm2, %v5192_v9  ;;  %v4937_v18 = vadd.f32 %v7872_v53, %v3000_v10  ;;  %v5193_v19 = vadd.f32 %v7872_v53, %v4024_v11  ;;  %6925 = vmatmul.mubr.msk.bf16.gmra.mrb[144].mxu0 %vm2037_vm0, %v7463_v0  ;;  %7181 = vmatmul.mubr.msk.bf16.gmra.mrb[144].mxu1 %vm2037_vm0, %v7464_v1  ;;  %v7473_v0 = vld [vmem:[%s7640_s29 + $0x270] sm:$0xff]  }
 0x13b   : > { %5447 = vst.msk [vmem:[%s7883_s13 + $0x120] sm:$0xff] %vm5410_vm2, %v4934_v14  ;;  %5703 = vst.msk [vmem:[%s7883_s13 + $0x920] sm:$0xff] %vm5410_vm2, %v5190_v15  ;;  %v4935_v20 = vadd.f32 %v7872_v53, %v2992_v16  ;;  %v5191_v21 = vadd.f32 %v7872_v53, %v4016_v17  ;;  %6928 = vmatprep.mubr.msk.bf16.mxu0 %vm2037_vm0, %v7465_v6  ;;  %7184 = vmatprep.mubr.msk.bf16.mxu1 %vm2037_vm0, %v7466_v7  ;;  %v7474_v1 = vld [vmem:[%s7640_s29 + $0x670] sm:$0xff]  }
 0x13c   : > { %5450 = vst.msk [vmem:[%s7883_s13 + $0x138] sm:$0xff] %vm5410_vm2, %v4937_v18  ;;  %5706 = vst.msk [vmem:[%s7883_s13 + $0x938] sm:$0xff] %vm5410_vm2, %v5193_v19 }
 0x13d   : > { %5448 = vst.msk [vmem:[%s7883_s13 + $0x128] sm:$0xff] %vm5410_vm2, %v4935_v20  ;;  %5704 = vst.msk [vmem:[%s7883_s13 + $0x928] sm:$0xff] %vm5410_vm2, %v5191_v21  ;;  %v6822_v22 = vpop.f32.mrb[40].mxu0  ;;  %v7078_v23 = vpop.f32.mrb[40].mxu1  ;;  %v7475_v21 = vld [vmem:[%s7640_s29 + $0x278] sm:$0xff]  }
 0x13e   : > { %v3013_v24 = vadd.f32 %v6822_v22, %v7865_v52  ;;  %v4037_v25 = vadd.f32 %v7078_v23, %v7865_v52  ;;  %v3004_v26 = vpop.f32.mrb[41].mxu0  ;;  %v4028_v27 = vpop.f32.mrb[41].mxu1  ;;  %v7476_v22 = vld [vmem:[%s7640_s29 + $0x678] sm:$0xff]  }
 0x13f   : > { %v3005_v30 = vadd.f32 %v7865_v52, %v3004_v26  ;;  %v4029_v31 = vadd.f32 %v7865_v52, %v4028_v27  ;;  %v6823_v32 = vpop.f32.mrb[42].mxu0  ;;  %v7079_v33 = vpop.f32.mrb[42].mxu1  ;;  %v7477_v27 = vld [vmem:[%s7640_s29 + $0x280] sm:$0xff]  }
 0x140   : > { %v4940_v36 = vadd.f32 %v7872_v53, %v3013_v24  ;;  %v5196_v37 = vadd.f32 %v7872_v53, %v4037_v25  ;;  %v3016_v38 = vadd.f32 %v6823_v32, %v7865_v52  ;;  %v4040_v39 = vadd.f32 %v7079_v33, %v7865_v52  ;;  %v3007_v40 = vpop.f32.mrb[43].mxu0  ;;  %v4031_v41 = vpop.f32.mrb[43].mxu1 }
 0x141   : > { %v4938_v42 = vadd.f32 %v7872_v53, %v3005_v30  ;;  %v5194_v43 = vadd.f32 %v7872_v53, %v4029_v31  ;;  %v3008_v44 = vadd.f32 %v7865_v52, %v3007_v40  ;;  %v4032_v45 = vadd.f32 %v7865_v52, %v4031_v41 }
 0x142   : > { %5453 = vst.msk [vmem:[%s7883_s13 + $0x150] sm:$0xff] %vm5410_vm2, %v4940_v36  ;;  %5709 = vst.msk [vmem:[%s7883_s13 + $0x950] sm:$0xff] %vm5410_vm2, %v5196_v37  ;;  %v4941_v46 = vadd.f32 %v7872_v53, %v3016_v38  ;;  %v5197_v47 = vadd.f32 %v7872_v53, %v4040_v39  ;;  %6929 = vmatmul.mubr.msk.bf16.gmra.mrb[148].mxu0 %vm2037_vm0, %v7467_v28  ;;  %7185 = vmatmul.mubr.msk.bf16.gmra.mrb[148].mxu1 %vm2037_vm0, %v7468_v29  ;;  %v7478_v28 = vld [vmem:[%s7640_s29 + $0x680] sm:$0xff]  }
 0x143   : > { %5451 = vst.msk [vmem:[%s7883_s13 + $0x140] sm:$0xff] %vm5410_vm2, %v4938_v42  ;;  %5707 = vst.msk [vmem:[%s7883_s13 + $0x940] sm:$0xff] %vm5410_vm2, %v5194_v43  ;;  %v4939_v48 = vadd.f32 %v7872_v53, %v3008_v44  ;;  %v5195_v49 = vadd.f32 %v7872_v53, %v4032_v45  ;;  %6932 = vmatprep.mubr.msk.bf16.mxu0 %vm2037_vm0, %v7469_v34  ;;  %7188 = vmatprep.mubr.msk.bf16.mxu1 %vm2037_vm0, %v7470_v35  ;;  %v8377_v29 = vld [vmem:[%s10267_s3] ss:$0 sm:$0xff] }
 0x144   : > { %5454 = vst.msk [vmem:[%s7883_s13 + $0x158] sm:$0xff] %vm5410_vm2, %v4941_v46  ;;  %5710 = vst.msk [vmem:[%s7883_s13 + $0x958] sm:$0xff] %vm5410_vm2, %v5197_v47 }
 0x145   : > { %5452 = vst.msk [vmem:[%s7883_s13 + $0x148] sm:$0xff] %vm5410_vm2, %v4939_v48  ;;  %5708 = vst.msk [vmem:[%s7883_s13 + $0x948] sm:$0xff] %vm5410_vm2, %v5195_v49  ;;  %v6826_v50 = vpop.f32.mrb[44].mxu0  ;;  %v7082_v51 = vpop.f32.mrb[44].mxu1 }
 0x146   : > { %v3029_v54 = vadd.f32 %v6826_v50, %v7865_v52  ;;  %v4053_v55 = vadd.f32 %v7082_v51, %v7865_v52  ;;  %v3020_v56 = vpop.f32.mrb[45].mxu0  ;;  %v4044_v57 = vpop.f32.mrb[45].mxu1  ;;  %v7479_v50 = vld [vmem:[%s7640_s29 + $0x288] sm:$0xff]  }
 0x147   : > { %v3021_v60 = vadd.f32 %v7865_v52, %v3020_v56  ;;  %v4045_v61 = vadd.f32 %v7865_v52, %v4044_v57  ;;  %v6827_v62 = vpop.f32.mrb[46].mxu0  ;;  %v7083_v63 = vpop.f32.mrb[46].mxu1  ;;  %v7480_v51 = vld [vmem:[%s7640_s29 + $0x688] sm:$0xff]  }
 0x148   : > { %v4944_v2 = vadd.f32 %v7872_v53, %v3029_v54  ;;  %v5200_v3 = vadd.f32 %v7872_v53, %v4053_v55  ;;  %v3032_v4 = vadd.f32 %v6827_v62, %v7865_v52  ;;  %v4056_v5 = vadd.f32 %v7083_v63, %v7865_v52  ;;  %v3023_v6 = vpop.f32.mrb[47].mxu0  ;;  %v4047_v7 = vpop.f32.mrb[47].mxu1 }
 0x149   : > { %v4942_v8 = vadd.f32 %v7872_v53, %v3021_v60  ;;  %v5198_v9 = vadd.f32 %v7872_v53, %v4045_v61  ;;  %v3024_v10 = vadd.f32 %v7865_v52, %v3023_v6  ;;  %v4048_v11 = vadd.f32 %v7865_v52, %v4047_v7 }
 0x14a   : > { %5457 = vst.msk [vmem:[%s7883_s13 + $0x170] sm:$0xff] %vm5410_vm2, %v4944_v2  ;;  %5713 = vst.msk [vmem:[%s7883_s13 + $0x970] sm:$0xff] %vm5410_vm2, %v5200_v3  ;;  %v4945_v12 = vadd.f32 %v7872_v53, %v3032_v4  ;;  %v5201_v13 = vadd.f32 %v7872_v53, %v4056_v5  ;;  %6933 = vmatmul.mubr.msk.bf16.gmra.mrb[152].mxu0 %vm2037_vm0, %v7471_v58  ;;  %7189 = vmatmul.mubr.msk.bf16.gmra.mrb[152].mxu1 %vm2037_vm0, %v7472_v59  ;;  %v7481_v58 = vld [vmem:[%s7640_s29 + $0x290] sm:$0xff]  }
 0x14b   : > { %5455 = vst.msk [vmem:[%s7883_s13 + $0x160] sm:$0xff] %vm5410_vm2, %v4942_v8  ;;  %5711 = vst.msk [vmem:[%s7883_s13 + $0x960] sm:$0xff] %vm5410_vm2, %v5198_v9  ;;  %v4943_v52 = vadd.f32 %v7872_v53, %v3024_v10  ;;  %v5199_v14 = vadd.f32 %v7872_v53, %v4048_v11  ;;  %6936 = vmatprep.mubr.msk.bf16.mxu0 %vm2037_vm0, %v7473_v0  ;;  %7192 = vmatprep.mubr.msk.bf16.mxu1 %vm2037_vm0, %v7474_v1  ;;  %v8364_v53 = vld [vmem:[%s10266_s2] ss:$0 sm:$0xff]  ;;  %v7482_v59 = vld [vmem:[%s7640_s29 + $0x690] sm:$0xff]  }
 0x14c   : > { %5458 = vst.msk [vmem:[%s7883_s13 + $0x178] sm:$0xff] %vm5410_vm2, %v4945_v12  ;;  %5714 = vst.msk [vmem:[%s7883_s13 + $0x978] sm:$0xff] %vm5410_vm2, %v5201_v13 }
 0x14d   : > { %5456 = vst.msk [vmem:[%s7883_s13 + $0x168] sm:$0xff] %vm5410_vm2, %v4943_v52  ;;  %5712 = vst.msk [vmem:[%s7883_s13 + $0x968] sm:$0xff] %vm5410_vm2, %v5199_v14  ;;  %v6830_v15 = vpop.f32.mrb[48].mxu0  ;;  %v7086_v16 = vpop.f32.mrb[48].mxu1 }
 0x14e   : > { %v3045_v17 = vadd.f32 %v8364_v53, %v6830_v15  ;;  %v4069_v18 = vadd.f32 %v8364_v53, %v7086_v16  ;;  %v3036_v19 = vpop.f32.mrb[49].mxu0  ;;  %v4060_v20 = vpop.f32.mrb[49].mxu1  ;;  %v7483_v15 = vld [vmem:[%s7640_s29 + $0x298] sm:$0xff]  }
 0x14f   : > { %v3037_v23 = vadd.f32 %v8364_v53, %v3036_v19  ;;  %v4061_v24 = vadd.f32 %v8364_v53, %v4060_v20  ;;  %v6831_v25 = vpop.f32.mrb[50].mxu0  ;;  %v7087_v26 = vpop.f32.mrb[50].mxu1  ;;  %v7484_v16 = vld [vmem:[%s7640_s29 + $0x698] sm:$0xff]  }
 0x150   : > { %v4948_v30 = vadd.f32 %v8377_v29, %v3045_v17  ;;  %v5204_v31 = vadd.f32 %v8377_v29, %v4069_v18  ;;  %v3048_v32 = vadd.f32 %v8364_v53, %v6831_v25  ;;  %v4072_v33 = vadd.f32 %v8364_v53, %v7087_v26  ;;  %v3039_v34 = vpop.f32.mrb[51].mxu0  ;;  %v4063_v35 = vpop.f32.mrb[51].mxu1 }
 0x151   : > { %v4946_v36 = vadd.f32 %v8377_v29, %v3037_v23  ;;  %v5202_v37 = vadd.f32 %v8377_v29, %v4061_v24  ;;  %v3040_v38 = vadd.f32 %v8364_v53, %v3039_v34  ;;  %v4064_v39 = vadd.f32 %v8364_v53, %v4063_v35 }
 0x152   : > { %5461 = vst.msk [vmem:[%s7883_s13 + $0x190] sm:$0xff] %vm5410_vm2, %v4948_v30  ;;  %5717 = vst.msk [vmem:[%s7883_s13 + $0x990] sm:$0xff] %vm5410_vm2, %v5204_v31  ;;  %v4949_v40 = vadd.f32 %v8377_v29, %v3048_v32  ;;  %v5205_v41 = vadd.f32 %v8377_v29, %v4072_v33  ;;  %6937 = vmatmul.mubr.msk.bf16.gmra.mrb[156].mxu0 %vm2037_vm0, %v7475_v21  ;;  %7193 = vmatmul.mubr.msk.bf16.gmra.mrb[156].mxu1 %vm2037_vm0, %v7476_v22  ;;  %v7485_v21 = vld [vmem:[%s7640_s29 + $0x2a0] sm:$0xff]  }
 0x153   : > { %5459 = vst.msk [vmem:[%s7883_s13 + $0x180] sm:$0xff] %vm5410_vm2, %v4946_v36  ;;  %5715 = vst.msk [vmem:[%s7883_s13 + $0x980] sm:$0xff] %vm5410_vm2, %v5202_v37  ;;  %v4947_v42 = vadd.f32 %v8377_v29, %v3040_v38  ;;  %v5203_v43 = vadd.f32 %v8377_v29, %v4064_v39  ;;  %6940 = vmatprep.mubr.msk.bf16.mxu0 %vm2037_vm0, %v7477_v27  ;;  %7196 = vmatprep.mubr.msk.bf16.mxu1 %vm2037_vm0, %v7478_v28  ;;  %v7486_v22 = vld [vmem:[%s7640_s29 + $0x6a0] sm:$0xff]  }
 0x154   : > { %5462 = vst.msk [vmem:[%s7883_s13 + $0x198] sm:$0xff] %vm5410_vm2, %v4949_v40  ;;  %5718 = vst.msk [vmem:[%s7883_s13 + $0x998] sm:$0xff] %vm5410_vm2, %v5205_v41 }
 0x155   : > { %5460 = vst.msk [vmem:[%s7883_s13 + $0x188] sm:$0xff] %vm5410_vm2, %v4947_v42  ;;  %5716 = vst.msk [vmem:[%s7883_s13 + $0x988] sm:$0xff] %vm5410_vm2, %v5203_v43  ;;  %v6834_v44 = vpop.f32.mrb[52].mxu0  ;;  %v7090_v45 = vpop.f32.mrb[52].mxu1 }
 0x156   : > { %v3061_v46 = vadd.f32 %v8364_v53, %v6834_v44  ;;  %v4085_v47 = vadd.f32 %v8364_v53, %v7090_v45  ;;  %v3052_v48 = vpop.f32.mrb[53].mxu0  ;;  %v4076_v49 = vpop.f32.mrb[53].mxu1  ;;  %v7487_v44 = vld [vmem:[%s7640_s29 + $0x2a8] sm:$0xff]  }
 0x157   : > { %v3053_v54 = vadd.f32 %v8364_v53, %v3052_v48  ;;  %v4077_v55 = vadd.f32 %v8364_v53, %v4076_v49  ;;  %v6835_v56 = vpop.f32.mrb[54].mxu0  ;;  %v7091_v57 = vpop.f32.mrb[54].mxu1  ;;  %v7488_v45 = vld [vmem:[%s7640_s29 + $0x6a8] sm:$0xff]  }
 0x158   : > { %v4952_v60 = vadd.f32 %v8377_v29, %v3061_v46  ;;  %v5208_v61 = vadd.f32 %v8377_v29, %v4085_v47  ;;  %v3064_v62 = vadd.f32 %v8364_v53, %v6835_v56  ;;  %v4088_v63 = vadd.f32 %v8364_v53, %v7091_v57  ;;  %v3055_v0 = vpop.f32.mrb[55].mxu0  ;;  %v4079_v1 = vpop.f32.mrb[55].mxu1 }
 0x159   : > { %v4950_v2 = vadd.f32 %v8377_v29, %v3053_v54  ;;  %v5206_v3 = vadd.f32 %v8377_v29, %v4077_v55  ;;  %v3056_v4 = vadd.f32 %v8364_v53, %v3055_v0  ;;  %v4080_v5 = vadd.f32 %v8364_v53, %v4079_v1 }
 0x15a   : > { %5465 = vst.msk [vmem:[%s7883_s13 + $0x1b0] sm:$0xff] %vm5410_vm2, %v4952_v60  ;;  %5721 = vst.msk [vmem:[%s7883_s13 + $0x9b0] sm:$0xff] %vm5410_vm2, %v5208_v61  ;;  %v4953_v6 = vadd.f32 %v8377_v29, %v3064_v62  ;;  %v5209_v7 = vadd.f32 %v8377_v29, %v4088_v63  ;;  %6941 = vmatmul.mubr.msk.bf16.gmra.mrb[160].mxu0 %vm2037_vm0, %v7479_v50  ;;  %7197 = vmatmul.mubr.msk.bf16.gmra.mrb[160].mxu1 %vm2037_vm0, %v7480_v51  ;;  %v7489_v50 = vld [vmem:[%s7640_s29 + $0x2b0] sm:$0xff]  }
 0x15b   : > { %5463 = vst.msk [vmem:[%s7883_s13 + $0x1a0] sm:$0xff] %vm5410_vm2, %v4950_v2  ;;  %5719 = vst.msk [vmem:[%s7883_s13 + $0x9a0] sm:$0xff] %vm5410_vm2, %v5206_v3  ;;  %v4951_v8 = vadd.f32 %v8377_v29, %v3056_v4  ;;  %v5207_v9 = vadd.f32 %v8377_v29, %v4080_v5  ;;  %6944 = vmatprep.mubr.msk.bf16.mxu0 %vm2037_vm0, %v7481_v58  ;;  %7200 = vmatprep.mubr.msk.bf16.mxu1 %vm2037_vm0, %v7482_v59  ;;  %v7490_v51 = vld [vmem:[%s7640_s29 + $0x6b0] sm:$0xff]  }
 0x15c   : > { %5466 = vst.msk [vmem:[%s7883_s13 + $0x1b8] sm:$0xff] %vm5410_vm2, %v4953_v6  ;;  %5722 = vst.msk [vmem:[%s7883_s13 + $0x9b8] sm:$0xff] %vm5410_vm2, %v5209_v7 }
 0x15d   : > { %5464 = vst.msk [vmem:[%s7883_s13 + $0x1a8] sm:$0xff] %vm5410_vm2, %v4951_v8  ;;  %5720 = vst.msk [vmem:[%s7883_s13 + $0x9a8] sm:$0xff] %vm5410_vm2, %v5207_v9  ;;  %v6838_v10 = vpop.f32.mrb[56].mxu0  ;;  %v7094_v11 = vpop.f32.mrb[56].mxu1 }
 0x15e   : > { %v3077_v12 = vadd.f32 %v8364_v53, %v6838_v10  ;;  %v4101_v13 = vadd.f32 %v8364_v53, %v7094_v11  ;;  %v3068_v52 = vpop.f32.mrb[57].mxu0  ;;  %v4092_v14 = vpop.f32.mrb[57].mxu1  ;;  %v7491_v10 = vld [vmem:[%s7640_s29 + $0x2b8] sm:$0xff]  }
 0x15f   : > { %v3069_v17 = vadd.f32 %v8364_v53, %v3068_v52  ;;  %v4093_v18 = vadd.f32 %v8364_v53, %v4092_v14  ;;  %v6839_v19 = vpop.f32.mrb[58].mxu0  ;;  %v7095_v20 = vpop.f32.mrb[58].mxu1  ;;  %v7492_v11 = vld [vmem:[%s7640_s29 + $0x6b8] sm:$0xff]  }
 0x160   : > { %v4956_v23 = vadd.f32 %v8377_v29, %v3077_v12  ;;  %v5212_v24 = vadd.f32 %v8377_v29, %v4101_v13  ;;  %v3080_v25 = vadd.f32 %v8364_v53, %v6839_v19  ;;  %v4104_v26 = vadd.f32 %v8364_v53, %v7095_v20  ;;  %v3071_v27 = vpop.f32.mrb[59].mxu0  ;;  %v4095_v28 = vpop.f32.mrb[59].mxu1 }
 0x161   : > { %v4954_v30 = vadd.f32 %v8377_v29, %v3069_v17  ;;  %v5210_v31 = vadd.f32 %v8377_v29, %v4093_v18  ;;  %v3072_v32 = vadd.f32 %v8364_v53, %v3071_v27  ;;  %v4096_v33 = vadd.f32 %v8364_v53, %v4095_v28 }
 0x162   : > { %5469 = vst.msk [vmem:[%s7883_s13 + $0x1d0] sm:$0xff] %vm5410_vm2, %v4956_v23  ;;  %5725 = vst.msk [vmem:[%s7883_s13 + $0x9d0] sm:$0xff] %vm5410_vm2, %v5212_v24  ;;  %v4957_v34 = vadd.f32 %v8377_v29, %v3080_v25  ;;  %v5213_v35 = vadd.f32 %v8377_v29, %v4104_v26  ;;  %6945 = vmatmul.mubr.msk.bf16.gmra.mrb[164].mxu0 %vm2037_vm0, %v7483_v15  ;;  %7201 = vmatmul.mubr.msk.bf16.gmra.mrb[164].mxu1 %vm2037_vm0, %v7484_v16  ;;  %v7493_v15 = vld [vmem:[%s7640_s29 + $0x2c0] sm:$0xff]  }
 0x163   : > { %5467 = vst.msk [vmem:[%s7883_s13 + $0x1c0] sm:$0xff] %vm5410_vm2, %v4954_v30  ;;  %5723 = vst.msk [vmem:[%s7883_s13 + $0x9c0] sm:$0xff] %vm5410_vm2, %v5210_v31  ;;  %v4955_v36 = vadd.f32 %v8377_v29, %v3072_v32  ;;  %v5211_v37 = vadd.f32 %v8377_v29, %v4096_v33  ;;  %6948 = vmatprep.mubr.msk.bf16.mxu0 %vm2037_vm0, %v7485_v21  ;;  %7204 = vmatprep.mubr.msk.bf16.mxu1 %vm2037_vm0, %v7486_v22  ;;  %v7494_v16 = vld [vmem:[%s7640_s29 + $0x6c0] sm:$0xff]  }
 0x164   : > { %5470 = vst.msk [vmem:[%s7883_s13 + $0x1d8] sm:$0xff] %vm5410_vm2, %v4957_v34  ;;  %5726 = vst.msk [vmem:[%s7883_s13 + $0x9d8] sm:$0xff] %vm5410_vm2, %v5213_v35 }
 0x165   : > { %5468 = vst.msk [vmem:[%s7883_s13 + $0x1c8] sm:$0xff] %vm5410_vm2, %v4955_v36  ;;  %5724 = vst.msk [vmem:[%s7883_s13 + $0x9c8] sm:$0xff] %vm5410_vm2, %v5211_v37  ;;  %v6842_v38 = vpop.f32.mrb[60].mxu0  ;;  %v7098_v39 = vpop.f32.mrb[60].mxu1 }
 0x166   : > { %v3093_v40 = vadd.f32 %v8364_v53, %v6842_v38  ;;  %v4117_v41 = vadd.f32 %v8364_v53, %v7098_v39  ;;  %v3084_v42 = vpop.f32.mrb[61].mxu0  ;;  %v4108_v43 = vpop.f32.mrb[61].mxu1  ;;  %v7495_v38 = vld [vmem:[%s7640_s29 + $0x2c8] sm:$0xff]  }
 0x167   : > { %v3085_v46 = vadd.f32 %v8364_v53, %v3084_v42  ;;  %v4109_v47 = vadd.f32 %v8364_v53, %v4108_v43  ;;  %v6843_v48 = vpop.f32.mrb[62].mxu0  ;;  %v7099_v49 = vpop.f32.mrb[62].mxu1  ;;  %v7496_v39 = vld [vmem:[%s7640_s29 + $0x6c8] sm:$0xff]  }
 0x168   : > { %v4960_v54 = vadd.f32 %v8377_v29, %v3093_v40  ;;  %v5216_v55 = vadd.f32 %v8377_v29, %v4117_v41  ;;  %v3096_v56 = vadd.f32 %v8364_v53, %v6843_v48  ;;  %v4120_v57 = vadd.f32 %v8364_v53, %v7099_v49  ;;  %v3087_v58 = vpop.f32.mrb[63].mxu0  ;;  %v4111_v59 = vpop.f32.mrb[63].mxu1 }
 0x169   : > { %v4958_v60 = vadd.f32 %v8377_v29, %v3085_v46  ;;  %v5214_v61 = vadd.f32 %v8377_v29, %v4109_v47  ;;  %v3088_v62 = vadd.f32 %v8364_v53, %v3087_v58  ;;  %v4112_v63 = vadd.f32 %v8364_v53, %v4111_v59 }
 0x16a   : > { %5473 = vst.msk [vmem:[%s7883_s13 + $0x1f0] sm:$0xff] %vm5410_vm2, %v4960_v54  ;;  %5729 = vst.msk [vmem:[%s7883_s13 + $0x9f0] sm:$0xff] %vm5410_vm2, %v5216_v55  ;;  %v4961_v0 = vadd.f32 %v8377_v29, %v3096_v56  ;;  %v5217_v1 = vadd.f32 %v8377_v29, %v4120_v57  ;;  %6949 = vmatmul.mubr.msk.bf16.gmra.mrb[168].mxu0 %vm2037_vm0, %v7487_v44  ;;  %7205 = vmatmul.mubr.msk.bf16.gmra.mrb[168].mxu1 %vm2037_vm0, %v7488_v45  ;;  %v7497_v44 = vld [vmem:[%s7640_s29 + $0x2d0] sm:$0xff]  }
 0x16b   : > { %5471 = vst.msk [vmem:[%s7883_s13 + $0x1e0] sm:$0xff] %vm5410_vm2, %v4958_v60  ;;  %5727 = vst.msk [vmem:[%s7883_s13 + $0x9e0] sm:$0xff] %vm5410_vm2, %v5214_v61  ;;  %v4959_v2 = vadd.f32 %v8377_v29, %v3088_v62  ;;  %v5215_v3 = vadd.f32 %v8377_v29, %v4112_v63  ;;  %6952 = vmatprep.mubr.msk.bf16.mxu0 %vm2037_vm0, %v7489_v50  ;;  %7208 = vmatprep.mubr.msk.bf16.mxu1 %vm2037_vm0, %v7490_v51  ;;  %v7498_v45 = vld [vmem:[%s7640_s29 + $0x6d0] sm:$0xff]  }
 0x16c   : > { %5474 = vst.msk [vmem:[%s7883_s13 + $0x1f8] sm:$0xff] %vm5410_vm2, %v4961_v0  ;;  %5730 = vst.msk [vmem:[%s7883_s13 + $0x9f8] sm:$0xff] %vm5410_vm2, %v5217_v1 }
 0x16d   : > { %5472 = vst.msk [vmem:[%s7883_s13 + $0x1e8] sm:$0xff] %vm5410_vm2, %v4959_v2  ;;  %5728 = vst.msk [vmem:[%s7883_s13 + $0x9e8] sm:$0xff] %vm5410_vm2, %v5215_v3  ;;  %v6846_v4 = vpop.f32.mrb[64].mxu0  ;;  %v7102_v5 = vpop.f32.mrb[64].mxu1 }
 0x16e   : > { %v3109_v6 = vadd.f32 %v8364_v53, %v6846_v4  ;;  %v4133_v7 = vadd.f32 %v8364_v53, %v7102_v5  ;;  %v3100_v8 = vpop.f32.mrb[65].mxu0  ;;  %v4124_v9 = vpop.f32.mrb[65].mxu1  ;;  %v7499_v4 = vld [vmem:[%s7640_s29 + $0x2d8] sm:$0xff]  }
 0x16f   : > { %v3101_v12 = vadd.f32 %v8364_v53, %v3100_v8  ;;  %v4125_v13 = vadd.f32 %v8364_v53, %v4124_v9  ;;  %v6847_v52 = vpop.f32.mrb[66].mxu0  ;;  %v7103_v14 = vpop.f32.mrb[66].mxu1  ;;  %v7500_v5 = vld [vmem:[%s7640_s29 + $0x6d8] sm:$0xff]  }
 0x170   : > { %v4964_v17 = vadd.f32 %v8377_v29, %v3109_v6  ;;  %v5220_v18 = vadd.f32 %v8377_v29, %v4133_v7  ;;  %v3112_v19 = vadd.f32 %v8364_v53, %v6847_v52  ;;  %v4136_v20 = vadd.f32 %v8364_v53, %v7103_v14  ;;  %v3103_v21 = vpop.f32.mrb[67].mxu0  ;;  %v4127_v22 = vpop.f32.mrb[67].mxu1 }
 0x171   : > { %v4962_v23 = vadd.f32 %v8377_v29, %v3101_v12  ;;  %v5218_v24 = vadd.f32 %v8377_v29, %v4125_v13  ;;  %v3104_v25 = vadd.f32 %v8364_v53, %v3103_v21  ;;  %v4128_v26 = vadd.f32 %v8364_v53, %v4127_v22 }
 0x172   : > { %5477 = vst.msk [vmem:[%s7883_s13 + $0x210] sm:$0xff] %vm5410_vm2, %v4964_v17  ;;  %5733 = vst.msk [vmem:[%s7883_s13 + $0xa10] sm:$0xff] %vm5410_vm2, %v5220_v18  ;;  %v4965_v27 = vadd.f32 %v8377_v29, %v3112_v19  ;;  %v5221_v28 = vadd.f32 %v8377_v29, %v4136_v20  ;;  %6953 = vmatmul.mubr.msk.bf16.gmra.mrb[172].mxu0 %vm2037_vm0, %v7491_v10  ;;  %7209 = vmatmul.mubr.msk.bf16.gmra.mrb[172].mxu1 %vm2037_vm0, %v7492_v11  ;;  %v7501_v10 = vld [vmem:[%s7640_s29 + $0x2e0] sm:$0xff]  }
 0x173   : > { %5475 = vst.msk [vmem:[%s7883_s13 + $0x200] sm:$0xff] %vm5410_vm2, %v4962_v23  ;;  %5731 = vst.msk [vmem:[%s7883_s13 + $0xa00] sm:$0xff] %vm5410_vm2, %v5218_v24  ;;  %v4963_v30 = vadd.f32 %v8377_v29, %v3104_v25  ;;  %v5219_v31 = vadd.f32 %v8377_v29, %v4128_v26  ;;  %6956 = vmatprep.mubr.msk.bf16.mxu0 %vm2037_vm0, %v7493_v15  ;;  %7212 = vmatprep.mubr.msk.bf16.mxu1 %vm2037_vm0, %v7494_v16  ;;  %v7502_v11 = vld [vmem:[%s7640_s29 + $0x6e0] sm:$0xff]  }
 0x174   : > { %5478 = vst.msk [vmem:[%s7883_s13 + $0x218] sm:$0xff] %vm5410_vm2, %v4965_v27  ;;  %5734 = vst.msk [vmem:[%s7883_s13 + $0xa18] sm:$0xff] %vm5410_vm2, %v5221_v28 }
 0x175   : > { %5476 = vst.msk [vmem:[%s7883_s13 + $0x208] sm:$0xff] %vm5410_vm2, %v4963_v30  ;;  %5732 = vst.msk [vmem:[%s7883_s13 + $0xa08] sm:$0xff] %vm5410_vm2, %v5219_v31  ;;  %v6850_v32 = vpop.f32.mrb[68].mxu0  ;;  %v7106_v33 = vpop.f32.mrb[68].mxu1 }
 0x176   : > { %v3125_v34 = vadd.f32 %v8364_v53, %v6850_v32  ;;  %v4149_v35 = vadd.f32 %v8364_v53, %v7106_v33  ;;  %v3116_v36 = vpop.f32.mrb[69].mxu0  ;;  %v4140_v37 = vpop.f32.mrb[69].mxu1  ;;  %v7503_v32 = vld [vmem:[%s7640_s29 + $0x2e8] sm:$0xff]  }
 0x177   : > { %v3117_v40 = vadd.f32 %v8364_v53, %v3116_v36  ;;  %v4141_v41 = vadd.f32 %v8364_v53, %v4140_v37  ;;  %v6851_v42 = vpop.f32.mrb[70].mxu0  ;;  %v7107_v43 = vpop.f32.mrb[70].mxu1  ;;  %v7504_v33 = vld [vmem:[%s7640_s29 + $0x6e8] sm:$0xff]  }
 0x178   : > { %v4968_v46 = vadd.f32 %v8377_v29, %v3125_v34  ;;  %v5224_v47 = vadd.f32 %v8377_v29, %v4149_v35  ;;  %v3128_v48 = vadd.f32 %v8364_v53, %v6851_v42  ;;  %v4152_v49 = vadd.f32 %v8364_v53, %v7107_v43  ;;  %v3119_v50 = vpop.f32.mrb[71].mxu0  ;;  %v4143_v51 = vpop.f32.mrb[71].mxu1 }
 0x179   : > { %v4966_v54 = vadd.f32 %v8377_v29, %v3117_v40  ;;  %v5222_v55 = vadd.f32 %v8377_v29, %v4141_v41  ;;  %v3120_v56 = vadd.f32 %v8364_v53, %v3119_v50  ;;  %v4144_v57 = vadd.f32 %v8364_v53, %v4143_v51 }
 0x17a   : > { %5481 = vst.msk [vmem:[%s7883_s13 + $0x230] sm:$0xff] %vm5410_vm2, %v4968_v46  ;;  %5737 = vst.msk [vmem:[%s7883_s13 + $0xa30] sm:$0xff] %vm5410_vm2, %v5224_v47  ;;  %v4969_v58 = vadd.f32 %v8377_v29, %v3128_v48  ;;  %v5225_v59 = vadd.f32 %v8377_v29, %v4152_v49  ;;  %6957 = vmatmul.mubr.msk.bf16.gmra.mrb[176].mxu0 %vm2037_vm0, %v7495_v38  ;;  %7213 = vmatmul.mubr.msk.bf16.gmra.mrb[176].mxu1 %vm2037_vm0, %v7496_v39  ;;  %v7505_v38 = vld [vmem:[%s7640_s29 + $0x2f0] sm:$0xff]  }
 0x17b   : > { %5479 = vst.msk [vmem:[%s7883_s13 + $0x220] sm:$0xff] %vm5410_vm2, %v4966_v54  ;;  %5735 = vst.msk [vmem:[%s7883_s13 + $0xa20] sm:$0xff] %vm5410_vm2, %v5222_v55  ;;  %v4967_v60 = vadd.f32 %v8377_v29, %v3120_v56  ;;  %v5223_v61 = vadd.f32 %v8377_v29, %v4144_v57  ;;  %6960 = vmatprep.mubr.msk.bf16.mxu0 %vm2037_vm0, %v7497_v44  ;;  %7216 = vmatprep.mubr.msk.bf16.mxu1 %vm2037_vm0, %v7498_v45  ;;  %v7506_v39 = vld [vmem:[%s7640_s29 + $0x6f0] sm:$0xff]  }
 0x17c   : > { %5482 = vst.msk [vmem:[%s7883_s13 + $0x238] sm:$0xff] %vm5410_vm2, %v4969_v58  ;;  %5738 = vst.msk [vmem:[%s7883_s13 + $0xa38] sm:$0xff] %vm5410_vm2, %v5225_v59 }
 0x17d   : > { %5480 = vst.msk [vmem:[%s7883_s13 + $0x228] sm:$0xff] %vm5410_vm2, %v4967_v60  ;;  %5736 = vst.msk [vmem:[%s7883_s13 + $0xa28] sm:$0xff] %vm5410_vm2, %v5223_v61  ;;  %v6854_v62 = vpop.f32.mrb[72].mxu0  ;;  %v7110_v63 = vpop.f32.mrb[72].mxu1 }
 0x17e   : > { %v3141_v0 = vadd.f32 %v8364_v53, %v6854_v62  ;;  %v4165_v1 = vadd.f32 %v8364_v53, %v7110_v63  ;;  %v3132_v2 = vpop.f32.mrb[73].mxu0  ;;  %v4156_v3 = vpop.f32.mrb[73].mxu1  ;;  %v7507_v62 = vld [vmem:[%s7640_s29 + $0x2f8] sm:$0xff]  }
 0x17f   : > { %v3133_v6 = vadd.f32 %v8364_v53, %v3132_v2  ;;  %v4157_v7 = vadd.f32 %v8364_v53, %v4156_v3  ;;  %v6855_v8 = vpop.f32.mrb[74].mxu0  ;;  %v7111_v9 = vpop.f32.mrb[74].mxu1  ;;  %v7508_v63 = vld [vmem:[%s7640_s29 + $0x6f8] sm:$0xff]  }
 0x180   : > { %v4972_v12 = vadd.f32 %v8377_v29, %v3141_v0  ;;  %v5228_v13 = vadd.f32 %v8377_v29, %v4165_v1  ;;  %v3144_v52 = vadd.f32 %v8364_v53, %v6855_v8  ;;  %v4168_v14 = vadd.f32 %v8364_v53, %v7111_v9  ;;  %v3135_v15 = vpop.f32.mrb[75].mxu0  ;;  %v4159_v16 = vpop.f32.mrb[75].mxu1 }
 0x181   : > { %v4970_v17 = vadd.f32 %v8377_v29, %v3133_v6  ;;  %v5226_v18 = vadd.f32 %v8377_v29, %v4157_v7  ;;  %v3136_v19 = vadd.f32 %v8364_v53, %v3135_v15  ;;  %v4160_v20 = vadd.f32 %v8364_v53, %v4159_v16 }
 0x182   : > { %5485 = vst.msk [vmem:[%s7883_s13 + $0x250] sm:$0xff] %vm5410_vm2, %v4972_v12  ;;  %5741 = vst.msk [vmem:[%s7883_s13 + $0xa50] sm:$0xff] %vm5410_vm2, %v5228_v13  ;;  %v4973_v21 = vadd.f32 %v8377_v29, %v3144_v52  ;;  %v5229_v22 = vadd.f32 %v8377_v29, %v4168_v14  ;;  %6961 = vmatmul.mubr.msk.bf16.gmra.mrb[180].mxu0 %vm2037_vm0, %v7499_v4  ;;  %7217 = vmatmul.mubr.msk.bf16.gmra.mrb[180].mxu1 %vm2037_vm0, %v7500_v5  ;;  %v7509_v4 = vld [vmem:[%s7640_s29 + $0x300] sm:$0xff]  }
 0x183   : > { %5483 = vst.msk [vmem:[%s7883_s13 + $0x240] sm:$0xff] %vm5410_vm2, %v4970_v17  ;;  %5739 = vst.msk [vmem:[%s7883_s13 + $0xa40] sm:$0xff] %vm5410_vm2, %v5226_v18  ;;  %v4971_v23 = vadd.f32 %v8377_v29, %v3136_v19  ;;  %v5227_v24 = vadd.f32 %v8377_v29, %v4160_v20  ;;  %6964 = vmatprep.mubr.msk.bf16.mxu0 %vm2037_vm0, %v7501_v10  ;;  %7220 = vmatprep.mubr.msk.bf16.mxu1 %vm2037_vm0, %v7502_v11  ;;  %v7510_v5 = vld [vmem:[%s7640_s29 + $0x700] sm:$0xff]  }
 0x184   : > { %5486 = vst.msk [vmem:[%s7883_s13 + $0x258] sm:$0xff] %vm5410_vm2, %v4973_v21  ;;  %5742 = vst.msk [vmem:[%s7883_s13 + $0xa58] sm:$0xff] %vm5410_vm2, %v5229_v22 }
 0x185   : > { %5484 = vst.msk [vmem:[%s7883_s13 + $0x248] sm:$0xff] %vm5410_vm2, %v4971_v23  ;;  %5740 = vst.msk [vmem:[%s7883_s13 + $0xa48] sm:$0xff] %vm5410_vm2, %v5227_v24  ;;  %v6858_v25 = vpop.f32.mrb[76].mxu0  ;;  %v7114_v26 = vpop.f32.mrb[76].mxu1 }
 0x186   : > { %v3157_v27 = vadd.f32 %v8364_v53, %v6858_v25  ;;  %v4181_v28 = vadd.f32 %v8364_v53, %v7114_v26  ;;  %v3148_v30 = vpop.f32.mrb[77].mxu0  ;;  %v4172_v31 = vpop.f32.mrb[77].mxu1  ;;  %v7511_v25 = vld [vmem:[%s7640_s29 + $0x308] sm:$0xff]  }
 0x187   : > { %v3149_v34 = vadd.f32 %v8364_v53, %v3148_v30  ;;  %v4173_v35 = vadd.f32 %v8364_v53, %v4172_v31  ;;  %v6859_v36 = vpop.f32.mrb[78].mxu0  ;;  %v7115_v37 = vpop.f32.mrb[78].mxu1  ;;  %v7512_v26 = vld [vmem:[%s7640_s29 + $0x708] sm:$0xff]  }
 0x188   : > { %v4976_v40 = vadd.f32 %v8377_v29, %v3157_v27  ;;  %v5232_v41 = vadd.f32 %v8377_v29, %v4181_v28  ;;  %v3160_v42 = vadd.f32 %v8364_v53, %v6859_v36  ;;  %v4184_v43 = vadd.f32 %v8364_v53, %v7115_v37  ;;  %v3151_v44 = vpop.f32.mrb[79].mxu0  ;;  %v4175_v45 = vpop.f32.mrb[79].mxu1 }
 0x189   : > { %v4974_v46 = vadd.f32 %v8377_v29, %v3149_v34  ;;  %v5230_v47 = vadd.f32 %v8377_v29, %v4173_v35  ;;  %v3152_v48 = vadd.f32 %v8364_v53, %v3151_v44  ;;  %v4176_v49 = vadd.f32 %v8364_v53, %v4175_v45 }
 0x18a   : > { %5489 = vst.msk [vmem:[%s7883_s13 + $0x270] sm:$0xff] %vm5410_vm2, %v4976_v40  ;;  %5745 = vst.msk [vmem:[%s7883_s13 + $0xa70] sm:$0xff] %vm5410_vm2, %v5232_v41  ;;  %v4977_v50 = vadd.f32 %v8377_v29, %v3160_v42  ;;  %v5233_v51 = vadd.f32 %v8377_v29, %v4184_v43  ;;  %6965 = vmatmul.mubr.msk.bf16.gmra.mrb[184].mxu0 %vm2037_vm0, %v7503_v32  ;;  %7221 = vmatmul.mubr.msk.bf16.gmra.mrb[184].mxu1 %vm2037_vm0, %v7504_v33  ;;  %v7513_v32 = vld [vmem:[%s7640_s29 + $0x310] sm:$0xff]  }
 0x18b   : > { %5487 = vst.msk [vmem:[%s7883_s13 + $0x260] sm:$0xff] %vm5410_vm2, %v4974_v46  ;;  %5743 = vst.msk [vmem:[%s7883_s13 + $0xa60] sm:$0xff] %vm5410_vm2, %v5230_v47  ;;  %v4975_v54 = vadd.f32 %v8377_v29, %v3152_v48  ;;  %v5231_v55 = vadd.f32 %v8377_v29, %v4176_v49  ;;  %6968 = vmatprep.mubr.msk.bf16.mxu0 %vm2037_vm0, %v7505_v38  ;;  %7224 = vmatprep.mubr.msk.bf16.mxu1 %vm2037_vm0, %v7506_v39  ;;  %v7514_v33 = vld [vmem:[%s7640_s29 + $0x710] sm:$0xff]  }
 0x18c   : > { %5490 = vst.msk [vmem:[%s7883_s13 + $0x278] sm:$0xff] %vm5410_vm2, %v4977_v50  ;;  %5746 = vst.msk [vmem:[%s7883_s13 + $0xa78] sm:$0xff] %vm5410_vm2, %v5233_v51 }
 0x18d   : > { %5488 = vst.msk [vmem:[%s7883_s13 + $0x268] sm:$0xff] %vm5410_vm2, %v4975_v54  ;;  %5744 = vst.msk [vmem:[%s7883_s13 + $0xa68] sm:$0xff] %vm5410_vm2, %v5231_v55  ;;  %v6862_v56 = vpop.f32.mrb[80].mxu0  ;;  %v7118_v57 = vpop.f32.mrb[80].mxu1 }
 0x18e   : > { %v3173_v58 = vadd.f32 %v8364_v53, %v6862_v56  ;;  %v4197_v59 = vadd.f32 %v8364_v53, %v7118_v57  ;;  %v3164_v60 = vpop.f32.mrb[81].mxu0  ;;  %v4188_v61 = vpop.f32.mrb[81].mxu1  ;;  %v7515_v56 = vld [vmem:[%s7640_s29 + $0x318] sm:$0xff]  }
 0x18f   : > { %v3165_v0 = vadd.f32 %v8364_v53, %v3164_v60  ;;  %v4189_v1 = vadd.f32 %v8364_v53, %v4188_v61  ;;  %v6863_v2 = vpop.f32.mrb[82].mxu0  ;;  %v7119_v3 = vpop.f32.mrb[82].mxu1  ;;  %v7516_v57 = vld [vmem:[%s7640_s29 + $0x718] sm:$0xff]  }
 0x190   : > { %v4980_v6 = vadd.f32 %v8377_v29, %v3173_v58  ;;  %v5236_v7 = vadd.f32 %v8377_v29, %v4197_v59  ;;  %v3176_v8 = vadd.f32 %v8364_v53, %v6863_v2  ;;  %v4200_v9 = vadd.f32 %v8364_v53, %v7119_v3  ;;  %v3167_v10 = vpop.f32.mrb[83].mxu0  ;;  %v4191_v11 = vpop.f32.mrb[83].mxu1 }
 0x191   : > { %v4978_v12 = vadd.f32 %v8377_v29, %v3165_v0  ;;  %v5234_v13 = vadd.f32 %v8377_v29, %v4189_v1  ;;  %v3168_v52 = vadd.f32 %v8364_v53, %v3167_v10  ;;  %v4192_v14 = vadd.f32 %v8364_v53, %v4191_v11 }
 0x192   : > { %5493 = vst.msk [vmem:[%s7883_s13 + $0x290] sm:$0xff] %vm5410_vm2, %v4980_v6  ;;  %5749 = vst.msk [vmem:[%s7883_s13 + $0xa90] sm:$0xff] %vm5410_vm2, %v5236_v7  ;;  %v4981_v15 = vadd.f32 %v8377_v29, %v3176_v8  ;;  %v5237_v16 = vadd.f32 %v8377_v29, %v4200_v9  ;;  %6969 = vmatmul.mubr.msk.bf16.gmra.mrb[188].mxu0 %vm2037_vm0, %v7507_v62  ;;  %7225 = vmatmul.mubr.msk.bf16.gmra.mrb[188].mxu1 %vm2037_vm0, %v7508_v63  ;;  %v7517_v62 = vld [vmem:[%s7640_s29 + $0x320] sm:$0xff]  }
 0x193   : > { %5491 = vst.msk [vmem:[%s7883_s13 + $0x280] sm:$0xff] %vm5410_vm2, %v4978_v12  ;;  %5747 = vst.msk [vmem:[%s7883_s13 + $0xa80] sm:$0xff] %vm5410_vm2, %v5234_v13  ;;  %v4979_v17 = vadd.f32 %v8377_v29, %v3168_v52  ;;  %v5235_v18 = vadd.f32 %v8377_v29, %v4192_v14  ;;  %6972 = vmatprep.mubr.msk.bf16.mxu0 %vm2037_vm0, %v7509_v4  ;;  %7228 = vmatprep.mubr.msk.bf16.mxu1 %vm2037_vm0, %v7510_v5  ;;  %v7518_v63 = vld [vmem:[%s7640_s29 + $0x720] sm:$0xff]  }
 0x194   : > { %5494 = vst.msk [vmem:[%s7883_s13 + $0x298] sm:$0xff] %vm5410_vm2, %v4981_v15  ;;  %5750 = vst.msk [vmem:[%s7883_s13 + $0xa98] sm:$0xff] %vm5410_vm2, %v5237_v16 }
 0x195   : > { %5492 = vst.msk [vmem:[%s7883_s13 + $0x288] sm:$0xff] %vm5410_vm2, %v4979_v17  ;;  %5748 = vst.msk [vmem:[%s7883_s13 + $0xa88] sm:$0xff] %vm5410_vm2, %v5235_v18  ;;  %v6866_v19 = vpop.f32.mrb[84].mxu0  ;;  %v7122_v20 = vpop.f32.mrb[84].mxu1 }
 0x196   : > { %v3189_v21 = vadd.f32 %v8364_v53, %v6866_v19  ;;  %v4213_v22 = vadd.f32 %v8364_v53, %v7122_v20  ;;  %v3180_v23 = vpop.f32.mrb[85].mxu0  ;;  %v4204_v24 = vpop.f32.mrb[85].mxu1  ;;  %v7519_v19 = vld [vmem:[%s7640_s29 + $0x328] sm:$0xff]  }
 0x197   : > { %v3181_v27 = vadd.f32 %v8364_v53, %v3180_v23  ;;  %v4205_v28 = vadd.f32 %v8364_v53, %v4204_v24  ;;  %v6867_v30 = vpop.f32.mrb[86].mxu0  ;;  %v7123_v31 = vpop.f32.mrb[86].mxu1  ;;  %v7520_v20 = vld [vmem:[%s7640_s29 + $0x728] sm:$0xff]  }
 0x198   : > { %v4984_v34 = vadd.f32 %v8377_v29, %v3189_v21  ;;  %v5240_v35 = vadd.f32 %v8377_v29, %v4213_v22  ;;  %v3192_v36 = vadd.f32 %v8364_v53, %v6867_v30  ;;  %v4216_v37 = vadd.f32 %v8364_v53, %v7123_v31  ;;  %v3183_v38 = vpop.f32.mrb[87].mxu0  ;;  %v4207_v39 = vpop.f32.mrb[87].mxu1 }
 0x199   : > { %v4982_v40 = vadd.f32 %v8377_v29, %v3181_v27  ;;  %v5238_v41 = vadd.f32 %v8377_v29, %v4205_v28  ;;  %v3184_v42 = vadd.f32 %v8364_v53, %v3183_v38  ;;  %v4208_v43 = vadd.f32 %v8364_v53, %v4207_v39 }
 0x19a   : > { %5497 = vst.msk [vmem:[%s7883_s13 + $0x2b0] sm:$0xff] %vm5410_vm2, %v4984_v34  ;;  %5753 = vst.msk [vmem:[%s7883_s13 + $0xab0] sm:$0xff] %vm5410_vm2, %v5240_v35  ;;  %v4985_v44 = vadd.f32 %v8377_v29, %v3192_v36  ;;  %v5241_v45 = vadd.f32 %v8377_v29, %v4216_v37  ;;  %6973 = vmatmul.mubr.msk.bf16.gmra.mrb[192].mxu0 %vm2037_vm0, %v7511_v25  ;;  %7229 = vmatmul.mubr.msk.bf16.gmra.mrb[192].mxu1 %vm2037_vm0, %v7512_v26  ;;  %v7521_v25 = vld [vmem:[%s7640_s29 + $0x330] sm:$0xff]  }
 0x19b   : > { %5495 = vst.msk [vmem:[%s7883_s13 + $0x2a0] sm:$0xff] %vm5410_vm2, %v4982_v40  ;;  %5751 = vst.msk [vmem:[%s7883_s13 + $0xaa0] sm:$0xff] %vm5410_vm2, %v5238_v41  ;;  %v4983_v46 = vadd.f32 %v8377_v29, %v3184_v42  ;;  %v5239_v47 = vadd.f32 %v8377_v29, %v4208_v43  ;;  %6976 = vmatprep.mubr.msk.bf16.mxu0 %vm2037_vm0, %v7513_v32  ;;  %7232 = vmatprep.mubr.msk.bf16.mxu1 %vm2037_vm0, %v7514_v33  ;;  %v7522_v26 = vld [vmem:[%s7640_s29 + $0x730] sm:$0xff]  }
 0x19c   : > { %5498 = vst.msk [vmem:[%s7883_s13 + $0x2b8] sm:$0xff] %vm5410_vm2, %v4985_v44  ;;  %5754 = vst.msk [vmem:[%s7883_s13 + $0xab8] sm:$0xff] %vm5410_vm2, %v5241_v45 }
 0x19d   : > { %5496 = vst.msk [vmem:[%s7883_s13 + $0x2a8] sm:$0xff] %vm5410_vm2, %v4983_v46  ;;  %5752 = vst.msk [vmem:[%s7883_s13 + $0xaa8] sm:$0xff] %vm5410_vm2, %v5239_v47  ;;  %v6870_v48 = vpop.f32.mrb[88].mxu0  ;;  %v7126_v49 = vpop.f32.mrb[88].mxu1 }
 0x19e   : > { %v3205_v50 = vadd.f32 %v8364_v53, %v6870_v48  ;;  %v4229_v51 = vadd.f32 %v8364_v53, %v7126_v49  ;;  %v3196_v54 = vpop.f32.mrb[89].mxu0  ;;  %v4220_v55 = vpop.f32.mrb[89].mxu1  ;;  %v7523_v48 = vld [vmem:[%s7640_s29 + $0x338] sm:$0xff]  }
 0x19f   : > { %v3197_v58 = vadd.f32 %v8364_v53, %v3196_v54  ;;  %v4221_v59 = vadd.f32 %v8364_v53, %v4220_v55  ;;  %v6871_v60 = vpop.f32.mrb[90].mxu0  ;;  %v7127_v61 = vpop.f32.mrb[90].mxu1  ;;  %v7524_v49 = vld [vmem:[%s7640_s29 + $0x738] sm:$0xff]  }
 0x1a0   : > { %v4988_v0 = vadd.f32 %v8377_v29, %v3205_v50  ;;  %v5244_v1 = vadd.f32 %v8377_v29, %v4229_v51  ;;  %v3208_v2 = vadd.f32 %v8364_v53, %v6871_v60  ;;  %v4232_v3 = vadd.f32 %v8364_v53, %v7127_v61  ;;  %v3199_v4 = vpop.f32.mrb[91].mxu0  ;;  %v4223_v5 = vpop.f32.mrb[91].mxu1 }
 0x1a1   : > { %v4986_v6 = vadd.f32 %v8377_v29, %v3197_v58  ;;  %v5242_v7 = vadd.f32 %v8377_v29, %v4221_v59  ;;  %v3200_v8 = vadd.f32 %v8364_v53, %v3199_v4  ;;  %v4224_v9 = vadd.f32 %v8364_v53, %v4223_v5 }
 0x1a2   : > { %5501 = vst.msk [vmem:[%s7883_s13 + $0x2d0] sm:$0xff] %vm5410_vm2, %v4988_v0  ;;  %5757 = vst.msk [vmem:[%s7883_s13 + $0xad0] sm:$0xff] %vm5410_vm2, %v5244_v1  ;;  %v4989_v10 = vadd.f32 %v8377_v29, %v3208_v2  ;;  %v5245_v11 = vadd.f32 %v8377_v29, %v4232_v3  ;;  %6977 = vmatmul.mubr.msk.bf16.gmra.mrb[196].mxu0 %vm2037_vm0, %v7515_v56  ;;  %7233 = vmatmul.mubr.msk.bf16.gmra.mrb[196].mxu1 %vm2037_vm0, %v7516_v57  ;;  %v7525_v56 = vld [vmem:[%s7640_s29 + $0x340] sm:$0xff]  }
 0x1a3   : > { %5499 = vst.msk [vmem:[%s7883_s13 + $0x2c0] sm:$0xff] %vm5410_vm2, %v4986_v6  ;;  %5755 = vst.msk [vmem:[%s7883_s13 + $0xac0] sm:$0xff] %vm5410_vm2, %v5242_v7  ;;  %v4987_v12 = vadd.f32 %v8377_v29, %v3200_v8  ;;  %v5243_v13 = vadd.f32 %v8377_v29, %v4224_v9  ;;  %6980 = vmatprep.mubr.msk.bf16.mxu0 %vm2037_vm0, %v7517_v62  ;;  %7236 = vmatprep.mubr.msk.bf16.mxu1 %vm2037_vm0, %v7518_v63  ;;  %v7526_v57 = vld [vmem:[%s7640_s29 + $0x740] sm:$0xff]  }
 0x1a4   : > { %5502 = vst.msk [vmem:[%s7883_s13 + $0x2d8] sm:$0xff] %vm5410_vm2, %v4989_v10  ;;  %5758 = vst.msk [vmem:[%s7883_s13 + $0xad8] sm:$0xff] %vm5410_vm2, %v5245_v11 }
 0x1a5   : > { %5500 = vst.msk [vmem:[%s7883_s13 + $0x2c8] sm:$0xff] %vm5410_vm2, %v4987_v12  ;;  %5756 = vst.msk [vmem:[%s7883_s13 + $0xac8] sm:$0xff] %vm5410_vm2, %v5243_v13  ;;  %v6874_v52 = vpop.f32.mrb[92].mxu0  ;;  %v7130_v14 = vpop.f32.mrb[92].mxu1  ;;  %v7527_v13 = vld [vmem:[%s7640_s29 + $0x348] sm:$0xff]  }
 0x1a6   : > { %v3221_v15 = vadd.f32 %v8364_v53, %v6874_v52  ;;  %v4245_v16 = vadd.f32 %v8364_v53, %v7130_v14  ;;  %v3212_v17 = vpop.f32.mrb[93].mxu0  ;;  %v4236_v18 = vpop.f32.mrb[93].mxu1  ;;  %v7528_v52 = vld [vmem:[%s7640_s29 + $0x748] sm:$0xff]  }
 0x1a7   : > { %v3213_v21 = vadd.f32 %v8364_v53, %v3212_v17  ;;  %v4237_v22 = vadd.f32 %v8364_v53, %v4236_v18  ;;  %v6875_v23 = vpop.f32.mrb[94].mxu0  ;;  %v7131_v24 = vpop.f32.mrb[94].mxu1  ;;  %v7529_v18 = vld [vmem:[%s7640_s29 + $0x350] sm:$0xff]  }
 0x1a8   : > { %v4992_v27 = vadd.f32 %v8377_v29, %v3221_v15  ;;  %v5248_v28 = vadd.f32 %v8377_v29, %v4245_v16  ;;  %v3224_v30 = vadd.f32 %v8364_v53, %v6875_v23  ;;  %v4248_v31 = vadd.f32 %v8364_v53, %v7131_v24  ;;  %v3215_v32 = vpop.f32.mrb[95].mxu0  ;;  %v4239_v33 = vpop.f32.mrb[95].mxu1 }
 0x1a9   : > { %v4990_v34 = vadd.f32 %v8377_v29, %v3213_v21  ;;  %v5246_v35 = vadd.f32 %v8377_v29, %v4237_v22  ;;  %v3216_v36 = vadd.f32 %v8364_v53, %v3215_v32  ;;  %v4240_v37 = vadd.f32 %v8364_v53, %v4239_v33 }
 0x1aa   : > { %5505 = vst.msk [vmem:[%s7883_s13 + $0x2f0] sm:$0xff] %vm5410_vm2, %v4992_v27  ;;  %5761 = vst.msk [vmem:[%s7883_s13 + $0xaf0] sm:$0xff] %vm5410_vm2, %v5248_v28  ;;  %v4993_v38 = vadd.f32 %v8377_v29, %v3224_v30  ;;  %v5249_v39 = vadd.f32 %v8377_v29, %v4248_v31  ;;  %6981 = vmatmul.mubr.msk.bf16.gmra.mrb[200].mxu0 %vm2037_vm0, %v7519_v19  ;;  %7237 = vmatmul.mubr.msk.bf16.gmra.mrb[200].mxu1 %vm2037_vm0, %v7520_v20  ;;  %v7530_v19 = vld [vmem:[%s7640_s29 + $0x750] sm:$0xff]   ;;  %v8907_v20 = vld [vmem:[%s10267_s3] ss:$0 sm:$0xff] }
 0x1ab   : > { %5503 = vst.msk [vmem:[%s7883_s13 + $0x2e0] sm:$0xff] %vm5410_vm2, %v4990_v34  ;;  %5759 = vst.msk [vmem:[%s7883_s13 + $0xae0] sm:$0xff] %vm5410_vm2, %v5246_v35  ;;  %v4991_v40 = vadd.f32 %v8377_v29, %v3216_v36  ;;  %v5247_v41 = vadd.f32 %v8377_v29, %v4240_v37  ;;  %6984 = vmatprep.mubr.msk.bf16.mxu0 %vm2037_vm0, %v7521_v25  ;;  %7240 = vmatprep.mubr.msk.bf16.mxu1 %vm2037_vm0, %v7522_v26 }
 0x1ac   : > { %5506 = vst.msk [vmem:[%s7883_s13 + $0x2f8] sm:$0xff] %vm5410_vm2, %v4993_v38  ;;  %5762 = vst.msk [vmem:[%s7883_s13 + $0xaf8] sm:$0xff] %vm5410_vm2, %v5249_v39 }
 0x1ad   : > { %5504 = vst.msk [vmem:[%s7883_s13 + $0x2e8] sm:$0xff] %vm5410_vm2, %v4991_v40  ;;  %5760 = vst.msk [vmem:[%s7883_s13 + $0xae8] sm:$0xff] %vm5410_vm2, %v5247_v41  ;;  %v6878_v42 = vpop.f32.mrb[96].mxu0  ;;  %v7134_v43 = vpop.f32.mrb[96].mxu1 }
 0x1ae   : > { %v3237_v44 = vadd.f32 %v8364_v53, %v6878_v42  ;;  %v4261_v45 = vadd.f32 %v8364_v53, %v7134_v43  ;;  %v3228_v46 = vpop.f32.mrb[97].mxu0  ;;  %v4252_v47 = vpop.f32.mrb[97].mxu1  ;;  %v7531_v42 = vld [vmem:[%s7640_s29 + $0x358] sm:$0xff]  }
 0x1af   : > { %v3229_v50 = vadd.f32 %v8364_v53, %v3228_v46  ;;  %v4253_v51 = vadd.f32 %v8364_v53, %v4252_v47  ;;  %v6879_v54 = vpop.f32.mrb[98].mxu0  ;;  %v7135_v55 = vpop.f32.mrb[98].mxu1  ;;  %v7532_v43 = vld [vmem:[%s7640_s29 + $0x758] sm:$0xff]  }
 0x1b0   : > { %v4996_v58 = vadd.f32 %v8377_v29, %v3237_v44  ;;  %v5252_v59 = vadd.f32 %v8377_v29, %v4261_v45  ;;  %v3240_v60 = vadd.f32 %v8364_v53, %v6879_v54  ;;  %v4264_v61 = vadd.f32 %v8364_v53, %v7135_v55  ;;  %v3231_v62 = vpop.f32.mrb[99].mxu0  ;;  %v4255_v63 = vpop.f32.mrb[99].mxu1 }
 0x1b1   : > { %v4994_v0 = vadd.f32 %v8377_v29, %v3229_v50  ;;  %v5250_v1 = vadd.f32 %v8377_v29, %v4253_v51  ;;  %v3232_v2 = vadd.f32 %v8364_v53, %v3231_v62  ;;  %v4256_v3 = vadd.f32 %v8364_v53, %v4255_v63 }
 0x1b2   : > { %5509 = vst.msk [vmem:[%s7883_s13 + $0x310] sm:$0xff] %vm5410_vm2, %v4996_v58  ;;  %5765 = vst.msk [vmem:[%s7883_s13 + $0xb10] sm:$0xff] %vm5410_vm2, %v5252_v59  ;;  %v4997_v4 = vadd.f32 %v8377_v29, %v3240_v60  ;;  %v5253_v5 = vadd.f32 %v8377_v29, %v4264_v61  ;;  %6985 = vmatmul.mubr.msk.bf16.gmra.mrb[204].mxu0 %vm2037_vm0, %v7523_v48  ;;  %7241 = vmatmul.mubr.msk.bf16.gmra.mrb[204].mxu1 %vm2037_vm0, %v7524_v49  ;;  %v7533_v48 = vld [vmem:[%s7640_s29 + $0x360] sm:$0xff]  }
 0x1b3   : > { %5507 = vst.msk [vmem:[%s7883_s13 + $0x300] sm:$0xff] %vm5410_vm2, %v4994_v0  ;;  %5763 = vst.msk [vmem:[%s7883_s13 + $0xb00] sm:$0xff] %vm5410_vm2, %v5250_v1  ;;  %v4995_v53 = vadd.f32 %v8377_v29, %v3232_v2  ;;  %v5251_v6 = vadd.f32 %v8377_v29, %v4256_v3  ;;  %6988 = vmatprep.mubr.msk.bf16.mxu0 %vm2037_vm0, %v7525_v56  ;;  %7244 = vmatprep.mubr.msk.bf16.mxu1 %vm2037_vm0, %v7526_v57  ;;  %v8894_v29 = vld [vmem:[%s10266_s2] ss:$0 sm:$0xff] }
 0x1b4   : > { %5510 = vst.msk [vmem:[%s7883_s13 + $0x318] sm:$0xff] %vm5410_vm2, %v4997_v4  ;;  %5766 = vst.msk [vmem:[%s7883_s13 + $0xb18] sm:$0xff] %vm5410_vm2, %v5253_v5  ;;  %v7534_v49 = vld [vmem:[%s7640_s29 + $0x760] sm:$0xff]  }
 0x1b5   : > { %5508 = vst.msk [vmem:[%s7883_s13 + $0x308] sm:$0xff] %vm5410_vm2, %v4995_v53  ;;  %5764 = vst.msk [vmem:[%s7883_s13 + $0xb08] sm:$0xff] %vm5410_vm2, %v5251_v6  ;;  %v6882_v7 = vpop.f32.mrb[100].mxu0  ;;  %v7138_v8 = vpop.f32.mrb[100].mxu1 }
 0x1b6   : > { %v3253_v9 = vadd.f32 %v8894_v29, %v6882_v7  ;;  %v4277_v10 = vadd.f32 %v8894_v29, %v7138_v8  ;;  %v3244_v11 = vpop.f32.mrb[101].mxu0  ;;  %v4268_v12 = vpop.f32.mrb[101].mxu1  ;;  %v7535_v7 = vld [vmem:[%s7640_s29 + $0x368] sm:$0xff]  }
 0x1b7   : > { %v3245_v14 = vadd.f32 %v8894_v29, %v3244_v11  ;;  %v4269_v15 = vadd.f32 %v8894_v29, %v4268_v12  ;;  %v6883_v16 = vpop.f32.mrb[102].mxu0  ;;  %v7139_v17 = vpop.f32.mrb[102].mxu1  ;;  %v7536_v8 = vld [vmem:[%s7640_s29 + $0x768] sm:$0xff]  }
 0x1b8   : > { %v5000_v21 = vadd.f32 %v8907_v20, %v3253_v9  ;;  %v5256_v22 = vadd.f32 %v8907_v20, %v4277_v10  ;;  %v3256_v23 = vadd.f32 %v8894_v29, %v6883_v16  ;;  %v4280_v24 = vadd.f32 %v8894_v29, %v7139_v17  ;;  %v3247_v25 = vpop.f32.mrb[103].mxu0  ;;  %v4271_v26 = vpop.f32.mrb[103].mxu1 }
 0x1b9   : > { %v4998_v27 = vadd.f32 %v8907_v20, %v3245_v14  ;;  %v5254_v28 = vadd.f32 %v8907_v20, %v4269_v15  ;;  %v3248_v30 = vadd.f32 %v8894_v29, %v3247_v25  ;;  %v4272_v31 = vadd.f32 %v8894_v29, %v4271_v26 }
 0x1ba   : > { %5513 = vst.msk [vmem:[%s7883_s13 + $0x330] sm:$0xff] %vm5410_vm2, %v5000_v21  ;;  %5769 = vst.msk [vmem:[%s7883_s13 + $0xb30] sm:$0xff] %vm5410_vm2, %v5256_v22  ;;  %v5001_v32 = vadd.f32 %v8907_v20, %v3256_v23  ;;  %v5257_v33 = vadd.f32 %v8907_v20, %v4280_v24  ;;  %6989 = vmatmul.mubr.msk.bf16.gmra.mrb[208].mxu0 %vm2037_vm0, %v7527_v13  ;;  %7245 = vmatmul.mubr.msk.bf16.gmra.mrb[208].mxu1 %vm2037_vm0, %v7528_v52  ;;  %v7537_v13 = vld [vmem:[%s7640_s29 + $0x370] sm:$0xff]  }
 0x1bb   : > { %5511 = vst.msk [vmem:[%s7883_s13 + $0x320] sm:$0xff] %vm5410_vm2, %v4998_v27  ;;  %5767 = vst.msk [vmem:[%s7883_s13 + $0xb20] sm:$0xff] %vm5410_vm2, %v5254_v28  ;;  %v4999_v34 = vadd.f32 %v8907_v20, %v3248_v30  ;;  %v5255_v35 = vadd.f32 %v8907_v20, %v4272_v31  ;;  %6992 = vmatprep.mubr.msk.bf16.mxu0 %vm2037_vm0, %v7529_v18  ;;  %7248 = vmatprep.mubr.msk.bf16.mxu1 %vm2037_vm0, %v7530_v19  ;;  %v7538_v52 = vld [vmem:[%s7640_s29 + $0x770] sm:$0xff]  }
 0x1bc   : > { %5514 = vst.msk [vmem:[%s7883_s13 + $0x338] sm:$0xff] %vm5410_vm2, %v5001_v32  ;;  %5770 = vst.msk [vmem:[%s7883_s13 + $0xb38] sm:$0xff] %vm5410_vm2, %v5257_v33 }
 0x1bd   : > { %5512 = vst.msk [vmem:[%s7883_s13 + $0x328] sm:$0xff] %vm5410_vm2, %v4999_v34  ;;  %5768 = vst.msk [vmem:[%s7883_s13 + $0xb28] sm:$0xff] %vm5410_vm2, %v5255_v35  ;;  %v6886_v36 = vpop.f32.mrb[104].mxu0  ;;  %v7142_v37 = vpop.f32.mrb[104].mxu1 }
 0x1be   : > { %v3269_v38 = vadd.f32 %v8894_v29, %v6886_v36  ;;  %v4293_v39 = vadd.f32 %v8894_v29, %v7142_v37  ;;  %v3260_v40 = vpop.f32.mrb[105].mxu0  ;;  %v4284_v41 = vpop.f32.mrb[105].mxu1  ;;  %v7539_v36 = vld [vmem:[%s7640_s29 + $0x378] sm:$0xff]  }
 0x1bf   : > { %v3261_v44 = vadd.f32 %v8894_v29, %v3260_v40  ;;  %v4285_v45 = vadd.f32 %v8894_v29, %v4284_v41  ;;  %v6887_v46 = vpop.f32.mrb[106].mxu0  ;;  %v7143_v47 = vpop.f32.mrb[106].mxu1  ;;  %v7540_v37 = vld [vmem:[%s7640_s29 + $0x778] sm:$0xff]  }
 0x1c0   : > { %v5004_v50 = vadd.f32 %v8907_v20, %v3269_v38  ;;  %v5260_v51 = vadd.f32 %v8907_v20, %v4293_v39  ;;  %v3272_v54 = vadd.f32 %v8894_v29, %v6887_v46  ;;  %v4296_v55 = vadd.f32 %v8894_v29, %v7143_v47  ;;  %v3263_v56 = vpop.f32.mrb[107].mxu0  ;;  %v4287_v57 = vpop.f32.mrb[107].mxu1 }
 0x1c1   : > { %v5002_v58 = vadd.f32 %v8907_v20, %v3261_v44  ;;  %v5258_v59 = vadd.f32 %v8907_v20, %v4285_v45  ;;  %v3264_v60 = vadd.f32 %v8894_v29, %v3263_v56  ;;  %v4288_v61 = vadd.f32 %v8894_v29, %v4287_v57 }
 0x1c2   : > { %5517 = vst.msk [vmem:[%s7883_s13 + $0x350] sm:$0xff] %vm5410_vm2, %v5004_v50  ;;  %5773 = vst.msk [vmem:[%s7883_s13 + $0xb50] sm:$0xff] %vm5410_vm2, %v5260_v51  ;;  %v5005_v62 = vadd.f32 %v8907_v20, %v3272_v54  ;;  %v5261_v63 = vadd.f32 %v8907_v20, %v4296_v55  ;;  %6993 = vmatmul.mubr.msk.bf16.gmra.mrb[212].mxu0 %vm2037_vm0, %v7531_v42  ;;  %7249 = vmatmul.mubr.msk.bf16.gmra.mrb[212].mxu1 %vm2037_vm0, %v7532_v43  ;;  %v7541_v42 = vld [vmem:[%s7640_s29 + $0x380] sm:$0xff]  }
 0x1c3   : > { %5515 = vst.msk [vmem:[%s7883_s13 + $0x340] sm:$0xff] %vm5410_vm2, %v5002_v58  ;;  %5771 = vst.msk [vmem:[%s7883_s13 + $0xb40] sm:$0xff] %vm5410_vm2, %v5258_v59  ;;  %v5003_v0 = vadd.f32 %v8907_v20, %v3264_v60  ;;  %v5259_v1 = vadd.f32 %v8907_v20, %v4288_v61  ;;  %6996 = vmatprep.mubr.msk.bf16.mxu0 %vm2037_vm0, %v7533_v48  ;;  %7252 = vmatprep.mubr.msk.bf16.mxu1 %vm2037_vm0, %v7534_v49  ;;  %v7542_v43 = vld [vmem:[%s7640_s29 + $0x780] sm:$0xff]  }
 0x1c4   : > { %5518 = vst.msk [vmem:[%s7883_s13 + $0x358] sm:$0xff] %vm5410_vm2, %v5005_v62  ;;  %5774 = vst.msk [vmem:[%s7883_s13 + $0xb58] sm:$0xff] %vm5410_vm2, %v5261_v63 }
 0x1c5   : > { %5516 = vst.msk [vmem:[%s7883_s13 + $0x348] sm:$0xff] %vm5410_vm2, %v5003_v0  ;;  %5772 = vst.msk [vmem:[%s7883_s13 + $0xb48] sm:$0xff] %vm5410_vm2, %v5259_v1  ;;  %v6890_v2 = vpop.f32.mrb[108].mxu0  ;;  %v7146_v3 = vpop.f32.mrb[108].mxu1 }
 0x1c6   : > { %v3285_v4 = vadd.f32 %v8894_v29, %v6890_v2  ;;  %v4309_v5 = vadd.f32 %v8894_v29, %v7146_v3  ;;  %v3276_v53 = vpop.f32.mrb[109].mxu0  ;;  %v4300_v6 = vpop.f32.mrb[109].mxu1  ;;  %v7543_v2 = vld [vmem:[%s7640_s29 + $0x388] sm:$0xff]  }
 0x1c7   : > { %v3277_v9 = vadd.f32 %v8894_v29, %v3276_v53  ;;  %v4301_v10 = vadd.f32 %v8894_v29, %v4300_v6  ;;  %v6891_v11 = vpop.f32.mrb[110].mxu0  ;;  %v7147_v12 = vpop.f32.mrb[110].mxu1  ;;  %v7544_v3 = vld [vmem:[%s7640_s29 + $0x788] sm:$0xff]  }
 0x1c8   : > { %v5008_v14 = vadd.f32 %v8907_v20, %v3285_v4  ;;  %v5264_v15 = vadd.f32 %v8907_v20, %v4309_v5  ;;  %v3288_v16 = vadd.f32 %v8894_v29, %v6891_v11  ;;  %v4312_v17 = vadd.f32 %v8894_v29, %v7147_v12  ;;  %v3279_v18 = vpop.f32.mrb[111].mxu0  ;;  %v4303_v19 = vpop.f32.mrb[111].mxu1 }
 0x1c9   : > { %v5006_v21 = vadd.f32 %v8907_v20, %v3277_v9  ;;  %v5262_v22 = vadd.f32 %v8907_v20, %v4301_v10  ;;  %v3280_v23 = vadd.f32 %v8894_v29, %v3279_v18  ;;  %v4304_v24 = vadd.f32 %v8894_v29, %v4303_v19 }
 0x1ca   : > { %5521 = vst.msk [vmem:[%s7883_s13 + $0x370] sm:$0xff] %vm5410_vm2, %v5008_v14  ;;  %5777 = vst.msk [vmem:[%s7883_s13 + $0xb70] sm:$0xff] %vm5410_vm2, %v5264_v15  ;;  %v5009_v25 = vadd.f32 %v8907_v20, %v3288_v16  ;;  %v5265_v26 = vadd.f32 %v8907_v20, %v4312_v17  ;;  %6997 = vmatmul.mubr.msk.bf16.gmra.mrb[216].mxu0 %vm2037_vm0, %v7535_v7  ;;  %7253 = vmatmul.mubr.msk.bf16.gmra.mrb[216].mxu1 %vm2037_vm0, %v7536_v8  ;;  %v7545_v7 = vld [vmem:[%s7640_s29 + $0x390] sm:$0xff]  }
 0x1cb   : > { %5519 = vst.msk [vmem:[%s7883_s13 + $0x360] sm:$0xff] %vm5410_vm2, %v5006_v21  ;;  %5775 = vst.msk [vmem:[%s7883_s13 + $0xb60] sm:$0xff] %vm5410_vm2, %v5262_v22  ;;  %v5007_v27 = vadd.f32 %v8907_v20, %v3280_v23  ;;  %v5263_v28 = vadd.f32 %v8907_v20, %v4304_v24  ;;  %7000 = vmatprep.mubr.msk.bf16.mxu0 %vm2037_vm0, %v7537_v13  ;;  %7256 = vmatprep.mubr.msk.bf16.mxu1 %vm2037_vm0, %v7538_v52  ;;  %v7546_v8 = vld [vmem:[%s7640_s29 + $0x790] sm:$0xff]  }
 0x1cc   : > { %5522 = vst.msk [vmem:[%s7883_s13 + $0x378] sm:$0xff] %vm5410_vm2, %v5009_v25  ;;  %5778 = vst.msk [vmem:[%s7883_s13 + $0xb78] sm:$0xff] %vm5410_vm2, %v5265_v26 }
 0x1cd   : > { %5520 = vst.msk [vmem:[%s7883_s13 + $0x368] sm:$0xff] %vm5410_vm2, %v5007_v27  ;;  %5776 = vst.msk [vmem:[%s7883_s13 + $0xb68] sm:$0xff] %vm5410_vm2, %v5263_v28  ;;  %v6894_v30 = vpop.f32.mrb[112].mxu0  ;;  %v7150_v31 = vpop.f32.mrb[112].mxu1 }
 0x1ce   : > { %v3301_v32 = vadd.f32 %v8894_v29, %v6894_v30  ;;  %v4325_v33 = vadd.f32 %v8894_v29, %v7150_v31  ;;  %v3292_v34 = vpop.f32.mrb[113].mxu0  ;;  %v4316_v35 = vpop.f32.mrb[113].mxu1  ;;  %v7547_v30 = vld [vmem:[%s7640_s29 + $0x398] sm:$0xff]  }
 0x1cf   : > { %v3293_v38 = vadd.f32 %v8894_v29, %v3292_v34  ;;  %v4317_v39 = vadd.f32 %v8894_v29, %v4316_v35  ;;  %v6895_v40 = vpop.f32.mrb[114].mxu0  ;;  %v7151_v41 = vpop.f32.mrb[114].mxu1  ;;  %v7548_v31 = vld [vmem:[%s7640_s29 + $0x798] sm:$0xff]  }
 0x1d0   : > { %v5012_v44 = vadd.f32 %v8907_v20, %v3301_v32  ;;  %v5268_v45 = vadd.f32 %v8907_v20, %v4325_v33  ;;  %v3304_v46 = vadd.f32 %v8894_v29, %v6895_v40  ;;  %v4328_v47 = vadd.f32 %v8894_v29, %v7151_v41  ;;  %v3295_v48 = vpop.f32.mrb[115].mxu0  ;;  %v4319_v49 = vpop.f32.mrb[115].mxu1 }
 0x1d1   : > { %v5010_v50 = vadd.f32 %v8907_v20, %v3293_v38  ;;  %v5266_v51 = vadd.f32 %v8907_v20, %v4317_v39  ;;  %v3296_v54 = vadd.f32 %v8894_v29, %v3295_v48  ;;  %v4320_v55 = vadd.f32 %v8894_v29, %v4319_v49 }
 0x1d2   : > { %5525 = vst.msk [vmem:[%s7883_s13 + $0x390] sm:$0xff] %vm5410_vm2, %v5012_v44  ;;  %5781 = vst.msk [vmem:[%s7883_s13 + $0xb90] sm:$0xff] %vm5410_vm2, %v5268_v45  ;;  %v5013_v56 = vadd.f32 %v8907_v20, %v3304_v46  ;;  %v5269_v57 = vadd.f32 %v8907_v20, %v4328_v47  ;;  %7001 = vmatmul.mubr.msk.bf16.gmra.mrb[220].mxu0 %vm2037_vm0, %v7539_v36  ;;  %7257 = vmatmul.mubr.msk.bf16.gmra.mrb[220].mxu1 %vm2037_vm0, %v7540_v37  ;;  %v7549_v36 = vld [vmem:[%s7640_s29 + $0x3a0] sm:$0xff]  }
 0x1d3   : > { %5523 = vst.msk [vmem:[%s7883_s13 + $0x380] sm:$0xff] %vm5410_vm2, %v5010_v50  ;;  %5779 = vst.msk [vmem:[%s7883_s13 + $0xb80] sm:$0xff] %vm5410_vm2, %v5266_v51  ;;  %v5011_v58 = vadd.f32 %v8907_v20, %v3296_v54  ;;  %v5267_v59 = vadd.f32 %v8907_v20, %v4320_v55  ;;  %7004 = vmatprep.mubr.msk.bf16.mxu0 %vm2037_vm0, %v7541_v42  ;;  %7260 = vmatprep.mubr.msk.bf16.mxu1 %vm2037_vm0, %v7542_v43  ;;  %v7550_v37 = vld [vmem:[%s7640_s29 + $0x7a0] sm:$0xff]  }
 0x1d4   : > { %5526 = vst.msk [vmem:[%s7883_s13 + $0x398] sm:$0xff] %vm5410_vm2, %v5013_v56  ;;  %5782 = vst.msk [vmem:[%s7883_s13 + $0xb98] sm:$0xff] %vm5410_vm2, %v5269_v57 }
 0x1d5   : > { %5524 = vst.msk [vmem:[%s7883_s13 + $0x388] sm:$0xff] %vm5410_vm2, %v5011_v58  ;;  %5780 = vst.msk [vmem:[%s7883_s13 + $0xb88] sm:$0xff] %vm5410_vm2, %v5267_v59  ;;  %v6898_v60 = vpop.f32.mrb[116].mxu0  ;;  %v7154_v61 = vpop.f32.mrb[116].mxu1 }
 0x1d6   : > { %v3317_v62 = vadd.f32 %v8894_v29, %v6898_v60  ;;  %v4341_v63 = vadd.f32 %v8894_v29, %v7154_v61  ;;  %v3308_v0 = vpop.f32.mrb[117].mxu0  ;;  %v4332_v1 = vpop.f32.mrb[117].mxu1  ;;  %v7551_v60 = vld [vmem:[%s7640_s29 + $0x3a8] sm:$0xff]  }
 0x1d7   : > { %v3309_v4 = vadd.f32 %v8894_v29, %v3308_v0  ;;  %v4333_v5 = vadd.f32 %v8894_v29, %v4332_v1  ;;  %v6899_v53 = vpop.f32.mrb[118].mxu0  ;;  %v7155_v6 = vpop.f32.mrb[118].mxu1  ;;  %v7552_v61 = vld [vmem:[%s7640_s29 + $0x7a8] sm:$0xff]  }
 0x1d8   : > { %v5016_v9 = vadd.f32 %v8907_v20, %v3317_v62  ;;  %v5272_v10 = vadd.f32 %v8907_v20, %v4341_v63  ;;  %v3320_v11 = vadd.f32 %v8894_v29, %v6899_v53  ;;  %v4344_v12 = vadd.f32 %v8894_v29, %v7155_v6  ;;  %v3311_v13 = vpop.f32.mrb[119].mxu0  ;;  %v4335_v52 = vpop.f32.mrb[119].mxu1 }
 0x1d9   : > { %v5014_v14 = vadd.f32 %v8907_v20, %v3309_v4  ;;  %v5270_v15 = vadd.f32 %v8907_v20, %v4333_v5  ;;  %v3312_v16 = vadd.f32 %v8894_v29, %v3311_v13  ;;  %v4336_v17 = vadd.f32 %v8894_v29, %v4335_v52 }
 0x1da   : > { %5529 = vst.msk [vmem:[%s7883_s13 + $0x3b0] sm:$0xff] %vm5410_vm2, %v5016_v9  ;;  %5785 = vst.msk [vmem:[%s7883_s13 + $0xbb0] sm:$0xff] %vm5410_vm2, %v5272_v10  ;;  %v5017_v18 = vadd.f32 %v8907_v20, %v3320_v11  ;;  %v5273_v19 = vadd.f32 %v8907_v20, %v4344_v12  ;;  %7005 = vmatmul.mubr.msk.bf16.gmra.mrb[224].mxu0 %vm2037_vm0, %v7543_v2  ;;  %7261 = vmatmul.mubr.msk.bf16.gmra.mrb[224].mxu1 %vm2037_vm0, %v7544_v3  ;;  %v7553_v2 = vld [vmem:[%s7640_s29 + $0x3b0] sm:$0xff]  }
 0x1db   : > { %5527 = vst.msk [vmem:[%s7883_s13 + $0x3a0] sm:$0xff] %vm5410_vm2, %v5014_v14  ;;  %5783 = vst.msk [vmem:[%s7883_s13 + $0xba0] sm:$0xff] %vm5410_vm2, %v5270_v15  ;;  %v5015_v21 = vadd.f32 %v8907_v20, %v3312_v16  ;;  %v5271_v22 = vadd.f32 %v8907_v20, %v4336_v17  ;;  %7008 = vmatprep.mubr.msk.bf16.mxu0 %vm2037_vm0, %v7545_v7  ;;  %7264 = vmatprep.mubr.msk.bf16.mxu1 %vm2037_vm0, %v7546_v8  ;;  %v7554_v3 = vld [vmem:[%s7640_s29 + $0x7b0] sm:$0xff]  }
 0x1dc   : > { %5530 = vst.msk [vmem:[%s7883_s13 + $0x3b8] sm:$0xff] %vm5410_vm2, %v5017_v18  ;;  %5786 = vst.msk [vmem:[%s7883_s13 + $0xbb8] sm:$0xff] %vm5410_vm2, %v5273_v19 }
 0x1dd   : > { %5528 = vst.msk [vmem:[%s7883_s13 + $0x3a8] sm:$0xff] %vm5410_vm2, %v5015_v21  ;;  %5784 = vst.msk [vmem:[%s7883_s13 + $0xba8] sm:$0xff] %vm5410_vm2, %v5271_v22  ;;  %v6902_v23 = vpop.f32.mrb[120].mxu0  ;;  %v7158_v24 = vpop.f32.mrb[120].mxu1 }
 0x1de   : > { %v3333_v25 = vadd.f32 %v8894_v29, %v6902_v23  ;;  %v4357_v26 = vadd.f32 %v8894_v29, %v7158_v24  ;;  %v3324_v27 = vpop.f32.mrb[121].mxu0  ;;  %v4348_v28 = vpop.f32.mrb[121].mxu1  ;;  %v7555_v23 = vld [vmem:[%s7640_s29 + $0x3b8] sm:$0xff]  }
 0x1df   : > { %v3325_v32 = vadd.f32 %v8894_v29, %v3324_v27  ;;  %v4349_v33 = vadd.f32 %v8894_v29, %v4348_v28  ;;  %v6903_v34 = vpop.f32.mrb[122].mxu0  ;;  %v7159_v35 = vpop.f32.mrb[122].mxu1  ;;  %v7556_v24 = vld [vmem:[%s7640_s29 + $0x7b8] sm:$0xff]  }
 0x1e0   : > { %v5020_v38 = vadd.f32 %v8907_v20, %v3333_v25  ;;  %v5276_v39 = vadd.f32 %v8907_v20, %v4357_v26  ;;  %v3336_v40 = vadd.f32 %v8894_v29, %v6903_v34  ;;  %v4360_v41 = vadd.f32 %v8894_v29, %v7159_v35  ;;  %v3327_v42 = vpop.f32.mrb[123].mxu0  ;;  %v4351_v43 = vpop.f32.mrb[123].mxu1 }
 0x1e1   : > { %v5018_v44 = vadd.f32 %v8907_v20, %v3325_v32  ;;  %v5274_v45 = vadd.f32 %v8907_v20, %v4349_v33  ;;  %v3328_v46 = vadd.f32 %v8894_v29, %v3327_v42  ;;  %v4352_v47 = vadd.f32 %v8894_v29, %v4351_v43 }
 0x1e2   : > { %5533 = vst.msk [vmem:[%s7883_s13 + $0x3d0] sm:$0xff] %vm5410_vm2, %v5020_v38  ;;  %5789 = vst.msk [vmem:[%s7883_s13 + $0xbd0] sm:$0xff] %vm5410_vm2, %v5276_v39  ;;  %v5021_v48 = vadd.f32 %v8907_v20, %v3336_v40  ;;  %v5277_v49 = vadd.f32 %v8907_v20, %v4360_v41  ;;  %7009 = vmatmul.mubr.msk.bf16.gmra.mrb[228].mxu0 %vm2037_vm0, %v7547_v30  ;;  %7265 = vmatmul.mubr.msk.bf16.gmra.mrb[228].mxu1 %vm2037_vm0, %v7548_v31  ;;  %v7557_v30 = vld [vmem:[%s7640_s29 + $0x3c0] sm:$0xff]  }
 0x1e3   : > { %5531 = vst.msk [vmem:[%s7883_s13 + $0x3c0] sm:$0xff] %vm5410_vm2, %v5018_v44  ;;  %5787 = vst.msk [vmem:[%s7883_s13 + $0xbc0] sm:$0xff] %vm5410_vm2, %v5274_v45  ;;  %v5019_v50 = vadd.f32 %v8907_v20, %v3328_v46  ;;  %v5275_v51 = vadd.f32 %v8907_v20, %v4352_v47  ;;  %7012 = vmatprep.mubr.msk.bf16.mxu0 %vm2037_vm0, %v7549_v36  ;;  %7268 = vmatprep.mubr.msk.bf16.mxu1 %vm2037_vm0, %v7550_v37  ;;  %v7558_v31 = vld [vmem:[%s7640_s29 + $0x7c0] sm:$0xff]  }
 0x1e4   : > { %5534 = vst.msk [vmem:[%s7883_s13 + $0x3d8] sm:$0xff] %vm5410_vm2, %v5021_v48  ;;  %5790 = vst.msk [vmem:[%s7883_s13 + $0xbd8] sm:$0xff] %vm5410_vm2, %v5277_v49 }
 0x1e5   : > { %5532 = vst.msk [vmem:[%s7883_s13 + $0x3c8] sm:$0xff] %vm5410_vm2, %v5019_v50  ;;  %5788 = vst.msk [vmem:[%s7883_s13 + $0xbc8] sm:$0xff] %vm5410_vm2, %v5275_v51  ;;  %v6906_v54 = vpop.f32.mrb[124].mxu0  ;;  %v7162_v55 = vpop.f32.mrb[124].mxu1 }
 0x1e6   : > { %v3349_v56 = vadd.f32 %v8894_v29, %v6906_v54  ;;  %v4373_v57 = vadd.f32 %v8894_v29, %v7162_v55  ;;  %v3340_v58 = vpop.f32.mrb[125].mxu0  ;;  %v4364_v59 = vpop.f32.mrb[125].mxu1  ;;  %v7559_v54 = vld [vmem:[%s7640_s29 + $0x3c8] sm:$0xff]  }
 0x1e7   : > { %v3341_v62 = vadd.f32 %v8894_v29, %v3340_v58  ;;  %v4365_v63 = vadd.f32 %v8894_v29, %v4364_v59  ;;  %v6907_v0 = vpop.f32.mrb[126].mxu0  ;;  %v7163_v1 = vpop.f32.mrb[126].mxu1  ;;  %v7560_v55 = vld [vmem:[%s7640_s29 + $0x7c8] sm:$0xff]  }
 0x1e8   : > { %v5024_v4 = vadd.f32 %v8907_v20, %v3349_v56  ;;  %v5280_v5 = vadd.f32 %v8907_v20, %v4373_v57  ;;  %v3352_v53 = vadd.f32 %v8894_v29, %v6907_v0  ;;  %v4376_v6 = vadd.f32 %v8894_v29, %v7163_v1  ;;  %v3343_v7 = vpop.f32.mrb[127].mxu0  ;;  %v4367_v8 = vpop.f32.mrb[127].mxu1 }
 0x1e9   : > { %v5022_v9 = vadd.f32 %v8907_v20, %v3341_v62  ;;  %v5278_v10 = vadd.f32 %v8907_v20, %v4365_v63  ;;  %v3344_v11 = vadd.f32 %v8894_v29, %v3343_v7  ;;  %v4368_v12 = vadd.f32 %v8894_v29, %v4367_v8 }
 0x1ea   : > { %5537 = vst.msk [vmem:[%s7883_s13 + $0x3f0] sm:$0xff] %vm5410_vm2, %v5024_v4  ;;  %5793 = vst.msk [vmem:[%s7883_s13 + $0xbf0] sm:$0xff] %vm5410_vm2, %v5280_v5  ;;  %v5025_v13 = vadd.f32 %v8907_v20, %v3352_v53  ;;  %v5281_v52 = vadd.f32 %v8907_v20, %v4376_v6  ;;  %7013 = vmatmul.mubr.msk.bf16.gmra.mrb[232].mxu0 %vm2037_vm0, %v7551_v60  ;;  %7269 = vmatmul.mubr.msk.bf16.gmra.mrb[232].mxu1 %vm2037_vm0, %v7552_v61  ;;  %v7561_v60 = vld [vmem:[%s7640_s29 + $0x3d0] sm:$0xff]  }
 0x1eb   : > { %5535 = vst.msk [vmem:[%s7883_s13 + $0x3e0] sm:$0xff] %vm5410_vm2, %v5022_v9  ;;  %5791 = vst.msk [vmem:[%s7883_s13 + $0xbe0] sm:$0xff] %vm5410_vm2, %v5278_v10  ;;  %v5023_v14 = vadd.f32 %v8907_v20, %v3344_v11  ;;  %v5279_v15 = vadd.f32 %v8907_v20, %v4368_v12  ;;  %7016 = vmatprep.mubr.msk.bf16.mxu0 %vm2037_vm0, %v7553_v2  ;;  %7272 = vmatprep.mubr.msk.bf16.mxu1 %vm2037_vm0, %v7554_v3  ;;  %v7562_v61 = vld [vmem:[%s7640_s29 + $0x7d0] sm:$0xff]  }
 0x1ec   : > { %5538 = vst.msk [vmem:[%s7883_s13 + $0x3f8] sm:$0xff] %vm5410_vm2, %v5025_v13  ;;  %5794 = vst.msk [vmem:[%s7883_s13 + $0xbf8] sm:$0xff] %vm5410_vm2, %v5281_v52 }
 0x1ed   : > { %5536 = vst.msk [vmem:[%s7883_s13 + $0x3e8] sm:$0xff] %vm5410_vm2, %v5023_v14  ;;  %5792 = vst.msk [vmem:[%s7883_s13 + $0xbe8] sm:$0xff] %vm5410_vm2, %v5279_v15  ;;  %v6910_v16 = vpop.f32.mrb[128].mxu0  ;;  %v7166_v17 = vpop.f32.mrb[128].mxu1 }
 0x1ee   : > { %v3365_v18 = vadd.f32 %v8894_v29, %v6910_v16  ;;  %v4389_v19 = vadd.f32 %v8894_v29, %v7166_v17  ;;  %v3356_v21 = vpop.f32.mrb[129].mxu0  ;;  %v4380_v22 = vpop.f32.mrb[129].mxu1  ;;  %v7563_v16 = vld [vmem:[%s7640_s29 + $0x3d8] sm:$0xff]  }
 0x1ef   : > { %v3357_v25 = vadd.f32 %v8894_v29, %v3356_v21  ;;  %v4381_v26 = vadd.f32 %v8894_v29, %v4380_v22  ;;  %v6911_v27 = vpop.f32.mrb[130].mxu0  ;;  %v7167_v28 = vpop.f32.mrb[130].mxu1  ;;  %v7564_v17 = vld [vmem:[%s7640_s29 + $0x7d8] sm:$0xff]  }
 0x1f0   : > { %v5028_v32 = vadd.f32 %v8907_v20, %v3365_v18  ;;  %v5284_v33 = vadd.f32 %v8907_v20, %v4389_v19  ;;  %v3368_v34 = vadd.f32 %v8894_v29, %v6911_v27  ;;  %v4392_v35 = vadd.f32 %v8894_v29, %v7167_v28  ;;  %v3359_v36 = vpop.f32.mrb[131].mxu0  ;;  %v4383_v37 = vpop.f32.mrb[131].mxu1 }
 0x1f1   : > { %v5026_v38 = vadd.f32 %v8907_v20, %v3357_v25  ;;  %v5282_v39 = vadd.f32 %v8907_v20, %v4381_v26  ;;  %v3360_v40 = vadd.f32 %v8894_v29, %v3359_v36  ;;  %v4384_v41 = vadd.f32 %v8894_v29, %v4383_v37 }
 0x1f2   : > { %5541 = vst.msk [vmem:[%s7883_s13 + $0x410] sm:$0xff] %vm5410_vm2, %v5028_v32  ;;  %5797 = vst.msk [vmem:[%s7883_s13 + $0xc10] sm:$0xff] %vm5410_vm2, %v5284_v33  ;;  %v5029_v42 = vadd.f32 %v8907_v20, %v3368_v34  ;;  %v5285_v43 = vadd.f32 %v8907_v20, %v4392_v35  ;;  %7017 = vmatmul.mubr.msk.bf16.gmra.mrb[236].mxu0 %vm2037_vm0, %v7555_v23  ;;  %7273 = vmatmul.mubr.msk.bf16.gmra.mrb[236].mxu1 %vm2037_vm0, %v7556_v24  ;;  %v7565_v23 = vld [vmem:[%s7640_s29 + $0x3e0] sm:$0xff]  }
 0x1f3   : > { %5539 = vst.msk [vmem:[%s7883_s13 + $0x400] sm:$0xff] %vm5410_vm2, %v5026_v38  ;;  %5795 = vst.msk [vmem:[%s7883_s13 + $0xc00] sm:$0xff] %vm5410_vm2, %v5282_v39  ;;  %v5027_v44 = vadd.f32 %v8907_v20, %v3360_v40  ;;  %v5283_v45 = vadd.f32 %v8907_v20, %v4384_v41  ;;  %7020 = vmatprep.mubr.msk.bf16.mxu0 %vm2037_vm0, %v7557_v30  ;;  %7276 = vmatprep.mubr.msk.bf16.mxu1 %vm2037_vm0, %v7558_v31  ;;  %v7566_v24 = vld [vmem:[%s7640_s29 + $0x7e0] sm:$0xff]  }
 0x1f4   : > { %5542 = vst.msk [vmem:[%s7883_s13 + $0x418] sm:$0xff] %vm5410_vm2, %v5029_v42  ;;  %5798 = vst.msk [vmem:[%s7883_s13 + $0xc18] sm:$0xff] %vm5410_vm2, %v5285_v43 }
 0x1f5   : > { %5540 = vst.msk [vmem:[%s7883_s13 + $0x408] sm:$0xff] %vm5410_vm2, %v5027_v44  ;;  %5796 = vst.msk [vmem:[%s7883_s13 + $0xc08] sm:$0xff] %vm5410_vm2, %v5283_v45  ;;  %v6914_v46 = vpop.f32.mrb[132].mxu0  ;;  %v7170_v47 = vpop.f32.mrb[132].mxu1 }
 0x1f6   : > { %v3381_v48 = vadd.f32 %v8894_v29, %v6914_v46  ;;  %v4405_v49 = vadd.f32 %v8894_v29, %v7170_v47  ;;  %v3372_v50 = vpop.f32.mrb[133].mxu0  ;;  %v4396_v51 = vpop.f32.mrb[133].mxu1  ;;  %v7567_v46 = vld [vmem:[%s7640_s29 + $0x3e8] sm:$0xff]  }
 0x1f7   : > { %v3373_v56 = vadd.f32 %v8894_v29, %v3372_v50  ;;  %v4397_v57 = vadd.f32 %v8894_v29, %v4396_v51  ;;  %v6915_v58 = vpop.f32.mrb[134].mxu0  ;;  %v7171_v59 = vpop.f32.mrb[134].mxu1  ;;  %v7568_v47 = vld [vmem:[%s7640_s29 + $0x7e8] sm:$0xff]  }
 0x1f8   : > { %v5032_v62 = vadd.f32 %v8907_v20, %v3381_v48  ;;  %v5288_v63 = vadd.f32 %v8907_v20, %v4405_v49  ;;  %v3384_v0 = vadd.f32 %v8894_v29, %v6915_v58  ;;  %v4408_v1 = vadd.f32 %v8894_v29, %v7171_v59  ;;  %v3375_v2 = vpop.f32.mrb[135].mxu0  ;;  %v4399_v3 = vpop.f32.mrb[135].mxu1 }
 0x1f9   : > { %v5030_v4 = vadd.f32 %v8907_v20, %v3373_v56  ;;  %v5286_v5 = vadd.f32 %v8907_v20, %v4397_v57  ;;  %v3376_v53 = vadd.f32 %v8894_v29, %v3375_v2  ;;  %v4400_v6 = vadd.f32 %v8894_v29, %v4399_v3 }
 0x1fa   : > { %5545 = vst.msk [vmem:[%s7883_s13 + $0x430] sm:$0xff] %vm5410_vm2, %v5032_v62  ;;  %5801 = vst.msk [vmem:[%s7883_s13 + $0xc30] sm:$0xff] %vm5410_vm2, %v5288_v63  ;;  %v5033_v7 = vadd.f32 %v8907_v20, %v3384_v0  ;;  %v5289_v8 = vadd.f32 %v8907_v20, %v4408_v1  ;;  %7021 = vmatmul.mubr.msk.bf16.gmra.mrb[240].mxu0 %vm2037_vm0, %v7559_v54  ;;  %7277 = vmatmul.mubr.msk.bf16.gmra.mrb[240].mxu1 %vm2037_vm0, %v7560_v55  ;;  %v7569_v54 = vld [vmem:[%s7640_s29 + $0x3f0] sm:$0xff]  }
 0x1fb   : > { %5543 = vst.msk [vmem:[%s7883_s13 + $0x420] sm:$0xff] %vm5410_vm2, %v5030_v4  ;;  %5799 = vst.msk [vmem:[%s7883_s13 + $0xc20] sm:$0xff] %vm5410_vm2, %v5286_v5  ;;  %v5031_v9 = vadd.f32 %v8907_v20, %v3376_v53  ;;  %v5287_v10 = vadd.f32 %v8907_v20, %v4400_v6  ;;  %7024 = vmatprep.mubr.msk.bf16.mxu0 %vm2037_vm0, %v7561_v60  ;;  %7280 = vmatprep.mubr.msk.bf16.mxu1 %vm2037_vm0, %v7562_v61  ;;  %v7570_v55 = vld [vmem:[%s7640_s29 + $0x7f0] sm:$0xff]  }
 0x1fc   : > { %5546 = vst.msk [vmem:[%s7883_s13 + $0x438] sm:$0xff] %vm5410_vm2, %v5033_v7  ;;  %5802 = vst.msk [vmem:[%s7883_s13 + $0xc38] sm:$0xff] %vm5410_vm2, %v5289_v8 }
 0x1fd   : > { %5544 = vst.msk [vmem:[%s7883_s13 + $0x428] sm:$0xff] %vm5410_vm2, %v5031_v9  ;;  %5800 = vst.msk [vmem:[%s7883_s13 + $0xc28] sm:$0xff] %vm5410_vm2, %v5287_v10  ;;  %v6918_v11 = vpop.f32.mrb[136].mxu0  ;;  %v7174_v12 = vpop.f32.mrb[136].mxu1 }
 0x1fe   : > { %v3397_v13 = vadd.f32 %v8894_v29, %v6918_v11  ;;  %v4421_v52 = vadd.f32 %v8894_v29, %v7174_v12  ;;  %v3388_v14 = vpop.f32.mrb[137].mxu0  ;;  %v4412_v15 = vpop.f32.mrb[137].mxu1  ;;  %v7571_v11 = vld [vmem:[%s7640_s29 + $0x3f8] sm:$0xff]  }
 0x1ff   : > { %v3389_v18 = vadd.f32 %v8894_v29, %v3388_v14  ;;  %v4413_v19 = vadd.f32 %v8894_v29, %v4412_v15  ;;  %v6919_v21 = vpop.f32.mrb[138].mxu0  ;;  %v7175_v22 = vpop.f32.mrb[138].mxu1  ;;  %v7572_v12 = vld [vmem:[%s7640_s29 + $0x7f8] sm:$0xff]  }
 0x200   : > { %v5036_v25 = vadd.f32 %v8907_v20, %v3397_v13  ;;  %v5292_v26 = vadd.f32 %v8907_v20, %v4421_v52  ;;  %v3400_v27 = vadd.f32 %v8894_v29, %v6919_v21  ;;  %v4424_v28 = vadd.f32 %v8894_v29, %v7175_v22  ;;  %v3391_v30 = vpop.f32.mrb[139].mxu0  ;;  %v4415_v31 = vpop.f32.mrb[139].mxu1 }
 0x201   : > { %v5034_v32 = vadd.f32 %v8907_v20, %v3389_v18  ;;  %v5290_v33 = vadd.f32 %v8907_v20, %v4413_v19  ;;  %v3392_v34 = vadd.f32 %v8894_v29, %v3391_v30  ;;  %v4416_v35 = vadd.f32 %v8894_v29, %v4415_v31 }
 0x202   : > { %5549 = vst.msk [vmem:[%s7883_s13 + $0x450] sm:$0xff] %vm5410_vm2, %v5036_v25  ;;  %5805 = vst.msk [vmem:[%s7883_s13 + $0xc50] sm:$0xff] %vm5410_vm2, %v5292_v26  ;;  %v5037_v36 = vadd.f32 %v8907_v20, %v3400_v27  ;;  %v5293_v37 = vadd.f32 %v8907_v20, %v4424_v28  ;;  %7025 = vmatmul.mubr.msk.bf16.gmra.mrb[244].mxu0 %vm2037_vm0, %v7563_v16  ;;  %7281 = vmatmul.mubr.msk.bf16.gmra.mrb[244].mxu1 %vm2037_vm0, %v7564_v17 }
 0x203   : > { %5547 = vst.msk [vmem:[%s7883_s13 + $0x440] sm:$0xff] %vm5410_vm2, %v5034_v32  ;;  %5803 = vst.msk [vmem:[%s7883_s13 + $0xc40] sm:$0xff] %vm5410_vm2, %v5290_v33  ;;  %v5035_v38 = vadd.f32 %v8907_v20, %v3392_v34  ;;  %v5291_v39 = vadd.f32 %v8907_v20, %v4416_v35  ;;  %7028 = vmatprep.mubr.msk.bf16.mxu0 %vm2037_vm0, %v7565_v23  ;;  %7284 = vmatprep.mubr.msk.bf16.mxu1 %vm2037_vm0, %v7566_v24 }
 0x204   : > { %5550 = vst.msk [vmem:[%s7883_s13 + $0x458] sm:$0xff] %vm5410_vm2, %v5037_v36  ;;  %5806 = vst.msk [vmem:[%s7883_s13 + $0xc58] sm:$0xff] %vm5410_vm2, %v5293_v37 }
 0x205   : > { %5548 = vst.msk [vmem:[%s7883_s13 + $0x448] sm:$0xff] %vm5410_vm2, %v5035_v38  ;;  %5804 = vst.msk [vmem:[%s7883_s13 + $0xc48] sm:$0xff] %vm5410_vm2, %v5291_v39  ;;  %v6922_v40 = vpop.f32.mrb[140].mxu0  ;;  %v7178_v41 = vpop.f32.mrb[140].mxu1 }
 0x206   : > { %v3413_v42 = vadd.f32 %v8894_v29, %v6922_v40  ;;  %v4437_v43 = vadd.f32 %v8894_v29, %v7178_v41  ;;  %v3404_v44 = vpop.f32.mrb[141].mxu0  ;;  %v4428_v45 = vpop.f32.mrb[141].mxu1 }
 0x207   : > { %v3405_v48 = vadd.f32 %v8894_v29, %v3404_v44  ;;  %v4429_v49 = vadd.f32 %v8894_v29, %v4428_v45  ;;  %v6923_v50 = vpop.f32.mrb[142].mxu0  ;;  %v7179_v51 = vpop.f32.mrb[142].mxu1 }
 0x208   : > { %v5040_v56 = vadd.f32 %v8907_v20, %v3413_v42  ;;  %v5296_v57 = vadd.f32 %v8907_v20, %v4437_v43  ;;  %v3416_v58 = vadd.f32 %v8894_v29, %v6923_v50  ;;  %v4440_v59 = vadd.f32 %v8894_v29, %v7179_v51  ;;  %v3407_v60 = vpop.f32.mrb[143].mxu0  ;;  %v4431_v61 = vpop.f32.mrb[143].mxu1 }
 0x209   : > { %v5038_v62 = vadd.f32 %v8907_v20, %v3405_v48  ;;  %v5294_v63 = vadd.f32 %v8907_v20, %v4429_v49  ;;  %v3408_v0 = vadd.f32 %v8894_v29, %v3407_v60  ;;  %v4432_v1 = vadd.f32 %v8894_v29, %v4431_v61 }
 0x20a   : > { %5553 = vst.msk [vmem:[%s7883_s13 + $0x470] sm:$0xff] %vm5410_vm2, %v5040_v56  ;;  %5809 = vst.msk [vmem:[%s7883_s13 + $0xc70] sm:$0xff] %vm5410_vm2, %v5296_v57  ;;  %v5041_v2 = vadd.f32 %v8907_v20, %v3416_v58  ;;  %v5297_v3 = vadd.f32 %v8907_v20, %v4440_v59  ;;  %7029 = vmatmul.mubr.msk.bf16.gmra.mrb[248].mxu0 %vm2037_vm0, %v7567_v46  ;;  %7285 = vmatmul.mubr.msk.bf16.gmra.mrb[248].mxu1 %vm2037_vm0, %v7568_v47 }
 0x20b   : > { %5551 = vst.msk [vmem:[%s7883_s13 + $0x460] sm:$0xff] %vm5410_vm2, %v5038_v62  ;;  %5807 = vst.msk [vmem:[%s7883_s13 + $0xc60] sm:$0xff] %vm5410_vm2, %v5294_v63  ;;  %v5039_v4 = vadd.f32 %v8907_v20, %v3408_v0  ;;  %v5295_v5 = vadd.f32 %v8907_v20, %v4432_v1  ;;  %7032 = vmatprep.mubr.msk.bf16.mxu0 %vm2037_vm0, %v7569_v54  ;;  %7288 = vmatprep.mubr.msk.bf16.mxu1 %vm2037_vm0, %v7570_v55  ;;  %v9414_v0 = vld [vmem:[%s10266_s2] ss:$0 sm:$0xff] }
 0x20c   : > { %5554 = vst.msk [vmem:[%s7883_s13 + $0x478] sm:$0xff] %vm5410_vm2, %v5041_v2  ;;  %5810 = vst.msk [vmem:[%s7883_s13 + $0xc78] sm:$0xff] %vm5410_vm2, %v5297_v3 }
 0x20d   : > { %5552 = vst.msk [vmem:[%s7883_s13 + $0x468] sm:$0xff] %vm5410_vm2, %v5039_v4  ;;  %5808 = vst.msk [vmem:[%s7883_s13 + $0xc68] sm:$0xff] %vm5410_vm2, %v5295_v5  ;;  %v6926_v53 = vpop.f32.mrb[144].mxu0  ;;  %v7182_v6 = vpop.f32.mrb[144].mxu1 }
 0x20e   : > { %v3429_v7 = vadd.f32 %v8894_v29, %v6926_v53  ;;  %v4453_v8 = vadd.f32 %v8894_v29, %v7182_v6  ;;  %v3420_v9 = vpop.f32.mrb[145].mxu0  ;;  %v4444_v10 = vpop.f32.mrb[145].mxu1 }
 0x20f   : > { %v3421_v13 = vadd.f32 %v8894_v29, %v3420_v9  ;;  %v4445_v52 = vadd.f32 %v8894_v29, %v4444_v10  ;;  %v6927_v14 = vpop.f32.mrb[146].mxu0  ;;  %v7183_v15 = vpop.f32.mrb[146].mxu1 }
 0x210   : > { %v5044_v16 = vadd.f32 %v8907_v20, %v3429_v7  ;;  %v5300_v17 = vadd.f32 %v8907_v20, %v4453_v8  ;;  %v3432_v18 = vadd.f32 %v8894_v29, %v6927_v14  ;;  %v4456_v19 = vadd.f32 %v8894_v29, %v7183_v15  ;;  %v3423_v21 = vpop.f32.mrb[147].mxu0  ;;  %v4447_v22 = vpop.f32.mrb[147].mxu1 }
 0x211   : > { %v5042_v23 = vadd.f32 %v8907_v20, %v3421_v13  ;;  %v5298_v24 = vadd.f32 %v8907_v20, %v4445_v52  ;;  %v3424_v25 = vadd.f32 %v8894_v29, %v3423_v21  ;;  %v4448_v26 = vadd.f32 %v8894_v29, %v4447_v22  ;;  %v9433_v13 = vld [vmem:[%s10267_s3] ss:$0 sm:$0xff] }
 0x212   : > { %5557 = vst.msk [vmem:[%s7883_s13 + $0x490] sm:$0xff] %vm5410_vm2, %v5044_v16  ;;  %5813 = vst.msk [vmem:[%s7883_s13 + $0xc90] sm:$0xff] %vm5410_vm2, %v5300_v17  ;;  %v5045_v27 = vadd.f32 %v8907_v20, %v3432_v18  ;;  %v5301_v28 = vadd.f32 %v8907_v20, %v4456_v19  ;;  %7033 = vmatmul.mubr.msk.bf16.gmra.mrb[252].mxu0 %vm2037_vm0, %v7571_v11  ;;  %7289 = vmatmul.mubr.msk.bf16.gmra.mrb[252].mxu1 %vm2037_vm0, %v7572_v12 }
 0x213   : > { %5555 = vst.msk [vmem:[%s7883_s13 + $0x480] sm:$0xff] %vm5410_vm2, %v5042_v23  ;;  %5811 = vst.msk [vmem:[%s7883_s13 + $0xc80] sm:$0xff] %vm5410_vm2, %v5298_v24  ;;  %v5043_v30 = vadd.f32 %v8907_v20, %v3424_v25  ;;  %v5299_v31 = vadd.f32 %v8907_v20, %v4448_v26 }
 0x214   : > { %5558 = vst.msk [vmem:[%s7883_s13 + $0x498] sm:$0xff] %vm5410_vm2, %v5045_v27  ;;  %5814 = vst.msk [vmem:[%s7883_s13 + $0xc98] sm:$0xff] %vm5410_vm2, %v5301_v28 }
 0x215   : > { %5556 = vst.msk [vmem:[%s7883_s13 + $0x488] sm:$0xff] %vm5410_vm2, %v5043_v30  ;;  %5812 = vst.msk [vmem:[%s7883_s13 + $0xc88] sm:$0xff] %vm5410_vm2, %v5299_v31  ;;  %v6930_v32 = vpop.f32.mrb[148].mxu0  ;;  %v7186_v33 = vpop.f32.mrb[148].mxu1 }
 0x216   : > { %v3445_v34 = vadd.f32 %v8894_v29, %v6930_v32  ;;  %v4469_v35 = vadd.f32 %v8894_v29, %v7186_v33  ;;  %v3436_v36 = vpop.f32.mrb[149].mxu0  ;;  %v4460_v37 = vpop.f32.mrb[149].mxu1 }
 0x217   : > { %v3437_v38 = vadd.f32 %v8894_v29, %v3436_v36  ;;  %v4461_v39 = vadd.f32 %v8894_v29, %v4460_v37  ;;  %v6931_v40 = vpop.f32.mrb[150].mxu0  ;;  %v7187_v41 = vpop.f32.mrb[150].mxu1 }
 0x218   : > { %v5048_v42 = vadd.f32 %v8907_v20, %v3445_v34  ;;  %v5304_v43 = vadd.f32 %v8907_v20, %v4469_v35  ;;  %v3448_v44 = vadd.f32 %v8894_v29, %v6931_v40  ;;  %v4472_v45 = vadd.f32 %v8894_v29, %v7187_v41  ;;  %v3439_v46 = vpop.f32.mrb[151].mxu0  ;;  %v4463_v47 = vpop.f32.mrb[151].mxu1 }
 0x219   : > { %v5046_v48 = vadd.f32 %v8907_v20, %v3437_v38  ;;  %v5302_v49 = vadd.f32 %v8907_v20, %v4461_v39  ;;  %v3440_v50 = vadd.f32 %v8894_v29, %v3439_v46  ;;  %v4464_v51 = vadd.f32 %v8894_v29, %v4463_v47 }
 0x21a   : > { %5561 = vst.msk [vmem:[%s7883_s13 + $0x4b0] sm:$0xff] %vm5410_vm2, %v5048_v42  ;;  %5817 = vst.msk [vmem:[%s7883_s13 + $0xcb0] sm:$0xff] %vm5410_vm2, %v5304_v43  ;;  %v5049_v54 = vadd.f32 %v8907_v20, %v3448_v44  ;;  %v5305_v55 = vadd.f32 %v8907_v20, %v4472_v45 }
 0x21b   : > { %5559 = vst.msk [vmem:[%s7883_s13 + $0x4a0] sm:$0xff] %vm5410_vm2, %v5046_v48  ;;  %5815 = vst.msk [vmem:[%s7883_s13 + $0xca0] sm:$0xff] %vm5410_vm2, %v5302_v49  ;;  %v5047_v56 = vadd.f32 %v8907_v20, %v3440_v50  ;;  %v5303_v57 = vadd.f32 %v8907_v20, %v4464_v51 }
 0x21c   : > { %5562 = vst.msk [vmem:[%s7883_s13 + $0x4b8] sm:$0xff] %vm5410_vm2, %v5049_v54  ;;  %5818 = vst.msk [vmem:[%s7883_s13 + $0xcb8] sm:$0xff] %vm5410_vm2, %v5305_v55 }
 0x21d   : > { %5560 = vst.msk [vmem:[%s7883_s13 + $0x4a8] sm:$0xff] %vm5410_vm2, %v5047_v56  ;;  %5816 = vst.msk [vmem:[%s7883_s13 + $0xca8] sm:$0xff] %vm5410_vm2, %v5303_v57  ;;  %v6934_v58 = vpop.f32.mrb[152].mxu0  ;;  %v7190_v59 = vpop.f32.mrb[152].mxu1 }
 0x21e   : > { %v3461_v60 = vadd.f32 %v8894_v29, %v6934_v58  ;;  %v4485_v61 = vadd.f32 %v8894_v29, %v7190_v59  ;;  %v3452_v62 = vpop.f32.mrb[153].mxu0  ;;  %v4476_v63 = vpop.f32.mrb[153].mxu1 }
 0x21f   : > { %v3453_v1 = vadd.f32 %v9414_v0, %v3452_v62  ;;  %v4477_v2 = vadd.f32 %v9414_v0, %v4476_v63  ;;  %v6935_v3 = vpop.f32.mrb[154].mxu0  ;;  %v7191_v4 = vpop.f32.mrb[154].mxu1 }
 0x220   : > { %v5052_v5 = vadd.f32 %v8907_v20, %v3461_v60  ;;  %v5308_v29 = vadd.f32 %v8907_v20, %v4485_v61  ;;  %v3464_v53 = vadd.f32 %v9414_v0, %v6935_v3  ;;  %v4488_v6 = vadd.f32 %v9414_v0, %v7191_v4  ;;  %v3455_v7 = vpop.f32.mrb[155].mxu0  ;;  %v4479_v8 = vpop.f32.mrb[155].mxu1 }
 0x221   : > { %v5050_v9 = vadd.f32 %v8907_v20, %v3453_v1  ;;  %v5306_v10 = vadd.f32 %v8907_v20, %v4477_v2  ;;  %v3456_v11 = vadd.f32 %v9414_v0, %v3455_v7  ;;  %v4480_v12 = vadd.f32 %v9414_v0, %v4479_v8 }
 0x222   : > { %5565 = vst.msk [vmem:[%s7883_s13 + $0x4d0] sm:$0xff] %vm5410_vm2, %v5052_v5  ;;  %5821 = vst.msk [vmem:[%s7883_s13 + $0xcd0] sm:$0xff] %vm5410_vm2, %v5308_v29  ;;  %v5053_v52 = vadd.f32 %v9433_v13, %v3464_v53  ;;  %v5309_v14 = vadd.f32 %v9433_v13, %v4488_v6 }
 0x223   : > { %5563 = vst.msk [vmem:[%s7883_s13 + $0x4c0] sm:$0xff] %vm5410_vm2, %v5050_v9  ;;  %5819 = vst.msk [vmem:[%s7883_s13 + $0xcc0] sm:$0xff] %vm5410_vm2, %v5306_v10  ;;  %v5051_v20 = vadd.f32 %v9433_v13, %v3456_v11  ;;  %v5307_v15 = vadd.f32 %v9433_v13, %v4480_v12 }
 0x224   : > { %5566 = vst.msk [vmem:[%s7883_s13 + $0x4d8] sm:$0xff] %vm5410_vm2, %v5053_v52  ;;  %5822 = vst.msk [vmem:[%s7883_s13 + $0xcd8] sm:$0xff] %vm5410_vm2, %v5309_v14 }
 0x225   : > { %5564 = vst.msk [vmem:[%s7883_s13 + $0x4c8] sm:$0xff] %vm5410_vm2, %v5051_v20  ;;  %5820 = vst.msk [vmem:[%s7883_s13 + $0xcc8] sm:$0xff] %vm5410_vm2, %v5307_v15  ;;  %v6938_v16 = vpop.f32.mrb[156].mxu0  ;;  %v7194_v17 = vpop.f32.mrb[156].mxu1 }
 0x226   : > { %v3477_v18 = vadd.f32 %v9414_v0, %v6938_v16  ;;  %v4501_v19 = vadd.f32 %v9414_v0, %v7194_v17  ;;  %v3468_v21 = vpop.f32.mrb[157].mxu0  ;;  %v4492_v22 = vpop.f32.mrb[157].mxu1 }
 0x227   : > { %v3469_v23 = vadd.f32 %v9414_v0, %v3468_v21  ;;  %v4493_v24 = vadd.f32 %v9414_v0, %v4492_v22  ;;  %v6939_v25 = vpop.f32.mrb[158].mxu0  ;;  %v7195_v26 = vpop.f32.mrb[158].mxu1 }
 0x228   : > { %v5056_v27 = vadd.f32 %v9433_v13, %v3477_v18  ;;  %v5312_v28 = vadd.f32 %v9433_v13, %v4501_v19  ;;  %v3480_v30 = vadd.f32 %v9414_v0, %v6939_v25  ;;  %v4504_v31 = vadd.f32 %v9414_v0, %v7195_v26  ;;  %v3471_v32 = vpop.f32.mrb[159].mxu0  ;;  %v4495_v33 = vpop.f32.mrb[159].mxu1 }
 0x229   : > { %v5054_v34 = vadd.f32 %v9433_v13, %v3469_v23  ;;  %v5310_v35 = vadd.f32 %v9433_v13, %v4493_v24  ;;  %v3472_v36 = vadd.f32 %v9414_v0, %v3471_v32  ;;  %v4496_v37 = vadd.f32 %v9414_v0, %v4495_v33 }
 0x22a   : > { %5569 = vst.msk [vmem:[%s7883_s13 + $0x4f0] sm:$0xff] %vm5410_vm2, %v5056_v27  ;;  %5825 = vst.msk [vmem:[%s7883_s13 + $0xcf0] sm:$0xff] %vm5410_vm2, %v5312_v28  ;;  %v5057_v38 = vadd.f32 %v9433_v13, %v3480_v30  ;;  %v5313_v39 = vadd.f32 %v9433_v13, %v4504_v31 }
 0x22b   : > { %5567 = vst.msk [vmem:[%s7883_s13 + $0x4e0] sm:$0xff] %vm5410_vm2, %v5054_v34  ;;  %5823 = vst.msk [vmem:[%s7883_s13 + $0xce0] sm:$0xff] %vm5410_vm2, %v5310_v35  ;;  %v5055_v40 = vadd.f32 %v9433_v13, %v3472_v36  ;;  %v5311_v41 = vadd.f32 %v9433_v13, %v4496_v37 }
 0x22c   : > { %5570 = vst.msk [vmem:[%s7883_s13 + $0x4f8] sm:$0xff] %vm5410_vm2, %v5057_v38  ;;  %5826 = vst.msk [vmem:[%s7883_s13 + $0xcf8] sm:$0xff] %vm5410_vm2, %v5313_v39 }
 0x22d   : > { %5568 = vst.msk [vmem:[%s7883_s13 + $0x4e8] sm:$0xff] %vm5410_vm2, %v5055_v40  ;;  %5824 = vst.msk [vmem:[%s7883_s13 + $0xce8] sm:$0xff] %vm5410_vm2, %v5311_v41  ;;  %v6942_v42 = vpop.f32.mrb[160].mxu0  ;;  %v7198_v43 = vpop.f32.mrb[160].mxu1 }
 0x22e   : > { %v3493_v44 = vadd.f32 %v9414_v0, %v6942_v42  ;;  %v4517_v45 = vadd.f32 %v9414_v0, %v7198_v43  ;;  %v3484_v46 = vpop.f32.mrb[161].mxu0  ;;  %v4508_v47 = vpop.f32.mrb[161].mxu1 }
 0x22f   : > { %v3485_v48 = vadd.f32 %v9414_v0, %v3484_v46  ;;  %v4509_v49 = vadd.f32 %v9414_v0, %v4508_v47  ;;  %v6943_v50 = vpop.f32.mrb[162].mxu0  ;;  %v7199_v51 = vpop.f32.mrb[162].mxu1 }
 0x230   : > { %v5060_v54 = vadd.f32 %v9433_v13, %v3493_v44  ;;  %v5316_v55 = vadd.f32 %v9433_v13, %v4517_v45  ;;  %v3496_v56 = vadd.f32 %v9414_v0, %v6943_v50  ;;  %v4520_v57 = vadd.f32 %v9414_v0, %v7199_v51  ;;  %v3487_v58 = vpop.f32.mrb[163].mxu0  ;;  %v4511_v59 = vpop.f32.mrb[163].mxu1 }
 0x231   : > { %v5058_v60 = vadd.f32 %v9433_v13, %v3485_v48  ;;  %v5314_v61 = vadd.f32 %v9433_v13, %v4509_v49  ;;  %v3488_v62 = vadd.f32 %v9414_v0, %v3487_v58  ;;  %v4512_v63 = vadd.f32 %v9414_v0, %v4511_v59 }
 0x232   : > { %5573 = vst.msk [vmem:[%s7883_s13 + $0x510] sm:$0xff] %vm5410_vm2, %v5060_v54  ;;  %5829 = vst.msk [vmem:[%s7883_s13 + $0xd10] sm:$0xff] %vm5410_vm2, %v5316_v55  ;;  %v5061_v1 = vadd.f32 %v9433_v13, %v3496_v56  ;;  %v5317_v2 = vadd.f32 %v9433_v13, %v4520_v57 }
 0x233   : > { %5571 = vst.msk [vmem:[%s7883_s13 + $0x500] sm:$0xff] %vm5410_vm2, %v5058_v60  ;;  %5827 = vst.msk [vmem:[%s7883_s13 + $0xd00] sm:$0xff] %vm5410_vm2, %v5314_v61  ;;  %v5059_v3 = vadd.f32 %v9433_v13, %v3488_v62  ;;  %v5315_v4 = vadd.f32 %v9433_v13, %v4512_v63 }
 0x234   : > { %5574 = vst.msk [vmem:[%s7883_s13 + $0x518] sm:$0xff] %vm5410_vm2, %v5061_v1  ;;  %5830 = vst.msk [vmem:[%s7883_s13 + $0xd18] sm:$0xff] %vm5410_vm2, %v5317_v2 }
 0x235   : > { %5572 = vst.msk [vmem:[%s7883_s13 + $0x508] sm:$0xff] %vm5410_vm2, %v5059_v3  ;;  %5828 = vst.msk [vmem:[%s7883_s13 + $0xd08] sm:$0xff] %vm5410_vm2, %v5315_v4  ;;  %v6946_v5 = vpop.f32.mrb[164].mxu0  ;;  %v7202_v29 = vpop.f32.mrb[164].mxu1 }
 0x236   : > { %v3509_v53 = vadd.f32 %v9414_v0, %v6946_v5  ;;  %v4533_v6 = vadd.f32 %v9414_v0, %v7202_v29  ;;  %v3500_v7 = vpop.f32.mrb[165].mxu0  ;;  %v4524_v8 = vpop.f32.mrb[165].mxu1 }
 0x237   : > { %v3501_v9 = vadd.f32 %v9414_v0, %v3500_v7  ;;  %v4525_v10 = vadd.f32 %v9414_v0, %v4524_v8  ;;  %v6947_v11 = vpop.f32.mrb[166].mxu0  ;;  %v7203_v12 = vpop.f32.mrb[166].mxu1 }
 0x238   : > { %v5064_v52 = vadd.f32 %v9433_v13, %v3509_v53  ;;  %v5320_v14 = vadd.f32 %v9433_v13, %v4533_v6  ;;  %v3512_v20 = vadd.f32 %v9414_v0, %v6947_v11  ;;  %v4536_v15 = vadd.f32 %v9414_v0, %v7203_v12  ;;  %v3503_v16 = vpop.f32.mrb[167].mxu0  ;;  %v4527_v17 = vpop.f32.mrb[167].mxu1 }
 0x239   : > { %v5062_v18 = vadd.f32 %v9433_v13, %v3501_v9  ;;  %v5318_v19 = vadd.f32 %v9433_v13, %v4525_v10  ;;  %v3504_v21 = vadd.f32 %v9414_v0, %v3503_v16  ;;  %v4528_v22 = vadd.f32 %v9414_v0, %v4527_v17 }
 0x23a   : > { %5577 = vst.msk [vmem:[%s7883_s13 + $0x530] sm:$0xff] %vm5410_vm2, %v5064_v52  ;;  %5833 = vst.msk [vmem:[%s7883_s13 + $0xd30] sm:$0xff] %vm5410_vm2, %v5320_v14  ;;  %v5065_v23 = vadd.f32 %v9433_v13, %v3512_v20  ;;  %v5321_v24 = vadd.f32 %v9433_v13, %v4536_v15 }
 0x23b   : > { %5575 = vst.msk [vmem:[%s7883_s13 + $0x520] sm:$0xff] %vm5410_vm2, %v5062_v18  ;;  %5831 = vst.msk [vmem:[%s7883_s13 + $0xd20] sm:$0xff] %vm5410_vm2, %v5318_v19  ;;  %v5063_v25 = vadd.f32 %v9433_v13, %v3504_v21  ;;  %v5319_v26 = vadd.f32 %v9433_v13, %v4528_v22 }
 0x23c   : > { %5578 = vst.msk [vmem:[%s7883_s13 + $0x538] sm:$0xff] %vm5410_vm2, %v5065_v23  ;;  %5834 = vst.msk [vmem:[%s7883_s13 + $0xd38] sm:$0xff] %vm5410_vm2, %v5321_v24 }
 0x23d   : > { %5576 = vst.msk [vmem:[%s7883_s13 + $0x528] sm:$0xff] %vm5410_vm2, %v5063_v25  ;;  %5832 = vst.msk [vmem:[%s7883_s13 + $0xd28] sm:$0xff] %vm5410_vm2, %v5319_v26  ;;  %v6950_v27 = vpop.f32.mrb[168].mxu0  ;;  %v7206_v28 = vpop.f32.mrb[168].mxu1 }
 0x23e   : > { %v3525_v30 = vadd.f32 %v9414_v0, %v6950_v27  ;;  %v4549_v31 = vadd.f32 %v9414_v0, %v7206_v28  ;;  %v3516_v32 = vpop.f32.mrb[169].mxu0  ;;  %v4540_v33 = vpop.f32.mrb[169].mxu1 }
 0x23f   : > { %v3517_v34 = vadd.f32 %v9414_v0, %v3516_v32  ;;  %v4541_v35 = vadd.f32 %v9414_v0, %v4540_v33  ;;  %v6951_v36 = vpop.f32.mrb[170].mxu0  ;;  %v7207_v37 = vpop.f32.mrb[170].mxu1 }
 0x240   : > { %v5068_v38 = vadd.f32 %v9433_v13, %v3525_v30  ;;  %v5324_v39 = vadd.f32 %v9433_v13, %v4549_v31  ;;  %v3528_v40 = vadd.f32 %v9414_v0, %v6951_v36  ;;  %v4552_v41 = vadd.f32 %v9414_v0, %v7207_v37  ;;  %v3519_v42 = vpop.f32.mrb[171].mxu0  ;;  %v4543_v43 = vpop.f32.mrb[171].mxu1 }
 0x241   : > { %v5066_v44 = vadd.f32 %v9433_v13, %v3517_v34  ;;  %v5322_v45 = vadd.f32 %v9433_v13, %v4541_v35  ;;  %v3520_v46 = vadd.f32 %v9414_v0, %v3519_v42  ;;  %v4544_v47 = vadd.f32 %v9414_v0, %v4543_v43 }
 0x242   : > { %5581 = vst.msk [vmem:[%s7883_s13 + $0x550] sm:$0xff] %vm5410_vm2, %v5068_v38  ;;  %5837 = vst.msk [vmem:[%s7883_s13 + $0xd50] sm:$0xff] %vm5410_vm2, %v5324_v39  ;;  %v5069_v48 = vadd.f32 %v9433_v13, %v3528_v40  ;;  %v5325_v49 = vadd.f32 %v9433_v13, %v4552_v41 }
 0x243   : > { %5579 = vst.msk [vmem:[%s7883_s13 + $0x540] sm:$0xff] %vm5410_vm2, %v5066_v44  ;;  %5835 = vst.msk [vmem:[%s7883_s13 + $0xd40] sm:$0xff] %vm5410_vm2, %v5322_v45  ;;  %v5067_v50 = vadd.f32 %v9433_v13, %v3520_v46  ;;  %v5323_v51 = vadd.f32 %v9433_v13, %v4544_v47 }
 0x244   : > { %5582 = vst.msk [vmem:[%s7883_s13 + $0x558] sm:$0xff] %vm5410_vm2, %v5069_v48  ;;  %5838 = vst.msk [vmem:[%s7883_s13 + $0xd58] sm:$0xff] %vm5410_vm2, %v5325_v49 }
 0x245   : > { %5580 = vst.msk [vmem:[%s7883_s13 + $0x548] sm:$0xff] %vm5410_vm2, %v5067_v50  ;;  %5836 = vst.msk [vmem:[%s7883_s13 + $0xd48] sm:$0xff] %vm5410_vm2, %v5323_v51  ;;  %v6954_v54 = vpop.f32.mrb[172].mxu0  ;;  %v7210_v55 = vpop.f32.mrb[172].mxu1 }
 0x246   : > { %v3541_v56 = vadd.f32 %v9414_v0, %v6954_v54  ;;  %v4565_v57 = vadd.f32 %v9414_v0, %v7210_v55  ;;  %v3532_v58 = vpop.f32.mrb[173].mxu0  ;;  %v4556_v59 = vpop.f32.mrb[173].mxu1 }
 0x247   : > { %v3533_v60 = vadd.f32 %v9414_v0, %v3532_v58  ;;  %v4557_v61 = vadd.f32 %v9414_v0, %v4556_v59  ;;  %v6955_v62 = vpop.f32.mrb[174].mxu0  ;;  %v7211_v63 = vpop.f32.mrb[174].mxu1 }
 0x248   : > { %v5072_v1 = vadd.f32 %v9433_v13, %v3541_v56  ;;  %v5328_v2 = vadd.f32 %v9433_v13, %v4565_v57  ;;  %v3544_v3 = vadd.f32 %v9414_v0, %v6955_v62  ;;  %v4568_v4 = vadd.f32 %v9414_v0, %v7211_v63  ;;  %v3535_v5 = vpop.f32.mrb[175].mxu0  ;;  %v4559_v29 = vpop.f32.mrb[175].mxu1 }
 0x249   : > { %v5070_v53 = vadd.f32 %v9433_v13, %v3533_v60  ;;  %v5326_v6 = vadd.f32 %v9433_v13, %v4557_v61  ;;  %v3536_v7 = vadd.f32 %v9414_v0, %v3535_v5  ;;  %v4560_v8 = vadd.f32 %v9414_v0, %v4559_v29 }
 0x24a   : > { %5585 = vst.msk [vmem:[%s7883_s13 + $0x570] sm:$0xff] %vm5410_vm2, %v5072_v1  ;;  %5841 = vst.msk [vmem:[%s7883_s13 + $0xd70] sm:$0xff] %vm5410_vm2, %v5328_v2  ;;  %v5073_v9 = vadd.f32 %v9433_v13, %v3544_v3  ;;  %v5329_v10 = vadd.f32 %v9433_v13, %v4568_v4 }
 0x24b   : > { %5583 = vst.msk [vmem:[%s7883_s13 + $0x560] sm:$0xff] %vm5410_vm2, %v5070_v53  ;;  %5839 = vst.msk [vmem:[%s7883_s13 + $0xd60] sm:$0xff] %vm5410_vm2, %v5326_v6  ;;  %v5071_v11 = vadd.f32 %v9433_v13, %v3536_v7  ;;  %v5327_v12 = vadd.f32 %v9433_v13, %v4560_v8 }
 0x24c   : > { %5586 = vst.msk [vmem:[%s7883_s13 + $0x578] sm:$0xff] %vm5410_vm2, %v5073_v9  ;;  %5842 = vst.msk [vmem:[%s7883_s13 + $0xd78] sm:$0xff] %vm5410_vm2, %v5329_v10 }
 0x24d   : > { %5584 = vst.msk [vmem:[%s7883_s13 + $0x568] sm:$0xff] %vm5410_vm2, %v5071_v11  ;;  %5840 = vst.msk [vmem:[%s7883_s13 + $0xd68] sm:$0xff] %vm5410_vm2, %v5327_v12  ;;  %v6958_v52 = vpop.f32.mrb[176].mxu0  ;;  %v7214_v14 = vpop.f32.mrb[176].mxu1 }
 0x24e   : > { %v3557_v20 = vadd.f32 %v9414_v0, %v6958_v52  ;;  %v4581_v15 = vadd.f32 %v9414_v0, %v7214_v14  ;;  %v3548_v16 = vpop.f32.mrb[177].mxu0  ;;  %v4572_v17 = vpop.f32.mrb[177].mxu1 }
 0x24f   : > { %v3549_v18 = vadd.f32 %v9414_v0, %v3548_v16  ;;  %v4573_v19 = vadd.f32 %v9414_v0, %v4572_v17  ;;  %v6959_v21 = vpop.f32.mrb[178].mxu0  ;;  %v7215_v22 = vpop.f32.mrb[178].mxu1 }
 0x250   : > { %v5076_v23 = vadd.f32 %v9433_v13, %v3557_v20  ;;  %v5332_v24 = vadd.f32 %v9433_v13, %v4581_v15  ;;  %v3560_v25 = vadd.f32 %v9414_v0, %v6959_v21  ;;  %v4584_v26 = vadd.f32 %v9414_v0, %v7215_v22  ;;  %v3551_v27 = vpop.f32.mrb[179].mxu0  ;;  %v4575_v28 = vpop.f32.mrb[179].mxu1 }
 0x251   : > { %v5074_v30 = vadd.f32 %v9433_v13, %v3549_v18  ;;  %v5330_v31 = vadd.f32 %v9433_v13, %v4573_v19  ;;  %v3552_v32 = vadd.f32 %v9414_v0, %v3551_v27  ;;  %v4576_v33 = vadd.f32 %v9414_v0, %v4575_v28 }
 0x252   : > { %5589 = vst.msk [vmem:[%s7883_s13 + $0x590] sm:$0xff] %vm5410_vm2, %v5076_v23  ;;  %5845 = vst.msk [vmem:[%s7883_s13 + $0xd90] sm:$0xff] %vm5410_vm2, %v5332_v24  ;;  %v5077_v34 = vadd.f32 %v9433_v13, %v3560_v25  ;;  %v5333_v35 = vadd.f32 %v9433_v13, %v4584_v26 }
 0x253   : > { %5587 = vst.msk [vmem:[%s7883_s13 + $0x580] sm:$0xff] %vm5410_vm2, %v5074_v30  ;;  %5843 = vst.msk [vmem:[%s7883_s13 + $0xd80] sm:$0xff] %vm5410_vm2, %v5330_v31  ;;  %v5075_v36 = vadd.f32 %v9433_v13, %v3552_v32  ;;  %v5331_v37 = vadd.f32 %v9433_v13, %v4576_v33 }
 0x254   : > { %5590 = vst.msk [vmem:[%s7883_s13 + $0x598] sm:$0xff] %vm5410_vm2, %v5077_v34  ;;  %5846 = vst.msk [vmem:[%s7883_s13 + $0xd98] sm:$0xff] %vm5410_vm2, %v5333_v35 }
 0x255   : > { %5588 = vst.msk [vmem:[%s7883_s13 + $0x588] sm:$0xff] %vm5410_vm2, %v5075_v36  ;;  %5844 = vst.msk [vmem:[%s7883_s13 + $0xd88] sm:$0xff] %vm5410_vm2, %v5331_v37  ;;  %v6962_v38 = vpop.f32.mrb[180].mxu0  ;;  %v7218_v39 = vpop.f32.mrb[180].mxu1 }
 0x256   : > { %v3573_v40 = vadd.f32 %v9414_v0, %v6962_v38  ;;  %v4597_v41 = vadd.f32 %v9414_v0, %v7218_v39  ;;  %v3564_v42 = vpop.f32.mrb[181].mxu0  ;;  %v4588_v43 = vpop.f32.mrb[181].mxu1 }
 0x257   : > { %v3565_v44 = vadd.f32 %v9414_v0, %v3564_v42  ;;  %v4589_v45 = vadd.f32 %v9414_v0, %v4588_v43  ;;  %v6963_v46 = vpop.f32.mrb[182].mxu0  ;;  %v7219_v47 = vpop.f32.mrb[182].mxu1 }
 0x258   : > { %v5080_v48 = vadd.f32 %v9433_v13, %v3573_v40  ;;  %v5336_v49 = vadd.f32 %v9433_v13, %v4597_v41  ;;  %v3576_v50 = vadd.f32 %v9414_v0, %v6963_v46  ;;  %v4600_v51 = vadd.f32 %v9414_v0, %v7219_v47  ;;  %v3567_v54 = vpop.f32.mrb[183].mxu0  ;;  %v4591_v55 = vpop.f32.mrb[183].mxu1 }
 0x259   : > { %v5078_v56 = vadd.f32 %v9433_v13, %v3565_v44  ;;  %v5334_v57 = vadd.f32 %v9433_v13, %v4589_v45  ;;  %v3568_v58 = vadd.f32 %v9414_v0, %v3567_v54  ;;  %v4592_v59 = vadd.f32 %v9414_v0, %v4591_v55 }
 0x25a   : > { %5593 = vst.msk [vmem:[%s7883_s13 + $0x5b0] sm:$0xff] %vm5410_vm2, %v5080_v48  ;;  %5849 = vst.msk [vmem:[%s7883_s13 + $0xdb0] sm:$0xff] %vm5410_vm2, %v5336_v49  ;;  %v5081_v60 = vadd.f32 %v9433_v13, %v3576_v50  ;;  %v5337_v61 = vadd.f32 %v9433_v13, %v4600_v51 }
 0x25b   : > { %5591 = vst.msk [vmem:[%s7883_s13 + $0x5a0] sm:$0xff] %vm5410_vm2, %v5078_v56  ;;  %5847 = vst.msk [vmem:[%s7883_s13 + $0xda0] sm:$0xff] %vm5410_vm2, %v5334_v57  ;;  %v5079_v62 = vadd.f32 %v9433_v13, %v3568_v58  ;;  %v5335_v63 = vadd.f32 %v9433_v13, %v4592_v59 }
 0x25c   : > { %5594 = vst.msk [vmem:[%s7883_s13 + $0x5b8] sm:$0xff] %vm5410_vm2, %v5081_v60  ;;  %5850 = vst.msk [vmem:[%s7883_s13 + $0xdb8] sm:$0xff] %vm5410_vm2, %v5337_v61 }
 0x25d   : > { %5592 = vst.msk [vmem:[%s7883_s13 + $0x5a8] sm:$0xff] %vm5410_vm2, %v5079_v62  ;;  %5848 = vst.msk [vmem:[%s7883_s13 + $0xda8] sm:$0xff] %vm5410_vm2, %v5335_v63  ;;  %v6966_v1 = vpop.f32.mrb[184].mxu0  ;;  %v7222_v2 = vpop.f32.mrb[184].mxu1 }
 0x25e   : > { %v3589_v3 = vadd.f32 %v9414_v0, %v6966_v1  ;;  %v4613_v4 = vadd.f32 %v9414_v0, %v7222_v2  ;;  %v3580_v5 = vpop.f32.mrb[185].mxu0  ;;  %v4604_v29 = vpop.f32.mrb[185].mxu1 }
 0x25f   : > { %v3581_v53 = vadd.f32 %v9414_v0, %v3580_v5  ;;  %v4605_v6 = vadd.f32 %v9414_v0, %v4604_v29  ;;  %v6967_v7 = vpop.f32.mrb[186].mxu0  ;;  %v7223_v8 = vpop.f32.mrb[186].mxu1 }
 0x260   : > { %v5084_v9 = vadd.f32 %v9433_v13, %v3589_v3  ;;  %v5340_v10 = vadd.f32 %v9433_v13, %v4613_v4  ;;  %v3592_v11 = vadd.f32 %v9414_v0, %v6967_v7  ;;  %v4616_v12 = vadd.f32 %v9414_v0, %v7223_v8  ;;  %v3583_v52 = vpop.f32.mrb[187].mxu0  ;;  %v4607_v14 = vpop.f32.mrb[187].mxu1 }
 0x261   : > { %v5082_v20 = vadd.f32 %v9433_v13, %v3581_v53  ;;  %v5338_v15 = vadd.f32 %v9433_v13, %v4605_v6  ;;  %v3584_v16 = vadd.f32 %v9414_v0, %v3583_v52  ;;  %v4608_v17 = vadd.f32 %v9414_v0, %v4607_v14 }
 0x262   : > { %5597 = vst.msk [vmem:[%s7883_s13 + $0x5d0] sm:$0xff] %vm5410_vm2, %v5084_v9  ;;  %5853 = vst.msk [vmem:[%s7883_s13 + $0xdd0] sm:$0xff] %vm5410_vm2, %v5340_v10  ;;  %v5085_v18 = vadd.f32 %v9433_v13, %v3592_v11  ;;  %v5341_v19 = vadd.f32 %v9433_v13, %v4616_v12 }
 0x263   : > { %5595 = vst.msk [vmem:[%s7883_s13 + $0x5c0] sm:$0xff] %vm5410_vm2, %v5082_v20  ;;  %5851 = vst.msk [vmem:[%s7883_s13 + $0xdc0] sm:$0xff] %vm5410_vm2, %v5338_v15  ;;  %v5083_v21 = vadd.f32 %v9433_v13, %v3584_v16  ;;  %v5339_v22 = vadd.f32 %v9433_v13, %v4608_v17 }
 0x264   : > { %5598 = vst.msk [vmem:[%s7883_s13 + $0x5d8] sm:$0xff] %vm5410_vm2, %v5085_v18  ;;  %5854 = vst.msk [vmem:[%s7883_s13 + $0xdd8] sm:$0xff] %vm5410_vm2, %v5341_v19 }
 0x265   : > { %5596 = vst.msk [vmem:[%s7883_s13 + $0x5c8] sm:$0xff] %vm5410_vm2, %v5083_v21  ;;  %5852 = vst.msk [vmem:[%s7883_s13 + $0xdc8] sm:$0xff] %vm5410_vm2, %v5339_v22  ;;  %v6970_v23 = vpop.f32.mrb[188].mxu0  ;;  %v7226_v24 = vpop.f32.mrb[188].mxu1 }
 0x266   : > { %v3605_v25 = vadd.f32 %v9414_v0, %v6970_v23  ;;  %v4629_v26 = vadd.f32 %v9414_v0, %v7226_v24  ;;  %v3596_v27 = vpop.f32.mrb[189].mxu0  ;;  %v4620_v28 = vpop.f32.mrb[189].mxu1 }
 0x267   : > { %v3597_v30 = vadd.f32 %v9414_v0, %v3596_v27  ;;  %v4621_v31 = vadd.f32 %v9414_v0, %v4620_v28  ;;  %v6971_v32 = vpop.f32.mrb[190].mxu0  ;;  %v7227_v33 = vpop.f32.mrb[190].mxu1 }
 0x268   : > { %v5088_v34 = vadd.f32 %v9433_v13, %v3605_v25  ;;  %v5344_v35 = vadd.f32 %v9433_v13, %v4629_v26  ;;  %v3608_v36 = vadd.f32 %v9414_v0, %v6971_v32  ;;  %v4632_v37 = vadd.f32 %v9414_v0, %v7227_v33  ;;  %v3599_v38 = vpop.f32.mrb[191].mxu0  ;;  %v4623_v39 = vpop.f32.mrb[191].mxu1 }
 0x269   : > { %v5086_v40 = vadd.f32 %v9433_v13, %v3597_v30  ;;  %v5342_v41 = vadd.f32 %v9433_v13, %v4621_v31  ;;  %v3600_v42 = vadd.f32 %v9414_v0, %v3599_v38  ;;  %v4624_v43 = vadd.f32 %v9414_v0, %v4623_v39 }
 0x26a   : > { %5601 = vst.msk [vmem:[%s7883_s13 + $0x5f0] sm:$0xff] %vm5410_vm2, %v5088_v34  ;;  %5857 = vst.msk [vmem:[%s7883_s13 + $0xdf0] sm:$0xff] %vm5410_vm2, %v5344_v35  ;;  %v5089_v44 = vadd.f32 %v9433_v13, %v3608_v36  ;;  %v5345_v45 = vadd.f32 %v9433_v13, %v4632_v37 }
 0x26b   : > { %5599 = vst.msk [vmem:[%s7883_s13 + $0x5e0] sm:$0xff] %vm5410_vm2, %v5086_v40  ;;  %5855 = vst.msk [vmem:[%s7883_s13 + $0xde0] sm:$0xff] %vm5410_vm2, %v5342_v41  ;;  %v5087_v46 = vadd.f32 %v9433_v13, %v3600_v42  ;;  %v5343_v47 = vadd.f32 %v9433_v13, %v4624_v43 }
 0x26c   : > { %5602 = vst.msk [vmem:[%s7883_s13 + $0x5f8] sm:$0xff] %vm5410_vm2, %v5089_v44  ;;  %5858 = vst.msk [vmem:[%s7883_s13 + $0xdf8] sm:$0xff] %vm5410_vm2, %v5345_v45 }
 0x26d   : > { %5600 = vst.msk [vmem:[%s7883_s13 + $0x5e8] sm:$0xff] %vm5410_vm2, %v5087_v46  ;;  %5856 = vst.msk [vmem:[%s7883_s13 + $0xde8] sm:$0xff] %vm5410_vm2, %v5343_v47  ;;  %v6974_v48 = vpop.f32.mrb[192].mxu0  ;;  %v7230_v49 = vpop.f32.mrb[192].mxu1 }
 0x26e   : > { %v3621_v50 = vadd.f32 %v9414_v0, %v6974_v48  ;;  %v4645_v51 = vadd.f32 %v9414_v0, %v7230_v49  ;;  %v3612_v54 = vpop.f32.mrb[193].mxu0  ;;  %v4636_v55 = vpop.f32.mrb[193].mxu1 }
 0x26f   : > { %v3613_v56 = vadd.f32 %v9414_v0, %v3612_v54  ;;  %v4637_v57 = vadd.f32 %v9414_v0, %v4636_v55  ;;  %v6975_v58 = vpop.f32.mrb[194].mxu0  ;;  %v7231_v59 = vpop.f32.mrb[194].mxu1 }
 0x270   : > { %v5092_v60 = vadd.f32 %v9433_v13, %v3621_v50  ;;  %v5348_v61 = vadd.f32 %v9433_v13, %v4645_v51  ;;  %v3624_v62 = vadd.f32 %v9414_v0, %v6975_v58  ;;  %v4648_v63 = vadd.f32 %v9414_v0, %v7231_v59  ;;  %v3615_v1 = vpop.f32.mrb[195].mxu0  ;;  %v4639_v2 = vpop.f32.mrb[195].mxu1 }
 0x271   : > { %v5090_v3 = vadd.f32 %v9433_v13, %v3613_v56  ;;  %v5346_v4 = vadd.f32 %v9433_v13, %v4637_v57  ;;  %v3616_v5 = vadd.f32 %v9414_v0, %v3615_v1  ;;  %v4640_v29 = vadd.f32 %v9414_v0, %v4639_v2 }
 0x272   : > { %5605 = vst.msk [vmem:[%s7883_s13 + $0x610] sm:$0xff] %vm5410_vm2, %v5092_v60  ;;  %5861 = vst.msk [vmem:[%s7883_s13 + $0xe10] sm:$0xff] %vm5410_vm2, %v5348_v61  ;;  %v5093_v53 = vadd.f32 %v9433_v13, %v3624_v62  ;;  %v5349_v6 = vadd.f32 %v9433_v13, %v4648_v63 }
 0x273   : > { %5603 = vst.msk [vmem:[%s7883_s13 + $0x600] sm:$0xff] %vm5410_vm2, %v5090_v3  ;;  %5859 = vst.msk [vmem:[%s7883_s13 + $0xe00] sm:$0xff] %vm5410_vm2, %v5346_v4  ;;  %v5091_v7 = vadd.f32 %v9433_v13, %v3616_v5  ;;  %v5347_v8 = vadd.f32 %v9433_v13, %v4640_v29 }
 0x274   : > { %5606 = vst.msk [vmem:[%s7883_s13 + $0x618] sm:$0xff] %vm5410_vm2, %v5093_v53  ;;  %5862 = vst.msk [vmem:[%s7883_s13 + $0xe18] sm:$0xff] %vm5410_vm2, %v5349_v6 }
 0x275   : > { %5604 = vst.msk [vmem:[%s7883_s13 + $0x608] sm:$0xff] %vm5410_vm2, %v5091_v7  ;;  %5860 = vst.msk [vmem:[%s7883_s13 + $0xe08] sm:$0xff] %vm5410_vm2, %v5347_v8  ;;  %v6978_v9 = vpop.f32.mrb[196].mxu0  ;;  %v7234_v10 = vpop.f32.mrb[196].mxu1 }
 0x276   : > { %v3637_v11 = vadd.f32 %v9414_v0, %v6978_v9  ;;  %v4661_v12 = vadd.f32 %v9414_v0, %v7234_v10  ;;  %v3628_v52 = vpop.f32.mrb[197].mxu0  ;;  %v4652_v14 = vpop.f32.mrb[197].mxu1 }
 0x277   : > { %v3629_v20 = vadd.f32 %v9414_v0, %v3628_v52  ;;  %v4653_v15 = vadd.f32 %v9414_v0, %v4652_v14  ;;  %v6979_v16 = vpop.f32.mrb[198].mxu0  ;;  %v7235_v17 = vpop.f32.mrb[198].mxu1 }
 0x278   : > { %v5096_v18 = vadd.f32 %v9433_v13, %v3637_v11  ;;  %v5352_v19 = vadd.f32 %v9433_v13, %v4661_v12  ;;  %v3640_v21 = vadd.f32 %v9414_v0, %v6979_v16  ;;  %v4664_v22 = vadd.f32 %v9414_v0, %v7235_v17  ;;  %v3631_v23 = vpop.f32.mrb[199].mxu0  ;;  %v4655_v24 = vpop.f32.mrb[199].mxu1 }
 0x279   : > { %v5094_v25 = vadd.f32 %v9433_v13, %v3629_v20  ;;  %v5350_v26 = vadd.f32 %v9433_v13, %v4653_v15  ;;  %v3632_v27 = vadd.f32 %v9414_v0, %v3631_v23  ;;  %v4656_v28 = vadd.f32 %v9414_v0, %v4655_v24 }
 0x27a   : > { %5609 = vst.msk [vmem:[%s7883_s13 + $0x630] sm:$0xff] %vm5410_vm2, %v5096_v18  ;;  %5865 = vst.msk [vmem:[%s7883_s13 + $0xe30] sm:$0xff] %vm5410_vm2, %v5352_v19  ;;  %v5097_v30 = vadd.f32 %v9433_v13, %v3640_v21  ;;  %v5353_v31 = vadd.f32 %v9433_v13, %v4664_v22 }
 0x27b   : > { %5607 = vst.msk [vmem:[%s7883_s13 + $0x620] sm:$0xff] %vm5410_vm2, %v5094_v25  ;;  %5863 = vst.msk [vmem:[%s7883_s13 + $0xe20] sm:$0xff] %vm5410_vm2, %v5350_v26  ;;  %v5095_v32 = vadd.f32 %v9433_v13, %v3632_v27  ;;  %v5351_v33 = vadd.f32 %v9433_v13, %v4656_v28 }
 0x27c   : > { %5610 = vst.msk [vmem:[%s7883_s13 + $0x638] sm:$0xff] %vm5410_vm2, %v5097_v30  ;;  %5866 = vst.msk [vmem:[%s7883_s13 + $0xe38] sm:$0xff] %vm5410_vm2, %v5353_v31 }
 0x27d   : > { %5608 = vst.msk [vmem:[%s7883_s13 + $0x628] sm:$0xff] %vm5410_vm2, %v5095_v32  ;;  %5864 = vst.msk [vmem:[%s7883_s13 + $0xe28] sm:$0xff] %vm5410_vm2, %v5351_v33  ;;  %v6982_v34 = vpop.f32.mrb[200].mxu0  ;;  %v7238_v35 = vpop.f32.mrb[200].mxu1 }
 0x27e   : > { %v3653_v36 = vadd.f32 %v9414_v0, %v6982_v34  ;;  %v4677_v37 = vadd.f32 %v9414_v0, %v7238_v35  ;;  %v3644_v38 = vpop.f32.mrb[201].mxu0  ;;  %v4668_v39 = vpop.f32.mrb[201].mxu1 }
 0x27f   : > { %v3645_v40 = vadd.f32 %v9414_v0, %v3644_v38  ;;  %v4669_v41 = vadd.f32 %v9414_v0, %v4668_v39  ;;  %v6983_v42 = vpop.f32.mrb[202].mxu0  ;;  %v7239_v43 = vpop.f32.mrb[202].mxu1 }
 0x280   : > { %v5100_v44 = vadd.f32 %v9433_v13, %v3653_v36  ;;  %v5356_v45 = vadd.f32 %v9433_v13, %v4677_v37  ;;  %v3656_v46 = vadd.f32 %v9414_v0, %v6983_v42  ;;  %v4680_v47 = vadd.f32 %v9414_v0, %v7239_v43  ;;  %v3647_v48 = vpop.f32.mrb[203].mxu0  ;;  %v4671_v49 = vpop.f32.mrb[203].mxu1 }
 0x281   : > { %v5098_v50 = vadd.f32 %v9433_v13, %v3645_v40  ;;  %v5354_v51 = vadd.f32 %v9433_v13, %v4669_v41  ;;  %v3648_v54 = vadd.f32 %v9414_v0, %v3647_v48  ;;  %v4672_v55 = vadd.f32 %v9414_v0, %v4671_v49 }
 0x282   : > { %5613 = vst.msk [vmem:[%s7883_s13 + $0x650] sm:$0xff] %vm5410_vm2, %v5100_v44  ;;  %5869 = vst.msk [vmem:[%s7883_s13 + $0xe50] sm:$0xff] %vm5410_vm2, %v5356_v45  ;;  %v5101_v56 = vadd.f32 %v9433_v13, %v3656_v46  ;;  %v5357_v57 = vadd.f32 %v9433_v13, %v4680_v47 }
 0x283   : > { %5611 = vst.msk [vmem:[%s7883_s13 + $0x640] sm:$0xff] %vm5410_vm2, %v5098_v50  ;;  %5867 = vst.msk [vmem:[%s7883_s13 + $0xe40] sm:$0xff] %vm5410_vm2, %v5354_v51  ;;  %v5099_v58 = vadd.f32 %v9433_v13, %v3648_v54  ;;  %v5355_v59 = vadd.f32 %v9433_v13, %v4672_v55 }
 0x284   : > { %5614 = vst.msk [vmem:[%s7883_s13 + $0x658] sm:$0xff] %vm5410_vm2, %v5101_v56  ;;  %5870 = vst.msk [vmem:[%s7883_s13 + $0xe58] sm:$0xff] %vm5410_vm2, %v5357_v57 }
 0x285   : > { %5612 = vst.msk [vmem:[%s7883_s13 + $0x648] sm:$0xff] %vm5410_vm2, %v5099_v58  ;;  %5868 = vst.msk [vmem:[%s7883_s13 + $0xe48] sm:$0xff] %vm5410_vm2, %v5355_v59  ;;  %v6986_v60 = vpop.f32.mrb[204].mxu0  ;;  %v7242_v61 = vpop.f32.mrb[204].mxu1 }
 0x286   : > { %v3669_v62 = vadd.f32 %v9414_v0, %v6986_v60  ;;  %v4693_v63 = vadd.f32 %v9414_v0, %v7242_v61  ;;  %v3660_v1 = vpop.f32.mrb[205].mxu0  ;;  %v4684_v2 = vpop.f32.mrb[205].mxu1 }
 0x287   : > { %v3661_v3 = vadd.f32 %v9414_v0, %v3660_v1  ;;  %v4685_v4 = vadd.f32 %v9414_v0, %v4684_v2  ;;  %v6987_v5 = vpop.f32.mrb[206].mxu0  ;;  %v7243_v29 = vpop.f32.mrb[206].mxu1 }
 0x288   : > { %v5104_v53 = vadd.f32 %v9433_v13, %v3669_v62  ;;  %v5360_v6 = vadd.f32 %v9433_v13, %v4693_v63  ;;  %v3672_v7 = vadd.f32 %v9414_v0, %v6987_v5  ;;  %v4696_v8 = vadd.f32 %v9414_v0, %v7243_v29  ;;  %v3663_v9 = vpop.f32.mrb[207].mxu0  ;;  %v4687_v10 = vpop.f32.mrb[207].mxu1 }
 0x289   : > { %v5102_v11 = vadd.f32 %v9433_v13, %v3661_v3  ;;  %v5358_v12 = vadd.f32 %v9433_v13, %v4685_v4  ;;  %v3664_v52 = vadd.f32 %v9414_v0, %v3663_v9  ;;  %v4688_v14 = vadd.f32 %v9414_v0, %v4687_v10 }
 0x28a   : > { %5617 = vst.msk [vmem:[%s7883_s13 + $0x670] sm:$0xff] %vm5410_vm2, %v5104_v53  ;;  %5873 = vst.msk [vmem:[%s7883_s13 + $0xe70] sm:$0xff] %vm5410_vm2, %v5360_v6  ;;  %v5105_v20 = vadd.f32 %v9433_v13, %v3672_v7  ;;  %v5361_v15 = vadd.f32 %v9433_v13, %v4696_v8 }
 0x28b   : > { %5615 = vst.msk [vmem:[%s7883_s13 + $0x660] sm:$0xff] %vm5410_vm2, %v5102_v11  ;;  %5871 = vst.msk [vmem:[%s7883_s13 + $0xe60] sm:$0xff] %vm5410_vm2, %v5358_v12  ;;  %v5103_v16 = vadd.f32 %v9433_v13, %v3664_v52  ;;  %v5359_v17 = vadd.f32 %v9433_v13, %v4688_v14  ;;  %v9936_v11 = vld [vmem:[%s10266_s2] ss:$0 sm:$0xff] }
 0x28c   : > { %5618 = vst.msk [vmem:[%s7883_s13 + $0x678] sm:$0xff] %vm5410_vm2, %v5105_v20  ;;  %5874 = vst.msk [vmem:[%s7883_s13 + $0xe78] sm:$0xff] %vm5410_vm2, %v5361_v15 }
 0x28d   : > { %5616 = vst.msk [vmem:[%s7883_s13 + $0x668] sm:$0xff] %vm5410_vm2, %v5103_v16  ;;  %5872 = vst.msk [vmem:[%s7883_s13 + $0xe68] sm:$0xff] %vm5410_vm2, %v5359_v17  ;;  %v6990_v18 = vpop.f32.mrb[208].mxu0  ;;  %v7246_v19 = vpop.f32.mrb[208].mxu1 }
 0x28e   : > { %v3685_v21 = vadd.f32 %v9414_v0, %v6990_v18  ;;  %v4709_v22 = vadd.f32 %v9414_v0, %v7246_v19  ;;  %v3676_v23 = vpop.f32.mrb[209].mxu0  ;;  %v4700_v24 = vpop.f32.mrb[209].mxu1 }
 0x28f   : > { %v3677_v25 = vadd.f32 %v9414_v0, %v3676_v23  ;;  %v4701_v26 = vadd.f32 %v9414_v0, %v4700_v24  ;;  %v6991_v27 = vpop.f32.mrb[210].mxu0  ;;  %v7247_v28 = vpop.f32.mrb[210].mxu1 }
 0x290   : > { %v5108_v30 = vadd.f32 %v9433_v13, %v3685_v21  ;;  %v5364_v31 = vadd.f32 %v9433_v13, %v4709_v22  ;;  %v3688_v32 = vadd.f32 %v9414_v0, %v6991_v27  ;;  %v4712_v33 = vadd.f32 %v9414_v0, %v7247_v28  ;;  %v3679_v34 = vpop.f32.mrb[211].mxu0  ;;  %v4703_v35 = vpop.f32.mrb[211].mxu1 }
 0x291   : > { %v5106_v36 = vadd.f32 %v9433_v13, %v3677_v25  ;;  %v5362_v37 = vadd.f32 %v9433_v13, %v4701_v26  ;;  %v3680_v38 = vadd.f32 %v9414_v0, %v3679_v34  ;;  %v4704_v39 = vadd.f32 %v9414_v0, %v4703_v35  ;;  %v9955_v25 = vld [vmem:[%s10267_s3] ss:$0 sm:$0xff] }
 0x292   : > { %5621 = vst.msk [vmem:[%s7883_s13 + $0x690] sm:$0xff] %vm5410_vm2, %v5108_v30  ;;  %5877 = vst.msk [vmem:[%s7883_s13 + $0xe90] sm:$0xff] %vm5410_vm2, %v5364_v31  ;;  %v5109_v40 = vadd.f32 %v9433_v13, %v3688_v32  ;;  %v5365_v41 = vadd.f32 %v9433_v13, %v4712_v33 }
 0x293   : > { %5619 = vst.msk [vmem:[%s7883_s13 + $0x680] sm:$0xff] %vm5410_vm2, %v5106_v36  ;;  %5875 = vst.msk [vmem:[%s7883_s13 + $0xe80] sm:$0xff] %vm5410_vm2, %v5362_v37  ;;  %v5107_v42 = vadd.f32 %v9433_v13, %v3680_v38  ;;  %v5363_v43 = vadd.f32 %v9433_v13, %v4704_v39 }
 0x294   : > { %5622 = vst.msk [vmem:[%s7883_s13 + $0x698] sm:$0xff] %vm5410_vm2, %v5109_v40  ;;  %5878 = vst.msk [vmem:[%s7883_s13 + $0xe98] sm:$0xff] %vm5410_vm2, %v5365_v41 }
 0x295   : > { %5620 = vst.msk [vmem:[%s7883_s13 + $0x688] sm:$0xff] %vm5410_vm2, %v5107_v42  ;;  %5876 = vst.msk [vmem:[%s7883_s13 + $0xe88] sm:$0xff] %vm5410_vm2, %v5363_v43  ;;  %v6994_v44 = vpop.f32.mrb[212].mxu0  ;;  %v7250_v45 = vpop.f32.mrb[212].mxu1 }
 0x296   : > { %v3701_v46 = vadd.f32 %v9414_v0, %v6994_v44  ;;  %v4725_v47 = vadd.f32 %v9414_v0, %v7250_v45  ;;  %v3692_v48 = vpop.f32.mrb[213].mxu0  ;;  %v4716_v49 = vpop.f32.mrb[213].mxu1 }
 0x297   : > { %v3693_v50 = vadd.f32 %v9414_v0, %v3692_v48  ;;  %v4717_v51 = vadd.f32 %v9414_v0, %v4716_v49  ;;  %v6995_v54 = vpop.f32.mrb[214].mxu0  ;;  %v7251_v55 = vpop.f32.mrb[214].mxu1 }
 0x298   : > { %v5112_v56 = vadd.f32 %v9433_v13, %v3701_v46  ;;  %v5368_v57 = vadd.f32 %v9433_v13, %v4725_v47  ;;  %v3704_v58 = vadd.f32 %v9414_v0, %v6995_v54  ;;  %v4728_v59 = vadd.f32 %v9414_v0, %v7251_v55  ;;  %v3695_v60 = vpop.f32.mrb[215].mxu0  ;;  %v4719_v61 = vpop.f32.mrb[215].mxu1 }
 0x299   : > { %v5110_v62 = vadd.f32 %v9433_v13, %v3693_v50  ;;  %v5366_v63 = vadd.f32 %v9433_v13, %v4717_v51  ;;  %v3696_v1 = vadd.f32 %v9414_v0, %v3695_v60  ;;  %v4720_v2 = vadd.f32 %v9414_v0, %v4719_v61 }
 0x29a   : > { %5625 = vst.msk [vmem:[%s7883_s13 + $0x6b0] sm:$0xff] %vm5410_vm2, %v5112_v56  ;;  %5881 = vst.msk [vmem:[%s7883_s13 + $0xeb0] sm:$0xff] %vm5410_vm2, %v5368_v57  ;;  %v5113_v3 = vadd.f32 %v9433_v13, %v3704_v58  ;;  %v5369_v4 = vadd.f32 %v9433_v13, %v4728_v59 }
 0x29b   : > { %5623 = vst.msk [vmem:[%s7883_s13 + $0x6a0] sm:$0xff] %vm5410_vm2, %v5110_v62  ;;  %5879 = vst.msk [vmem:[%s7883_s13 + $0xea0] sm:$0xff] %vm5410_vm2, %v5366_v63  ;;  %v5111_v5 = vadd.f32 %v9433_v13, %v3696_v1  ;;  %v5367_v29 = vadd.f32 %v9433_v13, %v4720_v2 }
 0x29c   : > { %5626 = vst.msk [vmem:[%s7883_s13 + $0x6b8] sm:$0xff] %vm5410_vm2, %v5113_v3  ;;  %5882 = vst.msk [vmem:[%s7883_s13 + $0xeb8] sm:$0xff] %vm5410_vm2, %v5369_v4 }
 0x29d   : > { %5624 = vst.msk [vmem:[%s7883_s13 + $0x6a8] sm:$0xff] %vm5410_vm2, %v5111_v5  ;;  %5880 = vst.msk [vmem:[%s7883_s13 + $0xea8] sm:$0xff] %vm5410_vm2, %v5367_v29  ;;  %v6998_v53 = vpop.f32.mrb[216].mxu0  ;;  %v7254_v6 = vpop.f32.mrb[216].mxu1 }
 0x29e   : > { %v3717_v7 = vadd.f32 %v9414_v0, %v6998_v53  ;;  %v4741_v8 = vadd.f32 %v9414_v0, %v7254_v6  ;;  %v3708_v9 = vpop.f32.mrb[217].mxu0  ;;  %v4732_v10 = vpop.f32.mrb[217].mxu1 }
 0x29f   : > { %v3709_v12 = vadd.f32 %v9936_v11, %v3708_v9  ;;  %v4733_v52 = vadd.f32 %v9936_v11, %v4732_v10  ;;  %v6999_v14 = vpop.f32.mrb[218].mxu0  ;;  %v7255_v20 = vpop.f32.mrb[218].mxu1 }
 0x2a0   : > { %v5116_v15 = vadd.f32 %v9433_v13, %v3717_v7  ;;  %v5372_v0 = vadd.f32 %v9433_v13, %v4741_v8  ;;  %v3720_v16 = vadd.f32 %v9936_v11, %v6999_v14  ;;  %v4744_v17 = vadd.f32 %v9936_v11, %v7255_v20  ;;  %v3711_v18 = vpop.f32.mrb[219].mxu0  ;;  %v4735_v19 = vpop.f32.mrb[219].mxu1 }
 0x2a1   : > { %v5114_v21 = vadd.f32 %v9433_v13, %v3709_v12  ;;  %v5370_v22 = vadd.f32 %v9433_v13, %v4733_v52  ;;  %v3712_v23 = vadd.f32 %v9936_v11, %v3711_v18  ;;  %v4736_v24 = vadd.f32 %v9936_v11, %v4735_v19 }
 0x2a2   : > { %5629 = vst.msk [vmem:[%s7883_s13 + $0x6d0] sm:$0xff] %vm5410_vm2, %v5116_v15  ;;  %5885 = vst.msk [vmem:[%s7883_s13 + $0xed0] sm:$0xff] %vm5410_vm2, %v5372_v0  ;;  %v5117_v26 = vadd.f32 %v9955_v25, %v3720_v16  ;;  %v5373_v27 = vadd.f32 %v9955_v25, %v4744_v17 }
 0x2a3   : > { %5627 = vst.msk [vmem:[%s7883_s13 + $0x6c0] sm:$0xff] %vm5410_vm2, %v5114_v21  ;;  %5883 = vst.msk [vmem:[%s7883_s13 + $0xec0] sm:$0xff] %vm5410_vm2, %v5370_v22  ;;  %v5115_v13 = vadd.f32 %v9955_v25, %v3712_v23  ;;  %v5371_v28 = vadd.f32 %v9955_v25, %v4736_v24 }
 0x2a4   : > { %5630 = vst.msk [vmem:[%s7883_s13 + $0x6d8] sm:$0xff] %vm5410_vm2, %v5117_v26  ;;  %5886 = vst.msk [vmem:[%s7883_s13 + $0xed8] sm:$0xff] %vm5410_vm2, %v5373_v27 }
 0x2a5   : > { %5628 = vst.msk [vmem:[%s7883_s13 + $0x6c8] sm:$0xff] %vm5410_vm2, %v5115_v13  ;;  %5884 = vst.msk [vmem:[%s7883_s13 + $0xec8] sm:$0xff] %vm5410_vm2, %v5371_v28  ;;  %v7002_v30 = vpop.f32.mrb[220].mxu0  ;;  %v7258_v31 = vpop.f32.mrb[220].mxu1 }
 0x2a6   : > { %v3733_v32 = vadd.f32 %v9936_v11, %v7002_v30  ;;  %v4757_v33 = vadd.f32 %v9936_v11, %v7258_v31  ;;  %v3724_v34 = vpop.f32.mrb[221].mxu0  ;;  %v4748_v35 = vpop.f32.mrb[221].mxu1 }
 0x2a7   : > { %v3725_v36 = vadd.f32 %v9936_v11, %v3724_v34  ;;  %v4749_v37 = vadd.f32 %v9936_v11, %v4748_v35  ;;  %v7003_v38 = vpop.f32.mrb[222].mxu0  ;;  %v7259_v39 = vpop.f32.mrb[222].mxu1 }
 0x2a8   : > { %v5120_v40 = vadd.f32 %v9955_v25, %v3733_v32  ;;  %v5376_v41 = vadd.f32 %v9955_v25, %v4757_v33  ;;  %v3736_v42 = vadd.f32 %v9936_v11, %v7003_v38  ;;  %v4760_v43 = vadd.f32 %v9936_v11, %v7259_v39  ;;  %v3727_v44 = vpop.f32.mrb[223].mxu0  ;;  %v4751_v45 = vpop.f32.mrb[223].mxu1 }
 0x2a9   : > { %v5118_v46 = vadd.f32 %v9955_v25, %v3725_v36  ;;  %v5374_v47 = vadd.f32 %v9955_v25, %v4749_v37  ;;  %v3728_v48 = vadd.f32 %v9936_v11, %v3727_v44  ;;  %v4752_v49 = vadd.f32 %v9936_v11, %v4751_v45 }
 0x2aa   : > { %5633 = vst.msk [vmem:[%s7883_s13 + $0x6f0] sm:$0xff] %vm5410_vm2, %v5120_v40  ;;  %5889 = vst.msk [vmem:[%s7883_s13 + $0xef0] sm:$0xff] %vm5410_vm2, %v5376_v41  ;;  %v5121_v50 = vadd.f32 %v9955_v25, %v3736_v42  ;;  %v5377_v51 = vadd.f32 %v9955_v25, %v4760_v43 }
 0x2ab   : > { %5631 = vst.msk [vmem:[%s7883_s13 + $0x6e0] sm:$0xff] %vm5410_vm2, %v5118_v46  ;;  %5887 = vst.msk [vmem:[%s7883_s13 + $0xee0] sm:$0xff] %vm5410_vm2, %v5374_v47  ;;  %v5119_v54 = vadd.f32 %v9955_v25, %v3728_v48  ;;  %v5375_v55 = vadd.f32 %v9955_v25, %v4752_v49 }
 0x2ac   : > { %5634 = vst.msk [vmem:[%s7883_s13 + $0x6f8] sm:$0xff] %vm5410_vm2, %v5121_v50  ;;  %5890 = vst.msk [vmem:[%s7883_s13 + $0xef8] sm:$0xff] %vm5410_vm2, %v5377_v51 }
 0x2ad   : > { %5632 = vst.msk [vmem:[%s7883_s13 + $0x6e8] sm:$0xff] %vm5410_vm2, %v5119_v54  ;;  %5888 = vst.msk [vmem:[%s7883_s13 + $0xee8] sm:$0xff] %vm5410_vm2, %v5375_v55  ;;  %v7006_v56 = vpop.f32.mrb[224].mxu0  ;;  %v7262_v57 = vpop.f32.mrb[224].mxu1 }
 0x2ae   : > { %v3749_v58 = vadd.f32 %v9936_v11, %v7006_v56  ;;  %v4773_v59 = vadd.f32 %v9936_v11, %v7262_v57  ;;  %v3740_v60 = vpop.f32.mrb[225].mxu0  ;;  %v4764_v61 = vpop.f32.mrb[225].mxu1 }
 0x2af   : > { %v3741_v62 = vadd.f32 %v9936_v11, %v3740_v60  ;;  %v4765_v63 = vadd.f32 %v9936_v11, %v4764_v61  ;;  %v7007_v1 = vpop.f32.mrb[226].mxu0  ;;  %v7263_v2 = vpop.f32.mrb[226].mxu1 }
 0x2b0   : > { %v5124_v3 = vadd.f32 %v9955_v25, %v3749_v58  ;;  %v5380_v4 = vadd.f32 %v9955_v25, %v4773_v59  ;;  %v3752_v5 = vadd.f32 %v9936_v11, %v7007_v1  ;;  %v4776_v29 = vadd.f32 %v9936_v11, %v7263_v2  ;;  %v3743_v53 = vpop.f32.mrb[227].mxu0  ;;  %v4767_v6 = vpop.f32.mrb[227].mxu1 }
 0x2b1   : > { %v5122_v7 = vadd.f32 %v9955_v25, %v3741_v62  ;;  %v5378_v8 = vadd.f32 %v9955_v25, %v4765_v63  ;;  %v3744_v9 = vadd.f32 %v9936_v11, %v3743_v53  ;;  %v4768_v10 = vadd.f32 %v9936_v11, %v4767_v6 }
 0x2b2   : > { %5637 = vst.msk [vmem:[%s7883_s13 + $0x710] sm:$0xff] %vm5410_vm2, %v5124_v3  ;;  %5893 = vst.msk [vmem:[%s7883_s13 + $0xf10] sm:$0xff] %vm5410_vm2, %v5380_v4  ;;  %v5125_v12 = vadd.f32 %v9955_v25, %v3752_v5  ;;  %v5381_v52 = vadd.f32 %v9955_v25, %v4776_v29 }
 0x2b3   : > { %5635 = vst.msk [vmem:[%s7883_s13 + $0x700] sm:$0xff] %vm5410_vm2, %v5122_v7  ;;  %5891 = vst.msk [vmem:[%s7883_s13 + $0xf00] sm:$0xff] %vm5410_vm2, %v5378_v8  ;;  %v5123_v14 = vadd.f32 %v9955_v25, %v3744_v9  ;;  %v5379_v20 = vadd.f32 %v9955_v25, %v4768_v10 }
 0x2b4   : > { %5638 = vst.msk [vmem:[%s7883_s13 + $0x718] sm:$0xff] %vm5410_vm2, %v5125_v12  ;;  %5894 = vst.msk [vmem:[%s7883_s13 + $0xf18] sm:$0xff] %vm5410_vm2, %v5381_v52 }
 0x2b5   : > { %5636 = vst.msk [vmem:[%s7883_s13 + $0x708] sm:$0xff] %vm5410_vm2, %v5123_v14  ;;  %5892 = vst.msk [vmem:[%s7883_s13 + $0xf08] sm:$0xff] %vm5410_vm2, %v5379_v20  ;;  %v7010_v15 = vpop.f32.mrb[228].mxu0  ;;  %v7266_v0 = vpop.f32.mrb[228].mxu1 }
 0x2b6   : > { %v3765_v16 = vadd.f32 %v9936_v11, %v7010_v15  ;;  %v4789_v17 = vadd.f32 %v9936_v11, %v7266_v0  ;;  %v3756_v18 = vpop.f32.mrb[229].mxu0  ;;  %v4780_v19 = vpop.f32.mrb[229].mxu1 }
 0x2b7   : > { %v3757_v21 = vadd.f32 %v9936_v11, %v3756_v18  ;;  %v4781_v22 = vadd.f32 %v9936_v11, %v4780_v19  ;;  %v7011_v23 = vpop.f32.mrb[230].mxu0  ;;  %v7267_v24 = vpop.f32.mrb[230].mxu1 }
 0x2b8   : > { %v5128_v26 = vadd.f32 %v9955_v25, %v3765_v16  ;;  %v5384_v27 = vadd.f32 %v9955_v25, %v4789_v17  ;;  %v3768_v13 = vadd.f32 %v9936_v11, %v7011_v23  ;;  %v4792_v28 = vadd.f32 %v9936_v11, %v7267_v24  ;;  %v3759_v30 = vpop.f32.mrb[231].mxu0  ;;  %v4783_v31 = vpop.f32.mrb[231].mxu1 }
 0x2b9   : > { %v5126_v32 = vadd.f32 %v9955_v25, %v3757_v21  ;;  %v5382_v33 = vadd.f32 %v9955_v25, %v4781_v22  ;;  %v3760_v34 = vadd.f32 %v9936_v11, %v3759_v30  ;;  %v4784_v35 = vadd.f32 %v9936_v11, %v4783_v31 }
 0x2ba   : > { %5641 = vst.msk [vmem:[%s7883_s13 + $0x730] sm:$0xff] %vm5410_vm2, %v5128_v26  ;;  %5897 = vst.msk [vmem:[%s7883_s13 + $0xf30] sm:$0xff] %vm5410_vm2, %v5384_v27  ;;  %v5129_v36 = vadd.f32 %v9955_v25, %v3768_v13  ;;  %v5385_v37 = vadd.f32 %v9955_v25, %v4792_v28 }
 0x2bb   : > { %5639 = vst.msk [vmem:[%s7883_s13 + $0x720] sm:$0xff] %vm5410_vm2, %v5126_v32  ;;  %5895 = vst.msk [vmem:[%s7883_s13 + $0xf20] sm:$0xff] %vm5410_vm2, %v5382_v33  ;;  %v5127_v38 = vadd.f32 %v9955_v25, %v3760_v34  ;;  %v5383_v39 = vadd.f32 %v9955_v25, %v4784_v35 }
 0x2bc   : > { %5642 = vst.msk [vmem:[%s7883_s13 + $0x738] sm:$0xff] %vm5410_vm2, %v5129_v36  ;;  %5898 = vst.msk [vmem:[%s7883_s13 + $0xf38] sm:$0xff] %vm5410_vm2, %v5385_v37 }
 0x2bd   : > { %5640 = vst.msk [vmem:[%s7883_s13 + $0x728] sm:$0xff] %vm5410_vm2, %v5127_v38  ;;  %5896 = vst.msk [vmem:[%s7883_s13 + $0xf28] sm:$0xff] %vm5410_vm2, %v5383_v39  ;;  %v7014_v40 = vpop.f32.mrb[232].mxu0  ;;  %v7270_v41 = vpop.f32.mrb[232].mxu1 }
 0x2be   : > { %v3781_v42 = vadd.f32 %v9936_v11, %v7014_v40  ;;  %v4805_v43 = vadd.f32 %v9936_v11, %v7270_v41  ;;  %v3772_v44 = vpop.f32.mrb[233].mxu0  ;;  %v4796_v45 = vpop.f32.mrb[233].mxu1 }
 0x2bf   : > { %v3773_v46 = vadd.f32 %v9936_v11, %v3772_v44  ;;  %v4797_v47 = vadd.f32 %v9936_v11, %v4796_v45  ;;  %v7015_v48 = vpop.f32.mrb[234].mxu0  ;;  %v7271_v49 = vpop.f32.mrb[234].mxu1 }
 0x2c0   : > { %v5132_v50 = vadd.f32 %v9955_v25, %v3781_v42  ;;  %v5388_v51 = vadd.f32 %v9955_v25, %v4805_v43  ;;  %v3784_v54 = vadd.f32 %v9936_v11, %v7015_v48  ;;  %v4808_v55 = vadd.f32 %v9936_v11, %v7271_v49  ;;  %v3775_v56 = vpop.f32.mrb[235].mxu0  ;;  %v4799_v57 = vpop.f32.mrb[235].mxu1 }
 0x2c1   : > { %v5130_v58 = vadd.f32 %v9955_v25, %v3773_v46  ;;  %v5386_v59 = vadd.f32 %v9955_v25, %v4797_v47  ;;  %v3776_v60 = vadd.f32 %v9936_v11, %v3775_v56  ;;  %v4800_v61 = vadd.f32 %v9936_v11, %v4799_v57 }
 0x2c2   : > { %5645 = vst.msk [vmem:[%s7883_s13 + $0x750] sm:$0xff] %vm5410_vm2, %v5132_v50  ;;  %5901 = vst.msk [vmem:[%s7883_s13 + $0xf50] sm:$0xff] %vm5410_vm2, %v5388_v51  ;;  %v5133_v62 = vadd.f32 %v9955_v25, %v3784_v54  ;;  %v5389_v63 = vadd.f32 %v9955_v25, %v4808_v55 }
 0x2c3   : > { %5643 = vst.msk [vmem:[%s7883_s13 + $0x740] sm:$0xff] %vm5410_vm2, %v5130_v58  ;;  %5899 = vst.msk [vmem:[%s7883_s13 + $0xf40] sm:$0xff] %vm5410_vm2, %v5386_v59  ;;  %v5131_v1 = vadd.f32 %v9955_v25, %v3776_v60  ;;  %v5387_v2 = vadd.f32 %v9955_v25, %v4800_v61 }
 0x2c4   : > { %5646 = vst.msk [vmem:[%s7883_s13 + $0x758] sm:$0xff] %vm5410_vm2, %v5133_v62  ;;  %5902 = vst.msk [vmem:[%s7883_s13 + $0xf58] sm:$0xff] %vm5410_vm2, %v5389_v63 }
 0x2c5   : > { %5644 = vst.msk [vmem:[%s7883_s13 + $0x748] sm:$0xff] %vm5410_vm2, %v5131_v1  ;;  %5900 = vst.msk [vmem:[%s7883_s13 + $0xf48] sm:$0xff] %vm5410_vm2, %v5387_v2  ;;  %v7018_v3 = vpop.f32.mrb[236].mxu0  ;;  %v7274_v4 = vpop.f32.mrb[236].mxu1 }
 0x2c6   : > { %v3797_v5 = vadd.f32 %v9936_v11, %v7018_v3  ;;  %v4821_v29 = vadd.f32 %v9936_v11, %v7274_v4  ;;  %v3788_v53 = vpop.f32.mrb[237].mxu0  ;;  %v4812_v6 = vpop.f32.mrb[237].mxu1 }
 0x2c7   : > { %v3789_v7 = vadd.f32 %v9936_v11, %v3788_v53  ;;  %v4813_v8 = vadd.f32 %v9936_v11, %v4812_v6  ;;  %v7019_v9 = vpop.f32.mrb[238].mxu0  ;;  %v7275_v10 = vpop.f32.mrb[238].mxu1 }
 0x2c8   : > { %v5136_v12 = vadd.f32 %v9955_v25, %v3797_v5  ;;  %v5392_v52 = vadd.f32 %v9955_v25, %v4821_v29  ;;  %v3800_v14 = vadd.f32 %v9936_v11, %v7019_v9  ;;  %v4824_v20 = vadd.f32 %v9936_v11, %v7275_v10  ;;  %v3791_v15 = vpop.f32.mrb[239].mxu0  ;;  %v4815_v0 = vpop.f32.mrb[239].mxu1 }
 0x2c9   : > { %v5134_v16 = vadd.f32 %v9955_v25, %v3789_v7  ;;  %v5390_v17 = vadd.f32 %v9955_v25, %v4813_v8  ;;  %v3792_v18 = vadd.f32 %v9936_v11, %v3791_v15  ;;  %v4816_v19 = vadd.f32 %v9936_v11, %v4815_v0 }
 0x2ca   : > { %5649 = vst.msk [vmem:[%s7883_s13 + $0x770] sm:$0xff] %vm5410_vm2, %v5136_v12  ;;  %5905 = vst.msk [vmem:[%s7883_s13 + $0xf70] sm:$0xff] %vm5410_vm2, %v5392_v52  ;;  %v5137_v21 = vadd.f32 %v9955_v25, %v3800_v14  ;;  %v5393_v22 = vadd.f32 %v9955_v25, %v4824_v20 }
 0x2cb   : > { %5647 = vst.msk [vmem:[%s7883_s13 + $0x760] sm:$0xff] %vm5410_vm2, %v5134_v16  ;;  %5903 = vst.msk [vmem:[%s7883_s13 + $0xf60] sm:$0xff] %vm5410_vm2, %v5390_v17  ;;  %v5135_v23 = vadd.f32 %v9955_v25, %v3792_v18  ;;  %v5391_v24 = vadd.f32 %v9955_v25, %v4816_v19 }
 0x2cc   : > { %5650 = vst.msk [vmem:[%s7883_s13 + $0x778] sm:$0xff] %vm5410_vm2, %v5137_v21  ;;  %5906 = vst.msk [vmem:[%s7883_s13 + $0xf78] sm:$0xff] %vm5410_vm2, %v5393_v22 }
 0x2cd   : > { %5648 = vst.msk [vmem:[%s7883_s13 + $0x768] sm:$0xff] %vm5410_vm2, %v5135_v23  ;;  %5904 = vst.msk [vmem:[%s7883_s13 + $0xf68] sm:$0xff] %vm5410_vm2, %v5391_v24  ;;  %v7022_v26 = vpop.f32.mrb[240].mxu0  ;;  %v7278_v27 = vpop.f32.mrb[240].mxu1 }
 0x2ce   : > { %v3813_v13 = vadd.f32 %v9936_v11, %v7022_v26  ;;  %v4837_v28 = vadd.f32 %v9936_v11, %v7278_v27  ;;  %v3804_v30 = vpop.f32.mrb[241].mxu0  ;;  %v4828_v31 = vpop.f32.mrb[241].mxu1 }
 0x2cf   : > { %v3805_v32 = vadd.f32 %v9936_v11, %v3804_v30  ;;  %v4829_v33 = vadd.f32 %v9936_v11, %v4828_v31  ;;  %v7023_v34 = vpop.f32.mrb[242].mxu0  ;;  %v7279_v35 = vpop.f32.mrb[242].mxu1 }
 0x2d0   : > { %v5140_v36 = vadd.f32 %v9955_v25, %v3813_v13  ;;  %v5396_v37 = vadd.f32 %v9955_v25, %v4837_v28  ;;  %v3816_v38 = vadd.f32 %v9936_v11, %v7023_v34  ;;  %v4840_v39 = vadd.f32 %v9936_v11, %v7279_v35  ;;  %v3807_v40 = vpop.f32.mrb[243].mxu0  ;;  %v4831_v41 = vpop.f32.mrb[243].mxu1 }
 0x2d1   : > { %v5138_v42 = vadd.f32 %v9955_v25, %v3805_v32  ;;  %v5394_v43 = vadd.f32 %v9955_v25, %v4829_v33  ;;  %v3808_v44 = vadd.f32 %v9936_v11, %v3807_v40  ;;  %v4832_v45 = vadd.f32 %v9936_v11, %v4831_v41 }
 0x2d2   : > { %5653 = vst.msk [vmem:[%s7883_s13 + $0x790] sm:$0xff] %vm5410_vm2, %v5140_v36  ;;  %5909 = vst.msk [vmem:[%s7883_s13 + $0xf90] sm:$0xff] %vm5410_vm2, %v5396_v37  ;;  %v5141_v46 = vadd.f32 %v9955_v25, %v3816_v38  ;;  %v5397_v47 = vadd.f32 %v9955_v25, %v4840_v39 }
 0x2d3   : > { %5651 = vst.msk [vmem:[%s7883_s13 + $0x780] sm:$0xff] %vm5410_vm2, %v5138_v42  ;;  %5907 = vst.msk [vmem:[%s7883_s13 + $0xf80] sm:$0xff] %vm5410_vm2, %v5394_v43  ;;  %v5139_v48 = vadd.f32 %v9955_v25, %v3808_v44  ;;  %v5395_v49 = vadd.f32 %v9955_v25, %v4832_v45 }
 0x2d4   : > { %5654 = vst.msk [vmem:[%s7883_s13 + $0x798] sm:$0xff] %vm5410_vm2, %v5141_v46  ;;  %5910 = vst.msk [vmem:[%s7883_s13 + $0xf98] sm:$0xff] %vm5410_vm2, %v5397_v47 }
 0x2d5   : > { %5652 = vst.msk [vmem:[%s7883_s13 + $0x788] sm:$0xff] %vm5410_vm2, %v5139_v48  ;;  %5908 = vst.msk [vmem:[%s7883_s13 + $0xf88] sm:$0xff] %vm5410_vm2, %v5395_v49  ;;  %v7026_v50 = vpop.f32.mrb[244].mxu0  ;;  %v7282_v51 = vpop.f32.mrb[244].mxu1 }
 0x2d6   : > { %v3829_v54 = vadd.f32 %v9936_v11, %v7026_v50  ;;  %v4853_v55 = vadd.f32 %v9936_v11, %v7282_v51  ;;  %v3820_v56 = vpop.f32.mrb[245].mxu0  ;;  %v4844_v57 = vpop.f32.mrb[245].mxu1 }
 0x2d7   : > { %v3821_v58 = vadd.f32 %v9936_v11, %v3820_v56  ;;  %v4845_v59 = vadd.f32 %v9936_v11, %v4844_v57  ;;  %v7027_v60 = vpop.f32.mrb[246].mxu0  ;;  %v7283_v61 = vpop.f32.mrb[246].mxu1 }
 0x2d8   : > { %v5144_v62 = vadd.f32 %v9955_v25, %v3829_v54  ;;  %v5400_v63 = vadd.f32 %v9955_v25, %v4853_v55  ;;  %v3832_v1 = vadd.f32 %v9936_v11, %v7027_v60  ;;  %v4856_v2 = vadd.f32 %v9936_v11, %v7283_v61  ;;  %v3823_v3 = vpop.f32.mrb[247].mxu0  ;;  %v4847_v4 = vpop.f32.mrb[247].mxu1 }
 0x2d9   : > { %v5142_v5 = vadd.f32 %v9955_v25, %v3821_v58  ;;  %v5398_v29 = vadd.f32 %v9955_v25, %v4845_v59  ;;  %v3824_v53 = vadd.f32 %v9936_v11, %v3823_v3  ;;  %v4848_v6 = vadd.f32 %v9936_v11, %v4847_v4 }
 0x2da   : > { %5657 = vst.msk [vmem:[%s7883_s13 + $0x7b0] sm:$0xff] %vm5410_vm2, %v5144_v62  ;;  %5913 = vst.msk [vmem:[%s7883_s13 + $0xfb0] sm:$0xff] %vm5410_vm2, %v5400_v63  ;;  %v5145_v7 = vadd.f32 %v9955_v25, %v3832_v1  ;;  %v5401_v8 = vadd.f32 %v9955_v25, %v4856_v2 }
 0x2db   : > { %5655 = vst.msk [vmem:[%s7883_s13 + $0x7a0] sm:$0xff] %vm5410_vm2, %v5142_v5  ;;  %5911 = vst.msk [vmem:[%s7883_s13 + $0xfa0] sm:$0xff] %vm5410_vm2, %v5398_v29  ;;  %v5143_v9 = vadd.f32 %v9955_v25, %v3824_v53  ;;  %v5399_v10 = vadd.f32 %v9955_v25, %v4848_v6 }
 0x2dc   : > { %5658 = vst.msk [vmem:[%s7883_s13 + $0x7b8] sm:$0xff] %vm5410_vm2, %v5145_v7  ;;  %5914 = vst.msk [vmem:[%s7883_s13 + $0xfb8] sm:$0xff] %vm5410_vm2, %v5401_v8 }
 0x2dd   : > { %5656 = vst.msk [vmem:[%s7883_s13 + $0x7a8] sm:$0xff] %vm5410_vm2, %v5143_v9  ;;  %5912 = vst.msk [vmem:[%s7883_s13 + $0xfa8] sm:$0xff] %vm5410_vm2, %v5399_v10  ;;  %v7030_v12 = vpop.f32.mrb[248].mxu0  ;;  %v7286_v52 = vpop.f32.mrb[248].mxu1 }
 0x2de   : > { %v3845_v14 = vadd.f32 %v9936_v11, %v7030_v12  ;;  %v4869_v20 = vadd.f32 %v9936_v11, %v7286_v52  ;;  %v3836_v15 = vpop.f32.mrb[249].mxu0  ;;  %v4860_v0 = vpop.f32.mrb[249].mxu1 }
 0x2df   : > { %v3837_v16 = vadd.f32 %v9936_v11, %v3836_v15  ;;  %v4861_v17 = vadd.f32 %v9936_v11, %v4860_v0  ;;  %v7031_v18 = vpop.f32.mrb[250].mxu0  ;;  %v7287_v19 = vpop.f32.mrb[250].mxu1 }
 0x2e0   : > { %v5148_v21 = vadd.f32 %v9955_v25, %v3845_v14  ;;  %v5404_v22 = vadd.f32 %v9955_v25, %v4869_v20  ;;  %v3848_v23 = vadd.f32 %v9936_v11, %v7031_v18  ;;  %v4872_v24 = vadd.f32 %v9936_v11, %v7287_v19  ;;  %v3839_v26 = vpop.f32.mrb[251].mxu0  ;;  %v4863_v27 = vpop.f32.mrb[251].mxu1 }
 0x2e1   : > { %v5146_v13 = vadd.f32 %v9955_v25, %v3837_v16  ;;  %v5402_v28 = vadd.f32 %v9955_v25, %v4861_v17  ;;  %v3840_v30 = vadd.f32 %v9936_v11, %v3839_v26  ;;  %v4864_v31 = vadd.f32 %v9936_v11, %v4863_v27 }
 0x2e2   : > { %5661 = vst.msk [vmem:[%s7883_s13 + $0x7d0] sm:$0xff] %vm5410_vm2, %v5148_v21  ;;  %5917 = vst.msk [vmem:[%s7883_s13 + $0xfd0] sm:$0xff] %vm5410_vm2, %v5404_v22  ;;  %v5149_v32 = vadd.f32 %v9955_v25, %v3848_v23  ;;  %v5405_v33 = vadd.f32 %v9955_v25, %v4872_v24 }
 0x2e3   : > { %5659 = vst.msk [vmem:[%s7883_s13 + $0x7c0] sm:$0xff] %vm5410_vm2, %v5146_v13  ;;  %5915 = vst.msk [vmem:[%s7883_s13 + $0xfc0] sm:$0xff] %vm5410_vm2, %v5402_v28  ;;  %v5147_v34 = vadd.f32 %v9955_v25, %v3840_v30  ;;  %v5403_v35 = vadd.f32 %v9955_v25, %v4864_v31 }
 0x2e4   : > { %5662 = vst.msk [vmem:[%s7883_s13 + $0x7d8] sm:$0xff] %vm5410_vm2, %v5149_v32  ;;  %5918 = vst.msk [vmem:[%s7883_s13 + $0xfd8] sm:$0xff] %vm5410_vm2, %v5405_v33 }
 0x2e5   : > { %5660 = vst.msk [vmem:[%s7883_s13 + $0x7c8] sm:$0xff] %vm5410_vm2, %v5147_v34  ;;  %5916 = vst.msk [vmem:[%s7883_s13 + $0xfc8] sm:$0xff] %vm5410_vm2, %v5403_v35  ;;  %v7034_v36 = vpop.f32.mrb[252].mxu0  ;;  %v7290_v37 = vpop.f32.mrb[252].mxu1 }
 0x2e6   : > { %v3861_v38 = vadd.f32 %v9936_v11, %v7034_v36  ;;  %v4885_v39 = vadd.f32 %v9936_v11, %v7290_v37  ;;  %v3852_v40 = vpop.f32.mrb[253].mxu0  ;;  %v4876_v41 = vpop.f32.mrb[253].mxu1 }
 0x2e7   : > { %v3853_v42 = vadd.f32 %v9936_v11, %v3852_v40  ;;  %v4877_v43 = vadd.f32 %v9936_v11, %v4876_v41  ;;  %v7035_v44 = vpop.f32.mrb[254].mxu0  ;;  %v7291_v45 = vpop.f32.mrb[254].mxu1 }
 0x2e8   : > { %v5152_v46 = vadd.f32 %v9955_v25, %v3861_v38  ;;  %v5408_v47 = vadd.f32 %v9955_v25, %v4885_v39  ;;  %v3864_v48 = vadd.f32 %v9936_v11, %v7035_v44  ;;  %v4888_v49 = vadd.f32 %v9936_v11, %v7291_v45  ;;  %v3855_v50 = vpop.f32.mrb[255].mxu0  ;;  %v4879_v51 = vpop.f32.mrb[255].mxu1 }
 0x2e9   : > { %v5150_v54 = vadd.f32 %v9955_v25, %v3853_v42  ;;  %v5406_v55 = vadd.f32 %v9955_v25, %v4877_v43  ;;  %v3856_v56 = vadd.f32 %v9936_v11, %v3855_v50  ;;  %v4880_v57 = vadd.f32 %v9936_v11, %v4879_v51 }
 0x2ea   : > { %5665 = vst.msk [vmem:[%s7883_s13 + $0x7f0] sm:$0xff] %vm5410_vm2, %v5152_v46  ;;  %5921 = vst.msk [vmem:[%s7883_s13 + $0xff0] sm:$0xff] %vm5410_vm2, %v5408_v47  ;;  %v5153_v58 = vadd.f32 %v9955_v25, %v3864_v48  ;;  %v5409_v59 = vadd.f32 %v9955_v25, %v4888_v49 }
 0x2eb   : > { %5663 = vst.msk [vmem:[%s7883_s13 + $0x7e0] sm:$0xff] %vm5410_vm2, %v5150_v54  ;;  %5919 = vst.msk [vmem:[%s7883_s13 + $0xfe0] sm:$0xff] %vm5410_vm2, %v5406_v55  ;;  %v5151_v60 = vadd.f32 %v9955_v25, %v3856_v56  ;;  %v5407_v61 = vadd.f32 %v9955_v25, %v4880_v57 }
 0x2ec   : > { %5666 = vst.msk [vmem:[%s7883_s13 + $0x7f8] sm:$0xff] %vm5410_vm2, %v5153_v58  ;;  %5922 = vst.msk [vmem:[%s7883_s13 + $0xff8] sm:$0xff] %vm5410_vm2, %v5409_v59 }
 0x2ed   : > { %5664 = vst.msk [vmem:[%s7883_s13 + $0x7e8] sm:$0xff] %vm5410_vm2, %v5151_v60  ;;  %5920 = vst.msk [vmem:[%s7883_s13 + $0xfe8] sm:$0xff] %vm5410_vm2, %v5407_v61 }
 0x2ee PF: > { %s14_s15 = sadd.s32 1, %s7587_s15  }
 0x2ef   : > { %p11_p4 = scmp.ge.s32.totalorder %s14_s15, 4  }
 0x2f1   :  { %13 = sbr.rel (!%p11_p4) target bundleno = 1 (0x1), region = 66 }

</bundles_post_ra>
